<compile_context>
chip_gen: v5e
topology: v5e:2x2
jax: 0.10.0
libtpu: 0.0.40
codegen_flags: <defaults>
</compile_context>

<pallas_src>
import functools
import math

import jax
import jax.numpy as jnp
from jax import lax
from jax.experimental import pallas as pl
from jax.experimental.pallas import tpu as pltpu

# ---------------- config (small, consistent with the module) ----------------
BATCH   = 2
T_SEQ   = 128     # sequence length / block_size
N_EMBD  = 128     # C
N_HEAD  = 4
HEAD_D  = N_EMBD // N_HEAD
LN_EPS  = 1e-5    # torch.nn.LayerNorm default
NEG_INF = -1e30   # finite mask sentinel (no -inf -> NaN risk); every query row
                  # keeps its diagonal key, so no fully-masked row exists.


def _layernorm(h, g, b):
    mu = jnp.mean(h, axis=-1, keepdims=True)
    var = jnp.mean((h - mu) ** 2, axis=-1, keepdims=True)
    return (h - mu) * lax.rsqrt(var + LN_EPS) * g + b


def _gelu_tanh(x):
    # GELU(approximate='tanh') exactly as PyTorch defines it.
    c = math.sqrt(2.0 / math.pi)
    return 0.5 * x * (1.0 + jnp.tanh(c * (x + 0.044715 * x * x * x)))


def _supports_bf16_elementwise():
    # v6e / v7x have bf16 VPU+EUP paths; v5e and older do not (bf16 GELU would
    # just insert conversions there).
    try:
        kind = jax.devices()[0].device_kind.lower()
    except Exception:
        return False
    return not any(s in kind for s in ("v2", "v3", "v4", "v5"))


def block_kernel(n_head, use_bf16_gelu,
                 x_ref,
                 ln1g_ref, ln1b_ref,
                 wqkv_ref, bqkv_ref,
                 wap_ref, bap_ref,
                 ln2g_ref, ln2b_ref,
                 wfc_ref, bfc_ref,
                 wmp_ref, bmp_ref,
                 o_ref):
    _, t, c = x_ref.shape
    hd = c // n_head
    bf16 = jnp.bfloat16

    x = x_ref[0]                                   # (T, C) f32, one sequence

    # ---------------- attention branch ----------------
    h = _layernorm(x, ln1g_ref[...], ln1b_ref[...])
    # QKV projection: bf16 x bf16 -> f32 accumulate.  The 1/sqrt(hd) attention
    # scale is pre-folded into the Q columns of wqkv / bqkv on the host.
    qkv = jnp.dot(h.astype(bf16), wqkv_ref[...],
                  preferred_element_type=jnp.float32) + bqkv_ref[...]  # (T, 3C)
    q = qkv[:, 0 * c:1 * c].astype(bf16)          # lane-aligned 128-wide slices,
    k = qkv[:, 1 * c:2 * c].astype(bf16)          # cast BEFORE any relayout
    v = qkv[:, 2 * c:3 * c].astype(bf16)

    # Head split: a 2-D transpose puts C on the sublane axis, then the
    # tile-aligned reshape (C, T) -> (H, hd, T) is free.
    q_t = q.T.reshape(n_head, hd, t)              # (H, hd, T) bf16
    k_t = k.T.reshape(n_head, hd, t)
    v_t = v.T.reshape(n_head, hd, t)
    q_h = jnp.transpose(q_t, (0, 2, 1))           # (H, T, hd) bf16

    # Batched-over-heads QK^T for this sequence only: (H, T, T).
    scores = jnp.einsum('hqd,hdk->hqk', q_h, k_t,
                        preferred_element_type=jnp.float32)

    # Causal mask generated in-kernel (no HBM mask traffic).
    row = lax.broadcasted_iota(jnp.int32, (t, t), 0)
    col = lax.broadcasted_iota(jnp.int32, (t, t), 1)
    scores = jnp.where((row >= col)[None, :, :], scores, NEG_INF)

    m = jnp.max(scores, axis=-1, keepdims=True)
    p = jnp.exp(scores - m)
    l = jnp.sum(p, axis=-1, keepdims=True)
    p = (p * pl.reciprocal(l, approx=True)).astype(bf16)

    # P @ V computed transposed per head: (H, hd, T).  The head merge
    # (H, hd, T) -> (C, T) is then a tile-aligned free reshape, and one 2-D
    # transpose yields the (T, C) slab for a single K=128 output projection
    # (replaces the old 4 x K=32 per-head matmul loop).
    y_t = jnp.einsum('hdk,hqk->hdq', v_t, p,
                     preferred_element_type=jnp.float32)              # (H, hd, T)
    y_cat = y_t.astype(bf16).reshape(c, t).T                          # (T, C) bf16

    att = jnp.dot(y_cat, wap_ref[...],
                  preferred_element_type=jnp.float32) + bap_ref[...]
    x1 = x + att                                  # residual 1

    # ---------------- MLP branch ----------------
    h2 = _layernorm(x1, ln2g_ref[...], ln2b_ref[...])
    f = jnp.dot(h2.astype(bf16), wfc_ref[...],
                preferred_element_type=jnp.float32) + bfc_ref[...]
    if use_bf16_gelu:
        f = _gelu_tanh(f.astype(bf16))            # bf16 VPU/EUP (v6e/v7x)
    else:
        f = _gelu_tanh(f).astype(bf16)            # keep f32 elementwise on v5e-
    mo = jnp.dot(f, wmp_ref[...],
                 preferred_element_type=jnp.float32) + bmp_ref[...]

    o_ref[...] = (x1 + mo).reshape(1, t, c).astype(o_ref.dtype)       # residual 2


def block_forward(x, params, n_head=N_HEAD):
    b, t, c = x.shape
    hd = c // n_head
    bf16 = jnp.bfloat16

    # Fold the 1/sqrt(hd) attention scale into the Q columns of the QKV proj.
    scale = 1.0 / math.sqrt(hd)
    col_scale = jnp.concatenate(
        [jnp.full((c,), scale, jnp.float32), jnp.ones((2 * c,), jnp.float32)])
    w_qkv = (params["w_qkv"] * col_scale[None, :]).astype(bf16)
    b_qkv = (params["b_qkv"] * col_scale[None, :]).astype(jnp.float32)

    w_ap = params["w_attn_proj"].astype(bf16)
    w_fc = params["w_fc"].astype(bf16)
    w_mp = params["w_mlp_proj"].astype(bf16)

    weight_args = [
        params["ln1_g"], params["ln1_b"],
        w_qkv, b_qkv,
        w_ap, params["b_attn_proj"],
        params["ln2_g"], params["ln2_b"],
        w_fc, params["b_fc"],
        w_mp, params["b_mlp_proj"],
    ]

    # Weights/biases: constant block index -> stay resident across grid steps.
    def resident_spec(a):
        nd = a.ndim
        return pl.BlockSpec(a.shape, lambda i, nd=nd: (0,) * nd)

    in_specs = [pl.BlockSpec((1, t, c), lambda i: (i, 0, 0))]
    in_specs += [resident_spec(a) for a in weight_args]

    use_bf16_gelu = _supports_bf16_elementwise()

    return pl.pallas_call(
        functools.partial(block_kernel, n_head, use_bf16_gelu),
        out_shape=jax.ShapeDtypeStruct((b, t, c), x.dtype),
        grid_spec=pltpu.PrefetchScalarGridSpec(
            num_scalar_prefetch=0,
            grid=(b,),                 # one sequence per step; megacore on v7x
            in_specs=in_specs,
            out_specs=pl.BlockSpec((1, t, c), lambda i: (i, 0, 0)),
        ),
        compiler_params=pltpu.CompilerParams(
            dimension_semantics=("parallel",),
            vmem_limit_bytes=32 * 1024 * 1024,
        ),
    )(x, *weight_args)


# ---------------- pure-JAX reference for verification ----------------
def block_reference(x, p):
    def ln(h, g, b):
        mu = jnp.mean(h, axis=-1, keepdims=True)
        var = jnp.mean((h - mu) ** 2, axis=-1, keepdims=True)
        return (h - mu) * lax.rsqrt(var + LN_EPS) * g[0] + b[0]

    b, t, c = x.shape
    hd = c // N_HEAD
    h = ln(x, p["ln1_g"], p["ln1_b"])
    qkv = h @ p["w_qkv"] + p["b_qkv"][0]
    q, k, v = qkv[..., :c], qkv[..., c:2 * c], qkv[..., 2 * c:]
    q = q.reshape(b, t, N_HEAD, hd).transpose(0, 2, 1, 3)
    k = k.reshape(b, t, N_HEAD, hd).transpose(0, 2, 1, 3)
    v = v.reshape(b, t, N_HEAD, hd).transpose(0, 2, 1, 3)
    scores = jnp.einsum("bhqd,bhkd->bhqk", q, k) / math.sqrt(hd)
    mask = jnp.tril(jnp.ones((t, t), dtype=bool))
    scores = jnp.where(mask, scores, -jnp.inf)
    att = jax.nn.softmax(scores, axis=-1)
    y = jnp.einsum("bhqk,bhkd->bhqd", att, v).transpose(0, 2, 1, 3).reshape(b, t, c)
    y = y @ p["w_attn_proj"] + p["b_attn_proj"][0]
    x1 = x + y
    h2 = ln(x1, p["ln2_g"], p["ln2_b"])
    f = h2 @ p["w_fc"] + p["b_fc"][0]
    cst = math.sqrt(2.0 / math.pi)
    f = 0.5 * f * (1.0 + jnp.tanh(cst * (f + 0.044715 * f ** 3)))
    m = f @ p["w_mlp_proj"] + p["b_mlp_proj"][0]
    return x1 + m


def make_params(key, c):
    ks = jax.random.split(key, 8)
    s = 0.02
    return {
        "ln1_g": jnp.ones((1, c), jnp.float32),
        "ln1_b": jnp.zeros((1, c), jnp.float32),
        "w_qkv": s * jax.random.normal(ks[0], (c, 3 * c), jnp.float32),
        "b_qkv": s * jax.random.normal(ks[1], (1, 3 * c), jnp.float32),
        "w_attn_proj": s * jax.random.normal(ks[2], (c, c), jnp.float32),
        "b_attn_proj": s * jax.random.normal(ks[3], (1, c), jnp.float32),
        "ln2_g": jnp.ones((1, c), jnp.float32),
        "ln2_b": jnp.zeros((1, c), jnp.float32),
        "w_fc": s * jax.random.normal(ks[4], (c, 4 * c), jnp.float32),
        "b_fc": s * jax.random.normal(ks[5], (1, 4 * c), jnp.float32),
        "w_mlp_proj": s * jax.random.normal(ks[6], (4 * c, c), jnp.float32),
        "b_mlp_proj": s * jax.random.normal(ks[7], (1, c), jnp.float32),
    }


if __name__ == "__main__":
    key = jax.random.PRNGKey(0)
    kx, kp = jax.random.split(key)
    x = jax.random.normal(kx, (BATCH, T_SEQ, N_EMBD), jnp.float32)
    params = make_params(kp, N_EMBD)

    out = block_forward(x, params)
    out = jax.block_until_ready(out)

    ref = block_reference(x, params)
    assert out.shape == ref.shape
    assert jnp.allclose(out, ref, rtol=2e-2, atol=2e-2), (
        float(jnp.max(jnp.abs(out - ref))))

    print("KERNEL_OK")
</pallas_src>

<mosaic_0001>
module attributes {stable_mosaic.version = 11 : i64} {
  func.func @block_kernel(%arg0: i32, %arg1: memref<1x128x128xf32, #tpu.memory_space<vmem>>, %arg2: memref<1x128xf32, #tpu.memory_space<vmem>>, %arg3: memref<1x128xf32, #tpu.memory_space<vmem>>, %arg4: memref<128x384xbf16, #tpu.memory_space<vmem>>, %arg5: memref<1x384xf32, #tpu.memory_space<vmem>>, %arg6: memref<128x128xbf16, #tpu.memory_space<vmem>>, %arg7: memref<1x128xf32, #tpu.memory_space<vmem>>, %arg8: memref<1x128xf32, #tpu.memory_space<vmem>>, %arg9: memref<1x128xf32, #tpu.memory_space<vmem>>, %arg10: memref<128x512xbf16, #tpu.memory_space<vmem>>, %arg11: memref<1x512xf32, #tpu.memory_space<vmem>>, %arg12: memref<512x128xbf16, #tpu.memory_space<vmem>>, %arg13: memref<1x128xf32, #tpu.memory_space<vmem>>, %arg14: memref<1x128x128xf32, #tpu.memory_space<vmem>>) attributes {dimension_semantics = [#tpu.dimension_semantics<parallel>], iteration_bounds = array<i64: 2>, scalar_prefetch = 0 : i64, scratch_operands = 0 : i64, tpu.core_type = #tpu.core_type<tc>, window_params = [{transform_indices = @transform_0, window_bounds = array<i64: 1, 128, 128>}, {pipeline_mode = #tpu.pipeline_mode<synchronous>, transform_indices = @transform_1, window_bounds = array<i64: 1, 128>}, {pipeline_mode = #tpu.pipeline_mode<synchronous>, transform_indices = @transform_2, window_bounds = array<i64: 1, 128>}, {pipeline_mode = #tpu.pipeline_mode<synchronous>, transform_indices = @transform_3, window_bounds = array<i64: 128, 384>}, {pipeline_mode = #tpu.pipeline_mode<synchronous>, transform_indices = @transform_4, window_bounds = array<i64: 1, 384>}, {pipeline_mode = #tpu.pipeline_mode<synchronous>, transform_indices = @transform_5, window_bounds = array<i64: 128, 128>}, {pipeline_mode = #tpu.pipeline_mode<synchronous>, transform_indices = @transform_6, window_bounds = array<i64: 1, 128>}, {pipeline_mode = #tpu.pipeline_mode<synchronous>, transform_indices = @transform_7, window_bounds = array<i64: 1, 128>}, {pipeline_mode = #tpu.pipeline_mode<synchronous>, transform_indices = @transform_8, window_bounds = array<i64: 1, 128>}, {pipeline_mode = #tpu.pipeline_mode<synchronous>, transform_indices = @transform_9, window_bounds = array<i64: 128, 512>}, {pipeline_mode = #tpu.pipeline_mode<synchronous>, transform_indices = @transform_10, window_bounds = array<i64: 1, 512>}, {pipeline_mode = #tpu.pipeline_mode<synchronous>, transform_indices = @transform_11, window_bounds = array<i64: 512, 128>}, {pipeline_mode = #tpu.pipeline_mode<synchronous>, transform_indices = @transform_12, window_bounds = array<i64: 1, 128>}, {transform_indices = @transform_13, window_bounds = array<i64: 1, 128, 128>}]} {
    %c0 = arith.constant 0 : index
    %c0_0 = arith.constant 0 : index
    %c0_1 = arith.constant 0 : index
    %0 = vector.load %arg1[%c0, %c0_0, %c0_1] : memref<1x128x128xf32, #tpu.memory_space<vmem>>, vector<1x128x128xf32>
    %1 = vector.shape_cast %0 : vector<1x128x128xf32> to vector<128x128xf32>
    %c0_2 = arith.constant 0 : index
    %c0_3 = arith.constant 0 : index
    %2 = vector.load %arg2[%c0_2, %c0_3] : memref<1x128xf32, #tpu.memory_space<vmem>>, vector<1x128xf32>
    %c0_4 = arith.constant 0 : index
    %c0_5 = arith.constant 0 : index
    %3 = vector.load %arg3[%c0_4, %c0_5] : memref<1x128xf32, #tpu.memory_space<vmem>>, vector<1x128xf32>
    %cst = arith.constant dense<0.000000e+00> : vector<128xf32>
    %4 = vector.multi_reduction <add>, %1, %cst [1] : vector<128x128xf32> to vector<128xf32>
    %5 = vector.shape_cast %4 : vector<128xf32> to vector<128x1xf32>
    %cst_6 = arith.constant 1.280000e+02 : f32
    %6 = vector.broadcast %cst_6 : f32 to vector<128x1xf32>
    %7 = arith.divf %5, %6 : vector<128x1xf32>
    %8 = vector.broadcast %7 : vector<128x1xf32> to vector<128x128xf32>
    %9 = arith.subf %1, %8 : vector<128x128xf32>
    %10 = arith.mulf %9, %9 : vector<128x128xf32>
    %cst_7 = arith.constant dense<0.000000e+00> : vector<128xf32>
    %11 = vector.multi_reduction <add>, %10, %cst_7 [1] : vector<128x128xf32> to vector<128xf32>
    %12 = vector.shape_cast %11 : vector<128xf32> to vector<128x1xf32>
    %cst_8 = arith.constant 1.280000e+02 : f32
    %13 = vector.broadcast %cst_8 : f32 to vector<128x1xf32>
    %14 = arith.divf %12, %13 : vector<128x1xf32>
    %15 = vector.broadcast %7 : vector<128x1xf32> to vector<128x128xf32>
    %16 = arith.subf %1, %15 : vector<128x128xf32>
    %cst_9 = arith.constant 9.99999974E-6 : f32
    %17 = vector.broadcast %cst_9 : f32 to vector<128x1xf32>
    %18 = arith.addf %14, %17 : vector<128x1xf32>
    %19 = math.rsqrt %18 : vector<128x1xf32>
    %20 = vector.broadcast %19 : vector<128x1xf32> to vector<128x128xf32>
    %21 = arith.mulf %16, %20 : vector<128x128xf32>
    %22 = vector.broadcast %2 : vector<1x128xf32> to vector<128x128xf32>
    %23 = arith.mulf %21, %22 : vector<128x128xf32>
    %24 = vector.broadcast %3 : vector<1x128xf32> to vector<128x128xf32>
    %25 = arith.addf %23, %24 : vector<128x128xf32>
    %26 = arith.truncf %25 : vector<128x128xf32> to vector<128x128xbf16>
    %c0_10 = arith.constant 0 : index
    %c0_11 = arith.constant 0 : index
    %27 = vector.load %arg4[%c0_10, %c0_11] : memref<128x384xbf16, #tpu.memory_space<vmem>>, vector<128x384xbf16>
    %cst_12 = arith.constant dense<0.000000e+00> : vector<128x384xf32>
    %28 = tpu.matmul %26, %27, %cst_12 {dimension_numbers = #tpu.dot_dimension_numbers<[1], [0], [0], [1], [0, 0, 1, 1], [], []>} : vector<128x128xbf16>, vector<128x384xbf16>, vector<128x384xf32> -> vector<128x384xf32>
    %c0_13 = arith.constant 0 : index
    %c0_14 = arith.constant 0 : index
    %29 = vector.load %arg5[%c0_13, %c0_14] : memref<1x384xf32, #tpu.memory_space<vmem>>, vector<1x384xf32>
    %30 = vector.broadcast %29 : vector<1x384xf32> to vector<128x384xf32>
    %31 = arith.addf %28, %30 : vector<128x384xf32>
    %32 = vector.extract_strided_slice %31 {offsets = [0, 0], sizes = [128, 128], strides = [1, 1]} : vector<128x384xf32> to vector<128x128xf32>
    %33 = arith.truncf %32 : vector<128x128xf32> to vector<128x128xbf16>
    %34 = vector.extract_strided_slice %31 {offsets = [0, 128], sizes = [128, 128], strides = [1, 1]} : vector<128x384xf32> to vector<128x128xf32>
    %35 = arith.truncf %34 : vector<128x128xf32> to vector<128x128xbf16>
    %36 = vector.extract_strided_slice %31 {offsets = [0, 256], sizes = [128, 128], strides = [1, 1]} : vector<128x384xf32> to vector<128x128xf32>
    %37 = arith.truncf %36 : vector<128x128xf32> to vector<128x128xbf16>
    %38 = tpu.transpose %33, [1, 0] : vector<128x128xbf16> -> vector<128x128xbf16>
    %39 = vector.shape_cast %38 : vector<128x128xbf16> to vector<4x32x128xbf16>
    %40 = tpu.transpose %35, [1, 0] : vector<128x128xbf16> -> vector<128x128xbf16>
    %41 = vector.shape_cast %40 : vector<128x128xbf16> to vector<4x32x128xbf16>
    %42 = tpu.transpose %37, [1, 0] : vector<128x128xbf16> -> vector<128x128xbf16>
    %43 = vector.shape_cast %42 : vector<128x128xbf16> to vector<4x32x128xbf16>
    %44 = tpu.transpose %39, [0, 2, 1] : vector<4x32x128xbf16> -> vector<4x128x32xbf16>
    "tpu.trace_start"() <{level = 10 : i32, message = "hqd,hdk->hqk"}> : () -> ()
    %cst_15 = arith.constant dense<0.000000e+00> : vector<4x128x128xf32>
    %45 = tpu.matmul %44, %41, %cst_15 {dimension_numbers = #tpu.dot_dimension_numbers<[2], [1], [1], [2], [0, 0, 0, 1, 1, 2], [0], [0]>} : vector<4x128x32xbf16>, vector<4x32x128xbf16>, vector<4x128x128xf32> -> vector<4x128x128xf32>
    "tpu.trace_stop"() : () -> ()
    %46 = tpu.iota {dimensions = array<i32: 0>} : vector<128x128xi32>
    %47 = tpu.iota {dimensions = array<i32: 1>} : vector<128x128xi32>
    %48 = arith.cmpi sge, %46, %47 : vector<128x128xi32>
    %49 = vector.shape_cast %48 : vector<128x128xi1> to vector<1x128x128xi1>
    %cst_16 = arith.constant -1.000000e+30 : f32
    %50 = vector.shape_cast %49 : vector<1x128x128xi1> to vector<1x128x128xi1>
    %51 = vector.broadcast %50 : vector<1x128x128xi1> to vector<4x128x128xi1>
    %52 = vector.broadcast %cst_16 : f32 to vector<4x128x128xf32>
    %53 = arith.select %51, %45, %52 : vector<4x128x128xi1>, vector<4x128x128xf32>
    %cst_17 = arith.constant dense<0xFF800000> : vector<4x128xf32>
    %54 = vector.multi_reduction <maximumf>, %53, %cst_17 [2] : vector<4x128x128xf32> to vector<4x128xf32>
    %55 = vector.shape_cast %54 : vector<4x128xf32> to vector<4x128x1xf32>
    %56 = vector.broadcast %55 : vector<4x128x1xf32> to vector<4x128x128xf32>
    %57 = arith.subf %53, %56 : vector<4x128x128xf32>
    %58 = math.exp %57 : vector<4x128x128xf32>
    %cst_18 = arith.constant dense<0.000000e+00> : vector<4x128xf32>
    %59 = vector.multi_reduction <add>, %58, %cst_18 [2] : vector<4x128x128xf32> to vector<4x128xf32>
    %60 = vector.shape_cast %59 : vector<4x128xf32> to vector<4x128x1xf32>
    %61 = tpu.reciprocal %60 {approx = true} : vector<4x128x1xf32> -> vector<4x128x1xf32>
    %62 = vector.broadcast %61 : vector<4x128x1xf32> to vector<4x128x128xf32>
    %63 = arith.mulf %58, %62 : vector<4x128x128xf32>
    %64 = arith.truncf %63 : vector<4x128x128xf32> to vector<4x128x128xbf16>
    "tpu.trace_start"() <{level = 10 : i32, message = "hdk,hqk->hdq"}> : () -> ()
    %cst_19 = arith.constant dense<0.000000e+00> : vector<4x32x128xf32>
    %65 = tpu.matmul %43, %64, %cst_19 {dimension_numbers = #tpu.dot_dimension_numbers<[2], [2], [1], [1], [0, 0, 0, 1, 1, 1], [0], [0]>} : vector<4x32x128xbf16>, vector<4x128x128xbf16>, vector<4x32x128xf32> -> vector<4x32x128xf32>
    "tpu.trace_stop"() : () -> ()
    %66 = arith.truncf %65 : vector<4x32x128xf32> to vector<4x32x128xbf16>
    %67 = vector.shape_cast %66 : vector<4x32x128xbf16> to vector<128x128xbf16>
    %68 = tpu.transpose %67, [1, 0] : vector<128x128xbf16> -> vector<128x128xbf16>
    %c0_20 = arith.constant 0 : index
    %c0_21 = arith.constant 0 : index
    %69 = vector.load %arg6[%c0_20, %c0_21] : memref<128x128xbf16, #tpu.memory_space<vmem>>, vector<128x128xbf16>
    %cst_22 = arith.constant dense<0.000000e+00> : vector<128x128xf32>
    %70 = tpu.matmul %68, %69, %cst_22 {dimension_numbers = #tpu.dot_dimension_numbers<[1], [0], [0], [1], [0, 0, 1, 1], [], []>} : vector<128x128xbf16>, vector<128x128xbf16>, vector<128x128xf32> -> vector<128x128xf32>
    %c0_23 = arith.constant 0 : index
    %c0_24 = arith.constant 0 : index
    %71 = vector.load %arg7[%c0_23, %c0_24] : memref<1x128xf32, #tpu.memory_space<vmem>>, vector<1x128xf32>
    %72 = vector.broadcast %71 : vector<1x128xf32> to vector<128x128xf32>
    %73 = arith.addf %70, %72 : vector<128x128xf32>
    %74 = arith.addf %1, %73 : vector<128x128xf32>
    %c0_25 = arith.constant 0 : index
    %c0_26 = arith.constant 0 : index
    %75 = vector.load %arg8[%c0_25, %c0_26] : memref<1x128xf32, #tpu.memory_space<vmem>>, vector<1x128xf32>
    %c0_27 = arith.constant 0 : index
    %c0_28 = arith.constant 0 : index
    %76 = vector.load %arg9[%c0_27, %c0_28] : memref<1x128xf32, #tpu.memory_space<vmem>>, vector<1x128xf32>
    %cst_29 = arith.constant dense<0.000000e+00> : vector<128xf32>
    %77 = vector.multi_reduction <add>, %74, %cst_29 [1] : vector<128x128xf32> to vector<128xf32>
    %78 = vector.shape_cast %77 : vector<128xf32> to vector<128x1xf32>
    %cst_30 = arith.constant 1.280000e+02 : f32
    %79 = vector.broadcast %cst_30 : f32 to vector<128x1xf32>
    %80 = arith.divf %78, %79 : vector<128x1xf32>
    %81 = vector.broadcast %80 : vector<128x1xf32> to vector<128x128xf32>
    %82 = arith.subf %74, %81 : vector<128x128xf32>
    %83 = arith.mulf %82, %82 : vector<128x128xf32>
    %cst_31 = arith.constant dense<0.000000e+00> : vector<128xf32>
    %84 = vector.multi_reduction <add>, %83, %cst_31 [1] : vector<128x128xf32> to vector<128xf32>
    %85 = vector.shape_cast %84 : vector<128xf32> to vector<128x1xf32>
    %cst_32 = arith.constant 1.280000e+02 : f32
    %86 = vector.broadcast %cst_32 : f32 to vector<128x1xf32>
    %87 = arith.divf %85, %86 : vector<128x1xf32>
    %88 = vector.broadcast %80 : vector<128x1xf32> to vector<128x128xf32>
    %89 = arith.subf %74, %88 : vector<128x128xf32>
    %cst_33 = arith.constant 9.99999974E-6 : f32
    %90 = vector.broadcast %cst_33 : f32 to vector<128x1xf32>
    %91 = arith.addf %87, %90 : vector<128x1xf32>
    %92 = math.rsqrt %91 : vector<128x1xf32>
    %93 = vector.broadcast %92 : vector<128x1xf32> to vector<128x128xf32>
    %94 = arith.mulf %89, %93 : vector<128x128xf32>
    %95 = vector.broadcast %75 : vector<1x128xf32> to vector<128x128xf32>
    %96 = arith.mulf %94, %95 : vector<128x128xf32>
    %97 = vector.broadcast %76 : vector<1x128xf32> to vector<128x128xf32>
    %98 = arith.addf %96, %97 : vector<128x128xf32>
    %99 = arith.truncf %98 : vector<128x128xf32> to vector<128x128xbf16>
    %c0_34 = arith.constant 0 : index
    %c0_35 = arith.constant 0 : index
    %100 = vector.load %arg10[%c0_34, %c0_35] : memref<128x512xbf16, #tpu.memory_space<vmem>>, vector<128x512xbf16>
    %cst_36 = arith.constant dense<0.000000e+00> : vector<128x512xf32>
    %101 = tpu.matmul %99, %100, %cst_36 {dimension_numbers = #tpu.dot_dimension_numbers<[1], [0], [0], [1], [0, 0, 1, 1], [], []>} : vector<128x128xbf16>, vector<128x512xbf16>, vector<128x512xf32> -> vector<128x512xf32>
    %c0_37 = arith.constant 0 : index
    %c0_38 = arith.constant 0 : index
    %102 = vector.load %arg11[%c0_37, %c0_38] : memref<1x512xf32, #tpu.memory_space<vmem>>, vector<1x512xf32>
    %103 = vector.broadcast %102 : vector<1x512xf32> to vector<128x512xf32>
    %104 = arith.addf %101, %103 : vector<128x512xf32>
    %105 = arith.truncf %104 : vector<128x512xf32> to vector<128x512xbf16>
    %cst_39 = arith.constant 5.000000e-01 : bf16
    %106 = vector.broadcast %cst_39 : bf16 to vector<128x512xbf16>
    %107 = arith.mulf %106, %105 : vector<128x512xbf16>
    %cst_40 = arith.constant 4.467770e-02 : bf16
    %108 = vector.broadcast %cst_40 : bf16 to vector<128x512xbf16>
    %109 = arith.mulf %108, %105 : vector<128x512xbf16>
    %110 = arith.mulf %109, %105 : vector<128x512xbf16>
    %111 = arith.mulf %110, %105 : vector<128x512xbf16>
    %112 = arith.addf %105, %111 : vector<128x512xbf16>
    %cst_41 = arith.constant 7.968750e-01 : bf16
    %113 = vector.broadcast %cst_41 : bf16 to vector<128x512xbf16>
    %114 = arith.mulf %113, %112 : vector<128x512xbf16>
    %115 = math.tanh %114 : vector<128x512xbf16>
    %cst_42 = arith.constant 1.000000e+00 : bf16
    %116 = vector.broadcast %cst_42 : bf16 to vector<128x512xbf16>
    %117 = arith.addf %116, %115 : vector<128x512xbf16>
    %118 = arith.mulf %107, %117 : vector<128x512xbf16>
    %c0_43 = arith.constant 0 : index
    %c0_44 = arith.constant 0 : index
    %119 = vector.load %arg12[%c0_43, %c0_44] : memref<512x128xbf16, #tpu.memory_space<vmem>>, vector<512x128xbf16>
    %cst_45 = arith.constant dense<0.000000e+00> : vector<128x128xf32>
    %120 = tpu.matmul %118, %119, %cst_45 {dimension_numbers = #tpu.dot_dimension_numbers<[1], [0], [0], [1], [0, 0, 1, 1], [], []>} : vector<128x512xbf16>, vector<512x128xbf16>, vector<128x128xf32> -> vector<128x128xf32>
    %c0_46 = arith.constant 0 : index
    %c0_47 = arith.constant 0 : index
    %121 = vector.load %arg13[%c0_46, %c0_47] : memref<1x128xf32, #tpu.memory_space<vmem>>, vector<1x128xf32>
    %122 = vector.broadcast %121 : vector<1x128xf32> to vector<128x128xf32>
    %123 = arith.addf %120, %122 : vector<128x128xf32>
    %124 = arith.addf %74, %123 : vector<128x128xf32>
    %125 = vector.shape_cast %124 : vector<128x128xf32> to vector<1x128x128xf32>
    %c0_48 = arith.constant 0 : index
    %c0_49 = arith.constant 0 : index
    %c0_50 = arith.constant 0 : index
    %126 = vector.load %arg14[%c0_48, %c0_49, %c0_50] : memref<1x128x128xf32, #tpu.memory_space<vmem>>, vector<1x128x128xf32>
    tpu.vector_store %arg14[%c0_48, %c0_49, %c0_50], %125 {strides = array<i32>} : memref<1x128x128xf32, #tpu.memory_space<vmem>>, vector<1x128x128xf32>,
    return
  }
  func.func @transform_0(%arg0: i32) -> (i32, i32, i32) {
    %c0_i32 = arith.constant 0 : i32
    %c0_i32_0 = arith.constant 0 : i32
    %c0_i32_1 = arith.constant 0 : i32
    return %arg0, %c0_i32, %c0_i32_0 : i32, i32, i32
  }
  func.func @transform_1(%arg0: i32) -> (i32, i32) {
    %c0_i32 = arith.constant 0 : i32
    %c0_i32_0 = arith.constant 0 : i32
    %c0_i32_1 = arith.constant 0 : i32
    return %c0_i32, %c0_i32_0 : i32, i32
  }
  func.func @transform_2(%arg0: i32) -> (i32, i32) {
    %c0_i32 = arith.constant 0 : i32
    %c0_i32_0 = arith.constant 0 : i32
    %c0_i32_1 = arith.constant 0 : i32
    return %c0_i32, %c0_i32_0 : i32, i32
  }
  func.func @transform_3(%arg0: i32) -> (i32, i32) {
    %c0_i32 = arith.constant 0 : i32
    %c0_i32_0 = arith.constant 0 : i32
    %c0_i32_1 = arith.constant 0 : i32
    return %c0_i32, %c0_i32_0 : i32, i32
  }
  func.func @transform_4(%arg0: i32) -> (i32, i32) {
    %c0_i32 = arith.constant 0 : i32
    %c0_i32_0 = arith.constant 0 : i32
    %c0_i32_1 = arith.constant 0 : i32
    return %c0_i32, %c0_i32_0 : i32, i32
  }
  func.func @transform_5(%arg0: i32) -> (i32, i32) {
    %c0_i32 = arith.constant 0 : i32
    %c0_i32_0 = arith.constant 0 : i32
    %c0_i32_1 = arith.constant 0 : i32
    return %c0_i32, %c0_i32_0 : i32, i32
  }
  func.func @transform_6(%arg0: i32) -> (i32, i32) {
    %c0_i32 = arith.constant 0 : i32
    %c0_i32_0 = arith.constant 0 : i32
    %c0_i32_1 = arith.constant 0 : i32
    return %c0_i32, %c0_i32_0 : i32, i32
  }
  func.func @transform_7(%arg0: i32) -> (i32, i32) {
    %c0_i32 = arith.constant 0 : i32
    %c0_i32_0 = arith.constant 0 : i32
    %c0_i32_1 = arith.constant 0 : i32
    return %c0_i32, %c0_i32_0 : i32, i32
  }
  func.func @transform_8(%arg0: i32) -> (i32, i32) {
    %c0_i32 = arith.constant 0 : i32
    %c0_i32_0 = arith.constant 0 : i32
    %c0_i32_1 = arith.constant 0 : i32
    return %c0_i32, %c0_i32_0 : i32, i32
  }
  func.func @transform_9(%arg0: i32) -> (i32, i32) {
    %c0_i32 = arith.constant 0 : i32
    %c0_i32_0 = arith.constant 0 : i32
    %c0_i32_1 = arith.constant 0 : i32
    return %c0_i32, %c0_i32_0 : i32, i32
  }
  func.func @transform_10(%arg0: i32) -> (i32, i32) {
    %c0_i32 = arith.constant 0 : i32
    %c0_i32_0 = arith.constant 0 : i32
    %c0_i32_1 = arith.constant 0 : i32
    return %c0_i32, %c0_i32_0 : i32, i32
  }
  func.func @transform_11(%arg0: i32) -> (i32, i32) {
    %c0_i32 = arith.constant 0 : i32
    %c0_i32_0 = arith.constant 0 : i32
    %c0_i32_1 = arith.constant 0 : i32
    return %c0_i32, %c0_i32_0 : i32, i32
  }
  func.func @transform_12(%arg0: i32) -> (i32, i32) {
    %c0_i32 = arith.constant 0 : i32
    %c0_i32_0 = arith.constant 0 : i32
    %c0_i32_1 = arith.constant 0 : i32
    return %c0_i32, %c0_i32_0 : i32, i32
  }
  func.func @transform_13(%arg0: i32) -> (i32, i32, i32) {
    %c0_i32 = arith.constant 0 : i32
    %c0_i32_0 = arith.constant 0 : i32
    %c0_i32_1 = arith.constant 0 : i32
    return %arg0, %c0_i32, %c0_i32_0 : i32, i32, i32
  }
}

</mosaic_0001>

<bundles_post_ra>
// kernel: tpu_custom_call.1
= control target key start
LH: loop header
LB: loop body
LE: loop exit
PB: predicated region body
PF: predicated region fallthrough
CT: control target
= control target key end

     0   :  { %s10696_s0 = inlined_call_operand.hbm [shape: f32[2,128,128], index: 0, kind: input, shape index: {}]   ;;  %s10697_s1 = inlined_call_operand.hbm [shape: f32[1,128], index: 1, kind: input, shape index: {}]   ;;  %s10698_s2 = inlined_call_operand.hbm [shape: f32[1,128], index: 2, kind: input, shape index: {}]   ;;  %s10699_s3 = inlined_call_operand.hbm [shape: bf16[128,384], index: 3, kind: input, shape index: {}]   ;;  %s10700_s4 = inlined_call_operand.vmem [shape: f32[1,384], index: 4, kind: input, shape index: {}]   ;;  %s10701_s5 = inlined_call_operand.hbm [shape: bf16[128,128], index: 5, kind: input, shape index: {}]   ;;  %s10702_s6 = inlined_call_operand.hbm [shape: f32[1,128], index: 6, kind: input, shape index: {}]   ;;  %s10703_s7 = inlined_call_operand.hbm [shape: f32[1,128], index: 7, kind: input, shape index: {}]   ;;  %s10704_s8 = inlined_call_operand.hbm [shape: f32[1,128], index: 8, kind: input, shape index: {}]   ;;  %s10705_s9 = inlined_call_operand.hbm [shape: bf16[128,512], index: 9, kind: input, shape index: {}]   ;;  %s10706_s10 = inlined_call_operand.vmem [shape: f32[1,512], index: 10, kind: input, shape index: {}]   ;;  %s10707_s11 = inlined_call_operand.hbm [shape: bf16[512,128], index: 11, kind: input, shape index: {}]   ;;  %s10708_s12 = inlined_call_operand.vmem [shape: f32[1,128], index: 12, kind: input, shape index: {}]   ;;  %s10709_s13 = inlined_call_operand.hbm [shape: f32[2,128,128], index: 13, kind: output, shape index: {}]  }
   0x1   :  { %10793 = sst [smem:[#allocation69_spill]] %s10697_s1 }
   0x2   :  { %10794 = sst [smem:[#allocation70_spill]] %s10698_s2 }
   0x3   :  { %10795 = sst [smem:[#allocation71_spill]] %s10699_s3 }
   0x4   :  { %10796 = sst [smem:[#allocation72_spill]] %s10701_s5 }
   0x5   :  { %10797 = sst [smem:[#allocation73_spill]] %s10702_s6 }
   0x6   :  { %10798 = sst [smem:[#allocation74_spill]] %s10706_s10 }
   0x7   :  { %10799 = sst [smem:[#allocation75_spill]] %s10708_s12 }
   0x8   :  { %10800 = sst [smem:[#allocation76_spill]] %s10709_s13 }
   0x9   :  { %18 = vsyncpa [#allocation3], 0 }
   0xa   :  { %20 = vsyncpa [#allocation3 + $0x1], 0 }
   0xb   :  { %21 = vsyncpa [#allocation6], 0 }
   0xc   :  { %22 = vsyncpa [#allocation9], 0 }
   0xd   :  { %23 = vsyncpa [#allocation12], 0 }
   0xe   :  { %24 = vsyncpa [#allocation15], 0 }
   0xf   :  { %25 = vsyncpa [#allocation18], 0 }
  0x10   :  { %26 = vsyncpa [#allocation4], 0 }
  0x11   :  { %28 = vsyncpa [#allocation4 + $0x1], 0  ;;  %s7626_s25 = smov 0   ;;  %s7628_s26 = smov 0  }
  0x12   :  { %s7630_s27 = smov 0   ;;  %s7632_s28 = smov 0  }
  0x13 LB: > { %s10801_s1 = sld [smem:[#allocation69_spill]]  ;;  %s7650_s15 = sadd.s32 4294967295, %s7533_s28   ;;  %s7533_s28 = sphi %s7632_s28, %s11054_s28   ;;  %s7529_s27 = sphi %s7630_s27, %s11053_s27   ;;  %s7525_s26 = sphi %s7628_s26, %s11052_s26   ;;  %s7521_s25 = sphi %s7626_s25, %s11051_s25  }
  0x14   : > { %p5890_p0 = scmp.ge.s32.totalorder %s7533_s28, 1  ;;  %p55_p1 = scmp.eq.s32.totalorder %s7650_s15, 0 }
  0x15   : > { %p343_p2 = scmp.lt.s32.totalorder %s7533_s28, 3  ;;  %s7535_s17 = smov [#allocation5]  }
  0x16   : > { %s357_s18 = sshll.u32 %s7535_s17, 4  ;;  %s10803_s3 = sld [smem:[#allocation71_spill]]  ;;  %s358_s18 = int_to_ptr.vmem [resolvable:$true] %s357_s18 }
  0x17   : > { %p7655_p3 = pnand %p5890_p0, %p343_p2  ;;  %s7536_s23 = smov [#allocation8]  }
  0x18   : > { %s380_s24 = sshll.u32 %s7536_s23, 4  ;;  %s7537_s29 = smov 192   ;;  %s381_s24 = int_to_ptr.vmem [resolvable:$true] %s380_s24 }
  0x19   : > { %s355_s14 = sshll.u32 %s10801_s1, 4  ;;  %p6503_p5 = pneg %p7655_p3  ;;  %s356_s14 = int_to_ptr.hbm [resolvable:$true] %s355_s14 }
  0x1a   : > { %s7538_s30 = smov 12   ;;  %s10805_s6 = sld [smem:[#allocation73_spill]] }
  0x1b   : > { %p7667_p6 = pnand %p6503_p5, %p55_p1  ;;  %s7539_s1 = smov [#allocation11]  }
  0x1c   : > { %s378_s21 = sshll.u32 %s10803_s3, 4  ;;  %s412_s3 = sshll.u32 %s7539_s1, 4  ;;  %s379_s21 = int_to_ptr.hbm [resolvable:$true] %s378_s21  ;;  %s413_s3 = int_to_ptr.vmem [resolvable:$true] %s412_s3 }
  0x1d   : > { %6506 = dma.hbm_to_vmem [thread:$0]  (!%p7667_p6), %s356_s14, 16, %s358_s18, [#allocation6]  }
  0x1e   : > { %6512 = dma.hbm_to_vmem [thread:$0]  (!%p7667_p6), %s379_s21, 3072, %s381_s24, [#allocation9], %s7537_s29, %s7537_s29, %s7538_s30  }
  0x1f   : > { %s434_s23 = sshll.u32 %s10704_s8, 4  ;;  %s7540_s14 = smov [#allocation14]   ;;  %s435_s23 = int_to_ptr.hbm [resolvable:$true] %s434_s23 }
  0x20   : > { %s410_s20 = sshll.u32 %s10805_s6, 4  ;;  %s436_s18 = sshll.u32 %s7540_s14, 4  ;;  %s411_s20 = int_to_ptr.hbm [resolvable:$true] %s410_s20  ;;  %s437_s18 = int_to_ptr.vmem [resolvable:$true] %s436_s18 }
  0x21   : > { %6518 = dma.hbm_to_vmem [thread:$0]  (!%p7667_p6), %s411_s20, 16, %s413_s3, [#allocation12]  }
  0x22   : > { %s10806_s2 = sld [smem:[#allocation70_spill]]  ;;  %s7541_s12 = smov [#allocation7]  }
  0x23   : > { %6524 = dma.hbm_to_vmem [thread:$0]  (!%p7667_p6), %s435_s23, 16, %s437_s18, [#allocation15]  }
  0x24   : > { %s10807_s5 = sld [smem:[#allocation72_spill]]  ;;  %s369_s13 = sshll.u32 %s7541_s12, 4  ;;  %s370_s13 = int_to_ptr.vmem [resolvable:$true] %s369_s13 }
  0x25   : > { %s7542_s3 = smov [#allocation10]   ;;  %s7543_s10 = smov 64  }
  0x26   : > { %s397_s17 = sshll.u32 %s7542_s3, 4  ;;  %s7544_s19 = smov 4   ;;  %s398_s17 = int_to_ptr.vmem [resolvable:$true] %s397_s17 }
  0x27   : > { %s422_s14 = sshll.u32 %s10703_s7, 4  ;;  %s7545_s18 = smov [#allocation13]   ;;  %s423_s14 = int_to_ptr.hbm [resolvable:$true] %s422_s14 }
  0x28   : > { %s367_s24 = sshll.u32 %s10806_s2, 4  ;;  %s424_s21 = sshll.u32 %s7545_s18, 4  ;;  %s368_s24 = int_to_ptr.hbm [resolvable:$true] %s367_s24  ;;  %s425_s21 = int_to_ptr.vmem [resolvable:$true] %s424_s21 }
  0x29   : > { %6509 = dma.hbm_to_vmem [thread:$0]  (!%p7667_p6), %s368_s24, 16, %s370_s13, [#allocation6]  }
  0x2a   : > { %s395_s30 = sshll.u32 %s10807_s5, 4  ;;  %s445_s24 = sshll.u32 %s10705_s9, 4  ;;  %s396_s30 = int_to_ptr.hbm [resolvable:$true] %s395_s30  ;;  %s446_s24 = int_to_ptr.hbm [resolvable:$true] %s445_s24 }
  0x2b   : > { %6515 = dma.hbm_to_vmem [thread:$0]  (!%p7667_p6), %s396_s30, 1024, %s398_s17, [#allocation9], %s7543_s10, %s7543_s10, %s7544_s19  }
  0x2c   : > { %6521 = dma.hbm_to_vmem [thread:$0]  (!%p7667_p6), %s423_s14, 16, %s425_s21, [#allocation12]  }
  0x2d   : > { %s7546_s30 = smov [#allocation16]   ;;  %s7547_s13 = smov 256  }
  0x2e   : > { %s447_s12 = sshll.u32 %s7546_s30, 4  ;;  %s7548_s3 = smov 16   ;;  %s448_s12 = int_to_ptr.vmem [resolvable:$true] %s447_s12 }
  0x2f   : > { %6527 = dma.hbm_to_vmem [thread:$0]  (!%p7667_p6), %s446_s24, 4096, %s448_s12, [#allocation15], %s7547_s13, %s7547_s13, %s7548_s3  }
  0x30   : > { %s462_s23 = sshll.u32 %s10707_s11, 4  ;;  %s7549_s14 = smov [#allocation17]   ;;  %s463_s23 = int_to_ptr.hbm [resolvable:$true] %s462_s23 }
  0x31   : > { %s464_s18 = sshll.u32 %s7549_s14, 4  ;;  %s5889_s21 = sadd.s32 4294967294, %s7533_s28   ;;  %s465_s18 = int_to_ptr.vmem [resolvable:$true] %s464_s18 }
  0x32   : > { %6530 = dma.hbm_to_vmem [thread:$0]  (!%p7667_p6), %s463_s23, 4096, %s465_s18, [#allocation18], %s7543_s10, %s7543_s10, %s7544_s19  }
  0x33   : > { %s7712_s1 = sadd.s32 1, %s7533_s28   ;;  %s41_s29 = sadd.s32 1, %s7529_s27 }
  0x34   : > { %s38_s24 = ssub.s32 %s7533_s28, %s7712_s1  ;;  %p48_p7 = scmp.ne.s32.totalorder %s7529_s27, %s7525_s26 }
  0x35   : > { %p39_p8 = scmp.eq.s32.totalorder %s38_s24, 0  ;;  %p49_p9 = scmp.eq.s32.totalorder %s7533_s28, 0 }
  0x36   : > { %p54_p10 = scmp.ne.s32.totalorder %s7525_s26, %s7521_s25  ;;  %p330_p11 = scmp.eq.s32.totalorder %s7650_s15, 1 }
  0x37   : > { %s7724_s30 = scalar_select %p39_p8, %s7529_s27, %s41_s29  }
  0x38   : > { %p7726_p12 = por %p49_p9, %p48_p7  ;;  %p7732_p13 = por %p55_p1, %p54_p10 }
  0x39   : > { %p7736_p0 = por %p330_p11, %p48_p7  ;;  %p336_p2 = scmp.eq.s32.totalorder %s5889_s21, 1 }
  0x3a   : > { %p6548_p5 = scmp.lt.s32.totalorder %s7533_s28, 2  ;;  %s481_s19 = sand.u32 1, %s7529_s27  }
  0x3b   : > { %p7742_p6 = por %p336_p2, %p54_p10  ;;  %s5901_s3 = sshll.u32 %s481_s19, 7 }
  0x3c   : > { %s6337_s17 = sshll.u32 %s7533_s28, 7  ;;  %s485_s29 = scalar_lea.vmem [#allocation2], %s5901_s3 }
  0x3d   : > { %s490_s14 = scalar_lea.hbm %s10696_s0, %s6337_s17  ;;  %s493_s24 = sshll.u32 %s485_s29, 4  ;;  %s494_s24 = int_to_ptr.vmem [resolvable:$true] %s493_s24 }
  0x3e   : > { %s491_s18 = sshll.u32 %s490_s14, 4  ;;  %p7752_p7 = pnand %p6548_p5, %p7726_p12  ;;  %s492_s18 = int_to_ptr.hbm [resolvable:$true] %s491_s18 }
  0x3f   : > { %s482_s2 = scalar_lea.sflag [#allocation3], %s481_s19  ;;  %s7417_s5 = sshra.s32 %s492_s18, 4  ;;  %s7418_s5 = int_to_ptr.hbm [resolvable:$true] %s7417_s5 }
  0x40   : > { %s7419_s6 = scalar_lea.hbm %s7418_s5, 128  ;;  %p7421_p9 = pneg %p7752_p7 }
  0x41   : > { %p7420_p8 = scmp.ne.s32.totalorder %s7418_s5, %s7419_s6  ;;  %s7424_s20 = scalar_lea.hbm %s10696_s0, 256 }
  0x42   : > { %p7425_p12 = scmp.lt.s32.totalorder %s7418_s5, %s10696_s0  ;;  %p7426_p2 = scmp.lt.s32.totalorder %s7424_s20, %s7419_s6 }
  0x43   : > { %p7422_p10 = pnand %p7421_p9, %p7420_p8 }
  0x44   : > { %p7427_p5 = por %p7426_p2, %p7425_p12 }
  0x45   : > { %p7423_p11 = pneg %p7422_p10 }
  0x47   : > { %p7428_p4 = pnand %p7427_p5, %p7423_p11 }
  0x49   : > { %7431 = shalt.err (!%p7428_p4)
}
  0x4a   : > { %s7550_s19 = smov 128   ;;  %s7551_s14 = smov 8  }
  0x4b   : > { %6534 = dma.hbm_to_vmem [thread:$0]  (!%p7752_p7), %s492_s18, 2048, %s494_s24, %s482_s2, %s7550_s19, %s7550_s19, %s7551_s14  }
  0x4c   : > { %505 = sbr.rel (%p7655_p3) target bundleno = 3341 (0xd0d), region = 72 }
  0x51   : > { %s7769_s29 = sand.u32 1, %s7525_s26  }
  0x52   : > { %s5905_s5 = sshll.u32 %s7769_s29, 7  ;;  %s508_s6 = scalar_lea.sflag [#allocation3], %s7769_s29 }
  0x53   : > { %s7775_s17 = scalar_lea.vmem [#allocation2], %s5905_s5 }
  0x54   : > { %7492 = dma.done.wait (%p7732_p13), %s508_s6, 2048  }
  0x55   : > { %7494 = vsyncadd (%p7732_p13), %s508_s6, 4294965248 }
  0x56   : > { %7496 = dma.done.wait (%p55_p1), [#allocation6], 32  }
  0x57   : > { %7498 = vsyncadd (%p55_p1), [#allocation6], 4294967264 }
  0x58   : > { %7500 = dma.done.wait (%p55_p1), [#allocation9], 4096  }
  0x59   : > { %7502 = vsyncadd (%p55_p1), [#allocation9], 4294963200 }
  0x5a   : > { %7504 = dma.done.wait (%p55_p1), [#allocation12], 32  }
  0x5b   : > { %7506 = vsyncadd (%p55_p1), [#allocation12], 4294967264 }
  0x5c   : > { %7508 = dma.done.wait (%p55_p1), [#allocation15], 4112  }
  0x5d   : > { %7510 = vsyncadd (%p55_p1), [#allocation15], 4294963184 }
  0x5e   : > { %7512 = dma.done.wait (%p55_p1), [#allocation18], 4096  }
  0x5f   : > { %7514 = vsyncadd (%p55_p1), [#allocation18], 4294963200  ;;  %v603_v0 = vld [vmem:[%s7775_s17 + $0x10] sm:$0xff]  ;;  %v601_v1 = vld [vmem:[%s7775_s17] sm:$0xff]  ;;  %v7552_v7 = vmov 128.0   ;;  %s10963_s3 = sld [smem:[#allocation74_spill]] }
  0x60   : > { %623 = vadd.xlane.f32.xlu1 %v603_v0  ;;  %619 = vadd.xlane.f32.xlu0 %v601_v1  ;;  %v605_v2 = vld [vmem:[%s7775_s17 + $0x20] sm:$0xff]  ;;  %v604_v3 = vld [vmem:[%s7775_s17 + $0x18] sm:$0xff]  ;;  %v602_v4 = vld [vmem:[%s7775_s17 + $0x8] sm:$0xff]  ;;  %6678 = vrcp.f32 %v7552_v7  ;;  %s11032_s12 = sld [smem:[#allocation75_spill]]  ;;  %s10556_s19 = scalar_lea.vmem [#allocation19], %s5905_s5 }
  0x61   : > { %627 = vadd.xlane.f32.xlu2 %v605_v2  ;;  %v606_v5 = vld [vmem:[%s7775_s17 + $0x28] sm:$0xff]  ;;  %v607_v6 = vld [vmem:[%s7775_s17 + $0x30] sm:$0xff]  ;;  %v7824_v28 = vld [vmem:[%s7775_s17 + $0x38] sm:$0xff]  ;;  %s6434_s14 = sshll.u32 %s7650_s15, 7  ;;  %s5727_s16 = sshll.u32 %s10556_s19, 4  ;;  %s5728_s16 = int_to_ptr.vmem [resolvable:$true] %s5727_s16 }
  0x62   : > { %v7839_v36 = vld [vmem:[%s7775_s17 + $0x40] sm:$0xff]  ;;  %v7850_v42 = vld [vmem:[%s7775_s17 + $0x58] sm:$0xff]  ;;  %v7853_v43 = vld [vmem:[%s7775_s17 + $0x48] sm:$0xff]  ;;  %s5715_s15 = scalar_lea.sflag [#allocation4], %s7769_s29 }
  0x63   : > { %v7862_v46 = vld [vmem:[%s7775_s17 + $0x60] sm:$0xff]  ;;  %v7865_v47 = vld [vmem:[%s7775_s17 + $0x50] sm:$0xff]  ;;  %v7870_v48 = vld [vmem:[%s7775_s17 + $0x68] sm:$0xff] }
  0x64   : > { %v7874_v49 = vld [vmem:[%s7775_s17 + $0x70] sm:$0xff]  ;;  %v6002_v50 = vld [vmem:[#allocation8 + $0xa8] sm:$0xf]  ;;  %v6360_v51 = vld [vmem:[#allocation8 + $0xb0] sm:$0xf0] }
  0x65   : > { %v6359_v52 = vld [vmem:[#allocation8 + $0xac] sm:$0xf]  ;;  %v6003_v53 = vor.u32 %v6360_v51, %v6002_v50  ;;  %v6004_v54 = vld [vmem:[#allocation8 + $0xb4] sm:$0xf0]  ;;  %v6010_v55 = vld [vmem:[#allocation8 + $0xb0] sm:$0xf] }
  0x66   : > { %v6679_v8 = vpop.eup %6678  ;;  %v6361_v56 = vld [vmem:[#allocation8 + $0xb8] sm:$0xf0]  ;;  %v6007_v57 = vor.u32 %v6359_v52, %v6004_v54  ;;  %v5990_v59 = vld [vmem:[#allocation8 + $0x90] sm:$0xf]  ;;  %v6356_v61 = vld [vmem:[#allocation8 + $0x94] sm:$0xf] }
  0x67   : > { %v652_v9 = vmul.f32 128.0, %v6679_v8  ;;  %vm656_vm0 = vweird.f32 %v6679_v8  ;;  %v6011_v58 = vor.u32 %v6361_v56, %v6010_v55  ;;  %1160 = vmatpush.bf16.msra.mxu0 %v6003_v53  ;;  %v6357_v60 = vld [vmem:[#allocation8 + $0x98] sm:$0xf0]  ;;  %v5992_v63 = vld [vmem:[#allocation8 + $0x9c] sm:$0xf0] }
  0x68   : > { %625 = vadd.xlane.f32.xlu1 %v604_v3  ;;  %621 = vadd.xlane.f32.xlu0 %v602_v4  ;;  %v5991_v62 = vor.u32 %v6357_v60, %v5990_v59  ;;  %v5944_v51 = vld [vmem:[#allocation8 + $0x3c] sm:$0xf0]  ;;  %v5950_v52 = vld [vmem:[#allocation8 + $0x38] sm:$0xf]  ;;  %v6346_v53 = vld [vmem:[#allocation8 + $0x40] sm:$0xf0] }
  0x69   : > { %629 = vadd.xlane.f32.xlu2 %v606_v5  ;;  %v653_v10 = vsub.f32 1.0, %v652_v9  ;;  %1209 = vmatpush.bf16.msra.mxu1 %v6007_v57  ;;  %v5986_v9 = vld [vmem:[#allocation8 + $0x80] sm:$0xf]  ;;  %v5951_v55 = vor.u32 %v6346_v53, %v5950_v52  ;;  %v5930_v56 = vld [vmem:[#allocation8 + $0x18] sm:$0xf] }
  0x6a   : > { %1258 = vmatpush.bf16.msra.mxu2 %v6011_v58  ;;  %v6342_v57 = vld [vmem:[#allocation8 + $0x20] sm:$0xf0]  ;;  %v6341_v58 = vld [vmem:[#allocation8 + $0x1c] sm:$0xf] }
  0x6b   : > { %v654_v11 = vmul.f32 %v6679_v8, %v653_v10  ;;  %1161 = vmatpush.bf16.msra.mxu0 %v5991_v62  ;;  %v6355_v10 = vld [vmem:[#allocation8 + $0x88] sm:$0xf0]  ;;  %v5931_v60 = vor.u32 %v6342_v57, %v5930_v56  ;;  %v5938_v62 = vld [vmem:[#allocation8 + $0x20] sm:$0xf] }
  0x6d   : > { %v655_v12 = vadd.f32 %v6679_v8, %v654_v11 }
  0x6f   : > { %v7808_v13 = vsel %vm656_vm0, %v6679_v8, %v655_v12  ;;  %v5980_v8 = vld [vmem:[#allocation8 + $0x84] sm:$0xf0]  ;;  %v5987_v12 = vor.u32 %v6355_v10, %v5986_v9 }
  0x70   : > { %10813 = vst [vmem:[#allocation27_spill] sm:$0xff] %v7808_v13  ;;  %v5926_v9 = vld [vmem:[#allocation8 + $0x8] sm:$0xf] }
  0x71   : > { %631 = vadd.xlane.f32.xlu2 %v607_v6 }
  0xd3   : > { %v624_v14 = vpop.xlane.xlu1 %623  ;;  %v620_v15 = vpop.xlane.xlu0 %619 }
  0xd4   : > { %v658_v16 = vmul.f32 %v7808_v13, %v620_v15  ;;  %v628_v18 = vpop.xlane.xlu2 %627  ;;  %v660_v27 = vmul.f32 %v7808_v13, %v624_v14  ;;  %v5966_v14 = vld [vmem:[#allocation8 + $0x60] sm:$0xf]  ;;  %v6351_v15 = vld [vmem:[#allocation8 + $0x68] sm:$0xf0] }
  0xd5   : > { %v662_v26 = vmul.f32 %v7808_v13, %v628_v18  ;;  %v5967_v18 = vor.u32 %v6351_v15, %v5966_v14 }
  0xd6   : > { %v7811_v17 = vsub.f32 %v601_v1, %v658_v16  ;;  %v7833_v33 = vsub.f32 %v603_v0, %v660_v27  ;;  %v5998_v0 = vld [vmem:[#allocation8 + $0x98] sm:$0xf]  ;;  %v6358_v1 = vld [vmem:[#allocation8 + $0xa0] sm:$0xf0]  ;;  %v6348_v27 = vld [vmem:[#allocation8 + $0x50] sm:$0xf0] }
  0xd7   : > { %v7831_v32 = vsub.f32 %v605_v2, %v662_v26  ;;  %v5995_v2 = vor.u32 %v6356_v61, %v5992_v63  ;;  %v6350_v16 = vld [vmem:[#allocation8 + $0x64] sm:$0xf]  ;;  %v5954_v26 = vld [vmem:[#allocation8 + $0x48] sm:$0xf] }
  0xd8   : > { %v690_v19 = vmul.f32 %v7811_v17, %v7811_v17  ;;  %v692_v37 = vmul.f32 %v7833_v33, %v7833_v33  ;;  %v5932_v61 = vld [vmem:[#allocation8 + $0x24] sm:$0xf0] }
  0xd9   : > { %v694_v34 = vmul.f32 %v7831_v32, %v7831_v32  ;;  %1210 = vmatpush.bf16.msra.mxu1 %v5995_v2 }
  0xda   : > { %706 = vadd.xlane.f32.xlu0 %v690_v19  ;;  %v5968_v19 = vld [vmem:[#allocation8 + $0x6c] sm:$0xf0] }
  0xdb   : > { %v626_v20 = vpop.xlane.xlu1 %625  ;;  %v622_v21 = vpop.xlane.xlu0 %621 }
  0xdc   : > { %v661_v22 = vmul.f32 %v7808_v13, %v626_v20  ;;  %v659_v23 = vmul.f32 %v7808_v13, %v622_v21  ;;  %v630_v31 = vpop.xlane.xlu2 %629  ;;  %v5974_v20 = vld [vmem:[#allocation8 + $0x68] sm:$0xf]  ;;  %v6352_v21 = vld [vmem:[#allocation8 + $0x70] sm:$0xf0] }
  0xdd   : > { %v663_v35 = vmul.f32 %v7808_v13, %v630_v31  ;;  %v5956_v31 = vld [vmem:[#allocation8 + $0x54] sm:$0xf0] }
  0xde   : > { %v7817_v24 = vsub.f32 %v604_v3, %v661_v22  ;;  %v7819_v25 = vsub.f32 %v602_v4, %v659_v23  ;;  %v5999_v3 = vor.u32 %v6358_v1, %v5998_v0  ;;  %v5978_v4 = vld [vmem:[#allocation8 + $0x78] sm:$0xf]  ;;  %v5971_v22 = vor.u32 %v6350_v16, %v5968_v19  ;;  %v6343_v1 = vld [vmem:[#allocation8 + $0x28] sm:$0xf0] }
  0xdf   : > { %v7844_v38 = vsub.f32 %v606_v5, %v663_v35  ;;  %v6354_v5 = vld [vmem:[#allocation8 + $0x80] sm:$0xf0]  ;;  %v5975_v23 = vor.u32 %v6352_v21, %v5974_v20  ;;  %v6349_v35 = vld [vmem:[#allocation8 + $0x58] sm:$0xf0]  ;;  %v5935_v0 = vor.u32 %v6341_v58, %v5932_v61  ;;  %v5939_v2 = vor.u32 %v6343_v1, %v5938_v62 }
  0xe0   : > { %v693_v29 = vmul.f32 %v7817_v24, %v7817_v24  ;;  %v691_v30 = vmul.f32 %v7819_v25, %v7819_v25  ;;  %1259 = vmatpush.bf16.msra.mxu2 %v5999_v3  ;;  %v5979_v7 = vor.u32 %v6354_v5, %v5978_v4  ;;  %v5918_v4 = vld [vmem:[#allocation8] sm:$0xf]  ;;  %v6339_v5 = vld [vmem:[#allocation8 + $0x8] sm:$0xf0] }
  0xe1   : > { %v695_v40 = vmul.f32 %v7844_v38, %v7844_v38 }
  0xe2   : > { %712 = vadd.xlane.f32.xlu2 %v693_v29  ;;  %633 = vadd.xlane.f32.xlu0 %v7824_v28  ;;  %v6347_v29 = vld [vmem:[#allocation8 + $0x4c] sm:$0xf] }
  0xe3   : > { %708 = vadd.xlane.f32.xlu1 %v691_v30  ;;  %1162 = vmatpush.bf16.msra.mxu0 %v5979_v7  ;;  %v5955_v30 = vor.u32 %v6348_v27, %v5954_v26  ;;  %v6338_v7 = vld [vmem:[#allocation8 + $0x4] sm:$0xf] }
  0xe4   : > { %v632_v39 = vpop.xlane.xlu2 %631  ;;  %1260 = vmatpush.bf16.msra.mxu2 %v5987_v12 }
  0xe5   : > { %v664_v41 = vmul.f32 %v7808_v13, %v632_v39 }
  0xe7   : > { %v7856_v44 = vsub.f32 %v607_v6, %v664_v41  ;;  %v6353_v6 = vld [vmem:[#allocation8 + $0x7c] sm:$0xf]  ;;  %1163 = vmatpush.bf16.msra.mxu0 %v5967_v18 }
  0xe8   : > { %v5983_v11 = vor.u32 %v6353_v6, %v5980_v8  ;;  %1261 = vmatpush.bf16.msra.mxu2 %v5975_v23  ;;  %v6345_v41 = vld [vmem:[#allocation8 + $0x38] sm:$0xf0]  ;;  %v5919_v6 = vor.u32 %v6339_v5, %v5918_v4  ;;  %v5920_v8 = vld [vmem:[#allocation8 + $0xc] sm:$0xf0] }
  0xe9   : > { %v696_v45 = vmul.f32 %v7856_v44, %v7856_v44  ;;  %v5923_v10 = vor.u32 %v6338_v7, %v5920_v8 }
  0xea   : > { %714 = vadd.xlane.f32.xlu2 %v694_v34  ;;  %635 = vadd.xlane.f32.xlu0 %v7839_v36  ;;  %v5962_v34 = vld [vmem:[#allocation8 + $0x50] sm:$0xf] }
  0xeb   : > { %710 = vadd.xlane.f32.xlu1 %v692_v37  ;;  %1211 = vmatpush.bf16.msra.mxu1 %v5983_v11  ;;  %v5959_v37 = vor.u32 %v6347_v29, %v5956_v31  ;;  %v5963_v39 = vor.u32 %v6349_v35, %v5962_v34  ;;  %v6340_v11 = vld [vmem:[#allocation8 + $0x10] sm:$0xf0] }
  0xec   : > { %1164 = vmatpush.bf16.msra.mxu0 %v5955_v30  ;;  %v5927_v12 = vor.u32 %v6340_v11, %v5926_v9 }
  0xed   : > { %1262 = vmatpush.bf16.msra.mxu2 %v5963_v39 }
  0xef   : > { %1212 = vmatpush.bf16.msra.mxu1 %v5971_v22 }
  0xf1   : > { %1263 = vmatpush.bf16.msra.mxu2 %v5951_v55 }
  0xf2   : > { %641 = vadd.xlane.f32.xlu2 %v7850_v42  ;;  %716 = vadd.xlane.f32.xlu0 %v695_v40  ;;  %v5942_v40 = vld [vmem:[#allocation8 + $0x30] sm:$0xf] }
  0xf3   : > { %637 = vadd.xlane.f32.xlu1 %v7853_v43  ;;  %1213 = vmatpush.bf16.msra.mxu1 %v5959_v37  ;;  %v5943_v50 = vor.u32 %v6345_v41, %v5942_v40 }
  0xf5   : > { %1165 = vmatpush.bf16.msra.mxu0 %v5943_v50  ;;  %1264 = vmatpush.bf16.msra.mxu2 %v5939_v2 }
  0xf9   : > { %1166 = vmatpush.bf16.msra.mxu0 %v5931_v60  ;;  %1265 = vmatpush.bf16.msra.mxu2 %v5927_v12 }
  0xfa   : > { %643 = vadd.xlane.f32.xlu2 %v7862_v46  ;;  %718 = vadd.xlane.f32.xlu0 %v696_v45  ;;  %v6344_v45 = vld [vmem:[#allocation8 + $0x34] sm:$0xf] }
  0xfb   : > { %639 = vadd.xlane.f32.xlu1 %v7865_v47  ;;  %v5947_v54 = vor.u32 %v6344_v45, %v5944_v51 }
  0xfd   : > { %1214 = vmatpush.bf16.msra.mxu1 %v5947_v54  ;;  %1167 = vmatpush.bf16.msra.mxu0 %v5919_v6 }
 0x101   : > { %1215 = vmatpush.bf16.msra.mxu1 %v5935_v0 }
 0x102   : > { %645 = vadd.xlane.f32.xlu0 %v7870_v48 }
 0x105   : > { %1216 = vmatpush.bf16.msra.mxu1 %v5923_v10 }
 0x10a   : > { %647 = vadd.xlane.f32.xlu0 %v7874_v49 }
 0x14d   : > { %v707_v59 = vpop.xlane.xlu0 %706 }
 0x14e   : > { %v738_v63 = vmul.f32 %v707_v59, %v7808_v13 }
 0x150   : > { %v754_v3 = vadd.f32 1e-05, %v738_v63 }
 0x152   : > { %6680 = vrsqrt.f32 %v754_v3  ;;  %vm776_vm2 = vweird.f32 %v754_v3 }
 0x155   : > { %v713_v14 = vpop.xlane.xlu2 %712  ;;  %v634_v15 = vpop.xlane.xlu0 %633 }
 0x156   : > { %v741_v16 = vmul.f32 %v713_v14, %v7808_v13  ;;  %v709_v18 = vpop.xlane.xlu1 %708  ;;  %v665_v19 = vmul.f32 %v7808_v13, %v634_v15 }
 0x157   : > { %v739_v20 = vmul.f32 %v709_v18, %v7808_v13 }
 0x158   : > { %v6681_v21 = vpop.eup %6680  ;;  %v7881_v22 = vadd.f32 1e-05, %v741_v16  ;;  %v7884_v23 = vsub.f32 %v7824_v28, %v665_v19  ;;  %v7938_v16 = vld [vmem:[%s7775_s17 + $0x78] sm:$0xff] }
 0x159   : > { %v771_v26 = vmul.f32 %v6681_v21, %v754_v3  ;;  %v755_v27 = vadd.f32 1e-05, %v739_v20  ;;  %vm777_vm1 = vweird.f32 %v6681_v21 }
 0x15a   : > { %6682 = vrsqrt.f32 %v7881_v22  ;;  %v697_v29 = vmul.f32 %v7884_v23, %v7884_v23  ;;  %vm7906_vm4 = vmor %vm776_vm2, %vm777_vm1  ;;  %vm806_vm9 = vweird.f32 %v7881_v22 }
 0x15b   : > { %v772_v30 = vmul.f32 %v6681_v21, %v771_v26  ;;  %6684 = vrsqrt.f32 %v755_v27  ;;  %vm786_vm3 = vweird.f32 %v755_v27 }
 0x15c   : > { %720 = vadd.xlane.f32.xlu1 %v697_v29 }
 0x15d   : > { %v773_v31 = vmul.f32 0.5, %v772_v30  ;;  %v715_v34 = vpop.xlane.xlu2 %714  ;;  %v636_v35 = vpop.xlane.xlu0 %635 }
 0x15e   : > { %v711_v37 = vpop.xlane.xlu1 %710  ;;  %v666_v39 = vmul.f32 %v7808_v13, %v636_v35  ;;  %v742_v51 = vmul.f32 %v715_v34, %v7808_v13 }
 0x15f   : > { %v774_v40 = vsub.f32 1.5, %v773_v31  ;;  %v740_v28 = vmul.f32 %v711_v37, %v7808_v13  ;;  %v7951_v31 = vld [vmem:[#allocation7] ss:$0 sm:$0xff] }
 0x160   : > { %v7891_v41 = vpop.eup %6682  ;;  %v7894_v45 = vsub.f32 %v7839_v36, %v666_v39  ;;  %v7904_v36 = vadd.f32 1e-05, %v742_v51 }
 0x161   : > { %v6685_v50 = vpop.eup %6684  ;;  %v7897_v52 = vadd.f32 1e-05, %v740_v28  ;;  %v775_v54 = vmul.f32 %v6681_v21, %v774_v40  ;;  %v801_v55 = vmul.f32 %v7891_v41, %v7881_v22  ;;  %vm807_vm10 = vweird.f32 %v7891_v41 }
 0x162   : > { %v781_v53 = vmul.f32 %v6685_v50, %v755_v27  ;;  %v698_v57 = vmul.f32 %v7894_v45, %v7894_v45  ;;  %vm787_vm5 = vweird.f32 %v6685_v50  ;;  %vm7979_vm12 = vmor %vm806_vm9, %vm807_vm10  ;;  %vm816_vm15 = vweird.f32 %v7904_v36 }
 0x163   : > { %6686 = vrsqrt.f32 %v7897_v52  ;;  %v779_v1 = vsel %vm7906_vm4, %v6681_v21, %v775_v54  ;;  %v802_v2 = vmul.f32 %v7891_v41, %v801_v55  ;;  %vm7922_vm6 = vmor %vm786_vm3, %vm787_vm5  ;;  %vm796_vm7 = vweird.f32 %v7897_v52 }
 0x164   : > { %v782_v56 = vmul.f32 %v6685_v50, %v781_v53  ;;  %722 = vadd.xlane.f32.xlu1 %v698_v57  ;;  %6688 = vrsqrt.f32 %v7904_v36  ;;  %v930_v12 = vmul.f32 %v779_v1, %v7811_v17 }
 0x165   : > { %v642_v58 = vpop.xlane.xlu2 %641  ;;  %v717_v59 = vpop.xlane.xlu0 %716  ;;  %v803_v14 = vmul.f32 0.5, %v802_v2 }
 0x166   : > { %v783_v61 = vmul.f32 0.5, %v782_v56  ;;  %v669_v62 = vmul.f32 %v7808_v13, %v642_v58  ;;  %v638_v63 = vpop.xlane.xlu1 %637  ;;  %v743_v0 = vmul.f32 %v717_v59, %v7808_v13 }
 0x167   : > { %v667_v3 = vmul.f32 %v7808_v13, %v638_v63  ;;  %v804_v35 = vsub.f32 1.5, %v803_v14 }
 0x168   : > { %v784_v4 = vsub.f32 1.5, %v783_v61  ;;  %v7916_v5 = vadd.f32 1e-05, %v743_v0  ;;  %v7919_v6 = vsub.f32 %v7850_v42, %v669_v62  ;;  %v7933_v42 = vld [vmem:[#allocation5] ss:$0 sm:$0xff] }
 0x169   : > { %v6687_v7 = vpop.eup %6686  ;;  %v7928_v9 = vsub.f32 %v7853_v43, %v667_v3  ;;  %v949_v30 = vmul.f32 %v7933_v42, %v930_v12  ;;  %v805_v22 = vmul.f32 %v7891_v41, %v804_v35 }
 0x16a   : > { %v785_v10 = vmul.f32 %v6685_v50, %v784_v4  ;;  %v791_v11 = vmul.f32 %v6687_v7, %v7897_v52  ;;  %6690 = vrsqrt.f32 %v7916_v5  ;;  %v701_v15 = vmul.f32 %v7919_v6, %v7919_v6  ;;  %v7953_v34 = vpop.eup %6688 }
 0x16b   : > { %v699_v19 = vmul.f32 %v7928_v9, %v7928_v9  ;;  %vm797_vm8 = vweird.f32 %v6687_v7  ;;  %v968_v55 = vadd.f32 %v7951_v31, %v949_v30  ;;  %v811_v56 = vmul.f32 %v7953_v34, %v7904_v36 }
 0x16c   : > { %v789_v18 = vsel %vm7922_vm6, %v6685_v50, %v785_v10  ;;  %v792_v43 = vmul.f32 %v6687_v7, %v791_v11  ;;  %728 = vadd.xlane.f32.xlu0 %v701_v15  ;;  %649 = vadd.xlane.f32.xlu1 %v7938_v16  ;;  %vm7968_vm11 = vmor %vm796_vm7, %vm797_vm8  ;;  %v809_v63 = vsel %vm7979_vm12, %v7891_v41, %v805_v22  ;;  %vm826_vm13 = vweird.f32 %v7916_v5 }
 0x16d   : > { %v644_v20 = vpop.xlane.xlu2 %643  ;;  %v7944_v21 = vpop.xlane.xlu0 %718  ;;  %v931_v17 = vmul.f32 %v789_v18, %v7819_v25  ;;  %724 = vadd.xlane.f32.xlu2 %v699_v19  ;;  %v812_v0 = vmul.f32 %v7953_v34, %v811_v56  ;;  %vm817_vm0 = vweird.f32 %v7953_v34 }
 0x16e   : > { %v793_v26 = vmul.f32 0.5, %v792_v43  ;;  %v670_v27 = vmul.f32 %v7808_v13, %v644_v20  ;;  %v640_v29 = vpop.xlane.xlu1 %639  ;;  %vm818_vm2 = vmor %vm816_vm15, %vm817_vm0 }
 0x16f   : > { %v668_v37 = vmul.f32 %v7808_v13, %v640_v29  ;;  %v950_v25 = vmul.f32 %v7933_v42, %v931_v17  ;;  %v813_v8 = vmul.f32 0.5, %v812_v0 }
 0x170   : > { %v6691_v39 = vpop.eup %6690  ;;  %v794_v40 = vsub.f32 1.5, %v793_v26  ;;  %v7958_v28 = vsub.f32 %v7862_v46, %v670_v27 }
 0x171   : > { %v821_v50 = vmul.f32 %v6691_v39, %v7916_v5  ;;  %v7964_v51 = vsub.f32 %v7865_v47, %v668_v37  ;;  %v969_v46 = vadd.f32 %v7951_v31, %v950_v25  ;;  %vm827_vm14 = vweird.f32 %v6691_v39 }
 0x172   : > { %v795_v53 = vmul.f32 %v6687_v7, %v794_v40  ;;  %v702_v58 = vmul.f32 %v7958_v28, %v7958_v28  ;;  %vm828_vm1 = vmor %vm826_vm13, %vm827_vm14 }
 0x173   : > { %v700_v47 = vmul.f32 %v7964_v51, %v7964_v51  ;;  %v984_v52 = vpack.c.bf16 %v969_v46, %v968_v55  ;;  %v822_v60 = vmul.f32 %v6691_v39, %v821_v50 }
 0x174   : > { %v799_v59 = vsel %vm7968_vm11, %v6687_v7, %v795_v53  ;;  %730 = vadd.xlane.f32.xlu1 %v702_v58  ;;  %v933_v7 = vmul.f32 %v809_v63, %v7817_v24 }
 0x175   : > { %v646_v61 = vpop.xlane.xlu0 %645  ;;  %726 = vadd.xlane.f32.xlu2 %v700_v47  ;;  %1168 = vmatmul.bf16.vlgmr.msra.gmra.mxu0 %v984_v52  ;;  %v932_v2 = vmul.f32 %v799_v59, %v7833_v33  ;;  %v823_v3 = vmul.f32 0.5, %v822_v60 }
 0x176   : > { %v671_v62 = vmul.f32 %v7808_v13, %v646_v61  ;;  %1217 = vmatmul.bf16.vlgmr.msra.gmra.mxu1 %v984_v52  ;;  %1266 = vmatmul.bf16.vlgmr.msra.gmra.mxu2 %v984_v52  ;;  %v952_v14 = vmul.f32 %v7933_v42, %v933_v7 }
 0x177   : > { %v951_v10 = vmul.f32 %v7933_v42, %v932_v2  ;;  %v824_v41 = vsub.f32 1.5, %v823_v3 }
 0x178   : > { %v7993_v1 = vsub.f32 %v7870_v48, %v671_v62  ;;  %v814_v48 = vsub.f32 1.5, %v813_v8  ;;  %v971_v18 = vadd.f32 %v7951_v31, %v952_v14 }
 0x179   : > { %v970_v33 = vadd.f32 %v7951_v31, %v951_v10  ;;  %v825_v24 = vmul.f32 %v6691_v39, %v824_v41 }
 0x17a   : > { %v703_v4 = vmul.f32 %v7993_v1, %v7993_v1  ;;  %v815_v19 = vmul.f32 %v7953_v34, %v814_v48 }
 0x17b   : > { %v985_v5 = vpack.c.bf16 %v971_v18, %v970_v33  ;;  %v829_v20 = vsel %vm828_vm1, %v6691_v39, %v825_v24 }
 0x17c   : > { %v935_v36 = vmul.f32 %v829_v20, %v7844_v38 }
 0x17d   : > { %v648_v11 = vpop.xlane.xlu0 %647  ;;  %732 = vadd.xlane.f32.xlu2 %v703_v4 }
 0x17e   : > { %v672_v12 = vmul.f32 %v7808_v13, %v648_v11  ;;  %v954_v26 = vmul.f32 %v7933_v42, %v935_v36 }
 0x180   : > { %v8005_v15 = vsub.f32 %v7874_v49, %v672_v12  ;;  %v819_v49 = vsel %vm818_vm2, %v7953_v34, %v815_v19  ;;  %v973_v29 = vadd.f32 %v7951_v31, %v954_v26  ;;  %v744_v34 = vmul.f32 %v7944_v21, %v7808_v13 }
 0x181   : > { %v934_v17 = vmul.f32 %v819_v49, %v7831_v32 }
 0x182   : > { %v704_v43 = vmul.f32 %v8005_v15, %v8005_v15  ;;  %v760_v37 = vadd.f32 1e-05, %v744_v34 }
 0x183   : > { %v953_v27 = vmul.f32 %v7933_v42, %v934_v17 }
 0x184   : > { %734 = vadd.xlane.f32.xlu0 %v704_v43  ;;  %6692 = vrsqrt.f32 %v760_v37  ;;  %vm836_vm3 = vweird.f32 %v760_v37 }
 0x185   : > { %1173 = vmatmul.bf16.gmra.mxu0 %v985_v5  ;;  %v972_v30 = vadd.f32 %v7951_v31, %v953_v27 }
 0x186   : > { %1222 = vmatmul.bf16.gmra.mxu1 %v985_v5  ;;  %1271 = vmatmul.bf16.gmra.mxu2 %v985_v5 }
 0x187   : > { %v986_v35 = vpack.c.bf16 %v973_v29, %v972_v30 }
 0x18a   : > { %v6693_v38 = vpop.eup %6692 }
 0x18b   : > { %v831_v25 = vmul.f32 %v6693_v38, %v760_v37  ;;  %vm837_vm4 = vweird.f32 %v6693_v38 }
 0x18c   : > { %vm8024_vm5 = vmor %vm836_vm3, %vm837_vm4 }
 0x18d   : > { %v832_v39 = vmul.f32 %v6693_v38, %v831_v25 }
 0x18f   : > { %v833_v53 = vmul.f32 0.5, %v832_v39 }
 0x191   : > { %v834_v54 = vsub.f32 1.5, %v833_v53 }
 0x193   : > { %v835_v21 = vmul.f32 %v6693_v38, %v834_v54 }
 0x195   : > { %1178 = vmatmul.bf16.gmra.mxu0 %v986_v35  ;;  %v839_v59 = vsel %vm8024_vm5, %v6693_v38, %v835_v21 }
 0x196   : > { %1227 = vmatmul.bf16.gmra.mxu1 %v986_v35  ;;  %1276 = vmatmul.bf16.gmra.mxu2 %v986_v35  ;;  %v936_v8 = vmul.f32 %v839_v59, %v7856_v44 }
 0x198   : > { %v955_v18 = vmul.f32 %v7933_v42, %v936_v8 }
 0x19a   : > { %v974_v36 = vadd.f32 %v7951_v31, %v955_v18 }
 0x1cf   : > { %v721_v32 = vpop.xlane.xlu1 %720 }
 0x1d0   : > { %v745_v40 = vmul.f32 %v721_v32, %v7808_v13 }
 0x1d2   : > { %v761_v50 = vadd.f32 1e-05, %v745_v40 }
 0x1d4   : > { %6694 = vrsqrt.f32 %v761_v50  ;;  %vm846_vm7 = vweird.f32 %v761_v50 }
 0x1d7   : > { %v723_v55 = vpop.xlane.xlu1 %722 }
 0x1d8   : > { %v746_v22 = vmul.f32 %v723_v55, %v7808_v13 }
 0x1da   : > { %v6695_v46 = vpop.eup %6694  ;;  %v762_v47 = vadd.f32 1e-05, %v746_v22 }
 0x1db   : > { %v841_v56 = vmul.f32 %v6695_v46, %v761_v50  ;;  %vm847_vm6 = vweird.f32 %v6695_v46 }
 0x1dc   : > { %6696 = vrsqrt.f32 %v762_v47  ;;  %vm848_vm8 = vmor %vm846_vm7, %vm847_vm6  ;;  %vm856_vm10 = vweird.f32 %v762_v47 }
 0x1dd   : > { %v842_v52 = vmul.f32 %v6695_v46, %v841_v56 }
 0x1df   : > { %v843_v58 = vmul.f32 0.5, %v842_v52  ;;  %v729_v60 = vpop.xlane.xlu0 %728  ;;  %v650_v63 = vpop.xlane.xlu1 %649 }
 0x1e0   : > { %v725_v62 = vpop.xlane.xlu2 %724  ;;  %v749_v0 = vmul.f32 %v729_v60, %v7808_v13  ;;  %v673_v3 = vmul.f32 %v7808_v13, %v650_v63 }
 0x1e1   : > { %v844_v61 = vsub.f32 1.5, %v843_v58  ;;  %v747_v2 = vmul.f32 %v725_v62, %v7808_v13  ;;  %v1024_v58 = vld [vmem:[%s10700_s4] sm:$0x7] }
 0x1e2   : > { %v8033_v7 = vadd.f32 1e-05, %v749_v0  ;;  %v6697_v10 = vpop.eup %6696  ;;  %v8037_v11 = vsub.f32 %v7938_v16, %v673_v3  ;;  %v8077_v3 = vperm.slane %v1024_v58, 1 }
 0x1e3   : > { %v845_v4 = vmul.f32 %v6695_v46, %v844_v61  ;;  %v763_v41 = vadd.f32 1e-05, %v747_v2  ;;  %v851_v14 = vmul.f32 %v6697_v10, %v762_v47  ;;  %vm857_vm9 = vweird.f32 %v6697_v10 }
 0x1e4   : > { %6698 = vrsqrt.f32 %v8033_v7  ;;  %v705_v48 = vmul.f32 %v8037_v11, %v8037_v11  ;;  %vm8053_vm11 = vmor %vm856_vm10, %vm857_vm9  ;;  %v8071_v61 = vperm.slane %v1024_v58, 0  ;;  %vm886_vm1 = vweird.f32 %v8033_v7 }
 0x1e5   : > { %v849_v12 = vsel %vm848_vm8, %v6695_v46, %v845_v4  ;;  %6700 = vrsqrt.f32 %v763_v41  ;;  %v852_v33 = vmul.f32 %v6697_v10, %v851_v14  ;;  %vm866_vm12 = vweird.f32 %v763_v41 }
 0x1e6   : > { %v937_v24 = vmul.f32 %v849_v12, %v7884_v23  ;;  %736 = vadd.xlane.f32.xlu1 %v705_v48 }
 0x1e7   : > { %v853_v44 = vmul.f32 0.5, %v852_v33  ;;  %v731_v49 = vpop.xlane.xlu1 %730 }
 0x1e8   : > { %v727_v43 = vpop.xlane.xlu2 %726  ;;  %v956_v19 = vmul.f32 %v7933_v42, %v937_v24  ;;  %v750_v27 = vmul.f32 %v731_v49, %v7808_v13 }
 0x1e9   : > { %v748_v16 = vmul.f32 %v727_v43, %v7808_v13  ;;  %v854_v20 = vsub.f32 1.5, %v853_v44 }
 0x1ea   : > { %v8046_v5 = vpop.eup %6698  ;;  %v975_v17 = vadd.f32 %v7951_v31, %v956_v19  ;;  %v8057_v25 = vadd.f32 1e-05, %v750_v27 }
 0x1eb   : > { %v6701_v26 = vpop.eup %6700  ;;  %v764_v23 = vadd.f32 1e-05, %v748_v16  ;;  %v855_v29 = vmul.f32 %v6697_v10, %v854_v20  ;;  %v881_v35 = vmul.f32 %v8046_v5, %v8033_v7  ;;  %vm887_vm2 = vweird.f32 %v8046_v5 }
 0x1ec   : > { %v861_v30 = vmul.f32 %v6701_v26, %v763_v41  ;;  %v987_v34 = vpack.c.bf16 %v975_v17, %v974_v36  ;;  %vm867_vm13 = vweird.f32 %v6701_v26  ;;  %vm8096_vm4 = vmor %vm886_vm1, %vm887_vm2  ;;  %vm896_vm7 = vweird.f32 %v8057_v25 }
 0x1ed   : > { %6702 = vrsqrt.f32 %v764_v23  ;;  %v859_v32 = vsel %vm8053_vm11, %v6697_v10, %v855_v29  ;;  %v882_v40 = vmul.f32 %v8046_v5, %v881_v35  ;;  %vm868_vm14 = vmor %vm866_vm12, %vm867_vm13  ;;  %vm876_vm15 = vweird.f32 %v764_v23 }
 0x1ee   : > { %v862_v37 = vmul.f32 %v6701_v26, %v861_v30  ;;  %1183 = vmatmul.bf16.gmra.mxu0 %v987_v34  ;;  %1232 = vmatmul.bf16.gmra.mxu1 %v987_v34  ;;  %6704 = vrsqrt.f32 %v8057_v25  ;;  %v938_v21 = vmul.f32 %v859_v32, %v7894_v45  ;;  %vm1443_vm1 = vcmask 261120  }
 0x1ef   : > { %1281 = vmatmul.bf16.gmra.mxu2 %v987_v34  ;;  %v883_v57 = vmul.f32 0.5, %v882_v40 }
 0x1f0   : > { %v863_v39 = vmul.f32 0.5, %v862_v37  ;;  %v733_v50 = vpop.xlane.xlu2 %732  ;;  %v957_v63 = vmul.f32 %v7933_v42, %v938_v21 }
 0x1f1   : > { %v751_v53 = vmul.f32 %v733_v50, %v7808_v13  ;;  %v884_v0 = vsub.f32 1.5, %v883_v57 }
 0x1f2   : > { %v864_v54 = vsub.f32 1.5, %v863_v39  ;;  %v1169_v55 = vpop.f32.mrf.mxu0  ;;  %v976_v33 = vadd.f32 %v7951_v31, %v957_v63 }
 0x1f3   : > { %v6703_v46 = vpop.eup %6702  ;;  %v8064_v22 = vadd.f32 1e-05, %v751_v53  ;;  %v1218_v56 = vpop.f32.mrf.mxu1  ;;  %v1170_v12 = vadd.f32 %v1169_v55, %v8071_v61  ;;  %v885_v18 = vmul.f32 %v8046_v5, %v884_v0 }
 0x1f4   : > { %v865_v47 = vmul.f32 %v6701_v26, %v864_v54  ;;  %v871_v52 = vmul.f32 %v6703_v46, %v764_v23  ;;  %vm877_vm0 = vweird.f32 %v6703_v46  ;;  %v8075_v45 = vpop.eup %6704  ;;  %v1219_v20 = vadd.f32 %v1218_v56, %v8077_v3 }
 0x1f5   : > { %6706 = vrsqrt.f32 %v8064_v22  ;;  %vm8082_vm3 = vmor %vm876_vm15, %vm877_vm0  ;;  %v891_v43 = vmul.f32 %v8075_v45, %v8057_v25  ;;  %v889_v7 = vsel %vm8096_vm4, %v8046_v5, %v885_v18  ;;  %vm906_vm5 = vweird.f32 %v8064_v22 }
 0x1f6   : > { %v869_v59 = vsel %vm868_vm14, %v6701_v26, %v865_v47  ;;  %v872_v60 = vmul.f32 %v6703_v46, %v871_v52  ;;  %v941_v38 = vmul.f32 %v889_v7, %v7919_v6  ;;  %vm897_vm8 = vweird.f32 %v8075_v45 }
 0x1f7   : > { %v939_v62 = vmul.f32 %v869_v59, %v7928_v9  ;;  %v892_v29 = vmul.f32 %v8075_v45, %v891_v43  ;;  %vm898_vm10 = vmor %vm896_vm7, %vm897_vm8  ;;  %v735_v18 = vpop.xlane.xlu0 %734 }
 0x1f8   : > { %v873_v2 = vmul.f32 0.5, %v872_v60  ;;  %v960_v50 = vmul.f32 %v7933_v42, %v941_v38 }
 0x1f9   : > { %v958_v4 = vmul.f32 %v7933_v42, %v939_v62  ;;  %v893_v32 = vmul.f32 0.5, %v892_v29 }
 0x1fa   : > { %v874_v8 = vsub.f32 1.5, %v873_v2  ;;  %v1171_v10 = vpop.f32.mrf.mxu0 }
 0x1fb   : > { %v6707_v41 = vpop.eup %6706  ;;  %v1172_v14 = vadd.f32 %v1171_v10, %v8071_v61  ;;  %v1220_v48 = vpop.f32.mrf.mxu1  ;;  %v977_v24 = vadd.f32 %v7951_v31, %v958_v4  ;;  %v894_v53 = vsub.f32 1.5, %v893_v32 }
 0x1fc   : > { %v875_v44 = vmul.f32 %v6703_v46, %v874_v8  ;;  %v901_v19 = vmul.f32 %v6707_v41, %v8064_v22  ;;  %v1221_v36 = vadd.f32 %v1220_v48, %v8077_v3  ;;  %vm907_vm6 = vweird.f32 %v6707_v41 }
 0x1fd   : > { %v1307_v49 = vpack.c.bf16 %v1172_v14, %v1170_v12  ;;  %v988_v17 = vpack.c.bf16 %v977_v24, %v976_v33  ;;  %vm8116_vm9 = vmor %vm906_vm5, %vm907_vm6  ;;  %v979_v22 = vadd.f32 %v7951_v31, %v960_v50  ;;  %v895_v21 = vmul.f32 %v8075_v45, %v894_v53 }
 0x1fe   : > { %v879_v26 = vsel %vm8082_vm3, %v6703_v46, %v875_v44  ;;  %v902_v23 = vmul.f32 %v6707_v41, %v901_v19  ;;  %v1315_v27 = vpack.c.bf16 %v1221_v36, %v1219_v20  ;;  %v752_v44 = vmul.f32 %v735_v18, %v7808_v13 }
 0x1ff   : > { %1188 = vmatmul.bf16.gmra.mxu0 %v988_v17  ;;  %1237 = vmatmul.bf16.gmra.mxu1 %v988_v17  ;;  %v940_v30 = vmul.f32 %v879_v26, %v7964_v51  ;;  %v899_v60 = vsel %vm898_vm10, %v8075_v45, %v895_v21 }
 0x200   : > { %1286 = vmatmul.bf16.gmra.mxu2 %v988_v17  ;;  %v903_v35 = vmul.f32 0.5, %v902_v23  ;;  %v942_v2 = vmul.f32 %v899_v60, %v7958_v28  ;;  %v768_v43 = vadd.f32 1e-05, %v752_v44 }
 0x201   : > { %6612 = vxpose.binary.xlu2.c.b16.start [1/16] %v1315_v27, %v1307_v49, 128  ;;  %v959_v39 = vmul.f32 %v7933_v42, %v940_v30 }
 0x202   : > { %v1174_v34 = vpop.f32.mrf.mxu0  ;;  %v904_v40 = vsub.f32 1.5, %v903_v35  ;;  %v961_v8 = vmul.f32 %v7933_v42, %v942_v2  ;;  %6708 = vrsqrt.f32 %v768_v43  ;;  %vm916_vm11 = vweird.f32 %v768_v43 }
 0x203   : > { %v1223_v37 = vpop.f32.mrf.mxu1  ;;  %v978_v5 = vadd.f32 %v7951_v31, %v959_v39  ;;  %v1175_v55 = vadd.f32 %v1174_v34, %v8071_v61 }
 0x204   : > { %v905_v51 = vmul.f32 %v6707_v41, %v904_v40  ;;  %v1224_v47 = vadd.f32 %v1223_v37, %v8077_v3  ;;  %v980_v14 = vadd.f32 %v7951_v31, %v961_v8 }
 0x205   : > { %v989_v52 = vpack.c.bf16 %v979_v22, %v978_v5 }
 0x206   : > { %v909_v58 = vsel %vm8116_vm9, %v6707_v41, %v905_v51 }
 0x207   : > { %v943_v62 = vmul.f32 %v909_v58, %v7993_v1 }
 0x208   : > { %v6709_v19 = vpop.eup %6708 }
 0x209   : > { %v962_v4 = vmul.f32 %v7933_v42, %v943_v62  ;;  %v911_v16 = vmul.f32 %v6709_v19, %v768_v43  ;;  %vm917_vm12 = vweird.f32 %v6709_v19 }
 0x20a   : > { %v1176_v54 = vpop.f32.mrf.mxu0  ;;  %vm918_vm13 = vmor %vm916_vm11, %vm917_vm12 }
 0x20b   : > { %v1177_v46 = vadd.f32 %v1176_v54, %v8071_v61  ;;  %v1225_v56 = vpop.f32.mrf.mxu1  ;;  %v981_v10 = vadd.f32 %v7951_v31, %v962_v4  ;;  %v912_v20 = vmul.f32 %v6709_v19, %v911_v16 }
 0x20c   : > { %v1226_v25 = vadd.f32 %v1225_v56, %v8077_v3 }
 0x20d   : > { %v1308_v57 = vpack.c.bf16 %v1177_v46, %v1175_v55  ;;  %v990_v28 = vpack.c.bf16 %v981_v10, %v980_v14  ;;  %v913_v26 = vmul.f32 0.5, %v912_v20 }
 0x20e   : > { %v1316_v59 = vpack.c.bf16 %v1226_v25, %v1224_v47 }
 0x20f   : > { %1193 = vmatmul.bf16.gmra.mxu0 %v989_v52  ;;  %1242 = vmatmul.bf16.gmra.mxu1 %v989_v52  ;;  %v914_v23 = vsub.f32 1.5, %v913_v26 }
 0x210   : > { %1291 = vmatmul.bf16.gmra.mxu2 %v989_v52 }
 0x211   : > { %6613 = vxpose.binary.xlu2.c.b16.cont [2/16] %v1316_v59, %v1308_v57, 128  ;;  %v915_v7 = vmul.f32 %v6709_v19, %v914_v23 }
 0x212   : > { %v1179_v63 = vpop.f32.mrf.mxu0 }
 0x213   : > { %v1228_v0 = vpop.f32.mrf.mxu1  ;;  %v1180_v9 = vadd.f32 %v1179_v63, %v8071_v61  ;;  %v919_v35 = vsel %vm918_vm13, %v6709_v19, %v915_v7 }
 0x214   : > { %v1229_v1 = vadd.f32 %v1228_v0, %v8077_v3  ;;  %v944_v39 = vmul.f32 %v919_v35, %v8005_v15 }
 0x216   : > { %v963_v5 = vmul.f32 %v7933_v42, %v944_v39 }
 0x218   : > { %v982_v22 = vadd.f32 %v7951_v31, %v963_v5 }
 0x21a   : > { %v1181_v41 = vpop.f32.mrf.mxu0 }
 0x21b   : > { %v1182_v12 = vadd.f32 %v1181_v41, %v8071_v61  ;;  %v1230_v45 = vpop.f32.mrf.mxu1 }
 0x21c   : > { %v1231_v48 = vadd.f32 %v1230_v45, %v8077_v3 }
 0x21d   : > { %v1309_v33 = vpack.c.bf16 %v1182_v12, %v1180_v9 }
 0x21e   : > { %v1317_v24 = vpack.c.bf16 %v1231_v48, %v1229_v1 }
 0x21f   : > { %1198 = vmatmul.bf16.gmra.mxu0 %v990_v28  ;;  %1247 = vmatmul.bf16.gmra.mxu1 %v990_v28 }
 0x220   : > { %1296 = vmatmul.bf16.gmra.mxu2 %v990_v28 }
 0x221   : > { %6614 = vxpose.binary.xlu2.c.b16.cont [3/16] %v1317_v24, %v1309_v33, 128 }
 0x259   : > { %v737_v49 = vpop.xlane.xlu1 %736 }
 0x25a   : > { %v753_v36 = vmul.f32 %v737_v49, %v7808_v13 }
 0x25c   : > { %v769_v17 = vadd.f32 1e-05, %v753_v36 }
 0x25e   : > { %6710 = vrsqrt.f32 %v769_v17  ;;  %vm926_vm15 = vweird.f32 %v769_v17 }
 0x264   : > { %v6711_v27 = vpop.eup %6710 }
 0x265   : > { %v921_v29 = vmul.f32 %v6711_v27, %v769_v17  ;;  %vm927_vm14 = vweird.f32 %v6711_v27 }
 0x266   : > { %vm928_vm0 = vmor %vm926_vm15, %vm927_vm14 }
 0x267   : > { %v922_v30 = vmul.f32 %v6711_v27, %v921_v29 }
 0x269   : > { %v923_v34 = vmul.f32 0.5, %v922_v30 }
 0x26b   : > { %v1184_v37 = vpop.f32.mrf.mxu0  ;;  %v1233_v38 = vpop.f32.mrf.mxu1  ;;  %v924_v32 = vsub.f32 1.5, %v923_v34 }
 0x26c   : > { %v1185_v55 = vadd.f32 %v1184_v37, %v8071_v61  ;;  %v1234_v46 = vadd.f32 %v1233_v38, %v8077_v3 }
 0x26d   : > { %v925_v40 = vmul.f32 %v6711_v27, %v924_v32 }
 0x26f   : > { %v929_v50 = vsel %vm928_vm0, %v6711_v27, %v925_v40 }
 0x270   : > { %v945_v53 = vmul.f32 %v929_v50, %v8037_v11 }
 0x272   : > { %v964_v6 = vmul.f32 %v7933_v42, %v945_v53 }
 0x273   : > { %v1186_v51 = vpop.f32.mrf.mxu0  ;;  %v1235_v54 = vpop.f32.mrf.mxu1 }
 0x274   : > { %v1187_v56 = vadd.f32 %v1186_v51, %v8071_v61  ;;  %v1236_v15 = vadd.f32 %v1235_v54, %v8077_v3  ;;  %v983_v21 = vadd.f32 %v7951_v31, %v964_v6 }
 0x276   : > { %v1310_v47 = vpack.c.bf16 %v1187_v56, %v1185_v55  ;;  %v1318_v11 = vpack.c.bf16 %v1236_v15, %v1234_v46  ;;  %v991_v25 = vpack.c.bf16 %v983_v21, %v982_v22 }
 0x278   : > { %6615 = vxpose.binary.xlu2.c.b16.cont [4/16] %v1318_v11, %v1310_v47, 128 }
 0x279   : > { %1203 = vmatmul.bf16.gmra.mxu0 %v991_v25  ;;  %1252 = vmatmul.bf16.gmra.mxu1 %v991_v25 }
 0x27a   : > { %1301 = vmatmul.bf16.gmra.mxu2 %v991_v25 }
 0x27c   : > { %v1189_v42 = vpop.f32.mrf.mxu0  ;;  %v1238_v57 = vpop.f32.mrf.mxu1 }
 0x27d   : > { %v1190_v59 = vadd.f32 %v1189_v42, %v8071_v61  ;;  %v1239_v60 = vadd.f32 %v1238_v57, %v8077_v3 }
 0x284   : > { %v1191_v52 = vpop.f32.mrf.mxu0  ;;  %v1240_v58 = vpop.f32.mrf.mxu1 }
 0x285   : > { %v1192_v62 = vadd.f32 %v1191_v52, %v8071_v61  ;;  %v1241_v63 = vadd.f32 %v1240_v58, %v8077_v3 }
 0x287   : > { %v1311_v31 = vpack.c.bf16 %v1192_v62, %v1190_v59  ;;  %v1319_v0 = vpack.c.bf16 %v1241_v63, %v1239_v60 }
 0x289   : > { %6616 = vxpose.binary.xlu2.c.b16.cont [5/16] %v1319_v0, %v1311_v31, 128 }
 0x28c   : > { %v1194_v2 = vpop.f32.mrf.mxu0  ;;  %v1243_v4 = vpop.f32.mrf.mxu1 }
 0x28d   : > { %v1195_v41 = vadd.f32 %v1194_v2, %v8071_v61  ;;  %v1244_v9 = vadd.f32 %v1243_v4, %v8077_v3 }
 0x294   : > { %v1196_v8 = vpop.f32.mrf.mxu0  ;;  %v1245_v10 = vpop.f32.mrf.mxu1 }
 0x295   : > { %v1197_v12 = vadd.f32 %v1196_v8, %v8071_v61  ;;  %v1246_v45 = vadd.f32 %v1245_v10, %v8077_v3 }
 0x297   : > { %v1312_v14 = vpack.c.bf16 %v1197_v12, %v1195_v41  ;;  %v1320_v1 = vpack.c.bf16 %v1246_v45, %v1244_v9 }
 0x299   : > { %6617 = vxpose.binary.xlu2.c.b16.cont [6/16] %v1320_v1, %v1312_v14, 128  ;;  %v1736_v1 = vlaneseq }
 0x29c   : > { %v1199_v48 = vpop.f32.mrf.mxu0  ;;  %v1248_v33 = vpop.f32.mrf.mxu1 }
 0x29d   : > { %v1200_v18 = vadd.f32 %v1199_v48, %v8071_v61  ;;  %v1249_v44 = vadd.f32 %v1248_v33, %v8077_v3  ;;  %v8192_v33 = vshrl.u32 %v1736_v1, 7 }
 0x2a4   : > { %v1201_v28 = vpop.f32.mrf.mxu0  ;;  %v1250_v24 = vpop.f32.mrf.mxu1 }
 0x2a5   : > { %v1202_v43 = vadd.f32 %v1201_v28, %v8071_v61  ;;  %v1251_v19 = vadd.f32 %v1250_v24, %v8077_v3  ;;  %v8194_v28 = vand.u32 127, %v1736_v1  ;;  %v8386_v1 = vadd.s32 104, %v8192_v33 }
 0x2a7   : > { %v1313_v16 = vpack.c.bf16 %v1202_v43, %v1200_v18  ;;  %v1321_v20 = vpack.c.bf16 %v1251_v19, %v1249_v44  ;;  %vm1755_vm2 = vcmp.ge.s32.totalorder %v8192_v33, %v8194_v28  ;;  %v8207_v43 = vadd.s32 8, %v8192_v33 }
 0x2a8   : > { %vm1768_vm15 = vcmp.ge.s32.totalorder %v8386_v1, %v8194_v28 }
 0x2a9   : > { %6618 = vxpose.binary.xlu2.c.b16.cont [7/16] %v1321_v20, %v1313_v16, 128  ;;  %vm1756_vm3 = vcmp.ge.s32.totalorder %v8207_v43, %v8194_v28  ;;  %v8218_v20 = vadd.s32 16, %v8192_v33 }
 0x2ab   : > { %vm1757_vm4 = vcmp.ge.s32.totalorder %v8218_v20, %v8194_v28 }
 0x2f6   : > { %v1204_v49 = vpop.f32.mrf.mxu0  ;;  %v1253_v36 = vpop.f32.mrf.mxu1 }
 0x2f7   : > { %v1205_v23 = vadd.f32 %v1204_v49, %v8071_v61  ;;  %v1254_v27 = vadd.f32 %v1253_v36, %v8077_v3 }
 0x2fe   : > { %v1206_v17 = vpop.f32.mrf.mxu0  ;;  %v1255_v26 = vpop.f32.mrf.mxu1 }
 0x2ff   : > { %v1207_v7 = vadd.f32 %v1206_v17, %v8071_v61  ;;  %v1256_v29 = vadd.f32 %v1255_v26, %v8077_v3  ;;  %v8232_v26 = vadd.s32 24, %v8192_v33 }
 0x301   : > { %v1314_v30 = vpack.c.bf16 %v1207_v7, %v1205_v23  ;;  %v1322_v35 = vpack.c.bf16 %v1256_v29, %v1254_v27  ;;  %vm1758_vm5 = vcmp.ge.s32.totalorder %v8232_v26, %v8194_v28  ;;  %v8243_v29 = vadd.s32 32, %v8192_v33 }
 0x303   : > { %6619 = vxpose.binary.xlu2.c.b16.end [8/16] %v1322_v35, %v1314_v30, 128  ;;  %vm1759_vm6 = vcmp.ge.s32.totalorder %v8243_v29, %v8194_v28 }
 0x334   : > { %v6620_v34 = vpop.trf.xlu2 }
 0x33c   : > { %v6621_v37 = vpop.trf.xlu2 }
 0x344   : > { %v6622_v38 = vpop.trf.xlu2 }
 0x34c   : > { %v6623_v32 = vpop.trf.xlu2 }
 0x34d   : > { %1474 = vmatpush.bf16.msra.mxu3 %v6623_v32 }
 0x351   : > { %1475 = vmatpush.bf16.msra.mxu3 %v6621_v37  ;;  %v8256_v37 = vadd.s32 40, %v8192_v33 }
 0x353   : > { %vm1760_vm7 = vcmp.ge.s32.totalorder %v8256_v37, %v8194_v28 }
 0x354   : > { %v6624_v39 = vpop.trf.xlu2 }
 0x35c   : > { %v6625_v40 = vpop.trf.xlu2 }
 0x364   : > { %v6626_v50 = vpop.trf.xlu2 }
 0x36c   : > { %v6627_v53 = vpop.trf.xlu2 }
 0x36d   : > { %1547 = vmatpush.bf16.msrb.mxu3 %v6627_v53 }
 0x371   : > { %1548 = vmatpush.bf16.msrb.mxu3 %v6625_v40 }
 0x374   : > { %v6628_v5 = vpop.trf.xlu2 }
 0x375   : > { %6636 = vxpose.binary.xlu1.c.b16.start [1/4] (short) %v6624_v39, %v6628_v5, 128  ;;  %v8267_v39 = vadd.s32 48, %v8192_v33  ;;  %v8279_v5 = vadd.s32 56, %v8192_v33 }
 0x377   : > { %vm1761_vm8 = vcmp.ge.s32.totalorder %v8267_v39, %v8194_v28  ;;  %vm1762_vm9 = vcmp.ge.s32.totalorder %v8279_v5, %v8194_v28 }
 0x37c   : > { %v6629_v61 = vpop.trf.xlu2 }
 0x384   : > { %v6630_v51 = vpop.trf.xlu2 }
 0x385   : > { %6637 = vxpose.binary.xlu1.c.b16.end [2/4] (short) %v6626_v50, %v6630_v51, 128 }
 0x38c   : > { %v6631_v3 = vpop.trf.xlu2 }
 0x38d   : > { %1620 = vmatpush.bf16.msrb.mxu0 %v6631_v3 }
 0x391   : > { %1621 = vmatpush.bf16.msrb.mxu0 %v6629_v61 }
 0x394   : > { %v6632_v54 = vpop.trf.xlu2 }
 0x395   : > { %6654 = vxpose.binary.xlu0.c.b16.start [1/4] (short) %v6632_v54, %v6620_v34, 128 }
 0x39c   : > { %v6633_v6 = vpop.trf.xlu2 }
 0x3a4   : > { %v6634_v55 = vpop.trf.xlu2 }
 0x3a5   : > { %6655 = vxpose.binary.xlu0.c.b16.end [2/4] (short) %v6634_v55, %v6622_v38, 128  ;;  %v8297_v55 = vadd.s32 64, %v8192_v33 }
 0x3a7   : > { %vm1763_vm10 = vcmp.ge.s32.totalorder %v8297_v55, %v8194_v28 }
 0x3ac   : > { %v6635_v46 = vpop.trf.xlu2 }
 0x3ad   : > { %1693 = vmatpush.bf16.msrb.mxu1 %v6635_v46 }
 0x3b1   : > { %1694 = vmatpush.bf16.msrb.mxu1 %v6633_v6 }
 0x421   : > { %v6638_v21 = vpop.trf.xlu1 }
 0x422   : > { %6028 = vmatmul.msk.bf16.vlgmr.msrb.gmra.mxu0 %vm1443_vm1, %v6638_v21 }
 0x429   : > { %v6639_v11 = vpop.trf.xlu1 }
 0x431   : > { %v6640_v42 = vpop.trf.xlu1 }
 0x432   : > { %6029 = vmatmul.msk.bf16.gmra.mxu0 %vm1443_vm1, %v6640_v42 }
 0x439   : > { %v6641_v52 = vpop.trf.xlu1 }
 0x441   : > { %v6656_v56 = vpop.trf.xlu0  ;;  %v6642_v59 = vpop.trf.xlu1 }
 0x442   : > { %6012 = vmatmul.msk.bf16.vlgmr.msra.gmra.mxu3 %vm1443_vm1, %v6656_v56  ;;  %6030 = vmatmul.msk.bf16.gmra.mxu0 %vm1443_vm1, %v6642_v59 }
 0x449   : > { %v6657_v15 = vpop.trf.xlu0  ;;  %v6643_v62 = vpop.trf.xlu1 }
 0x44a   : > { %6036 = vmatmul.msk.bf16.vlgmr.msrb.gmra.mxu1 %vm1443_vm1, %v6657_v15 }
 0x451   : > { %v6658_v22 = vpop.trf.xlu0  ;;  %v6644_v31 = vpop.trf.xlu1 }
 0x452   : > { %6013 = vmatmul.msk.bf16.gmra.mxu3 %vm1443_vm1, %v6658_v22  ;;  %6031 = vmatmul.msk.bf16.gmra.mxu0 %vm1443_vm1, %v6644_v31 }
 0x459   : > { %v6659_v47 = vpop.trf.xlu0  ;;  %v6645_v2 = vpop.trf.xlu1 }
 0x45a   : > { %6037 = vmatmul.msk.bf16.gmra.mxu1 %vm1443_vm1, %v6659_v47  ;;  %v8316_v47 = vadd.s32 72, %v8192_v33 }
 0x45c   : > { %vm1764_vm11 = vcmp.ge.s32.totalorder %v8316_v47, %v8194_v28 }
 0x461   : > { %v6660_v25 = vpop.trf.xlu0  ;;  %v6646_v8 = vpop.trf.xlu1 }
 0x462   : > { %6014 = vmatmul.msk.bf16.gmra.mxu3 %vm1443_vm1, %v6660_v25  ;;  %6032 = vmatmul.msk.bf16.gmra.mxu0 %vm1443_vm1, %v6646_v8 }
 0x469   : > { %v6661_v57 = vpop.trf.xlu0  ;;  %v8184_v41 = vpop.trf.xlu1 }
 0x46a   : > { %6038 = vmatmul.msk.bf16.gmra.mxu1 %vm1443_vm1, %v6661_v57 }
 0x471   : > { %v6662_v58 = vpop.trf.xlu0  ;;  %v6648_v12 = vpop.trf.xlu1 }
 0x472   : > { %6015 = vmatmul.msk.bf16.gmra.mxu3 %vm1443_vm1, %v6662_v58  ;;  %6033 = vmatmul.msk.bf16.gmra.mxu0 %vm1443_vm1, %v6648_v12  ;;  %v8333_v58 = vadd.s32 80, %v8192_v33 }
 0x474   : > { %vm1765_vm12 = vcmp.ge.s32.totalorder %v8333_v58, %v8194_v28 }
 0x479   : > { %v6663_v60 = vpop.trf.xlu0  ;;  %v8190_v48 = vpop.trf.xlu1 }
 0x47a   : > { %6039 = vmatmul.msk.bf16.gmra.mxu1 %vm1443_vm1, %v6663_v60 }
 0x481   : > { %v6664_v63 = vpop.trf.xlu0  ;;  %v6650_v18 = vpop.trf.xlu1 }
 0x482   : > { %6016 = vmatmul.msk.bf16.gmra.mxu3 %vm1443_vm1, %v6664_v63  ;;  %6034 = vmatmul.msk.bf16.gmra.mxu0 %vm1443_vm1, %v6650_v18 }
 0x489   : > { %v6665_v0 = vpop.trf.xlu0  ;;  %v8228_v17 = vpop.trf.xlu1 }
 0x48a   : > { %6040 = vmatmul.msk.bf16.gmra.mxu1 %vm1443_vm1, %v6665_v0  ;;  %v8352_v0 = vadd.s32 88, %v8192_v33 }
 0x48c   : > { %vm1766_vm13 = vcmp.ge.s32.totalorder %v8352_v0, %v8194_v28 }
 0x491   : > { %v6666_v4 = vpop.trf.xlu0  ;;  %v6652_v7 = vpop.trf.xlu1 }
 0x492   : > { %6017 = vmatmul.msk.bf16.gmra.mxu3 %vm1443_vm1, %v6666_v4  ;;  %6035 = vmatmul.msk.bf16.gmra.mxu0 %vm1443_vm1, %v6652_v7 }
 0x499   : > { %v6667_v10 = vpop.trf.xlu0 }
 0x49a   : > { %6041 = vmatmul.msk.bf16.gmra.mxu1 %vm1443_vm1, %v6667_v10 }
 0x49f   : > { %v1623_v35 = vpop.f32.mrf.mxu0 }
 0x4a0   : > { %v8287_v3 = vsel %vm1755_vm2, %v1623_v35, -1e+30 }
 0x4a1   : > { %v6668_v9 = vpop.trf.xlu0  ;;  %10838 = vst [vmem:[#allocation34_spill] sm:$0xff] %v8287_v3 }
 0x4a2   : > { %6018 = vmatmul.msk.bf16.gmra.mxu3 %vm1443_vm1, %v6668_v9 }
 0x4a7   : > { %v1625_v40 = vpop.f32.mrf.mxu0 }
 0x4a8   : > { %v8306_v22 = vsel %vm1756_vm3, %v1625_v40, -1e+30 }
 0x4a9   : > { %v6669_v45 = vpop.trf.xlu0  ;;  %10839 = vst [vmem:[#allocation35_spill] sm:$0xff] %v8306_v22 }
 0x4aa   : > { %6042 = vmatmul.msk.bf16.gmra.mxu1 %vm1443_vm1, %v6669_v45 }
 0x4af   : > { %v1628_v51 = vpop.f32.mrf.mxu0 }
 0x4b0   : > { %v8323_v25 = vsel %vm1757_vm4, %v1628_v51, -1e+30 }
 0x4b1   : > { %v6670_v14 = vpop.trf.xlu0 }
 0x4b2   : > { %6019 = vmatmul.msk.bf16.gmra.mxu3 %vm1443_vm1, %v6670_v14  ;;  %v8383_v14 = vadd.s32 96, %v8192_v33 }
 0x4b4   : > { %vm1767_vm14 = vcmp.ge.s32.totalorder %v8383_v14, %v8194_v28 }
 0x4b7   : > { %v1630_v56 = vpop.f32.mrf.mxu0 }
 0x4b8   : > { %v8359_v8 = vsel %vm1758_vm5, %v1630_v56, -1e+30 }
 0x4b9   : > { %v6671_v61 = vpop.trf.xlu0  ;;  %10841 = vst [vmem:[#allocation37_spill] sm:$0xff] %v8359_v8 }
 0x4ba   : > { %6043 = vmatmul.msk.bf16.gmra.mxu1 %vm1443_vm1, %v6671_v61 }
 0x4bf   : > { %v1633_v57 = vpop.f32.mrf.mxu0 }
 0x4c0   : > { %v8373_v12 = vsel %vm1759_vm6, %v1633_v57, -1e+30 }
 0x4c2   : > { %6020 = vmatmul.msk.bf16.vlgmr.msrb.gmra.mxu3 %vm1443_vm1, %v6639_v11 }
 0x4c5   : > { %v1477_v24 = vpop.f32.mrf.mxu3 }
 0x4c6   : > { %v8202_v44 = vsel %vm1755_vm2, %v1477_v24, -1e+30 }
 0x4c7   : > { %10832 = vst [vmem:[#allocation28_spill] sm:$0xff] %v8202_v44  ;;  %1867 = vmax.xlane.f32.xlu1 %v8202_v44  ;;  %v1696_v46 = vpop.f32.mrf.mxu1  ;;  %v1635_v31 = vpop.f32.mrf.mxu0 }
 0x4c8   : > { %v8378_v45 = vsel %vm1755_vm2, %v1696_v46, -1e+30 }
 0x4c9   : > { %10842 = vst [vmem:[#allocation38_spill] sm:$0xff] %v8378_v45 }
 0x4cd   : > { %v1479_v19 = vpop.f32.mrf.mxu3 }
 0x4ce   : > { %v8214_v16 = vsel %vm1756_vm3, %v1479_v19, -1e+30 }
 0x4cf   : > { %10833 = vst [vmem:[#allocation29_spill] sm:$0xff] %v8214_v16  ;;  %1869 = vmax.xlane.f32.xlu2 %v8214_v16  ;;  %v1698_v11 = vpop.f32.mrf.mxu1 }
 0x4d0   : > { %v8347_v63 = vsel %vm1756_vm3, %v1698_v11, -1e+30 }
 0x4d1   : > { %10840 = vst [vmem:[#allocation36_spill] sm:$0xff] %v8347_v63 }
 0x4d2   : > { %6021 = vmatmul.msk.bf16.gmra.mxu3 %vm1443_vm1, %v6641_v52 }
 0x4d5   : > { %v1482_v49 = vpop.f32.mrf.mxu3 }
 0x4d6   : > { %v8226_v36 = vsel %vm1757_vm4, %v1482_v49, -1e+30 }
 0x4d7   : > { %10834 = vst [vmem:[#allocation30_spill] sm:$0xff] %v8226_v36  ;;  %1871 = vmax.xlane.f32.xlu0 %v8226_v36  ;;  %v1701_v59 = vpop.f32.mrf.mxu1 }
 0x4dd   : > { %v1484_v23 = vpop.f32.mrf.mxu3 }
 0x4de   : > { %v8239_v27 = vsel %vm1758_vm5, %v1484_v23, -1e+30  ;;  %v6653_v23 = vpop.trf.xlu1 }
 0x4df   : > { %10835 = vst [vmem:[#allocation31_spill] sm:$0xff] %v8239_v27  ;;  %1873 = vmax.xlane.f32.xlu1 %v8239_v27  ;;  %v1703_v4 = vpop.f32.mrf.mxu1 }
 0x4e2   : > { %6022 = vmatmul.msk.bf16.gmra.mxu3 %vm1443_vm1, %v6643_v62 }
 0x4e5   : > { %v1487_v30 = vpop.f32.mrf.mxu3 }
 0x4e6   : > { %v8252_v34 = vsel %vm1759_vm6, %v1487_v30, -1e+30 }
 0x4e7   : > { %10836 = vst [vmem:[#allocation32_spill] sm:$0xff] %v8252_v34  ;;  %1875 = vmax.xlane.f32.xlu2 %v8252_v34 }
 0x4ed   : > { %v1489_v38 = vpop.f32.mrf.mxu3 }
 0x4ee   : > { %v8263_v32 = vsel %vm1760_vm7, %v1489_v38, -1e+30  ;;  %v8413_v38 = vsel %vm1760_vm7, %v1635_v31, -1e+30  ;;  %v8460_v31 = vsel %vm1758_vm5, %v1703_v4, -1e+30 }
 0x4ef   : > { %10837 = vst [vmem:[#allocation33_spill] sm:$0xff] %v8263_v32  ;;  %1877 = vmax.xlane.f32.xlu0 %v8263_v32 }
 0x4f2   : > { %6023 = vmatmul.msk.bf16.gmra.mxu3 %vm1443_vm1, %v6645_v2 }
 0x4f5   : > { %v1492_v50 = vpop.f32.mrf.mxu3 }
 0x4f6   : > { %v8275_v53 = vsel %vm1761_vm8, %v1492_v50, -1e+30  ;;  %v8423_v50 = vadd.s32 120, %v8192_v33 }
 0x4f7   : > { %1879 = vmax.xlane.f32.xlu0 %v8275_v53 }
 0x4fd   : > { %v1494_v54 = vpop.f32.mrf.mxu3 }
 0x4fe   : > { %v8292_v6 = vsel %vm1762_vm9, %v1494_v54, -1e+30 }
 0x4ff   : > { %1931 = vmax.xlane.f32.xlu0 %v8287_v3  ;;  %1881 = vmax.xlane.f32.xlu1 %v8292_v6 }
 0x502   : > { %6024 = vmatmul.msk.bf16.gmra.mxu3 %vm1443_vm1, %v8184_v41  ;;  %v1638_v41 = vpop.f32.mrf.mxu0 }
 0x503   : > { %v8435_v46 = vsel %vm1761_vm8, %v1638_v41, -1e+30 }
 0x505   : > { %v1497_v15 = vpop.f32.mrf.mxu3 }
 0x506   : > { %v8311_v21 = vsel %vm1763_vm10, %v1497_v15, -1e+30 }
 0x507   : > { %1933 = vmax.xlane.f32.xlu1 %v8306_v22  ;;  %1883 = vmax.xlane.f32.xlu0 %v8311_v21 }
 0x50a   : > { %v1640_v24 = vpop.f32.mrf.mxu0 }
 0x50b   : > { %v8442_v15 = vsel %vm1762_vm9, %v1640_v24, -1e+30 }
 0x50d   : > { %v1499_v42 = vpop.f32.mrf.mxu3 }
 0x50e   : > { %v8328_v52 = vsel %vm1764_vm11, %v1499_v42, -1e+30 }
 0x50f   : > { %1935 = vmax.xlane.f32.xlu0 %v8323_v25  ;;  %1885 = vmax.xlane.f32.xlu1 %v8328_v52 }
 0x512   : > { %6025 = vmatmul.msk.bf16.gmra.mxu3 %vm1443_vm1, %v8190_v48  ;;  %v1706_v48 = vpop.f32.mrf.mxu1  ;;  %v1643_v35 = vpop.f32.mrf.mxu0 }
 0x513   : > { %v8478_v4 = vsel %vm1763_vm10, %v1643_v35, -1e+30 }
 0x515   : > { %v1502_v60 = vpop.f32.mrf.mxu3 }
 0x516   : > { %v8342_v62 = vsel %vm1765_vm12, %v1502_v60, -1e+30  ;;  %v8453_v60 = vsel %vm1757_vm4, %v1701_v59, -1e+30 }
 0x517   : > { %1887 = vmax.xlane.f32.xlu1 %v8342_v62  ;;  %1965 = vmax.xlane.f32.xlu0 %v8347_v63 }
 0x51a   : > { %v1708_v7 = vpop.f32.mrf.mxu1  ;;  %v1645_v56 = vpop.f32.mrf.mxu0 }
 0x51b   : > { %v8466_v41 = vsel %vm1764_vm11, %v1645_v56, -1e+30 }
 0x51d   : > { %v1504_v2 = vpop.f32.mrf.mxu3 }
 0x51e   : > { %v8364_v10 = vsel %vm1766_vm13, %v1504_v2, -1e+30 }
 0x51f   : > { %1937 = vmax.xlane.f32.xlu1 %v8359_v8  ;;  %1889 = vmax.xlane.f32.xlu2 %v8364_v10 }
 0x522   : > { %6026 = vmatmul.msk.bf16.gmra.mxu3 %vm1443_vm1, %v8228_v17  ;;  %v8405_v17 = vadd.s32 112, %v8192_v33  ;;  %v1711_v61 = vpop.f32.mrf.mxu1  ;;  %v1648_v2 = vpop.f32.mrf.mxu0 }
 0x524   : > { %vm1769_vm0 = vcmp.ge.s32.totalorder %v8405_v17, %v8194_v28 }
 0x525   : > { %v1507_v9 = vpop.f32.mrf.mxu3 }
 0x526   : > { %v8395_v19 = vsel %vm1767_vm14, %v1507_v9, -1e+30 }
 0x527   : > { %1939 = vmax.xlane.f32.xlu1 %v8373_v12  ;;  %1963 = vmax.xlane.f32.xlu2 %v8378_v45 }
 0x52a   : > { %v1713_v42 = vpop.f32.mrf.mxu1  ;;  %v1650_v24 = vpop.f32.mrf.mxu0 }
 0x52b   : > { %v8484_v43 = vsel %vm1766_vm13, %v1650_v24, -1e+30 }
 0x52d   : > { %v1509_v18 = vpop.f32.mrf.mxu3 }
 0x52e   : > { %v8400_v49 = vsel %vm1768_vm15, %v1509_v18, -1e+30 }
 0x52f   : > { %1891 = vmax.xlane.f32.xlu2 %v8395_v19  ;;  %1893 = vmax.xlane.f32.xlu0 %v8400_v49 }
 0x532   : > { %6027 = vmatmul.msk.bf16.gmra.mxu3 %vm1443_vm1, %v6653_v23  ;;  %vm1770_vm1 = vcmp.ge.s32.totalorder %v8423_v50, %v8194_v28  ;;  %v1716_v9 = vpop.f32.mrf.mxu1  ;;  %v8489_v23 = vsel %vm1760_vm7, %v1708_v7, -1e+30  ;;  %v8504_v7 = vsel %vm1765_vm12, %v1648_v2, -1e+30 }
 0x535   : > { %v1512_v30 = vpop.f32.mrf.mxu3 }
 0x536   : > { %v8418_v40 = vsel %vm1769_vm0, %v1512_v30, -1e+30  ;;  %v8495_v30 = vsel %vm1759_vm6, %v1706_v48, -1e+30 }
 0x537   : > { %1941 = vmax.xlane.f32.xlu2 %v8413_v38  ;;  %1895 = vmax.xlane.f32.xlu0 %v8418_v40 }
 0x53a   : > { %v1718_v35 = vpop.f32.mrf.mxu1 }
 0x53b   : > { %v8516_v48 = vsel %vm1764_vm11, %v1718_v35, -1e+30 }
 0x53d   : > { %v1514_v51 = vpop.f32.mrf.mxu3 }
 0x53e   : > { %v8430_v54 = vsel %vm1770_vm1, %v1514_v51, -1e+30 }
 0x53f   : > { %1897 = vmax.xlane.f32.xlu1 %v8430_v54  ;;  %1943 = vmax.xlane.f32.xlu2 %v8435_v46 }
 0x540   : > { %1945 = vmax.xlane.f32.xlu0 %v8442_v15 }
 0x542   : > { %v1721_v24 = vpop.f32.mrf.mxu1 }
 0x543   : > { %v8538_v35 = vsel %vm1765_vm12, %v1721_v24, -1e+30 }
 0x545   : > { %v1550_v11 = vpop.f32.mrf.mxu3 }
 0x546   : > { %v8448_v57 = vsel %vm1755_vm2, %v1550_v11, -1e+30  ;;  %v8509_v11 = vsel %vm1762_vm9, %v1713_v42, -1e+30  ;;  %v8526_v42 = vsel %vm1761_vm8, %v1711_v61, -1e+30 }
 0x547   : > { %10843 = vst [vmem:[#allocation39_spill] sm:$0xff] %v8448_v57  ;;  %1899 = vmax.xlane.f32.xlu1 %v8448_v57  ;;  %1967 = vmax.xlane.f32.xlu2 %v8453_v60 }
 0x548   : > { %1969 = vmax.xlane.f32.xlu0 %v8460_v31 }
 0x54a   : > { %v8499_v51 = vpop.xlane.xlu0 %1871  ;;  %v1723_v16 = vpop.f32.mrf.mxu1 }
 0x54b   : > { %10845 = vst [vmem:[#allocation41_spill] sm:$0xff] %v8499_v51 }
 0x54d   : > { %v1552_v33 = vpop.f32.mrf.mxu3 }
 0x54e   : > { %v8471_v59 = vsel %vm1756_vm3, %v1552_v33, -1e+30  ;;  %v8519_v33 = vpop.xlane.xlu1 %1867 }
 0x54f   : > { %10844 = vst [vmem:[#allocation40_spill] sm:$0xff] %v8471_v59  ;;  %1949 = vmax.xlane.f32.xlu1 %v8466_v41  ;;  %1901 = vmax.xlane.f32.xlu2 %v8471_v59 }
 0x550   : > { %1947 = vmax.xlane.f32.xlu0 %v8478_v4  ;;  %10846 = vst [vmem:[#allocation42_spill] sm:$0xff] %v8519_v33  ;;  %v1653_v33 = vpop.f32.mrf.mxu0 }
 0x551   : > { %v8564_v20 = vsel %vm1767_vm14, %v1653_v33, -1e+30 }
 0x552   : > { %v1726_v45 = vpop.f32.mrf.mxu1 }
 0x555   : > { %v1555_v18 = vpop.f32.mrf.mxu3 }
 0x556   : > { %v8541_v36 = vpop.xlane.xlu1 %1873  ;;  %v8548_v26 = vsel %vm1757_vm4, %v1555_v18, -1e+30 }
 0x557   : > { %1953 = vmax.xlane.f32.xlu2 %v8484_v43  ;;  %1973 = vmax.xlane.f32.xlu1 %v8489_v23  ;;  %10849 = vst [vmem:[#allocation45_spill] sm:$0xff] %v8541_v36 }
 0x558   : > { %1971 = vmax.xlane.f32.xlu0 %v8495_v30  ;;  %10850 = vst [vmem:[#allocation46_spill] sm:$0xff] %v8548_v26  ;;  %v1655_v57 = vpop.f32.mrf.mxu0 }
 0x55d   : > { %v1557_v56 = vpop.f32.mrf.mxu3 }
 0x55e   : > { %v8531_v44 = vsel %vm1758_vm5, %v1557_v56, -1e+30  ;;  %v8553_v56 = vsel %vm1763_vm10, %v1716_v9, -1e+30  ;;  %v8569_v9 = vsel %vm1768_vm15, %v1655_v57, -1e+30 }
 0x55f   : > { %1951 = vmax.xlane.f32.xlu1 %v8504_v7  ;;  %1977 = vmax.xlane.f32.xlu2 %v8509_v11  ;;  %10848 = vst [vmem:[#allocation44_spill] sm:$0xff] %v8531_v44 }
 0x560   : > { %1981 = vmax.xlane.f32.xlu0 %v8516_v48  ;;  %v1658_v37 = vpop.f32.mrf.mxu0 }
 0x562   : > { %v8521_v2 = vpop.xlane.xlu0 %1877 }
 0x563   : > { %10847 = vst [vmem:[#allocation43_spill] sm:$0xff] %v8521_v2 }
 0x565   : > { %v1560_v13 = vpop.f32.mrf.mxu3 }
 0x566   : > { %v8578_v59 = vsel %vm1759_vm6, %v1560_v13, -1e+30  ;;  %v8594_v13 = vpop.xlane.xlu2 %1869 }
 0x567   : > { %1975 = vmax.xlane.f32.xlu1 %v8526_v42  ;;  %1905 = vmax.xlane.f32.xlu2 %v8531_v44  ;;  %10853 = vst [vmem:[#allocation49_spill] sm:$0xff] %v8578_v59 }
 0x568   : > { %1983 = vmax.xlane.f32.xlu0 %v8538_v35  ;;  %10854 = vst [vmem:[#allocation50_spill] sm:$0xff] %v8594_v13  ;;  %v1660_v2 = vpop.f32.mrf.mxu0 }
 0x569   : > { %v8647_v55 = vsel %vm1770_vm1, %v1660_v2, -1e+30 }
 0x56a   : > { %v8543_v61 = vpop.xlane.xlu0 %1879 }
 0x56d   : > { %v1562_v51 = vpop.f32.mrf.mxu3 }
 0x56e   : > { %v8583_v33 = vsel %vm1760_vm7, %v1562_v51, -1e+30 }
 0x56f   : > { %1903 = vmax.xlane.f32.xlu1 %v8548_v26  ;;  %1979 = vmax.xlane.f32.xlu2 %v8553_v56 }
 0x572   : > { %v8557_v24 = vpop.xlane.xlu1 %1881  ;;  %v8559_v34 = vpop.xlane.xlu0 %1931 }
 0x573   : > { %10851 = vst [vmem:[#allocation47_spill] sm:$0xff] %v8559_v34 }
 0x575   : > { %v1565_v44 = vpop.f32.mrf.mxu3 }
 0x577   : > { %1955 = vmax.xlane.f32.xlu1 %v8564_v20  ;;  %1957 = vmax.xlane.f32.xlu2 %v8569_v9 }
 0x57a   : > { %v8573_v18 = vpop.xlane.xlu1 %1933  ;;  %v1884_v27 = vpop.xlane.xlu0 %1883 }
 0x57b   : > { %10852 = vst [vmem:[#allocation48_spill] sm:$0xff] %v8573_v18  ;;  %v2003_v22 = vsub.f32 %v8311_v21, %v1884_v27  ;;  %v8606_v18 = vsel %vm1766_vm13, %v1723_v16, -1e+30  ;;  %v8613_v27 = vsel %vm1767_vm14, %v1726_v45, -1e+30  ;;  %v8616_v21 = vpop.xlane.xlu2 %1875 }
 0x57c   : > { %10855 = vst [vmem:[#allocation51_spill] sm:$0xff] %v8616_v21  ;;  %v8623_v16 = vsel %vm1761_vm8, %v1565_v44, -1e+30 }
 0x57d   : > { %v1567_v36 = vpop.f32.mrf.mxu3  ;;  %v2075_v51 = vmul.f32 1.442695, %v2003_v22  ;;  %v1728_v22 = vpop.f32.mrf.mxu1 }
 0x57e   : > { %v8588_v57 = vsel %vm1762_vm9, %v1567_v36, -1e+30  ;;  %v8601_v36 = vsel %vm1769_vm0, %v1658_v37, -1e+30 }
 0x57f   : > { %1907 = vmax.xlane.f32.xlu1 %v8578_v59  ;;  %1909 = vmax.xlane.f32.xlu2 %v8583_v33  ;;  %6712 = vpow2.f32 %v2075_v51 }
 0x580   : > { %1913 = vmax.xlane.f32.xlu0 %v8588_v57 }
 0x582   : > { %v8596_v29 = vpop.xlane.xlu1 %1885  ;;  %v8633_v51 = vpop.xlane.xlu0 %1935 }
 0x585   : > { %v1570_v5 = vpop.f32.mrf.mxu3  ;;  %v8618_v13 = vpop.eup %6712 }
 0x586   : > { %10856 = vst [vmem:[#allocation52_spill] sm:$0xff] %v8618_v13  ;;  %v8631_v45 = vsel %vm1763_vm10, %v1570_v5, -1e+30  ;;  %v1731_v21 = vpop.f32.mrf.mxu1  ;;  %v8652_v5 = vsel %vm1768_vm15, %v1728_v22, -1e+30 }
 0x587   : > { %1959 = vmax.xlane.f32.xlu2 %v8601_v36  ;;  %1985 = vmax.xlane.f32.xlu1 %v8606_v18 }
 0x588   : > { %1987 = vmax.xlane.f32.xlu0 %v8613_v27 }
 0x58a   : > { %v1888_v37 = vpop.xlane.xlu1 %1887 }
 0x58b   : > { %v2005_v8 = vsub.f32 %v8342_v62, %v1888_v37 }
 0x58d   : > { %v1572_v32 = vpop.f32.mrf.mxu3  ;;  %v2079_v62 = vmul.f32 1.442695, %v2005_v8 }
 0x58e   : > { %v8668_v22 = vsel %vm1764_vm11, %v1572_v32, -1e+30 }
 0x58f   : > { %1911 = vmax.xlane.f32.xlu2 %v8623_v16  ;;  %2203 = vadd.xlane.f32.xlu1 %v8618_v13  ;;  %v8642_v13 = vsel %vm1769_vm0, %v1731_v21, -1e+30  ;;  %6714 = vpow2.f32 %v2079_v62 }
 0x590   : > { %1915 = vmax.xlane.f32.xlu0 %v8631_v45 }
 0x592   : > { %v8636_v39 = vpop.xlane.xlu1 %1937  ;;  %v1890_v44 = vpop.xlane.xlu2 %1889 }
 0x593   : > { %10857 = vst [vmem:[#allocation53_spill] sm:$0xff] %v8636_v39  ;;  %v2006_v37 = vsub.f32 %v8364_v10, %v1890_v44  ;;  %v8657_v10 = vpop.xlane.xlu0 %1965 }
 0x594   : > { %10858 = vst [vmem:[#allocation54_spill] sm:$0xff] %v8657_v10 }
 0x595   : > { %v2081_v26 = vmul.f32 1.442695, %v2006_v37  ;;  %v1575_v8 = vpop.f32.mrf.mxu3  ;;  %v8661_v44 = vpop.eup %6714 }
 0x596   : > { %10860 = vst [vmem:[#allocation56_spill] sm:$0xff] %v8661_v44  ;;  %v8683_v47 = vsel %vm1765_vm12, %v1575_v8, -1e+30 }
 0x597   : > { %1961 = vmax.xlane.f32.xlu2 %v8647_v55  ;;  %1989 = vmax.xlane.f32.xlu1 %v8652_v5  ;;  %6716 = vpow2.f32 %v2081_v26 }
 0x598   : > { %1991 = vmax.xlane.f32.xlu0 %v8642_v13 }
 0x59a   : > { %v8659_v21 = vpop.xlane.xlu2 %1963  ;;  %v1940_v2 = vpop.xlane.xlu1 %1939 }
 0x59b   : > { %10859 = vst [vmem:[#allocation55_spill] sm:$0xff] %v8659_v21  ;;  %v2031_v62 = vsub.f32 %v8373_v12, %v1940_v2 }
 0x59d   : > { %v8663_v37 = vpop.eup %6716  ;;  %v2131_v39 = vmul.f32 1.442695, %v2031_v62  ;;  %v1577_v59 = vpop.f32.mrf.mxu3 }
 0x59e   : > { %10861 = vst [vmem:[#allocation57_spill] sm:$0xff] %v8663_v37  ;;  %v8678_v32 = vsel %vm1766_vm13, %v1577_v59, -1e+30 }
 0x59f   : > { %2207 = vadd.xlane.f32.xlu2 %v8661_v44  ;;  %1917 = vmax.xlane.f32.xlu1 %v8668_v22  ;;  %6718 = vpow2.f32 %v2131_v39 }
 0x5a0   : > { %2209 = vadd.xlane.f32.xlu0 %v8663_v37 }
 0x5a2   : > { %v1894_v26 = vpop.xlane.xlu0 %1893  ;;  %v1892_v21 = vpop.xlane.xlu2 %1891 }
 0x5a3   : > { %v2007_v3 = vsub.f32 %v8395_v19, %v1892_v21  ;;  %v2008_v12 = vsub.f32 %v8400_v49, %v1894_v26  ;;  %v1733_v19 = vpop.f32.mrf.mxu1 }
 0x5a4   : > { %v8694_v58 = vsel %vm1770_vm1, %v1733_v19, -1e+30 }
 0x5a5   : > { %v2083_v34 = vmul.f32 1.442695, %v2007_v3  ;;  %v8689_v59 = vpop.eup %6718  ;;  %v2085_v2 = vmul.f32 1.442695, %v2008_v12  ;;  %v1580_v49 = vpop.f32.mrf.mxu3 }
 0x5a7   : > { %1921 = vmax.xlane.f32.xlu2 %v8678_v32  ;;  %1919 = vmax.xlane.f32.xlu1 %v8683_v47  ;;  %6720 = vpow2.f32 %v2083_v34 }
 0x5aa   : > { %v1896_v3 = vpop.xlane.xlu0 %1895  ;;  %v1942_v21 = vpop.xlane.xlu2 %1941 }
 0x5ab   : > { %v2032_v0 = vsub.f32 %v8413_v38, %v1942_v21  ;;  %v2009_v34 = vsub.f32 %v8418_v40, %v1896_v3  ;;  %v8708_v40 = vsel %vm1767_vm14, %v1580_v49, -1e+30 }
 0x5ad   : > { %v2133_v62 = vmul.f32 1.442695, %v2032_v0  ;;  %v8696_v39 = vpop.eup %6720  ;;  %v2087_v26 = vmul.f32 1.442695, %v2009_v34  ;;  %v1582_v34 = vpop.f32.mrf.mxu3 }
 0x5ae   : > { %2211 = vadd.xlane.f32.xlu0 %v8696_v39 }
 0x5af   : > { %2259 = vadd.xlane.f32.xlu2 %v8689_v59  ;;  %6722 = vpow2.f32 %v2133_v62  ;;  %1993 = vmax.xlane.f32.xlu1 %v8694_v58 }
 0x5b0   : > { %6724 = vpow2.f32 %v2085_v2 }
 0x5b1   : > { %6726 = vpow2.f32 %v2087_v26 }
 0x5b2   : > { %v1898_v38 = vpop.xlane.xlu1 %1897  ;;  %v1944_v8 = vpop.xlane.xlu2 %1943 }
 0x5b3   : > { %v1946_v12 = vpop.xlane.xlu0 %1945  ;;  %v2033_v2 = vsub.f32 %v8435_v46, %v1944_v8  ;;  %v2010_v46 = vsub.f32 %v8430_v54, %v1898_v38 }
 0x5b4   : > { %v2034_v19 = vsub.f32 %v8442_v15, %v1946_v12 }
 0x5b5   : > { %v8703_v21 = vpop.eup %6722  ;;  %v2135_v49 = vmul.f32 1.442695, %v2033_v2  ;;  %v2089_v2 = vmul.f32 1.442695, %v2010_v46 }
 0x5b6   : > { %v2137_v0 = vmul.f32 1.442695, %v2034_v19  ;;  %v8710_v3 = vpop.eup %6724  ;;  %2261 = vadd.xlane.f32.xlu0 %v8703_v21  ;;  %v8729_v19 = vsel %vm1768_vm15, %v1582_v34, -1e+30 }
 0x5b7   : > { %1923 = vmax.xlane.f32.xlu2 %v8708_v40  ;;  %2213 = vadd.xlane.f32.xlu1 %v8710_v3  ;;  %v8722_v12 = vpop.eup %6726 }
 0x5b8   : > { %6728 = vpow2.f32 %v2137_v0 }
 0x5b9   : > { %6730 = vpow2.f32 %v2135_v49 }
 0x5ba   : > { %v8716_v15 = vpop.xlane.xlu1 %1899  ;;  %v8718_v62 = vpop.xlane.xlu2 %1967  ;;  %6732 = vpow2.f32 %v2089_v2 }
 0x5bb   : > { %10862 = vst [vmem:[#allocation58_spill] sm:$0xff] %v8716_v15  ;;  %v8720_v14 = vpop.xlane.xlu0 %1969  ;;  %v1585_v15 = vpop.f32.mrf.mxu3 }
 0x5bc   : > { %v8740_v1 = vsel %vm1769_vm0, %v1585_v15, -1e+30 }
 0x5be   : > { %v8724_v26 = vpop.eup %6728  ;;  %1925 = vmax.xlane.f32.xlu0 %v8729_v19 }
 0x5bf   : > { %2215 = vadd.xlane.f32.xlu2 %v8722_v12  ;;  %2265 = vadd.xlane.f32.xlu1 %v8724_v26  ;;  %v8743_v38 = vpop.eup %6730 }
 0x5c0   : > { %v8749_v15 = vpop.eup %6732 }
 0x5c2   : > { %v1950_v8 = vpop.xlane.xlu1 %1949  ;;  %v8735_v0 = vpop.xlane.xlu2 %1901 }
 0x5c3   : > { %10863 = vst [vmem:[#allocation59_spill] sm:$0xff] %v8735_v0  ;;  %v1948_v37 = vpop.xlane.xlu0 %1947  ;;  %v2036_v2 = vsub.f32 %v8466_v41, %v1950_v8  ;;  %v1587_v10 = vpop.f32.mrf.mxu3 }
 0x5c4   : > { %v2035_v54 = vsub.f32 %v8478_v4, %v1948_v37 }
 0x5c6   : > { %v2139_v34 = vmul.f32 1.442695, %v2035_v54  ;;  %2263 = vadd.xlane.f32.xlu0 %v8743_v38 }
 0x5c7   : > { %1927 = vmax.xlane.f32.xlu2 %v8740_v1 }
 0x5c8   : > { %6734 = vpow2.f32 %v2139_v34 }
 0x5ca   : > { %v1974_v49 = vpop.xlane.xlu1 %1973  ;;  %v1954_v46 = vpop.xlane.xlu2 %1953 }
 0x5cb   : > { %v1972_v0 = vpop.xlane.xlu0 %1971  ;;  %v2048_v44 = vsub.f32 %v8489_v23, %v1974_v49 }
 0x5cc   : > { %v2047_v17 = vsub.f32 %v8495_v30, %v1972_v0  ;;  %v2141_v30 = vmul.f32 1.442695, %v2036_v2 }
 0x5cd   : > { %v2165_v63 = vmul.f32 1.442695, %v2048_v44 }
 0x5ce   : > { %v8751_v4 = vpop.eup %6734  ;;  %v2163_v37 = vmul.f32 1.442695, %v2047_v17  ;;  %2217 = vadd.xlane.f32.xlu0 %v8749_v15 }
 0x5cf   : > { %10864 = vst [vmem:[#allocation60_spill] sm:$0xff] %v8751_v4  ;;  %6736 = vpow2.f32 %v2165_v63  ;;  %2267 = vadd.xlane.f32.xlu2 %v8751_v4  ;;  %v8764_v63 = vsel %vm1770_vm1, %v1587_v10, -1e+30  ;;  %v2038_v10 = vsub.f32 %v8484_v43, %v1954_v46 }
 0x5d0   : > { %6738 = vpow2.f32 %v2163_v37 }
 0x5d2   : > { %v1952_v54 = vpop.xlane.xlu1 %1951  ;;  %v1978_v34 = vpop.xlane.xlu2 %1977 }
 0x5d3   : > { %v2037_v23 = vsub.f32 %v8504_v7, %v1952_v54  ;;  %v2050_v41 = vsub.f32 %v8509_v11, %v1978_v34  ;;  %v1982_v11 = vpop.xlane.xlu0 %1981 }
 0x5d4   : > { %v2052_v43 = vsub.f32 %v8516_v48, %v1982_v11 }
 0x5d5   : > { %v8757_v0 = vpop.eup %6736  ;;  %v2143_v44 = vmul.f32 1.442695, %v2037_v23  ;;  %v2169_v37 = vmul.f32 1.442695, %v2050_v41  ;;  %v2145_v23 = vmul.f32 1.442695, %v2038_v10 }
 0x5d6   : > { %v8759_v49 = vpop.eup %6738  ;;  %1929 = vmax.xlane.f32.xlu0 %v8764_v63  ;;  %v2173_v46 = vmul.f32 1.442695, %v2052_v43 }
 0x5d7   : > { %6740 = vpow2.f32 %v2143_v44  ;;  %2291 = vadd.xlane.f32.xlu1 %v8759_v49  ;;  %2293 = vadd.xlane.f32.xlu2 %v8757_v0 }
 0x5d8   : > { %6742 = vpow2.f32 %v2141_v30 }
 0x5da   : > { %v1976_v7 = vpop.xlane.xlu1 %1975  ;;  %v8770_v8 = vpop.xlane.xlu2 %1905 }
 0x5db   : > { %v2049_v17 = vsub.f32 %v8526_v42, %v1976_v7 }
 0x5dd   : > { %v8773_v2 = vpop.eup %6740  ;;  %v2167_v28 = vmul.f32 1.442695, %v2049_v17 }
 0x5de   : > { %10865 = vst [vmem:[#allocation61_spill] sm:$0xff] %v8773_v2  ;;  %v8775_v50 = vpop.eup %6742 }
 0x5df   : > { %10866 = vst [vmem:[#allocation62_spill] sm:$0xff] %v8775_v50  ;;  %6744 = vpow2.f32 %v2167_v28  ;;  %2271 = vadd.xlane.f32.xlu1 %v8773_v2  ;;  %2269 = vadd.xlane.f32.xlu0 %v8775_v50 }
 0x5e0   : > { %6746 = vpow2.f32 %v2169_v37  ;;  %v1984_v37 = vpop.xlane.xlu0 %1983 }
 0x5e1   : > { %6748 = vpow2.f32 %v2145_v23  ;;  %v2053_v48 = vsub.f32 %v8538_v35, %v1984_v37 }
 0x5e2   : > { %v8780_v54 = vpop.xlane.xlu1 %1903  ;;  %v1980_v34 = vpop.xlane.xlu2 %1979 }
 0x5e3   : > { %v2051_v42 = vsub.f32 %v8553_v56, %v1980_v34 }
 0x5e5   : > { %v8783_v30 = vpop.eup %6744  ;;  %v2171_v44 = vmul.f32 1.442695, %v2051_v42 }
 0x5e6   : > { %v8785_v41 = vpop.eup %6746  ;;  %2295 = vadd.xlane.f32.xlu2 %v8783_v30 }
 0x5e7   : > { %2297 = vadd.xlane.f32.xlu0 %v8785_v41  ;;  %6750 = vpow2.f32 %v2171_v44  ;;  %v8792_v10 = vpop.eup %6748 }
 0x5e8   : > { %6752 = vpow2.f32 %v2173_v46 }
 0x5ea   : > { %v1956_v7 = vpop.xlane.xlu1 %1955  ;;  %v1958_v17 = vpop.xlane.xlu2 %1957 }
 0x5eb   : > { %v2039_v28 = vsub.f32 %v8564_v20, %v1956_v7  ;;  %v2040_v56 = vsub.f32 %v8569_v9, %v1958_v17  ;;  %v2175_v9 = vmul.f32 1.442695, %v2053_v48 }
 0x5ed   : > { %v2147_v34 = vmul.f32 1.442695, %v2039_v28  ;;  %v2149_v42 = vmul.f32 1.442695, %v2040_v56  ;;  %v8794_v4 = vpop.eup %6750 }
 0x5ee   : > { %10867 = vst [vmem:[#allocation63_spill] sm:$0xff] %v8794_v4  ;;  %2273 = vadd.xlane.f32.xlu2 %v8792_v10  ;;  %2299 = vadd.xlane.f32.xlu1 %v8794_v4  ;;  %v8803_v44 = vpop.eup %6752 }
 0x5ef   : > { %6754 = vpow2.f32 %v2147_v34  ;;  %10868 = vst [vmem:[#allocation64_spill] sm:$0xff] %v8803_v44 }
 0x5f0   : > { %6756 = vpow2.f32 %v2149_v42 }
 0x5f1   : > { %6758 = vpow2.f32 %v2175_v9 }
 0x5f2   : > { %v8799_v11 = vpop.xlane.xlu1 %1907  ;;  %v8801_v20 = vpop.xlane.xlu2 %1909 }
 0x5f3   : > { %v1914_v23 = vpop.xlane.xlu0 %1913 }
 0x5f5   : > { %v8805_v43 = vpop.eup %6754 }
 0x5f6   : > { %v8807_v7 = vpop.eup %6756  ;;  %2301 = vadd.xlane.f32.xlu2 %v8803_v44  ;;  %2275 = vadd.xlane.f32.xlu0 %v8805_v43 }
 0x5f7   : > { %2277 = vadd.xlane.f32.xlu1 %v8807_v7  ;;  %v8813_v28 = vpop.eup %6758 }
 0x5fa   : > { %v1986_v35 = vpop.xlane.xlu1 %1985  ;;  %v1960_v46 = vpop.xlane.xlu2 %1959 }
 0x5fb   : > { %v1988_v17 = vpop.xlane.xlu0 %1987  ;;  %v2041_v37 = vsub.f32 %v8601_v36, %v1960_v46  ;;  %v2054_v34 = vsub.f32 %v8606_v18, %v1986_v35  ;;  %v2018_v36 = vsub.f32 %v8588_v57, %v1914_v23 }
 0x5fd   : > { %v2151_v56 = vmul.f32 1.442695, %v2041_v37  ;;  %v2177_v4 = vmul.f32 1.442695, %v2054_v34 }
 0x5fe   : > { %2303 = vadd.xlane.f32.xlu0 %v8813_v28 }
 0x5ff   : > { %6760 = vpow2.f32 %v2151_v56  ;;  %v2105_v56 = vmul.f32 1.442695, %v2018_v36 }
 0x602   : > { %v8817_v42 = vpop.xlane.xlu1 %2203  ;;  %v1912_v48 = vpop.xlane.xlu2 %1911 }
 0x603   : > { %10869 = vst [vmem:[#allocation65_spill] sm:$0xff] %v8817_v42  ;;  %v2017_v9 = vsub.f32 %v8623_v16, %v1912_v48  ;;  %v1916_v44 = vpop.xlane.xlu0 %1915 }
 0x605   : > { %v2103_v50 = vmul.f32 1.442695, %v2017_v9  ;;  %v8820_v2 = vpop.eup %6760 }
 0x606   : > { %2279 = vadd.xlane.f32.xlu1 %v8820_v2 }
 0x607   : > { %6762 = vpow2.f32 %v2103_v50 }
 0x608   : > { %6764 = vpow2.f32 %v2177_v4  ;;  %v2055_v4 = vsub.f32 %v8613_v27, %v1988_v17 }
 0x60a   : > { %v1990_v46 = vpop.xlane.xlu1 %1989  ;;  %v1962_v37 = vpop.xlane.xlu2 %1961  ;;  %v2179_v23 = vmul.f32 1.442695, %v2055_v4 }
 0x60b   : > { %v2056_v18 = vsub.f32 %v8652_v5, %v1990_v46  ;;  %v2042_v35 = vsub.f32 %v8647_v55, %v1962_v37  ;;  %v1992_v57 = vpop.xlane.xlu0 %1991  ;;  %v2019_v5 = vsub.f32 %v8631_v45, %v1916_v44 }
 0x60d   : > { %v8826_v42 = vpop.eup %6762  ;;  %v2181_v16 = vmul.f32 1.442695, %v2056_v18  ;;  %v2153_v34 = vmul.f32 1.442695, %v2042_v35  ;;  %v2107_v36 = vmul.f32 1.442695, %v2019_v5 }
 0x60e   : > { %2231 = vadd.xlane.f32.xlu0 %v8826_v42  ;;  %v8829_v48 = vpop.eup %6764 }
 0x60f   : > { %6766 = vpow2.f32 %v2181_v16  ;;  %2305 = vadd.xlane.f32.xlu1 %v8829_v48 }
 0x610   : > { %6768 = vpow2.f32 %v2105_v56 }
 0x611   : > { %6770 = vpow2.f32 %v2153_v34 }
 0x612   : > { %v1918_v55 = vpop.xlane.xlu1 %1917  ;;  %v8834_v50 = vpop.xlane.xlu2 %2207  ;;  %6772 = vpow2.f32 %v2179_v23 }
 0x613   : > { %6774 = vpow2.f32 %v2107_v36  ;;  %v2020_v27 = vsub.f32 %v8668_v22, %v1918_v55  ;;  %v8846_v45 = vpop.xlane.xlu0 %2209  ;;  %v2057_v22 = vsub.f32 %v8642_v13, %v1992_v57 }
 0x615   : > { %v8836_v9 = vpop.eup %6766  ;;  %v2109_v56 = vmul.f32 1.442695, %v2020_v27  ;;  %v2183_v27 = vmul.f32 1.442695, %v2057_v22 }
 0x616   : > { %v8838_v46 = vpop.eup %6768  ;;  %2309 = vadd.xlane.f32.xlu0 %v8836_v9 }
 0x617   : > { %v8841_v37 = vpop.eup %6770  ;;  %2233 = vadd.xlane.f32.xlu1 %v8838_v46 }
 0x618   : > { %2281 = vadd.xlane.f32.xlu2 %v8841_v37  ;;  %v8850_v4 = vpop.eup %6772 }
 0x619   : > { %v8852_v5 = vpop.eup %6774 }
 0x61a   : > { %v1920_v44 = vpop.xlane.xlu1 %1919  ;;  %v1922_v17 = vpop.xlane.xlu2 %1921  ;;  %10870 = vst [vmem:[#allocation66_spill] sm:$0xff] %v8852_v5 }
 0x61b   : > { %v2021_v18 = vsub.f32 %v8683_v47, %v1920_v44  ;;  %v2022_v35 = vsub.f32 %v8678_v32, %v1922_v17 }
 0x61d   : > { %v2111_v16 = vmul.f32 1.442695, %v2021_v18  ;;  %v2113_v34 = vmul.f32 1.442695, %v2022_v35 }
 0x61f   : > { %6776 = vpow2.f32 %v2111_v16  ;;  %2235 = vadd.xlane.f32.xlu1 %v8852_v5 }
 0x620   : > { %6778 = vpow2.f32 %v2113_v34  ;;  %2307 = vadd.xlane.f32.xlu2 %v8850_v4 }
 0x621   : > { %6780 = vpow2.f32 %v2109_v56  ;;  %v8857_v55 = vpop.xlane.xlu0 %2211 }
 0x622   : > { %v2260_v47 = vpop.xlane.xlu2 %2259  ;;  %v1994_v32 = vpop.xlane.xlu1 %1993 }
 0x623   : > { %v2058_v23 = vsub.f32 %v8694_v58, %v1994_v32  ;;  %6782 = vrcp.f32 %v2260_v47 }
 0x625   : > { %v8860_v36 = vpop.eup %6776  ;;  %v2185_v17 = vmul.f32 1.442695, %v2058_v23 }
 0x626   : > { %v8862_v44 = vpop.eup %6778  ;;  %2239 = vadd.xlane.f32.xlu0 %v8860_v36 }
 0x627   : > { %v8865_v18 = vpop.eup %6780  ;;  %6784 = vpow2.f32 %v2185_v17  ;;  %2241 = vadd.xlane.f32.xlu1 %v8862_v44 }
 0x628   : > { %10871 = vst [vmem:[#allocation67_spill] sm:$0xff] %v8865_v18  ;;  %2237 = vadd.xlane.f32.xlu2 %v8865_v18  ;;  %6786 = vpow2.f32 %v2183_v27 }
 0x629   : > { %v2262_v13 = vpop.xlane.xlu0 %2261  ;;  %v6783_v58 = vpop.eup %6782 }
 0x62a   : > { %v1924_v57 = vpop.xlane.xlu2 %1923  ;;  %6788 = vrcp.f32 %v2262_v13  ;;  %v2214_v35 = vpop.xlane.xlu1 %2213  ;;  %v2415_v22 = vmul.f32 %v6783_v58, %v8689_v59  ;;  %v2045_v58 = vsub.f32 %v8453_v60, %v8718_v62  ;;  %v2046_v62 = vsub.f32 %v8460_v31, %v8720_v14 }
 0x62b   : > { %v2023_v56 = vsub.f32 %v8708_v40, %v1924_v57 }
 0x62c   : > { %v2479_v13 = vpack.c.bf16 %v2415_v22, %v2415_v22 }
 0x62d   : > { %v2115_v16 = vmul.f32 1.442695, %v2023_v56  ;;  %v8870_v34 = vpop.eup %6784 }
 0x62e   : > { %v8873_v47 = vpop.eup %6786  ;;  %2313 = vadd.xlane.f32.xlu0 %v8870_v34 }
 0x62f   : > { %6790 = vpow2.f32 %v2115_v16  ;;  %v8883_v16 = vunpack.c.l.b16 %v2479_v13 }
 0x630   : > { %2311 = vadd.xlane.f32.xlu2 %v8873_v47  ;;  %v6789_v32 = vpop.eup %6788 }
 0x631   : > { %v1926_v23 = vpop.xlane.xlu0 %1925  ;;  %v2416_v17 = vmul.f32 %v6789_v32, %v8703_v21 }
 0x632   : > { %v2216_v27 = vpop.xlane.xlu2 %2215  ;;  %v2024_v40 = vsub.f32 %v8729_v19, %v1926_v23  ;;  %v2266_v57 = vpop.xlane.xlu1 %2265  ;;  %v2159_v19 = vmul.f32 1.442695, %v2045_v58 }
 0x633   : > { %v2480_v56 = vpack.c.bf16 %v2416_v17, %v2416_v17  ;;  %6792 = vrcp.f32 %v2266_v57  ;;  %v2016_v57 = vsub.f32 %v8583_v33, %v8801_v20  ;;  %v2001_v33 = vsub.f32 %v8275_v53, %v8543_v61 }
 0x634   : > { %v2117_v59 = vmul.f32 1.442695, %v2024_v40 }
 0x635   : > { %v8879_v5 = vpop.eup %6790  ;;  %v8885_v18 = vunpack.c.l.b16 %v2480_v56  ;;  %v2101_v31 = vmul.f32 1.442695, %v2016_v57 }
 0x636   : > { %6794 = vpow2.f32 %v2117_v59  ;;  %v2161_v59 = vmul.f32 1.442695, %v2046_v62 }
 0x638   : > { %2243 = vadd.xlane.f32.xlu2 %v8879_v5 }
 0x639   : > { %v2264_v22 = vpop.xlane.xlu0 %2263  ;;  %v6793_v23 = vpop.eup %6792 }
 0x63a   : > { %v1928_v32 = vpop.xlane.xlu2 %1927  ;;  %6796 = vrcp.f32 %v2264_v22  ;;  %v2418_v13 = vmul.f32 %v6793_v23, %v8724_v26 }
 0x63b   : > { %v2025_v17 = vsub.f32 %v8740_v1, %v1928_v32  ;;  %6798 = vrcp.f32 %v2216_v27 }
 0x63c   : > { %v8891_v40 = vpop.eup %6794  ;;  %6800 = vpow2.f32 %v2159_v19  ;;  %v2482_v22 = vpack.c.bf16 %v2418_v13, %v2418_v13 }
 0x63d   : > { %v2119_v60 = vmul.f32 1.442695, %v2025_v17  ;;  %2245 = vadd.xlane.f32.xlu0 %v8891_v40  ;;  %v2029_v17 = vsub.f32 %v8323_v25, %v8633_v51 }
 0x63f   : > { %6802 = vpow2.f32 %v2119_v60  ;;  %v2127_v51 = vmul.f32 1.442695, %v2029_v17 }
 0x640   : > { %v6797_v56 = vpop.eup %6796  ;;  %6804 = vrcp.f32 %v2214_v35  ;;  %v8914_v35 = vunpack.c.l.b16 %v2482_v22  ;;  %v2004_v22 = vsub.f32 %v8328_v52, %v8596_v29 }
 0x641   : > { %v2218_v1 = vpop.xlane.xlu0 %2217  ;;  %v2417_v27 = vmul.f32 %v6797_v56, %v8743_v38  ;;  %v6799_v32 = vpop.eup %6798 }
 0x642   : > { %v8899_v58 = vpop.xlane.xlu2 %2267  ;;  %6806 = vrcp.f32 %v2218_v1  ;;  %v8902_v14 = vpop.eup %6800  ;;  %v2393_v20 = vmul.f32 %v6799_v32, %v8722_v12  ;;  %v2077_v29 = vmul.f32 1.442695, %v2004_v22 }
 0x643   : > { %v2481_v19 = vpack.c.bf16 %v2417_v27, %v2417_v27  ;;  %6808 = vrcp.f32 %v8857_v55  ;;  %v2071_v55 = vmul.f32 1.442695, %v2001_v33  ;;  %v10874_v33 = vld [vmem:[#allocation36_spill] sm:$0xff] }
 0x644   : > { %6810 = vpow2.f32 %v2161_v59  ;;  %v2457_v12 = vpack.c.bf16 %v2393_v20, %v2393_v20 }
 0x645   : > { %v8904_v26 = vpop.eup %6802  ;;  %2287 = vadd.xlane.f32.xlu0 %v8902_v14  ;;  %v8912_v38 = vunpack.c.l.b16 %v2481_v19  ;;  %6812 = vpow2.f32 %v2101_v31 }
 0x646   : > { %2247 = vadd.xlane.f32.xlu1 %v8904_v26  ;;  %v6805_v23 = vpop.eup %6804  ;;  %6814 = vrcp.f32 %v8834_v50  ;;  %v2537_v32 = vunpack.c.l.b16 %v2457_v12 }
 0x647   : > { %6816 = vrcp.f32 %v8846_v45  ;;  %v2392_v27 = vmul.f32 %v6805_v23, %v8710_v3  ;;  %v10873_v3 = vld [vmem:[#allocation54_spill] sm:$0xff] }
 0x648   : > { %v6807_v61 = vpop.eup %6806  ;;  %v2044_v20 = vsub.f32 %v10874_v33, %v10873_v3 }
 0x649   : > { %v2394_v60 = vmul.f32 %v6807_v61, %v8749_v15  ;;  %v1930_v13 = vpop.xlane.xlu0 %1929  ;;  %v6809_v57 = vpop.eup %6808  ;;  %v2002_v15 = vsub.f32 %v8292_v6, %v8557_v24  ;;  %v2456_v24 = vpack.c.bf16 %v2392_v27, %v2392_v27 }
 0x64a   : > { %v2292_v62 = vpop.xlane.xlu1 %2291  ;;  %v2026_v56 = vsub.f32 %v8764_v63, %v1930_v13  ;;  %v2294_v59 = vpop.xlane.xlu2 %2293  ;;  %v2391_v31 = vmul.f32 %v6809_v57, %v8696_v39 }
 0x64b   : > { %6818 = vrcp.f32 %v2292_v62  ;;  %v8924_v25 = vpop.eup %6810  ;;  %v2458_v1 = vpack.c.bf16 %v2394_v60, %v2394_v60  ;;  %v2073_v61 = vmul.f32 1.442695, %v2002_v15  ;;  %v2157_v62 = vmul.f32 1.442695, %v2044_v20  ;;  %v10880_v20 = vld [vmem:[#allocation46_spill] sm:$0xff] }
 0x64c   : > { %6820 = vrcp.f32 %v2294_v59  ;;  %v8927_v50 = vpop.eup %6812  ;;  %v2121_v45 = vmul.f32 1.442695, %v2026_v56  ;;  %v2455_v12 = vpack.c.bf16 %v2391_v31, %v2391_v31  ;;  %v2536_v57 = vunpack.c.l.b16 %v2456_v24  ;;  %v10875_v56 = vld [vmem:[#allocation56_spill] sm:$0xff] }
 0x64d   : > { %10872 = vst [vmem:[#allocation68_spill] sm:$0xff] %v8927_v50  ;;  %6822 = vpow2.f32 %v2071_v55  ;;  %v2538_v63 = vunpack.c.l.b16 %v2458_v1  ;;  %2229 = vadd.xlane.f32.xlu0 %v8927_v50  ;;  %v6815_v19 = vpop.eup %6814 }
 0x64e   : > { %2289 = vadd.xlane.f32.xlu1 %v8924_v25  ;;  %6824 = vpow2.f32 %v2121_v45  ;;  %v6817_v23 = vpop.eup %6816  ;;  %v2389_v59 = vmul.f32 %v6815_v19, %v10875_v56  ;;  %v10879_v19 = vld [vmem:[#allocation49_spill] sm:$0xff] }
 0x64f   : > { %6826 = vpow2.f32 %v2127_v51  ;;  %v2546_v6 = vpack.c.b16 %v2538_v63, %v2537_v32  ;;  %v10876_v51 = vld [vmem:[#allocation57_spill] sm:$0xff]  ;;  %v10877_v32 = vld [vmem:[#allocation47_spill] sm:$0xff]  ;;  %v10878_v63 = vld [vmem:[#allocation34_spill] sm:$0xff]  ;;  %v2015_v3 = vsub.f32 %v10879_v19, %v8799_v11 }
 0x650   : > { %v2390_v1 = vmul.f32 %v6817_v23, %v10876_v51  ;;  %6828 = vpow2.f32 %v2073_v61  ;;  %v2013_v23 = vsub.f32 %v10880_v20, %v8780_v54  ;;  %v2453_v24 = vpack.c.bf16 %v2389_v59, %v2389_v59  ;;  %v10882_v59 = vld [vmem:[#allocation43_spill] sm:$0xff]  ;;  %v10883_v51 = vld [vmem:[#allocation33_spill] sm:$0xff] }
 0x651   : > { %v6819_v17 = vpop.eup %6818  ;;  %2555 = vmatpush.bf16.xpose.msra.mxu1 %v2546_v6  ;;  %6830 = vpow2.f32 %v2077_v29  ;;  %v2099_v11 = vmul.f32 1.442695, %v2015_v3 }
 0x652   : > { %v6821_v52 = vpop.eup %6820  ;;  %v8938_v55 = vpop.xlane.xlu0 %2269  ;;  %v2431_v60 = vmul.f32 %v6819_v17, %v8759_v49  ;;  %v2027_v49 = vsub.f32 %v10878_v63, %v10877_v32  ;;  %6832 = vpow2.f32 %v2157_v62  ;;  %v2454_v17 = vpack.c.bf16 %v2390_v1, %v2390_v1 }
 0x653   : > { %v8941_v39 = vpop.eup %6822  ;;  %v2432_v13 = vmul.f32 %v6821_v52, %v8757_v0  ;;  %v2535_v0 = vunpack.c.l.b16 %v2455_v12  ;;  %v2533_v56 = vunpack.c.l.b16 %v2453_v24  ;;  %v2000_v1 = vsub.f32 %v10883_v51, %v10882_v59 }
 0x654   : > { %v2495_v27 = vpack.c.bf16 %v2431_v60, %v2431_v60  ;;  %v8946_v15 = vpop.eup %6824  ;;  %v2123_v29 = vmul.f32 1.442695, %v2027_v49  ;;  %v2534_v54 = vunpack.c.l.b16 %v2454_v17  ;;  %v10886_v49 = vld [vmem:[#allocation48_spill] sm:$0xff] }
 0x655   : > { %v2496_v45 = vpack.c.bf16 %v2432_v13, %v2432_v13  ;;  %v8948_v22 = vpop.eup %6826  ;;  %2199 = vadd.xlane.f32.xlu0 %v8941_v39  ;;  %2249 = vadd.xlane.f32.xlu2 %v8946_v15  ;;  %v2545_v6 = vpack.c.b16 %v2536_v57, %v2535_v0  ;;  %v2095_v13 = vmul.f32 1.442695, %v2013_v23  ;;  %v10887_v0 = vld [vmem:[#allocation35_spill] sm:$0xff]  ;;  %v8980_v23 = vpop.xlane.xlu1 %2271  ;;  %v2069_v24 = vmul.f32 1.442695, %v2000_v1 }
 0x656   : > { %v8954_v31 = vunpack.c.l.b16 %v2495_v27  ;;  %2255 = vadd.xlane.f32.xlu1 %v8948_v22  ;;  %v8965_v60 = vpop.eup %6828  ;;  %v10884_v27 = vld [vmem:[#allocation53_spill] sm:$0xff]  ;;  %v2028_v19 = vsub.f32 %v10887_v0, %v10886_v49  ;;  %v2544_v3 = vpack.c.b16 %v2534_v54, %v2533_v56  ;;  %v10891_v56 = vld [vmem:[#allocation55_spill] sm:$0xff]  ;;  %v10892_v54 = vld [vmem:[#allocation38_spill] sm:$0xff] }
 0x657   : > { %v8959_v33 = vunpack.c.l.b16 %v2496_v45  ;;  %v8967_v62 = vpop.eup %6830  ;;  %v10885_v45 = vld [vmem:[#allocation37_spill] sm:$0xff]  ;;  %v10893_v1 = vld [vmem:[#allocation59_spill] sm:$0xff] }
 0x658   : > { %v8969_v57 = vpop.eup %6832  ;;  %v2030_v32 = vsub.f32 %v10885_v45, %v10884_v27  ;;  %v10894_v45 = vld [vmem:[#allocation40_spill] sm:$0xff] }
 0x659   : > { %v2296_v61 = vpop.xlane.xlu2 %2295  ;;  %2556 = vmatpush.bf16.xpose.msra.mxu1 %v2545_v6  ;;  %10881 = vst [vmem:[#allocation54_spill] sm:$0xff] %v8969_v57 }
 0x65a   : > { %v2298_v12 = vpop.xlane.xlu0 %2297  ;;  %6834 = vrcp.f32 %v2296_v61  ;;  %v2129_v61 = vmul.f32 1.442695, %v2030_v32  ;;  %v2012_v32 = vsub.f32 %v10894_v45, %v10893_v1 }
 0x65b   : > { %6836 = vrcp.f32 %v2298_v12 }
 0x65c   : > { %6838 = vpow2.f32 %v2123_v29 }
 0x65d   : > { %2285 = vadd.xlane.f32.xlu0 %v8969_v57  ;;  %2205 = vadd.xlane.f32.xlu2 %v8967_v62  ;;  %6840 = vpow2.f32 %v2099_v11  ;;  %v2125_v11 = vmul.f32 1.442695, %v2028_v19  ;;  %v2093_v19 = vmul.f32 1.442695, %v2012_v32  ;;  %v10901_v32 = vld [vmem:[#allocation50_spill] sm:$0xff] }
 0x65e   : > { %2201 = vadd.xlane.f32.xlu1 %v8965_v60  ;;  %6842 = vpow2.f32 %v2095_v13 }
 0x65f   : > { %6844 = vpow2.f32 %v2069_v24  ;;  %v10896_v24 = vld [vmem:[#allocation45_spill] sm:$0xff] }
 0x660   : > { %v6835_v63 = vpop.eup %6834  ;;  %6846 = vpow2.f32 %v2129_v61 }
 0x661   : > { %v6837_v20 = vpop.eup %6836  ;;  %v2433_v6 = vmul.f32 %v6835_v63, %v8783_v30  ;;  %2557 = vmatpush.bf16.xpose.msra.mxu1 %v2544_v3  ;;  %v2043_v30 = vsub.f32 %v10892_v54, %v10891_v56  ;;  %6848 = vpow2.f32 %v2125_v11  ;;  %v9003_v49 = vpop.xlane.xlu1 %2299 }
 0x662   : > { %v2434_v17 = vmul.f32 %v6837_v20, %v8785_v41  ;;  %v8984_v12 = vpop.eup %6838 }
 0x663   : > { %v2497_v29 = vpack.c.bf16 %v2433_v6, %v2433_v6  ;;  %10888 = vst [vmem:[#allocation36_spill] sm:$0xff] %v8984_v12  ;;  %v8986_v51 = vpop.eup %6840  ;;  %v2155_v0 = vmul.f32 1.442695, %v2043_v30 }
 0x664   : > { %v2498_v59 = vpack.c.bf16 %v2434_v17, %v2434_v17  ;;  %10889 = vst [vmem:[#allocation56_spill] sm:$0xff] %v8986_v51  ;;  %v8990_v13 = vpop.eup %6842  ;;  %v10897_v17 = vld [vmem:[#allocation31_spill] sm:$0xff] }
 0x665   : > { %v8988_v27 = vunpack.c.l.b16 %v2497_v29  ;;  %10890 = vst [vmem:[#allocation57_spill] sm:$0xff] %v8990_v13  ;;  %2251 = vadd.xlane.f32.xlu0 %v8984_v12  ;;  %2227 = vadd.xlane.f32.xlu2 %v8986_v51  ;;  %v9005_v3 = vpop.eup %6844  ;;  %v1998_v61 = vsub.f32 %v10897_v17, %v10896_v24  ;;  %6850 = vpow2.f32 %v2155_v0  ;;  %v10898_v29 = vld [vmem:[#allocation44_spill] sm:$0xff]  ;;  %v10902_v0 = vld [vmem:[#allocation29_spill] sm:$0xff] }
 0x666   : > { %v8996_v41 = vunpack.c.l.b16 %v2498_v59  ;;  %2223 = vadd.xlane.f32.xlu1 %v8990_v13  ;;  %10895 = vst [vmem:[#allocation47_spill] sm:$0xff] %v9005_v3  ;;  %v9007_v20 = vpop.eup %6846  ;;  %6852 = vpow2.f32 %v2093_v19  ;;  %v2014_v11 = vsub.f32 %v10898_v29, %v8770_v8  ;;  %v1996_v24 = vsub.f32 %v10902_v0, %v10901_v32  ;;  %v10903_v19 = vld [vmem:[#allocation51_spill] sm:$0xff]  ;;  %v10904_v8 = vld [vmem:[#allocation32_spill] sm:$0xff]  ;;  %v2274_v29 = vpop.xlane.xlu2 %2273  ;;  %v10907_v32 = vld [vmem:[#allocation58_spill] sm:$0xff] }
 0x667   : > { %v9009_v6 = vpop.eup %6848  ;;  %v2065_v56 = vmul.f32 1.442695, %v1998_v61  ;;  %v1999_v17 = vsub.f32 %v10904_v8, %v10903_v19 }
 0x668   : > { %v2097_v54 = vmul.f32 1.442695, %v2014_v11  ;;  %v2061_v61 = vmul.f32 1.442695, %v1996_v24 }
 0x669   : > { %v2276_v59 = vpop.xlane.xlu0 %2275  ;;  %6854 = vpow2.f32 %v2065_v56  ;;  %v2067_v11 = vmul.f32 1.442695, %v1999_v17  ;;  %v10908_v56 = vld [vmem:[#allocation39_spill] sm:$0xff] }
 0x66a   : > { %v2278_v30 = vpop.xlane.xlu1 %2277  ;;  %6856 = vpow2.f32 %v2097_v54  ;;  %v2011_v0 = vsub.f32 %v10908_v56, %v10907_v32  ;;  %v10912_v32 = vld [vmem:[#allocation30_spill] sm:$0xff] }
 0x66b   : > { %v9018_v1 = vpop.eup %6850  ;;  %6858 = vpow2.f32 %v2061_v61  ;;  %v10911_v61 = vld [vmem:[#allocation41_spill] sm:$0xff] }
 0x66c   : > { %10899 = vst [vmem:[#allocation34_spill] sm:$0xff] %v9018_v1  ;;  %v9020_v45 = vpop.eup %6852  ;;  %6860 = vpow2.f32 %v2067_v11  ;;  %v2091_v54 = vmul.f32 1.442695, %v2011_v0  ;;  %v1997_v56 = vsub.f32 %v10912_v32, %v10911_v61 }
 0x66d   : > { %2197 = vadd.xlane.f32.xlu0 %v9005_v3  ;;  %2257 = vadd.xlane.f32.xlu2 %v9007_v20  ;;  %10900 = vst [vmem:[#allocation49_spill] sm:$0xff] %v9020_v45 }
 0x66e   : > { %2253 = vadd.xlane.f32.xlu1 %v9009_v6  ;;  %v9040_v24 = vpop.xlane.xlu2 %2301  ;;  %6862 = vpow2.f32 %v2091_v54 }
 0x66f   : > { %v9030_v21 = vpop.eup %6854 }
 0x670   : > { %10905 = vst [vmem:[#allocation46_spill] sm:$0xff] %v9030_v21  ;;  %v9032_v53 = vpop.eup %6856 }
 0x671   : > { %v9028_v52 = vpop.xlane.xlu0 %2303  ;;  %10906 = vst [vmem:[#allocation43_spill] sm:$0xff] %v9032_v53  ;;  %v9044_v17 = vpop.eup %6858 }
 0x672   : > { %10909 = vst [vmem:[#allocation33_spill] sm:$0xff] %v9044_v17  ;;  %v9046_v13 = vpop.eup %6860 }
 0x673   : > { %10910 = vst [vmem:[#allocation53_spill] sm:$0xff] %v9046_v13 }
 0x674   : > { %v9054_v0 = vpop.eup %6862 }
 0x675   : > { %2221 = vadd.xlane.f32.xlu0 %v9020_v45  ;;  %2283 = vadd.xlane.f32.xlu2 %v9018_v1  ;;  %v9036_v45 = vpop.f32.mrf.mxu2 }
 0x679   : > { %v2280_v63 = vpop.xlane.xlu1 %2279 }
 0x67d   : > { %2193 = vadd.xlane.f32.xlu0 %v9030_v21  ;;  %2225 = vadd.xlane.f32.xlu2 %v9032_v53  ;;  %v9052_v11 = vpop.f32.mrf.mxu2  ;;  %v2063_v21 = vmul.f32 1.442695, %v1997_v56 }
 0x681   : > { %v2232_v8 = vpop.xlane.xlu0 %2231 }
 0x682   : > { %v9042_v19 = vpop.xlane.xlu1 %2305  ;;  %6864 = vrcp.f32 %v2232_v8  ;;  %v10913_v8 = vld [vmem:[#allocation42_spill] sm:$0xff] }
 0x683   : > { %6866 = vrcp.f32 %v2280_v63 }
 0x684   : > { %6868 = vrcp.f32 %v2276_v59 }
 0x685   : > { %2189 = vadd.xlane.f32.xlu0 %v9044_v17  ;;  %2195 = vadd.xlane.f32.xlu2 %v9046_v13  ;;  %6870 = vrcp.f32 %v2278_v30  ;;  %v10914_v17 = vld [vmem:[#allocation28_spill] sm:$0xff]  ;;  %v9061_v51 = vpop.f32.mrf.mxu2 }
 0x686   : > { %v1995_v13 = vsub.f32 %v10914_v17, %v10913_v8 }
 0x688   : > { %v6865_v50 = vpop.eup %6864  ;;  %v2059_v1 = vmul.f32 1.442695, %v1995_v13 }
 0x689   : > { %v6867_v54 = vpop.eup %6866  ;;  %v2401_v63 = vmul.f32 %v6865_v50, %v8826_v42  ;;  %v2310_v56 = vpop.xlane.xlu0 %2309 }
 0x68a   : > { %v2234_v3 = vpop.xlane.xlu1 %2233  ;;  %v6869_v61 = vpop.eup %6868  ;;  %v2425_v59 = vmul.f32 %v6867_v54, %v8820_v2 }
 0x68b   : > { %v2282_v53 = vpop.xlane.xlu2 %2281  ;;  %6872 = vrcp.f32 %v2234_v3  ;;  %v6871_v32 = vpop.eup %6870  ;;  %v2465_v12 = vpack.c.bf16 %v2401_v63, %v2401_v63  ;;  %v2423_v50 = vmul.f32 %v6869_v61, %v8805_v43 }
 0x68c   : > { %6874 = vrcp.f32 %v2282_v53  ;;  %v2489_v17 = vpack.c.bf16 %v2425_v59, %v2425_v59  ;;  %v2424_v13 = vmul.f32 %v6871_v32, %v8807_v7 }
 0x68d   : > { %2219 = vadd.xlane.f32.xlu2 %v9054_v0  ;;  %6876 = vpow2.f32 %v2063_v21  ;;  %v9071_v54 = vunpack.c.l.b16 %v2465_v12 }
 0x68e   : > { %6878 = vrcp.f32 %v2274_v29  ;;  %v2671_v63 = vunpack.c.l.b16 %v2489_v17 }
 0x68f   : > { %6880 = vpow2.f32 %v2059_v1 }
 0x690   : > { %6882 = vrcp.f32 %v8980_v23  ;;  %v1274_v23 = vpop.f32.mrf.mxu2 }
 0x691   : > { %v6873_v30 = vpop.eup %6872  ;;  %6884 = vrcp.f32 %v8938_v55 }
 0x692   : > { %v6875_v3 = vpop.eup %6874  ;;  %v2402_v53 = vmul.f32 %v6873_v30, %v8838_v46  ;;  %v2487_v30 = vpack.c.bf16 %v2423_v50, %v2423_v50  ;;  %6886 = vrcp.f32 %v8899_v58 }
 0x693   : > { %v2308_v57 = vpop.xlane.xlu2 %2307  ;;  %v2426_v8 = vmul.f32 %v6875_v3, %v8841_v37  ;;  %v9065_v21 = vpop.eup %6876  ;;  %v2488_v3 = vpack.c.bf16 %v2424_v13, %v2424_v13 }
 0x694   : > { %v2466_v42 = vpack.c.bf16 %v2402_v53, %v2402_v53  ;;  %v6879_v53 = vpop.eup %6878  ;;  %v2669_v61 = vunpack.c.l.b16 %v2487_v30  ;;  %6888 = vrcp.f32 %v2308_v57 }
 0x695   : > { %v2490_v2 = vpack.c.bf16 %v2426_v8, %v2426_v8  ;;  %2191 = vadd.xlane.f32.xlu2 %v9065_v21  ;;  %v9081_v7 = vpop.eup %6880  ;;  %v2670_v32 = vunpack.c.l.b16 %v2488_v3  ;;  %v2422_v17 = vmul.f32 %v6879_v53, %v8792_v10  ;;  %v10916_v8 = vld [vmem:[#allocation61_spill] sm:$0xff] }
 0x696   : > { %v9073_v46 = vunpack.c.l.b16 %v2466_v42  ;;  %10915 = vst [vmem:[#allocation37_spill] sm:$0xff] %v9081_v7  ;;  %v6883_v12 = vpop.eup %6882 }
 0x697   : > { %v2672_v37 = vunpack.c.l.b16 %v2490_v2  ;;  %v2421_v42 = vmul.f32 %v6883_v12, %v10916_v8  ;;  %v7128_v2 = vld [vmem:[%s10700_s4] sm:$0x7]  ;;  %v2486_v55 = vpack.c.bf16 %v2422_v17, %v2422_v17  ;;  %v9100_v17 = vpop.xlane.xlu1 %2235 }
 0x698   : > { %v9091_v50 = vperm.slane %v7128_v2, 2  ;;  %v9097_v53 = vpop.f32.mrf.mxu2  ;;  %v10917_v12 = vld [vmem:[#allocation62_spill] sm:$0xff]  ;;  %v10918_v2 = vld [vmem:[#allocation60_spill] sm:$0xff] }
 0x699   : > { %v9075_v59 = vpop.xlane.xlu0 %2239  ;;  %v2680_v29 = vpack.c.b16 %v2672_v37, %v2671_v63  ;;  %v2679_v63 = vpack.c.b16 %v2670_v32, %v2669_v61  ;;  %v6885_v37 = vpop.eup %6884  ;;  %v2485_v58 = vpack.c.bf16 %v2421_v42, %v2421_v42  ;;  %v2668_v57 = vunpack.c.l.b16 %v2486_v55 }
 0x69a   : > { %v6887_v30 = vpop.eup %6886  ;;  %v1268_v3 = vadd.f32 %v9036_v45, %v9091_v50  ;;  %v2420_v61 = vmul.f32 %v6885_v37, %v10917_v12 }
 0x69b   : > { %v9079_v43 = vpop.xlane.xlu2 %2237  ;;  %2689 = vmatpush.bf16.xpose.msra.mxu3 %v2680_v29  ;;  %v1270_v29 = vadd.f32 %v9052_v11, %v9091_v50  ;;  %v6889_v8 = vpop.eup %6888  ;;  %v2667_v11 = vunpack.c.l.b16 %v2485_v58 }
 0x69c   : > { %v2484_v45 = vpack.c.bf16 %v2420_v61, %v2420_v61  ;;  %v2439_v58 = vmul.f32 %v6889_v8, %v8850_v4 }
 0x69d   : > { %2187 = vadd.xlane.f32.xlu2 %v9081_v7  ;;  %v1323_v32 = vpack.c.bf16 %v1270_v29, %v1268_v3  ;;  %v2678_v1 = vpack.c.b16 %v2668_v57, %v2667_v11 }
 0x69e   : > { %v2666_v3 = vunpack.c.l.b16 %v2484_v45 }
 0x6a0   : > { %v1279_v57 = vpop.f32.mrf.mxu2 }
 0x6a1   : > { %v2314_v13 = vpop.xlane.xlu0 %2313 }
 0x6a2   : > { %6890 = vrcp.f32 %v2314_v13  ;;  %v2419_v13 = vmul.f32 %v6887_v30, %v10918_v2 }
 0x6a3   : > { %v2312_v10 = vpop.xlane.xlu2 %2311  ;;  %2690 = vmatpush.bf16.xpose.msra.mxu3 %v2679_v63 }
 0x6a4   : > { %6892 = vrcp.f32 %v2312_v10  ;;  %v2483_v37 = vpack.c.bf16 %v2419_v13, %v2419_v13 }
 0x6a5   : > { %6894 = vrcp.f32 %v2310_v56 }
 0x6a6   : > { %6896 = vrcp.f32 %v9042_v19  ;;  %v2665_v61 = vunpack.c.l.b16 %v2483_v37  ;;  %v2503_v19 = vpack.c.bf16 %v2439_v58, %v2439_v58  ;;  %v10920_v58 = vld [vmem:[#allocation64_spill] sm:$0xff] }
 0x6a7   : > { %6898 = vrcp.f32 %v9028_v52 }
 0x6a8   : > { %v6891_v63 = vpop.eup %6890  ;;  %1363 = vxpose.xlu1.c.b16.start [1/8] %v1323_v32, 128  ;;  %v9109_v32 = vpop.xlane.xlu1 %2241  ;;  %6900 = vrcp.f32 %v9040_v24  ;;  %v2736_v52 = vunpack.c.l.b16 %v2503_v19 }
 0x6a9   : > { %v2442_v10 = vmul.f32 %v6891_v63, %v8870_v34  ;;  %6902 = vrcp.f32 %v9003_v49  ;;  %v9118_v45 = vpop.f32.mrf.mxu2 }
 0x6aa   : > { %v6893_v42 = vpop.eup %6892 }
 0x6ab   : > { %v2441_v7 = vmul.f32 %v6893_v42, %v8873_v47  ;;  %v6895_v56 = vpop.eup %6894  ;;  %v2506_v55 = vpack.c.bf16 %v2442_v10, %v2442_v10  ;;  %2691 = vmatpush.bf16.xpose.msra.mxu3 %v2678_v1  ;;  %v2677_v1 = vpack.c.b16 %v2666_v3, %v2665_v61 }
 0x6ac   : > { %v2440_v34 = vmul.f32 %v6895_v56, %v8836_v9  ;;  %v6897_v2 = vpop.eup %6896  ;;  %v1273_v9 = vadd.f32 %v9061_v51, %v9091_v50 }
 0x6ad   : > { %v2505_v29 = vpack.c.bf16 %v2441_v7, %v2441_v7  ;;  %v2739_v30 = vunpack.c.l.b16 %v2506_v55  ;;  %v1275_v7 = vadd.f32 %v1274_v23, %v9091_v50  ;;  %v6899_v8 = vpop.eup %6898  ;;  %v2438_v13 = vmul.f32 %v6897_v2, %v8829_v48 }
 0x6ae   : > { %v2504_v4 = vpack.c.bf16 %v2440_v34, %v2440_v34  ;;  %v2437_v10 = vmul.f32 %v6899_v8, %v8813_v28  ;;  %v6901_v37 = vpop.eup %6900  ;;  %v10919_v48 = vpack.c.b16 %v8914_v35, %v8912_v38  ;;  %v10921_v28 = vld [vmem:[#allocation63_spill] sm:$0xff]  ;;  %v2244_v34 = vpop.xlane.xlu2 %2243  ;;  %v10922_v38 = vpack.c.b16 %v8885_v18, %v8883_v16 }
 0x6af   : > { %v2738_v12 = vunpack.c.l.b16 %v2505_v29  ;;  %v1324_v63 = vpack.c.bf16 %v1275_v7, %v1273_v9  ;;  %v2502_v24 = vpack.c.bf16 %v2438_v13, %v2438_v13  ;;  %v6903_v51 = vpop.eup %6902  ;;  %v1278_v35 = vadd.f32 %v9097_v53, %v9091_v50  ;;  %v10923_v13 = vld [vmem:[#allocation65_spill] sm:$0xff] }
 0x6b0   : > { %v2246_v47 = vpop.xlane.xlu0 %2245  ;;  %v2737_v42 = vunpack.c.l.b16 %v2504_v4  ;;  %v2501_v29 = vpack.c.bf16 %v2437_v10, %v2437_v10 }
 0x6b1   : > { %v2747_v11 = vpack.c.b16 %v2739_v30, %v2738_v12  ;;  %v2735_v49 = vunpack.c.l.b16 %v2502_v24  ;;  %v2436_v30 = vmul.f32 %v6901_v37, %v10920_v58  ;;  %v2435_v12 = vmul.f32 %v6903_v51, %v10921_v28  ;;  %v1284_v2 = vpop.f32.mrf.mxu2 }
 0x6b2   : > { %v2746_v55 = vpack.c.b16 %v2737_v42, %v2736_v52  ;;  %v2734_v3 = vunpack.c.l.b16 %v2501_v29  ;;  %v1285_v58 = vadd.f32 %v1284_v2, %v9091_v50 }
 0x6b3   : > { %2756 = vmatpush.bf16.xpose.msra.mxu0 %v2747_v11  ;;  %2692 = vmatpush.bf16.xpose.msra.mxu3 %v2677_v1  ;;  %v2500_v19 = vpack.c.bf16 %v2436_v30, %v2436_v30  ;;  %v1280_v1 = vadd.f32 %v1279_v57, %v9091_v50  ;;  %v2499_v4 = vpack.c.bf16 %v2435_v12, %v2435_v12 }
 0x6b4   : > { %v2745_v11 = vpack.c.b16 %v2735_v49, %v2734_v3 }
 0x6b5   : > { %v2733_v8 = vunpack.c.l.b16 %v2500_v19  ;;  %v1325_v9 = vpack.c.bf16 %v1280_v1, %v1278_v35  ;;  %v2732_v52 = vunpack.c.l.b16 %v2499_v4 }
 0x6b7   : > { %v2744_v57 = vpack.c.b16 %v2733_v8, %v2732_v52 }
 0x6b8   : > { %v2288_v23 = vpop.xlane.xlu0 %2287  ;;  %1364 = vxpose.xlu1.c.b16.cont [2/8] %v1324_v63, 128 }
 0x6b9   : > { %v2248_v56 = vpop.xlane.xlu1 %2247  ;;  %v9136_v18 = vpop.f32.mrf.mxu2 }
 0x6ba   : > { %6904 = vrcp.f32 %v2248_v56 }
 0x6bb   : > { %2757 = vmatpush.bf16.xpose.msra.mxu0 %v2746_v55  ;;  %2693 = vmatpush.bf16.xpose.msra.mxu3 %v10919_v48  ;;  %6906 = vrcp.f32 %v10923_v13 }
 0x6bc   : > { %6908 = vrcp.f32 %v2246_v47 }
 0x6c0   : > { %v9126_v7 = vpop.xlane.xlu0 %2229  ;;  %v6905_v10 = vpop.eup %6904 }
 0x6c1   : > { %v2290_v61 = vpop.xlane.xlu1 %2289  ;;  %v2409_v53 = vmul.f32 %v6905_v10, %v8904_v26  ;;  %v6907_v56 = vpop.eup %6906  ;;  %v10924_v26 = vpack.c.b16 %v8996_v41, %v8988_v27 }
 0x6c2   : > { %v6909_v55 = vpop.eup %6908  ;;  %v1289_v3 = vpop.f32.mrf.mxu2 }
 0x6c3   : > { %2758 = vmatpush.bf16.xpose.msra.mxu0 %v2745_v11  ;;  %2694 = vmatpush.bf16.xpose.msra.mxu3 %v10922_v38  ;;  %v2473_v48 = vpack.c.bf16 %v2409_v53, %v2409_v53 }
 0x6c5   : > { %v2604_v28 = vunpack.c.l.b16 %v2473_v48 }
 0x6c8   : > { %1365 = vxpose.xlu1.c.b16.cont [3/8] %v1325_v9, 128  ;;  %v2250_v63 = vpop.xlane.xlu2 %2249  ;;  %v2200_v16 = vpop.xlane.xlu0 %2199 }
 0x6c9   : > { %v9134_v42 = vpop.xlane.xlu1 %2255  ;;  %6910 = vrcp.f32 %v2250_v63 }
 0x6ca   : > { %6912 = vrcp.f32 %v2290_v61 }
 0x6cb   : > { %2759 = vmatpush.bf16.xpose.msra.mxu0 %v2744_v57  ;;  %6914 = vrcp.f32 %v2244_v34  ;;  %v10925_v34 = vld [vmem:[#allocation52_spill] sm:$0xff] }
 0x6cc   : > { %6916 = vrcp.f32 %v2288_v23  ;;  %v2387_v61 = vmul.f32 %v6907_v56, %v10925_v34  ;;  %v10928_v34 = vld [vmem:[#allocation66_spill] sm:$0xff] }
 0x6cd   : > { %6918 = vrcp.f32 %v9075_v59  ;;  %v2408_v59 = vmul.f32 %v6909_v55, %v8891_v40 }
 0x6ce   : > { %6920 = vrcp.f32 %v9109_v32  ;;  %v1283_v32 = vadd.f32 %v9118_v45, %v9091_v50  ;;  %v2451_v9 = vpack.c.bf16 %v2387_v61, %v2387_v61 }
 0x6cf   : > { %v6911_v24 = vpop.eup %6910  ;;  %v2472_v4 = vpack.c.bf16 %v2408_v59, %v2408_v59 }
 0x6d0   : > { %v2206_v37 = vpop.xlane.xlu2 %2205  ;;  %v6913_v47 = vpop.eup %6912  ;;  %v2410_v51 = vmul.f32 %v6911_v24, %v8946_v15  ;;  %v1326_v41 = vpack.c.bf16 %v1285_v58, %v1283_v32  ;;  %v2531_v56 = vunpack.c.l.b16 %v2451_v9 }
 0x6d1   : > { %v2202_v29 = vpop.xlane.xlu1 %2201  ;;  %v6915_v49 = vpop.eup %6914  ;;  %6922 = vrcp.f32 %v2206_v37  ;;  %v2430_v15 = vmul.f32 %v6913_v47, %v8924_v25 }
 0x6d2   : > { %v6917_v23 = vpop.eup %6916  ;;  %6924 = vrcp.f32 %v2202_v29  ;;  %v2474_v30 = vpack.c.bf16 %v2410_v51, %v2410_v51  ;;  %v2407_v11 = vmul.f32 %v6915_v49, %v8879_v5  ;;  %v2286_v19 = vpop.xlane.xlu0 %2285 }
 0x6d3   : > { %2760 = vmatpush.bf16.xpose.msra.mxu0 %v10924_v26  ;;  %6926 = vrcp.f32 %v2200_v16  ;;  %v6919_v27 = vpop.eup %6918  ;;  %v2429_v2 = vmul.f32 %v6917_v23, %v8902_v14  ;;  %v2494_v25 = vpack.c.bf16 %v2430_v15, %v2430_v15  ;;  %v10926_v14 = vpack.c.b16 %v8959_v33, %v8954_v31  ;;  %v9168_v47 = vpop.f32.mrf.mxu2 }
 0x6d4   : > { %v2605_v12 = vunpack.c.l.b16 %v2474_v30  ;;  %v6921_v1 = vpop.eup %6920  ;;  %6928 = vrcp.f32 %v9079_v43  ;;  %v2471_v52 = vpack.c.bf16 %v2407_v11, %v2407_v11  ;;  %v2405_v57 = vmul.f32 %v6919_v27, %v8860_v36  ;;  %v10927_v30 = vld [vmem:[#allocation67_spill] sm:$0xff] }
 0x6d5   : > { %6930 = vrcp.f32 %v9100_v17  ;;  %v2493_v63 = vpack.c.bf16 %v2429_v2, %v2429_v2  ;;  %v2603_v16 = vunpack.c.l.b16 %v2472_v4  ;;  %v2406_v53 = vmul.f32 %v6921_v1, %v8862_v44 }
 0x6d6   : > { %v2613_v40 = vpack.c.b16 %v2605_v12, %v2604_v28  ;;  %6932 = vrcp.f32 %v9134_v42  ;;  %v2602_v24 = vunpack.c.l.b16 %v2471_v52  ;;  %v2469_v31 = vpack.c.bf16 %v2405_v57, %v2405_v57 }
 0x6d7   : > { %v6923_v38 = vpop.eup %6922  ;;  %v2726_v37 = vunpack.c.l.b16 %v2493_v63  ;;  %v2470_v48 = vpack.c.bf16 %v2406_v53, %v2406_v53  ;;  %6934 = vrcp.f32 %v2286_v19  ;;  %v1288_v12 = vadd.f32 %v9136_v18, %v9091_v50 }
 0x6d8   : > { %1366 = vxpose.xlu1.c.b16.cont [4/8] %v1326_v41, 128  ;;  %v9153_v45 = vpop.xlane.xlu2 %2227  ;;  %v6925_v35 = vpop.eup %6924  ;;  %2622 = vmatpush.bf16.xpose.msra.mxu2 %v2613_v40  ;;  %v2388_v5 = vmul.f32 %v6923_v38, %v8967_v62  ;;  %v2727_v62 = vunpack.c.l.b16 %v2494_v25  ;;  %v2612_v29 = vpack.c.b16 %v2603_v16, %v2602_v24  ;;  %v2600_v15 = vunpack.c.l.b16 %v2469_v31  ;;  %v10929_v16 = vld [vmem:[#allocation36_spill] sm:$0xff]  ;;  %v10931_v31 = vld [vmem:[#allocation34_spill] sm:$0xff] }
 0x6d9   : > { %v9156_v8 = vpop.xlane.xlu1 %2223  ;;  %v6927_v13 = vpop.eup %6926  ;;  %v2386_v43 = vmul.f32 %v6925_v35, %v8965_v60  ;;  %v2601_v28 = vunpack.c.l.b16 %v2470_v48 }
 0x6da   : > { %v2452_v10 = vpack.c.bf16 %v2388_v5, %v2388_v5  ;;  %v2385_v17 = vmul.f32 %v6927_v13, %v8941_v39  ;;  %v6929_v33 = vpop.eup %6928  ;;  %v2252_v49 = vpop.xlane.xlu0 %2251  ;;  %v2741_v58 = vpack.c.b16 %v2727_v62, %v2726_v37  ;;  %v1290_v39 = vadd.f32 %v1289_v3, %v9091_v50 }
 0x6db   : > { %2761 = vmatpush.bf16.xpose.msra.mxu0 %v10926_v14  ;;  %v2450_v51 = vpack.c.bf16 %v2386_v43, %v2386_v43  ;;  %v6931_v60 = vpop.eup %6930  ;;  %v2404_v59 = vmul.f32 %v6929_v33, %v10927_v30  ;;  %v2611_v2 = vpack.c.b16 %v2601_v28, %v2600_v15  ;;  %v1294_v35 = vpop.f32.mrf.mxu2 }
 0x6dc   : > { %v2532_v55 = vunpack.c.l.b16 %v2452_v10  ;;  %v2449_v26 = vpack.c.bf16 %v2385_v17, %v2385_v17  ;;  %v6933_v23 = vpop.eup %6932  ;;  %v2403_v61 = vmul.f32 %v6931_v60, %v10928_v34  ;;  %v1327_v41 = vpack.c.bf16 %v1290_v39, %v1288_v12  ;;  %v10932_v60 = vld [vmem:[#allocation56_spill] sm:$0xff] }
 0x6dd   : > { %v2530_v32 = vunpack.c.l.b16 %v2450_v51  ;;  %v2413_v27 = vmul.f32 %v6933_v23, %v8948_v22  ;;  %v6935_v19 = vpop.eup %6934  ;;  %v2468_v1 = vpack.c.bf16 %v2404_v59, %v2404_v59  ;;  %v10933_v39 = vld [vmem:[#allocation68_spill] sm:$0xff] }
 0x6de   : > { %v2543_v36 = vpack.c.b16 %v2532_v55, %v2531_v56  ;;  %v2529_v11 = vunpack.c.l.b16 %v2449_v26  ;;  %v2467_v38 = vpack.c.bf16 %v2403_v61, %v2403_v61  ;;  %v10934_v61 = vpack.c.b16 %v9073_v46, %v9071_v54 }
 0x6df   : > { %v2477_v5 = vpack.c.bf16 %v2413_v27, %v2413_v27  ;;  %v2599_v52 = vunpack.c.l.b16 %v2468_v1  ;;  %v10936_v1 = vld [vmem:[#allocation47_spill] sm:$0xff] }
 0x6e0   : > { %v2258_v44 = vpop.xlane.xlu2 %2257  ;;  %2558 = vmatpush.bf16.xpose.msra.mxu1 %v2543_v36  ;;  %2623 = vmatpush.bf16.xpose.msra.mxu2 %v2612_v29  ;;  %v2542_v3 = vpack.c.b16 %v2530_v32, %v2529_v11  ;;  %v2598_v63 = vunpack.c.l.b16 %v2467_v38  ;;  %v1295_v36 = vadd.f32 %v1294_v35, %v9091_v50 }
 0x6e1   : > { %v2254_v42 = vpop.xlane.xlu1 %2253  ;;  %6936 = vrcp.f32 %v2258_v44  ;;  %v2659_v57 = vunpack.c.l.b16 %v2477_v5  ;;  %v1293_v44 = vadd.f32 %v9168_v47, %v9091_v50 }
 0x6e2   : > { %6938 = vrcp.f32 %v2254_v42  ;;  %v2198_v22 = vpop.xlane.xlu0 %2197  ;;  %v2610_v56 = vpack.c.b16 %v2599_v52, %v2598_v63 }
 0x6e3   : > { %2762 = vmatpush.bf16.xpose.msra.mxu0 %v2741_v58  ;;  %6940 = vrcp.f32 %v2252_v49  ;;  %v1297_v29 = vpop.f32.mrf.mxu2  ;;  %v1328_v59 = vpack.c.bf16 %v1295_v36, %v1293_v44 }
 0x6e4   : > { %6942 = vrcp.f32 %v9153_v45  ;;  %v10930_v45 = vld [vmem:[#allocation54_spill] sm:$0xff] }
 0x6e5   : > { %v2428_v53 = vmul.f32 %v6935_v19, %v10930_v45 }
 0x6e7   : > { %v6937_v40 = vpop.eup %6936  ;;  %v2492_v33 = vpack.c.bf16 %v2428_v53, %v2428_v53 }
 0x6e8   : > { %1367 = vxpose.xlu1.c.b16.cont [5/8] %v1327_v41, 128  ;;  %v2284_v4 = vpop.xlane.xlu2 %2283  ;;  %v6939_v25 = vpop.eup %6938  ;;  %2559 = vmatpush.bf16.xpose.msra.mxu1 %v2542_v3  ;;  %v2414_v18 = vmul.f32 %v6937_v40, %v9007_v20  ;;  %v10935_v41 = vld [vmem:[#allocation43_spill] sm:$0xff] }
 0x6e9   : > { %2624 = vmatpush.bf16.xpose.msra.mxu2 %v2611_v2  ;;  %v6941_v9 = vpop.eup %6940  ;;  %6944 = vrcp.f32 %v2284_v4  ;;  %v2412_v14 = vmul.f32 %v6939_v25, %v9009_v6  ;;  %v2725_v23 = vunpack.c.l.b16 %v2492_v33  ;;  %v10937_v4 = vld [vmem:[#allocation57_spill] sm:$0xff] }
 0x6ea   : > { %v2478_v13 = vpack.c.bf16 %v2414_v18, %v2414_v18  ;;  %6946 = vrcp.f32 %v9126_v7  ;;  %v2411_v43 = vmul.f32 %v6941_v9, %v10929_v16  ;;  %v6943_v62 = vpop.eup %6942  ;;  %v2222_v58 = vpop.xlane.xlu0 %2221  ;;  %v10938_v9 = vld [vmem:[#allocation53_spill] sm:$0xff] }
 0x6eb   : > { %v2476_v55 = vpack.c.bf16 %v2412_v14, %v2412_v14  ;;  %v2399_v49 = vmul.f32 %v6943_v62, %v10932_v60  ;;  %v1299_v3 = vpop.f32.mrf.mxu2  ;;  %v10939_v16 = vld [vmem:[#allocation49_spill] sm:$0xff] }
 0x6ec   : > { %v2660_v10 = vunpack.c.l.b16 %v2478_v13  ;;  %v2475_v37 = vpack.c.bf16 %v2411_v43, %v2411_v43  ;;  %v1300_v14 = vadd.f32 %v1299_v3, %v9091_v50 }
 0x6ed   : > { %v2658_v51 = vunpack.c.l.b16 %v2476_v55  ;;  %v2463_v28 = vpack.c.bf16 %v2399_v49, %v2399_v49 }
 0x6ee   : > { %v2674_v20 = vpack.c.b16 %v2660_v10, %v2659_v57  ;;  %v2657_v42 = vunpack.c.l.b16 %v2475_v37  ;;  %v1298_v10 = vadd.f32 %v1297_v29, %v9091_v50 }
 0x6ef   : > { %v6945_v24 = vpop.eup %6944  ;;  %v2594_v27 = vunpack.c.l.b16 %v2463_v28  ;;  %v10941_v28 = vld [vmem:[#allocation33_spill] sm:$0xff] }
 0x6f0   : > { %v2226_v17 = vpop.xlane.xlu2 %2225  ;;  %2695 = vmatpush.bf16.xpose.msra.mxu3 %v2674_v20  ;;  %v2427_v6 = vmul.f32 %v6945_v24, %v10931_v31  ;;  %v6947_v7 = vpop.eup %6946  ;;  %v2673_v32 = vpack.c.b16 %v2658_v51, %v2657_v42  ;;  %v1329_v20 = vpack.c.bf16 %v1300_v14, %v1298_v10 }
 0x6f1   : > { %2625 = vmatpush.bf16.xpose.msra.mxu2 %v2610_v56  ;;  %6948 = vrcp.f32 %v2226_v17  ;;  %v2400_v30 = vmul.f32 %v6947_v7, %v10933_v39 }
 0x6f2   : > { %6950 = vrcp.f32 %v9156_v8  ;;  %v2491_v48 = vpack.c.bf16 %v2427_v6, %v2427_v6  ;;  %v2194_v25 = vpop.xlane.xlu0 %2193 }
 0x6f3   : > { %6952 = vrcp.f32 %v2198_v22  ;;  %v2464_v47 = vpack.c.bf16 %v2400_v30, %v2400_v30  ;;  %v1302_v45 = vpop.f32.mrf.mxu2 }
 0x6f4   : > { %v2724_v26 = vunpack.c.l.b16 %v2491_v48  ;;  %v10940_v48 = vld [vmem:[#allocation46_spill] sm:$0xff] }
 0x6f5   : > { %v2595_v2 = vunpack.c.l.b16 %v2464_v47  ;;  %v10942_v47 = vld [vmem:[#allocation37_spill] sm:$0xff] }
 0x6f6   : > { %v2740_v15 = vpack.c.b16 %v2725_v23, %v2724_v26 }
 0x6f7   : > { %v6949_v12 = vpop.eup %6948  ;;  %v2608_v35 = vpack.c.b16 %v2595_v2, %v2594_v27 }
 0x6f8   : > { %1368 = vxpose.xlu1.c.b16.cont [6/8] %v1328_v59, 128  ;;  %v2196_v8 = vpop.xlane.xlu2 %2195  ;;  %v6951_v34 = vpop.eup %6950  ;;  %2696 = vmatpush.bf16.xpose.msra.mxu3 %v2673_v32  ;;  %v2398_v19 = vmul.f32 %v6949_v12, %v10935_v41  ;;  %v1303_v59 = vadd.f32 %v1302_v45, %v9091_v50 }
 0x6f9   : > { %2626 = vmatpush.bf16.xpose.msra.mxu2 %v10934_v61  ;;  %v6953_v11 = vpop.eup %6952  ;;  %2763 = vmatpush.bf16.xpose.msra.mxu0 %v2740_v15  ;;  %6954 = vrcp.f32 %v2196_v8  ;;  %v2397_v38 = vmul.f32 %v6951_v34, %v10937_v4 }
 0x6fa   : > { %6956 = vrcp.f32 %v2222_v58  ;;  %v2384_v40 = vmul.f32 %v6953_v11, %v10936_v1  ;;  %v2462_v18 = vpack.c.bf16 %v2398_v19, %v2398_v19  ;;  %v2190_v37 = vpop.xlane.xlu0 %2189 }
 0x6fb   : > { %v2461_v13 = vpack.c.bf16 %v2397_v38, %v2397_v38  ;;  %v1304_v58 = vpop.f32.mrf.mxu2 }
 0x6fc   : > { %v2448_v52 = vpack.c.bf16 %v2384_v40, %v2384_v40  ;;  %v2593_v57 = vunpack.c.l.b16 %v2462_v18 }
 0x6fd   : > { %v2592_v56 = vunpack.c.l.b16 %v2461_v13 }
 0x6fe   : > { %v2528_v62 = vunpack.c.l.b16 %v2448_v52 }
 0x6ff   : > { %v6955_v54 = vpop.eup %6954  ;;  %v2607_v17 = vpack.c.b16 %v2593_v57, %v2592_v56 }
 0x700   : > { %v2220_v46 = vpop.xlane.xlu2 %2219  ;;  %v6957_v5 = vpop.eup %6956  ;;  %v2383_v22 = vmul.f32 %v6955_v54, %v10938_v9 }
 0x701   : > { %2627 = vmatpush.bf16.xpose.msra.mxu2 %v2608_v35  ;;  %6958 = vrcp.f32 %v2220_v46  ;;  %v2396_v43 = vmul.f32 %v6957_v5, %v10939_v16 }
 0x702   : > { %6960 = vrcp.f32 %v2194_v25  ;;  %v2447_v63 = vpack.c.bf16 %v2383_v22, %v2383_v22 }
 0x703   : > { %v2460_v33 = vpack.c.bf16 %v2396_v43, %v2396_v43 }
 0x704   : > { %v2527_v53 = vunpack.c.l.b16 %v2447_v63 }
 0x705   : > { %v2591_v51 = vunpack.c.l.b16 %v2460_v33 }
 0x706   : > { %v2541_v24 = vpack.c.b16 %v2528_v62, %v2527_v53 }
 0x707   : > { %v6959_v55 = vpop.eup %6958 }
 0x708   : > { %1369 = vxpose.xlu1.c.b16.cont [7/8] %v1329_v20, 128  ;;  %v2192_v31 = vpop.xlane.xlu2 %2191  ;;  %v2395_v6 = vmul.f32 %v6959_v55, %v9054_v0  ;;  %v6961_v7 = vpop.eup %6960  ;;  %2560 = vmatpush.bf16.xpose.msra.mxu1 %v2541_v24  ;;  %v1305_v0 = vadd.f32 %v1304_v58, %v9091_v50  ;;  %v6367_v58 = vld [vmem:[#allocation10 + $0x28] sm:$0xff] }
 0x709   : > { %2628 = vmatpush.bf16.xpose.msra.mxu2 %v2607_v17  ;;  %6962 = vrcp.f32 %v2192_v31  ;;  %v2382_v60 = vmul.f32 %v6961_v7, %v10940_v48  ;;  %v6369_v31 = vld [vmem:[#allocation10 + $0x38] sm:$0xff] }
 0x70a   : > { %v2459_v36 = vpack.c.bf16 %v2395_v6, %v2395_v6  ;;  %6964 = vrcp.f32 %v2190_v37  ;;  %v1330_v8 = vpack.c.bf16 %v1305_v0, %v1303_v59 }
 0x70b   : > { %v2446_v23 = vpack.c.bf16 %v2382_v60, %v2382_v60 }
 0x70c   : > { %v2590_v29 = vunpack.c.l.b16 %v2459_v36  ;;  %v6368_v36 = vld [vmem:[#allocation10 + $0x30] sm:$0xff] }
 0x70d   : > { %v2526_v15 = vunpack.c.l.b16 %v2446_v23 }
 0x70e   : > { %v2606_v49 = vpack.c.b16 %v2591_v51, %v2590_v29 }
 0x70f   : > { %v6963_v44 = vpop.eup %6962 }
 0x710   : > { %v2188_v42 = vpop.xlane.xlu2 %2187  ;;  %v2381_v26 = vmul.f32 %v6963_v44, %v9065_v21  ;;  %v6965_v39 = vpop.eup %6964 }
 0x711   : > { %2629 = vmatpush.bf16.xpose.msra.mxu2 %v2606_v49  ;;  %6966 = vrcp.f32 %v2188_v42  ;;  %v2380_v12 = vmul.f32 %v6965_v39, %v10941_v28 }
 0x712   : > { %v2445_v30 = vpack.c.bf16 %v2381_v26, %v2381_v26 }
 0x713   : > { %v2444_v11 = vpack.c.bf16 %v2380_v12, %v2380_v12 }
 0x714   : > { %v2525_v32 = vunpack.c.l.b16 %v2445_v30  ;;  %v6366_v30 = vld [vmem:[#allocation10 + $0x20] sm:$0xff] }
 0x715   : > { %v2524_v19 = vunpack.c.l.b16 %v2444_v11 }
 0x716   : > { %v2540_v34 = vpack.c.b16 %v2526_v15, %v2525_v32 }
 0x717   : > { %v6967_v61 = vpop.eup %6966 }
 0x718   : > { %1370 = vxpose.xlu1.c.b16.end [8/8] %v1330_v8, 128  ;;  %2561 = vmatpush.bf16.xpose.msra.mxu1 %v2540_v34  ;;  %v2379_v21 = vmul.f32 %v6967_v61, %v10942_v47  ;;  %v6365_v34 = vld [vmem:[#allocation10 + $0x18] sm:$0xff] }
 0x71a   : > { %v2443_v27 = vpack.c.bf16 %v2379_v21, %v2379_v21 }
 0x71c   : > { %v2523_v41 = vunpack.c.l.b16 %v2443_v27 }
 0x71e   : > { %v2539_v3 = vpack.c.b16 %v2524_v19, %v2523_v41  ;;  %v6364_v41 = vld [vmem:[#allocation10 + $0x10] sm:$0xff] }
 0x720   : > { %2562 = vmatpush.bf16.xpose.msra.mxu1 %v2539_v3 }
 0x754   : > { %v1371_v2 = vpop.trf.xlu1 }
 0x755   : > { %2563 = vmatmul.bf16.vlgmr.msra.gmra.mxu1 %v1371_v2 }
 0x764   : > { %v1372_v50 = vpop.trf.xlu1 }
 0x765   : > { %2568 = vmatmul.bf16.gmra.mxu1 %v1372_v50 }
 0x774   : > { %v1373_v1 = vpop.trf.xlu1 }
 0x775   : > { %2630 = vmatmul.bf16.vlgmr.msra.gmra.mxu2 %v1373_v1  ;;  %v6363_v1 = vld [vmem:[#allocation10 + $0x8] sm:$0xff] }
 0x784   : > { %v1374_v40 = vpop.trf.xlu1 }
 0x785   : > { %2635 = vmatmul.bf16.gmra.mxu2 %v1374_v40 }
 0x794   : > { %v1375_v4 = vpop.trf.xlu1 }
 0x795   : > { %2697 = vmatmul.bf16.vlgmr.msra.gmra.mxu3 %v1375_v4 }
 0x7a4   : > { %v1376_v38 = vpop.trf.xlu1 }
 0x7a5   : > { %2702 = vmatmul.bf16.gmra.mxu3 %v1376_v38 }
 0x7b4   : > { %v1377_v25 = vpop.trf.xlu1 }
 0x7b5   : > { %2764 = vmatmul.bf16.vlgmr.msra.gmra.mxu0 %v1377_v25  ;;  %v6362_v25 = vld [vmem:[#allocation10] sm:$0xff] }
 0x7c4   : > { %v1378_v35 = vpop.trf.xlu1 }
 0x7c5   : > { %2769 = vmatmul.bf16.gmra.mxu0 %v1378_v35 }
 0x7d2   : > { %v9206_v22 = vpop.f32.mrf.mxu1 }
 0x7d3   : > { %v2775_v27 = vpack.c.bf16 %v9206_v22, %v9206_v22 }
 0x7d5   : > { %v2807_v40 = vunpack.c.l.b16 %v2775_v27  ;;  %v7137_v27 = vld [vmem:[%s7775_s17 + $0x40] sm:$0xff] }
 0x7da   : > { %v9208_v63 = vpop.f32.mrf.mxu1 }
 0x7db   : > { %v2776_v19 = vpack.c.bf16 %v9208_v63, %v9208_v63 }
 0x7dd   : > { %v2808_v4 = vunpack.c.l.b16 %v2776_v19 }
 0x7df   : > { %v2823_v35 = vpack.c.b16 %v2808_v4, %v2807_v40  ;;  %v7138_v4 = vld [vmem:[%s7775_s17 + $0x48] sm:$0xff] }
 0x7e2   : > { %v2569_v33 = vpop.f32.mrf.mxu1 }
 0x7e3   : > { %v2777_v8 = vpack.c.bf16 %v2569_v33, %v2569_v33 }
 0x7e5   : > { %v2809_v3 = vunpack.c.l.b16 %v2777_v8 }
 0x7ea   : > { %v2571_v12 = vpop.f32.mrf.mxu1 }
 0x7eb   : > { %v2778_v47 = vpack.c.bf16 %v2571_v12, %v2571_v12 }
 0x7ed   : > { %v2810_v2 = vunpack.c.l.b16 %v2778_v47 }
 0x7ef   : > { %v2824_v38 = vpack.c.b16 %v2810_v2, %v2809_v3 }
 0x7f8   : > { %v2631_v46 = vpop.f32.mrf.mxu2 }
 0x7f9   : > { %v2779_v0 = vpack.c.bf16 %v2631_v46, %v2631_v46 }
 0x7fb   : > { %v2811_v61 = vunpack.c.l.b16 %v2779_v0 }
 0x800   : > { %v2633_v52 = vpop.f32.mrf.mxu2 }
 0x801   : > { %v2780_v59 = vpack.c.bf16 %v2633_v52, %v2633_v52 }
 0x803   : > { %v2812_v21 = vunpack.c.l.b16 %v2780_v59 }
 0x805   : > { %v2825_v50 = vpack.c.b16 %v2812_v21, %v2811_v61 }
 0x808   : > { %v2636_v10 = vpop.f32.mrf.mxu2 }
 0x809   : > { %v2781_v44 = vpack.c.bf16 %v2636_v10, %v2636_v10  ;;  %v7131_v10 = vld [vmem:[%s7775_s17 + $0x10] sm:$0xff] }
 0x80b   : > { %v2813_v32 = vunpack.c.l.b16 %v2781_v44 }
 0x810   : > { %v2638_v49 = vpop.f32.mrf.mxu2 }
 0x811   : > { %v2782_v26 = vpack.c.bf16 %v2638_v49, %v2638_v49 }
 0x813   : > { %v2814_v15 = vunpack.c.l.b16 %v2782_v26  ;;  %v7135_v26 = vld [vmem:[%s7775_s17 + $0x30] sm:$0xff] }
 0x815   : > { %v2826_v11 = vpack.c.b16 %v2814_v15, %v2813_v32 }
 0x818   : > { %v2698_v18 = vpop.f32.mrf.mxu3 }
 0x819   : > { %v2783_v7 = vpack.c.bf16 %v2698_v18, %v2698_v18  ;;  %v9214_v18 = vld [vmem:[#allocation11] ss:$0 sm:$0xff] }
 0x81b   : > { %v2815_v42 = vunpack.c.l.b16 %v2783_v7 }
 0x820   : > { %v2700_v5 = vpop.f32.mrf.mxu3 }
 0x821   : > { %v2784_v29 = vpack.c.bf16 %v2700_v5, %v2700_v5  ;;  %v7129_v5 = vld [vmem:[%s7775_s17] sm:$0xff] }
 0x823   : > { %v2816_v23 = vunpack.c.l.b16 %v2784_v29 }
 0x825   : > { %v2827_v28 = vpack.c.b16 %v2816_v23, %v2815_v42 }
 0x828   : > { %v2703_v13 = vpop.f32.mrf.mxu3 }
 0x829   : > { %v2785_v55 = vpack.c.bf16 %v2703_v13, %v2703_v13  ;;  %v7130_v13 = vld [vmem:[%s7775_s17 + $0x8] sm:$0xff] }
 0x82b   : > { %v2817_v51 = vunpack.c.l.b16 %v2785_v55  ;;  %v7133_v55 = vld [vmem:[%s7775_s17 + $0x20] sm:$0xff] }
 0x830   : > { %v2705_v53 = vpop.f32.mrf.mxu3 }
 0x831   : > { %v2786_v24 = vpack.c.bf16 %v2705_v53, %v2705_v53  ;;  %v7132_v53 = vld [vmem:[%s7775_s17 + $0x18] sm:$0xff] }
 0x832   : > { %v2765_v54 = vpop.f32.mrf.mxu0 }
 0x833   : > { %v2787_v62 = vpack.c.bf16 %v2765_v54, %v2765_v54  ;;  %v2818_v48 = vunpack.c.l.b16 %v2786_v24 }
 0x835   : > { %v2819_v6 = vunpack.c.l.b16 %v2787_v62  ;;  %v2828_v39 = vpack.c.b16 %v2818_v48, %v2817_v51 }
 0x83a   : > { %v2767_v9 = vpop.f32.mrf.mxu0 }
 0x83b   : > { %v2788_v43 = vpack.c.bf16 %v2767_v9, %v2767_v9 }
 0x83d   : > { %v2820_v17 = vunpack.c.l.b16 %v2788_v43 }
 0x83f   : > { %v2829_v60 = vpack.c.b16 %v2820_v17, %v2819_v6 }
 0x842   : > { %v2770_v14 = vpop.f32.mrf.mxu0 }
 0x843   : > { %v2789_v57 = vpack.c.bf16 %v2770_v14, %v2770_v14 }
 0x845   : > { %v2821_v56 = vunpack.c.l.b16 %v2789_v57 }
 0x84a   : > { %v2772_v16 = vpop.f32.mrf.mxu0 }
 0x84b   : > { %v2790_v45 = vpack.c.bf16 %v2772_v16, %v2772_v16 }
 0x84d   : > { %v2822_v20 = vunpack.c.l.b16 %v2790_v45 }
 0x84f   : > { %v2830_v37 = vpack.c.b16 %v2822_v20, %v2821_v56 }
 0x851   : > { %6438 = vmatpush.lsf.bf16.msrb.mxu2 %v2830_v37 }
 0x855   : > { %2923 = vmatpush.bf16.msra.mxu2 %v6369_v31  ;;  %v7134_v31 = vld [vmem:[%s7775_s17 + $0x28] sm:$0xff] }
 0x859   : > { %6439 = vmatpush.lsf.bf16.msrb.mxu2 %v2829_v60 }
 0x85d   : > { %2924 = vmatpush.bf16.msra.mxu2 %v6368_v36  ;;  %v10949_v36 = vld [vmem:[#allocation27_spill] sm:$0xff] }
 0x861   : > { %6440 = vmatpush.lsf.bf16.msrb.mxu2 %v2828_v39 }
 0x865   : > { %2925 = vmatpush.bf16.msra.mxu2 %v6367_v58 }
 0x869   : > { %6441 = vmatpush.lsf.bf16.msrb.mxu2 %v2827_v28  ;;  %v7136_v28 = vld [vmem:[%s7775_s17 + $0x38] sm:$0xff] }
 0x86d   : > { %2926 = vmatpush.bf16.msra.mxu2 %v6366_v30 }
 0x871   : > { %6442 = vmatpush.lsf.bf16.msrb.mxu2 %v2826_v11 }
 0x875   : > { %2927 = vmatpush.bf16.msra.mxu2 %v6365_v34 }
 0x879   : > { %6443 = vmatpush.lsf.bf16.msrb.mxu2 %v2825_v50 }
 0x87d   : > { %2928 = vmatpush.bf16.msra.mxu2 %v6364_v41 }
 0x881   : > { %6444 = vmatpush.lsf.bf16.msrb.mxu2 %v2824_v38 }
 0x885   : > { %2929 = vmatpush.bf16.msra.mxu2 %v6363_v1 }
 0x889   : > { %6445 = vmatpush.lsf.bf16.msrb.mxu2 %v2823_v35 }
 0x88b   : > { %6446 = vllmr.16.mxu2 }
 0x88d   : > { %2930 = vmatpush.bf16.msra.mxu2 %v6362_v25 }
 0x8ac   : > { %6447 = vmatmul.lmr.bf16.vlgmr.msra.gmra.16.mxu2 }
 0x8b4   : > { %6448 = vmatmul.lmr.bf16.gmra.16.mxu2 }
 0x8bc   : > { %6449 = vmatmul.lmr.bf16.gmra.16.mxu2 }
 0x8c4   : > { %6450 = vmatmul.lmr.bf16.gmra.16.mxu2 }
 0x8cc   : > { %6451 = vmatmul.lmr.bf16.gmra.16.mxu2 }
 0x8d4   : > { %6452 = vmatmul.lmr.bf16.gmra.16.mxu2 }
 0x8dc   : > { %6453 = vmatmul.lmr.bf16.gmra.16.mxu2 }
 0x8e4   : > { %6454 = vmatmul.lmr.bf16.gmra.16.mxu2 }
 0x8ec   : > { %6455 = vmatmul.lmr.bf16.gmra.16.mxu2 }
 0x8f4   : > { %6456 = vmatmul.lmr.bf16.gmra.16.mxu2 }
 0x8fc   : > { %6457 = vmatmul.lmr.bf16.gmra.16.mxu2 }
 0x904   : > { %6458 = vmatmul.lmr.bf16.gmra.16.mxu2 }
 0x90c   : > { %6459 = vmatmul.lmr.bf16.gmra.16.mxu2 }
 0x914   : > { %6460 = vmatmul.lmr.bf16.gmra.16.mxu2 }
 0x91c   : > { %6461 = vmatmul.lmr.bf16.gmra.16.mxu2 }
 0x924   : > { %6462 = vmatmul.lmr.bf16.gmra.16.mxu2 }
 0x92f   : > { %v2932_v54 = vpop.f32.mrf.mxu2 }
 0x930   : > { %v2933_v46 = vadd.f32 %v9214_v18, %v2932_v54 }
 0x932   : > { %v9218_v9 = vadd.f32 %v7129_v5, %v2933_v46 }
 0x934   : > { %10943 = vst [vmem:[#allocation48_spill] sm:$0xff] %v9218_v9  ;;  %2990 = vadd.xlane.f32.xlu2 %v9218_v9 }
 0x937   : > { %v2934_v22 = vpop.f32.mrf.mxu2 }
 0x938   : > { %v2935_v52 = vadd.f32 %v9214_v18, %v2934_v22  ;;  %v7139_v22 = vld [vmem:[%s7775_s17 + $0x50] sm:$0xff] }
 0x93a   : > { %v9223_v14 = vadd.f32 %v7130_v13, %v2935_v52 }
 0x93c   : > { %10944 = vst [vmem:[#allocation35_spill] sm:$0xff] %v9223_v14  ;;  %2992 = vadd.xlane.f32.xlu0 %v9223_v14 }
 0x93f   : > { %v2937_v63 = vpop.f32.mrf.mxu2 }
 0x940   : > { %v2938_v57 = vadd.f32 %v9214_v18, %v2937_v63 }
 0x942   : > { %v9228_v16 = vadd.f32 %v7131_v10, %v2938_v57  ;;  %v7140_v10 = vld [vmem:[%s7775_s17 + $0x58] sm:$0xff] }
 0x944   : > { %10945 = vst [vmem:[#allocation55_spill] sm:$0xff] %v9228_v16  ;;  %2994 = vadd.xlane.f32.xlu2 %v9228_v16 }
 0x947   : > { %v2939_v43 = vpop.f32.mrf.mxu2 }
 0x948   : > { %v2940_v45 = vadd.f32 %v9214_v18, %v2939_v43 }
 0x94a   : > { %v9233_v62 = vadd.f32 %v7132_v53, %v2940_v45  ;;  %v6190_v45 = vld [vmem:[#allocation16 + $0xe0] sm:$0xf]  ;;  %v6400_v53 = vld [vmem:[#allocation16 + $0xec] sm:$0xf0] }
 0x94c   : > { %10946 = vst [vmem:[#allocation38_spill] sm:$0xff] %v9233_v62  ;;  %2996 = vadd.xlane.f32.xlu0 %v9233_v62 }
 0x94f   : > { %v2942_v56 = vpop.f32.mrf.mxu2 }
 0x950   : > { %v2943_v20 = vadd.f32 %v9214_v18, %v2942_v56  ;;  %v6398_v56 = vld [vmem:[#allocation16 + $0xe4] sm:$0xf] }
 0x952   : > { %v9238_v24 = vadd.f32 %v7133_v55, %v2943_v20  ;;  %v6191_v20 = vor.u32 %v6400_v53, %v6190_v45  ;;  %v6192_v55 = vld [vmem:[#allocation16 + $0xf0] sm:$0xf0]  ;;  %v6387_v53 = vld [vmem:[#allocation16 + $0x8c] sm:$0xf] }
 0x954   : > { %10947 = vst [vmem:[#allocation59_spill] sm:$0xff] %v9238_v24  ;;  %2998 = vadd.xlane.f32.xlu2 %v9238_v24  ;;  %3558 = vmatpush.bf16.msrb.mxu1 %v6191_v20 }
 0x957   : > { %v2944_v17 = vpop.f32.mrf.mxu2 }
 0x958   : > { %v2945_v37 = vadd.f32 %v9214_v18, %v2944_v17  ;;  %v6198_v17 = vld [vmem:[#allocation16 + $0xe8] sm:$0xf] }
 0x95a   : > { %v9243_v6 = vadd.f32 %v7134_v31, %v2945_v37  ;;  %v6401_v37 = vld [vmem:[#allocation16 + $0xf4] sm:$0xf0]  ;;  %v6195_v31 = vor.u32 %v6398_v56, %v6192_v55  ;;  %v6152_v56 = vld [vmem:[#allocation16 + $0x98] sm:$0xf0]  ;;  %v6126_v55 = vld [vmem:[#allocation16 + $0x60] sm:$0xf] }
 0x95b   : > { %v6155_v20 = vor.u32 %v6387_v53, %v6152_v56  ;;  %v6370_v56 = vld [vmem:[#allocation16 + $0x4] sm:$0xf] }
 0x95c   : > { %10948 = vst [vmem:[#allocation40_spill] sm:$0xff] %v9243_v6  ;;  %3000 = vadd.xlane.f32.xlu0 %v9243_v6  ;;  %3607 = vmatpush.bf16.msrb.mxu3 %v6195_v31 }
 0x95f   : > { %v2947_v33 = vpop.f32.mrf.mxu2 }
 0x960   : > { %v2948_v49 = vadd.f32 %v9214_v18, %v2947_v33  ;;  %v6199_v33 = vor.u32 %v6401_v37, %v6198_v17  ;;  %v6384_v17 = vld [vmem:[#allocation16 + $0x6c] sm:$0xf0]  ;;  %v6382_v37 = vld [vmem:[#allocation16 + $0x64] sm:$0xf] }
 0x961   : > { %v6127_v31 = vor.u32 %v6384_v17, %v6126_v55  ;;  %v6086_v55 = vld [vmem:[#allocation16 + $0x8] sm:$0xf] }
 0x962   : > { %v9258_v23 = vadd.f32 %v7135_v26, %v2948_v49  ;;  %3656 = vmatpush.bf16.msrb.mxu0 %v6199_v33  ;;  %v6396_v49 = vld [vmem:[#allocation16 + $0xcc] sm:$0xf0]  ;;  %v6176_v26 = vld [vmem:[#allocation16 + $0xd0] sm:$0xf0] }
 0x963   : > { %v6128_v33 = vld [vmem:[#allocation16 + $0x70] sm:$0xf0] }
 0x964   : > { %10950 = vst [vmem:[#allocation45_spill] sm:$0xff] %v9258_v23 }
 0x967   : > { %v2949_v48 = vpop.f32.mrf.mxu2 }
 0x968   : > { %v2950_v30 = vadd.f32 %v9214_v18, %v2949_v48 }
 0x96a   : > { %v9269_v12 = vadd.f32 %v7136_v28, %v2950_v30  ;;  %v6184_v28 = vld [vmem:[#allocation16 + $0xd8] sm:$0xf0] }
 0x96c   : > { %10951 = vst [vmem:[#allocation31_spill] sm:$0xff] %v9269_v12 }
 0x96f   : > { %v2952_v0 = vpop.f32.mrf.mxu2 }
 0x970   : > { %v2953_v34 = vadd.f32 %v9214_v18, %v2952_v0  ;;  %v6397_v0 = vld [vmem:[#allocation16 + $0xd4] sm:$0xf0] }
 0x972   : > { %v9280_v41 = vadd.f32 %v7137_v27, %v2953_v34  ;;  %v6158_v34 = vld [vmem:[#allocation16 + $0xa0] sm:$0xf]  ;;  %v6160_v27 = vld [vmem:[#allocation16 + $0xb0] sm:$0xf0] }
 0x974   : > { %10952 = vst [vmem:[#allocation44_spill] sm:$0xff] %v9280_v41 }
 0x977   : > { %v2954_v47 = vpop.f32.mrf.mxu2 }
 0x978   : > { %v2955_v3 = vadd.f32 %v9214_v18, %v2954_v47  ;;  %v6390_v47 = vld [vmem:[#allocation16 + $0xa4] sm:$0xf] }
 0x97a   : > { %v9291_v38 = vadd.f32 %v7138_v4, %v2955_v3  ;;  %v6393_v3 = vld [vmem:[#allocation16 + $0xb4] sm:$0xf0]  ;;  %v6168_v4 = vld [vmem:[#allocation16 + $0xb8] sm:$0xf0] }
 0x97c   : > { %10953 = vst [vmem:[#allocation50_spill] sm:$0xff] %v9291_v38 }
 0x97f   : > { %v2957_v1 = vpop.f32.mrf.mxu2 }
 0x980   : > { %v2958_v35 = vadd.f32 %v9214_v18, %v2957_v1  ;;  %v6391_v1 = vld [vmem:[#allocation16 + $0xac] sm:$0xf] }
 0x982   : > { %v9302_v52 = vadd.f32 %v7139_v22, %v2958_v35  ;;  %v6142_v35 = vld [vmem:[#allocation16 + $0x80] sm:$0xf] }
 0x984   : > { %10954 = vst [vmem:[#allocation29_spill] sm:$0xff] %v9302_v52 }
 0x987   : > { %v2959_v13 = vpop.f32.mrf.mxu2 }
 0x988   : > { %v2960_v57 = vadd.f32 %v9214_v18, %v2959_v13  ;;  %v6144_v13 = vld [vmem:[#allocation16 + $0x90] sm:$0xf0] }
 0x98a   : > { %v9309_v43 = vadd.f32 %v7140_v10, %v2960_v57  ;;  %v6389_v57 = vld [vmem:[#allocation16 + $0x94] sm:$0xf0] }
 0x98c   : > { %10955 = vst [vmem:[#allocation51_spill] sm:$0xff] %v9309_v43 }
 0x9a7   : > { %v2991_v7 = vpop.xlane.xlu2 %2990 }
 0x9a8   : > { %v3022_v29 = vmul.f32 %v2991_v7, %v10949_v36  ;;  %v6399_v7 = vld [vmem:[#allocation16 + $0xec] sm:$0xf] }
 0x9aa   : > { %v9248_v51 = vsub.f32 %v9218_v9, %v3022_v29  ;;  %v6200_v29 = vld [vmem:[#allocation16 + $0xf8] sm:$0xf0] }
 0x9ab   : > { %v6203_v48 = vor.u32 %v6399_v7, %v6200_v29  ;;  %v6134_v7 = vld [vmem:[#allocation16 + $0x68] sm:$0xf]  ;;  %v6385_v29 = vld [vmem:[#allocation16 + $0x74] sm:$0xf0] }
 0x9ac   : > { %v3054_v60 = vmul.f32 %v9248_v51, %v9248_v51 }
 0x9ad   : > { %3705 = vmatpush.bf16.msra.mxu2 %v6203_v48  ;;  %v6131_v48 = vor.u32 %v6382_v37, %v6128_v33  ;;  %v6373_v37 = vld [vmem:[#allocation16 + $0x14] sm:$0xf0]  ;;  %v6088_v33 = vld [vmem:[#allocation16 + $0x18] sm:$0xf0] }
 0x9ae   : > { %3070 = vadd.xlane.f32.xlu2 %v3054_v60  ;;  %v6174_v60 = vld [vmem:[#allocation16 + $0xc0] sm:$0xf] }
 0x9af   : > { %v2993_v44 = vpop.xlane.xlu0 %2992 }
 0x9b0   : > { %v3023_v58 = vmul.f32 %v2993_v44, %v10949_v36  ;;  %v6394_v44 = vld [vmem:[#allocation16 + $0xc4] sm:$0xf] }
 0x9b1   : > { %v6179_v30 = vor.u32 %v6394_v44, %v6176_v26  ;;  %v6136_v44 = vld [vmem:[#allocation16 + $0x78] sm:$0xf0]  ;;  %v6110_v26 = vld [vmem:[#allocation16 + $0x40] sm:$0xf] }
 0x9b2   : > { %v9255_v42 = vsub.f32 %v9223_v14, %v3023_v58  ;;  %v6175_v58 = vor.u32 %v6396_v49, %v6174_v60  ;;  %v6135_v60 = vor.u32 %v6385_v29, %v6134_v7  ;;  %v6383_v49 = vld [vmem:[#allocation16 + $0x6c] sm:$0xf]  ;;  %v6087_v7 = vor.u32 %v6373_v37, %v6086_v55 }
 0x9b3   : > { %3608 = vmatpush.bf16.msrb.mxu3 %v6179_v30 }
 0x9b4   : > { %v3055_v39 = vmul.f32 %v9255_v42, %v9255_v42  ;;  %3559 = vmatpush.bf16.msrb.mxu1 %v6175_v58  ;;  %v6139_v58 = vor.u32 %v6383_v49, %v6136_v44 }
 0x9b6   : > { %3002 = vadd.xlane.f32.xlu2 %v9258_v23  ;;  %3072 = vadd.xlane.f32.xlu0 %v3055_v39  ;;  %v6182_v39 = vld [vmem:[#allocation16 + $0xc8] sm:$0xf] }
 0x9b7   : > { %v2995_v59 = vpop.xlane.xlu2 %2994 }
 0x9b8   : > { %v3024_v32 = vmul.f32 %v2995_v59, %v10949_v36  ;;  %v6183_v59 = vor.u32 %v6397_v0, %v6182_v39  ;;  %v6380_v39 = vld [vmem:[#allocation16 + $0x4c] sm:$0xf0]  ;;  %v6378_v0 = vld [vmem:[#allocation16 + $0x44] sm:$0xf] }
 0x9b9   : > { %v6111_v30 = vor.u32 %v6380_v39, %v6110_v26 }
 0x9ba   : > { %v9266_v15 = vsub.f32 %v9228_v16, %v3024_v32  ;;  %v6395_v32 = vld [vmem:[#allocation16 + $0xcc] sm:$0xf]  ;;  %3657 = vmatpush.bf16.msrb.mxu0 %v6183_v59  ;;  %v6112_v59 = vld [vmem:[#allocation16 + $0x50] sm:$0xf0] }
 0x9bc   : > { %v3056_v8 = vmul.f32 %v9266_v15, %v9266_v15 }
 0x9be   : > { %3074 = vadd.xlane.f32.xlu2 %v3056_v8  ;;  %3004 = vadd.xlane.f32.xlu0 %v9269_v12  ;;  %v6187_v8 = vor.u32 %v6395_v32, %v6184_v28  ;;  %v6118_v32 = vld [vmem:[#allocation16 + $0x48] sm:$0xf]  ;;  %v6381_v28 = vld [vmem:[#allocation16 + $0x54] sm:$0xf0] }
 0x9bf   : > { %v2997_v61 = vpop.xlane.xlu0 %2996 }
 0x9c0   : > { %v3025_v21 = vmul.f32 %v2997_v61, %v10949_v36  ;;  %v6392_v61 = vld [vmem:[#allocation16 + $0xac] sm:$0xf0]  ;;  %3706 = vmatpush.bf16.msra.mxu2 %v6187_v8  ;;  %v6115_v8 = vor.u32 %v6378_v0, %v6112_v59 }
 0x9c2   : > { %v9277_v11 = vsub.f32 %v9233_v62, %v3025_v21  ;;  %v6159_v21 = vor.u32 %v6392_v61, %v6158_v34  ;;  %v6119_v34 = vor.u32 %v6381_v28, %v6118_v32  ;;  %v6379_v61 = vld [vmem:[#allocation16 + $0x4c] sm:$0xf] }
 0x9c4   : > { %v3057_v19 = vmul.f32 %v9277_v11, %v9277_v11  ;;  %3560 = vmatpush.bf16.msrb.mxu1 %v6159_v21 }
 0x9c6   : > { %3006 = vadd.xlane.f32.xlu2 %v9280_v41  ;;  %3076 = vadd.xlane.f32.xlu0 %v3057_v19  ;;  %v6166_v19 = vld [vmem:[#allocation16 + $0xa8] sm:$0xf] }
 0x9c7   : > { %v2999_v2 = vpop.xlane.xlu2 %2998 }
 0x9c8   : > { %v3026_v50 = vmul.f32 %v2999_v2, %v10949_v36  ;;  %v6163_v2 = vor.u32 %v6390_v47, %v6160_v27  ;;  %v6120_v47 = vld [vmem:[#allocation16 + $0x58] sm:$0xf0]  ;;  %v6094_v27 = vld [vmem:[#allocation16 + $0x20] sm:$0xf] }
 0x9c9   : > { %v6123_v21 = vor.u32 %v6379_v61, %v6120_v47 }
 0x9ca   : > { %v9288_v40 = vsub.f32 %v9238_v24, %v3026_v50  ;;  %v6167_v50 = vor.u32 %v6393_v3, %v6166_v19  ;;  %3609 = vmatpush.bf16.msrb.mxu3 %v6163_v2  ;;  %v6376_v19 = vld [vmem:[#allocation16 + $0x2c] sm:$0xf0]  ;;  %v6374_v3 = vld [vmem:[#allocation16 + $0x24] sm:$0xf] }
 0x9cc   : > { %v3058_v25 = vmul.f32 %v9288_v40, %v9288_v40  ;;  %3658 = vmatpush.bf16.msrb.mxu0 %v6167_v50  ;;  %v6095_v50 = vor.u32 %v6376_v19, %v6094_v27 }
 0x9ce   : > { %3078 = vadd.xlane.f32.xlu2 %v3058_v25  ;;  %3008 = vadd.xlane.f32.xlu0 %v9291_v38  ;;  %v6171_v25 = vor.u32 %v6391_v1, %v6168_v4  ;;  %v6096_v1 = vld [vmem:[#allocation16 + $0x30] sm:$0xf0]  ;;  %v6102_v4 = vld [vmem:[#allocation16 + $0x28] sm:$0xf] }
 0x9cf   : > { %v3001_v54 = vpop.xlane.xlu0 %3000 }
 0x9d0   : > { %v3027_v46 = vmul.f32 %v3001_v54, %v10949_v36  ;;  %v6388_v54 = vld [vmem:[#allocation16 + $0x8c] sm:$0xf0]  ;;  %3707 = vmatpush.bf16.msra.mxu2 %v6171_v25  ;;  %v6377_v25 = vld [vmem:[#allocation16 + $0x34] sm:$0xf0] }
 0x9d1   : > { %v6143_v22 = vor.u32 %v6388_v54, %v6142_v35  ;;  %v6099_v54 = vor.u32 %v6374_v3, %v6096_v1  ;;  %v7141_v1 = vld [vmem:[%s7775_s17 + $0x60] sm:$0xff] }
 0x9d2   : > { %v9299_v5 = vsub.f32 %v9243_v6, %v3027_v46  ;;  %v6386_v46 = vld [vmem:[#allocation16 + $0x84] sm:$0xf] }
 0x9d3   : > { %v6147_v10 = vor.u32 %v6386_v46, %v6144_v13  ;;  %3561 = vmatpush.bf16.msrb.mxu1 %v6143_v22  ;;  %v6103_v46 = vor.u32 %v6377_v25, %v6102_v4  ;;  %v6375_v22 = vld [vmem:[#allocation16 + $0x2c] sm:$0xf]  ;;  %v6104_v13 = vld [vmem:[#allocation16 + $0x38] sm:$0xf0] }
 0x9d4   : > { %v3059_v63 = vmul.f32 %v9299_v5, %v9299_v5  ;;  %3708 = vmatpush.bf16.msra.mxu2 %v6155_v20  ;;  %v6080_v20 = vld [vmem:[#allocation16 + $0x10] sm:$0xf0] }
 0x9d5   : > { %3610 = vmatpush.bf16.msrb.mxu3 %v6147_v10  ;;  %v6078_v10 = vld [vmem:[#allocation16] sm:$0xf]  ;;  %v6083_v17 = vor.u32 %v6370_v56, %v6080_v20 }
 0x9d6   : > { %3010 = vadd.xlane.f32.xlu2 %v9302_v52  ;;  %3080 = vadd.xlane.f32.xlu0 %v3059_v63  ;;  %v6150_v63 = vld [vmem:[#allocation16 + $0x88] sm:$0xf] }
 0x9d7   : > { %v6151_v45 = vor.u32 %v6389_v57, %v6150_v63  ;;  %3562 = vmatpush.bf16.msrb.mxu1 %v6127_v31  ;;  %v6107_v63 = vor.u32 %v6375_v22, %v6104_v13  ;;  %v6371_v31 = vld [vmem:[#allocation16 + $0xc] sm:$0xf] }
 0x9d8   : > { %3709 = vmatpush.bf16.msra.mxu2 %v6139_v58  ;;  %v6091_v29 = vor.u32 %v6371_v31, %v6088_v33  ;;  %v7142_v33 = vld [vmem:[%s7775_s17 + $0x68] sm:$0xff] }
 0x9d9   : > { %3659 = vmatpush.bf16.msrb.mxu0 %v6151_v45  ;;  %3611 = vmatpush.bf16.msrb.mxu3 %v6131_v48  ;;  %v6372_v45 = vld [vmem:[#allocation16 + $0xc] sm:$0xf0]  ;;  %v2962_v48 = vpop.f32.mrf.mxu2 }
 0x9da   : > { %v6079_v53 = vor.u32 %v6372_v45, %v6078_v10  ;;  %v2963_v28 = vadd.f32 %v9214_v18, %v2962_v48 }
 0x9db   : > { %3563 = vmatpush.bf16.msrb.mxu1 %v6111_v30 }
 0x9dc   : > { %3710 = vmatpush.bf16.msra.mxu2 %v6123_v21  ;;  %v9329_v4 = vadd.f32 %v7141_v1, %v2963_v28 }
 0x9dd   : > { %3660 = vmatpush.bf16.msrb.mxu0 %v6135_v60  ;;  %3612 = vmatpush.bf16.msrb.mxu3 %v6115_v8 }
 0x9de   : > { %3012 = vadd.xlane.f32.xlu0 %v9309_v43  ;;  %10956 = vst [vmem:[#allocation32_spill] sm:$0xff] %v9329_v4 }
 0x9df   : > { %3564 = vmatpush.bf16.msrb.mxu1 %v6095_v50 }
 0x9e0   : > { %3711 = vmatpush.bf16.msra.mxu2 %v6107_v63 }
 0x9e1   : > { %3661 = vmatpush.bf16.msrb.mxu0 %v6119_v34  ;;  %3613 = vmatpush.bf16.msrb.mxu3 %v6099_v54  ;;  %v2964_v27 = vpop.f32.mrf.mxu2 }
 0x9e2   : > { %v2965_v22 = vadd.f32 %v9214_v18, %v2964_v27 }
 0x9e3   : > { %3565 = vmatpush.bf16.msrb.mxu1 %v6079_v53 }
 0x9e4   : > { %3712 = vmatpush.bf16.msra.mxu2 %v6091_v29 }
 0x9e5   : > { %3662 = vmatpush.bf16.msrb.mxu0 %v6103_v46  ;;  %3614 = vmatpush.bf16.msrb.mxu3 %v6083_v17 }
 0x9e9   : > { %3663 = vmatpush.bf16.msrb.mxu0 %v6087_v7  ;;  %v9349_v7 = vadd.f32 %v7142_v33, %v2965_v22  ;;  %v2967_v29 = vpop.f32.mrf.mxu2 }
 0x9eb   : > { %10957 = vst [vmem:[#allocation58_spill] sm:$0xff] %v9349_v7 }
 0xa21   : > { %v3071_v2 = vpop.xlane.xlu2 %3070 }
 0xa22   : > { %v3102_v35 = vmul.f32 %v3071_v2, %v10949_v36 }
 0xa24   : > { %v3118_v57 = vadd.f32 1e-05, %v3102_v35 }
 0xa26   : > { %6968 = vrsqrt.f32 %v3118_v57  ;;  %vm3140_vm3 = vweird.f32 %v3118_v57 }
 0xa29   : > { %v3003_v60 = vpop.xlane.xlu2 %3002  ;;  %v3073_v49 = vpop.xlane.xlu0 %3072 }
 0xa2a   : > { %v3028_v44 = vmul.f32 %v3003_v60, %v10949_v36  ;;  %v3103_v58 = vmul.f32 %v3073_v49, %v10949_v36 }
 0xa2c   : > { %v6969_v26 = vpop.eup %6968  ;;  %v9316_v39 = vsub.f32 %v9258_v23, %v3028_v44  ;;  %v3119_v0 = vadd.f32 1e-05, %v3103_v58  ;;  %v2968_v58 = vadd.f32 %v9214_v18, %v2967_v29 }
 0xa2d   : > { %v3135_v30 = vmul.f32 %v6969_v26, %v3118_v57  ;;  %vm3141_vm2 = vweird.f32 %v6969_v26  ;;  %v9340_v57 = vld [vmem:[#allocation13] ss:$0 sm:$0xff] }
 0xa2e   : > { %6970 = vrsqrt.f32 %v3119_v0  ;;  %v3060_v59 = vmul.f32 %v9316_v39, %v9316_v39  ;;  %vm3142_vm4 = vmor %vm3140_vm3, %vm3141_vm2  ;;  %vm3150_vm6 = vweird.f32 %v3119_v0 }
 0xa2f   : > { %v3136_v32 = vmul.f32 %v6969_v26, %v3135_v30 }
 0xa30   : > { %3082 = vadd.xlane.f32.xlu2 %v3060_v59 }
 0xa31   : > { %v3137_v8 = vmul.f32 0.5, %v3136_v32  ;;  %v3075_v34 = vpop.xlane.xlu2 %3074  ;;  %v3005_v61 = vpop.xlane.xlu0 %3004 }
 0xa32   : > { %v3104_v47 = vmul.f32 %v3075_v34, %v10949_v36  ;;  %v3029_v21 = vmul.f32 %v3005_v61, %v10949_v36 }
 0xa33   : > { %v3138_v19 = vsub.f32 1.5, %v3137_v8 }
 0xa34   : > { %v6971_v3 = vpop.eup %6970  ;;  %v9323_v2 = vadd.f32 1e-05, %v3104_v47  ;;  %v9326_v50 = vsub.f32 %v9269_v12, %v3029_v21  ;;  %v7143_v21 = vld [vmem:[%s7775_s17 + $0x70] sm:$0xff] }
 0xa35   : > { %v3139_v25 = vmul.f32 %v6969_v26, %v3138_v19  ;;  %v3145_v35 = vmul.f32 %v6971_v3, %v3119_v0  ;;  %vm3151_vm5 = vweird.f32 %v6971_v3  ;;  %v9367_v27 = vadd.f32 %v7143_v21, %v2968_v58  ;;  %v7144_v58 = vld [vmem:[%s7775_s17 + $0x78] sm:$0xff]  ;;  %s11048_s17 = sld [smem:[#allocation76_spill]] }
 0xa36   : > { %6972 = vrsqrt.f32 %v9323_v2  ;;  %v3061_v54 = vmul.f32 %v9326_v50, %v9326_v50  ;;  %vm3152_vm7 = vmor %vm3150_vm6, %vm3151_vm5  ;;  %vm3160_vm9 = vweird.f32 %v9323_v2 }
 0xa37   : > { %v3146_v46 = vmul.f32 %v6971_v3, %v3145_v35  ;;  %v3143_v13 = vsel %vm3142_vm4, %v6969_v26, %v3139_v25  ;;  %v9358_v26 = vld [vmem:[#allocation14] ss:$0 sm:$0xff]  ;;  %10958 = vst [vmem:[#allocation39_spill] sm:$0xff] %v9367_v27 }
 0xa38   : > { %3014 = vadd.xlane.f32.xlu2 %v9329_v4  ;;  %3084 = vadd.xlane.f32.xlu0 %v3061_v54  ;;  %v3294_v17 = vmul.f32 %v3143_v13, %v9248_v51 }
 0xa39   : > { %v3147_v63 = vmul.f32 0.5, %v3146_v46  ;;  %v3007_v10 = vpop.xlane.xlu2 %3006  ;;  %v3077_v45 = vpop.xlane.xlu0 %3076 }
 0xa3a   : > { %v3030_v53 = vmul.f32 %v3007_v10, %v10949_v36  ;;  %v3105_v56 = vmul.f32 %v3077_v45, %v10949_v36  ;;  %v3313_v30 = vmul.f32 %v9340_v57, %v3294_v17 }
 0xa3b   : > { %v3148_v20 = vsub.f32 1.5, %v3147_v63  ;;  %v2969_v63 = vpop.f32.mrf.mxu2  ;;  %s5726_s2 = scalar_lea.hbm %s11048_s17, %s6434_s14  ;;  %s7467_s20 = scalar_lea.hbm %s11048_s17, 256 }
 0xa3c   : > { %v9338_v55 = vpop.eup %6972  ;;  %v9344_v37 = vsub.f32 %v9280_v41, %v3030_v53  ;;  %v9346_v31 = vadd.f32 1e-05, %v3105_v56  ;;  %v2970_v33 = vadd.f32 %v9214_v18, %v2969_v63  ;;  %s5729_s22 = sshll.u32 %s5726_s2, 4  ;;  %s5730_s22 = int_to_ptr.hbm [resolvable:$true] %s5729_s22 }
 0xa3d   : > { %v3149_v48 = vmul.f32 %v6971_v3, %v3148_v20  ;;  %v3155_v60 = vmul.f32 %v9338_v55, %v9323_v2  ;;  %vm3161_vm8 = vweird.f32 %v9338_v55  ;;  %s7461_s18 = sshra.s32 %s5730_s22, 4  ;;  %s7462_s18 = int_to_ptr.hbm [resolvable:$true] %s7461_s18 }
 0xa3e   : > { %6974 = vrsqrt.f32 %v9346_v31  ;;  %v3062_v51 = vmul.f32 %v9344_v37, %v9344_v37  ;;  %vm9380_vm10 = vmor %vm3160_vm9, %vm3161_vm8  ;;  %vm3170_vm12 = vweird.f32 %v9346_v31  ;;  %s7463_s24 = scalar_lea.hbm %s7462_s18, 128  ;;  %p7468_p13 = scmp.lt.s32.totalorder %s7462_s18, %s11048_s17 }
 0xa3f   : > { %v3153_v49 = vsel %vm3152_vm7, %v6971_v3, %v3149_v48  ;;  %v3156_v44 = vmul.f32 %v9338_v55, %v3155_v60  ;;  %v3332_v3 = vadd.f32 %v9358_v26, %v3313_v30  ;;  %v9397_v30 = vadd.f32 %v7144_v58, %v2970_v33  ;;  %p7464_p1 = scmp.ne.s32.totalorder %s7462_s18, %s7463_s24  ;;  %p7469_p7 = scmp.lt.s32.totalorder %s7467_s20, %s7463_s24 }
 0xa40   : > { %v3295_v0 = vmul.f32 %v3153_v49, %v9255_v42  ;;  %3086 = vadd.xlane.f32.xlu2 %v3062_v51  ;;  %3016 = vadd.xlane.f32.xlu0 %v9349_v7 }
 0xa41   : > { %v3157_v59 = vmul.f32 0.5, %v3156_v44  ;;  %v3079_v32 = vpop.xlane.xlu2 %3078  ;;  %v3009_v28 = vpop.xlane.xlu0 %3008  ;;  %10961 = vst [vmem:[#allocation41_spill] sm:$0xff] %v9397_v30  ;;  %p7465_p3 = pnand %p7464_p1, %p7736_p0  ;;  %p7470_p8 = por %p7469_p7, %p7468_p13 }
 0xa42   : > { %v3314_v8 = vmul.f32 %v9340_v57, %v3295_v0  ;;  %v3106_v34 = vmul.f32 %v3079_v32, %v10949_v36  ;;  %v3031_v61 = vmul.f32 %v3009_v28, %v10949_v36 }
 0xa43   : > { %v3158_v47 = vsub.f32 1.5, %v3157_v59  ;;  %p7466_p4 = pneg %p7465_p3 }
 0xa44   : > { %v6975_v19 = vpop.eup %6974  ;;  %v3333_v42 = vadd.f32 %v9358_v26, %v3314_v8  ;;  %v3122_v1 = vadd.f32 1e-05, %v3106_v34  ;;  %v9372_v25 = vsub.f32 %v9291_v38, %v3031_v61 }
 0xa45   : > { %v3159_v35 = vmul.f32 %v9338_v55, %v3158_v47  ;;  %v3165_v54 = vmul.f32 %v6975_v19, %v9346_v31  ;;  %vm3171_vm11 = vweird.f32 %v6975_v19  ;;  %p7471_p9 = pnand %p7470_p8, %p7466_p4 }
 0xa46   : > { %6976 = vrsqrt.f32 %v3122_v1  ;;  %v3348_v46 = vpack.c.bf16 %v3333_v42, %v3332_v3  ;;  %v3063_v22 = vmul.f32 %v9372_v25, %v9372_v25  ;;  %vm3172_vm13 = vmor %vm3170_vm12, %vm3171_vm11  ;;  %vm3180_vm15 = vweird.f32 %v3122_v1 }
 0xa47   : > { %v3166_v13 = vmul.f32 %v6975_v19, %v3165_v54  ;;  %v3163_v45 = vsel %vm9380_vm10, %v9338_v55, %v3159_v35 }
 0xa48   : > { %3018 = vadd.xlane.f32.xlu2 %v9367_v27  ;;  %3566 = vmatmul.bf16.vlgmr.msrb.gmra.mxu1 %v3348_v46  ;;  %v3296_v60 = vmul.f32 %v3163_v45, %v9266_v15 }
 0xa49   : > { %v3167_v53 = vmul.f32 0.5, %v3166_v13  ;;  %3615 = vmatmul.bf16.vlgmr.msrb.gmra.mxu3 %v3348_v46  ;;  %3664 = vmatmul.bf16.vlgmr.msrb.gmra.mxu0 %v3348_v46  ;;  %v3011_v56 = vpop.xlane.xlu2 %3010  ;;  %v3081_v20 = vpop.xlane.xlu0 %3080 }
 0xa4a   : > { %3713 = vmatmul.bf16.vlgmr.msra.gmra.mxu2 %v3348_v46  ;;  %3088 = vadd.xlane.f32.xlu0 %v3063_v22  ;;  %v3032_v2 = vmul.f32 %v3011_v56, %v10949_v36  ;;  %v3107_v17 = vmul.f32 %v3081_v20, %v10949_v36  ;;  %v3315_v32 = vmul.f32 %v9340_v57, %v3296_v60 }
 0xa4b   : > { %v3168_v29 = vsub.f32 1.5, %v3167_v53 }
 0xa4c   : > { %v6977_v48 = vpop.eup %6976  ;;  %v9393_v55 = vsub.f32 %v9302_v52, %v3032_v2  ;;  %v3123_v51 = vadd.f32 1e-05, %v3107_v17 }
 0xa4d   : > { %v3169_v49 = vmul.f32 %v6975_v19, %v3168_v29  ;;  %v3175_v44 = vmul.f32 %v6977_v48, %v3122_v1  ;;  %vm3181_vm14 = vweird.f32 %v6977_v48 }
 0xa4e   : > { %6978 = vrsqrt.f32 %v3123_v51  ;;  %v3064_v18 = vmul.f32 %v9393_v55, %v9393_v55  ;;  %vm3182_vm0 = vmor %vm3180_vm15, %vm3181_vm14  ;;  %vm3190_vm2 = vweird.f32 %v3123_v51 }
 0xa4f   : > { %v3173_v0 = vsel %vm3172_vm13, %v6975_v19, %v3169_v49  ;;  %v3176_v59 = vmul.f32 %v6977_v48, %v3175_v44  ;;  %v3334_v19 = vadd.f32 %v9358_v26, %v3315_v32 }
 0xa50   : > { %v3297_v15 = vmul.f32 %v3173_v0, %v9277_v11  ;;  %3090 = vadd.xlane.f32.xlu2 %v3064_v18 }
 0xa51   : > { %v3177_v28 = vmul.f32 0.5, %v3176_v59  ;;  %v3013_v8 = vpop.xlane.xlu0 %3012 }
 0xa52   : > { %3020 = vadd.xlane.f32.xlu0 %v9397_v30  ;;  %v3033_v31 = vmul.f32 %v3013_v8, %v10949_v36  ;;  %v3316_v34 = vmul.f32 %v9340_v57, %v3297_v15 }
 0xa53   : > { %v3178_v61 = vsub.f32 1.5, %v3177_v28 }
 0xa54   : > { %v6979_v47 = vpop.eup %6978  ;;  %v9407_v21 = vsub.f32 %v9309_v43, %v3033_v31  ;;  %v3335_v11 = vadd.f32 %v9358_v26, %v3316_v34 }
 0xa55   : > { %v3179_v3 = vmul.f32 %v6977_v48, %v3178_v61  ;;  %v3185_v42 = vmul.f32 %v6979_v47, %v3123_v51  ;;  %vm3191_vm1 = vweird.f32 %v6979_v47 }
 0xa56   : > { %v3349_v35 = vpack.c.bf16 %v3335_v11, %v3334_v19  ;;  %v3065_v54 = vmul.f32 %v9407_v21, %v9407_v21  ;;  %vm3192_vm3 = vmor %vm3190_vm2, %vm3191_vm1 }
 0xa57   : > { %v3186_v46 = vmul.f32 %v6979_v47, %v3185_v42  ;;  %v3183_v22 = vsel %vm3182_vm0, %v6977_v48, %v3179_v3 }
 0xa58   : > { %3571 = vmatmul.bf16.gmra.mxu1 %v3349_v35  ;;  %v3298_v10 = vmul.f32 %v3183_v22, %v9288_v40 }
 0xa59   : > { %v3187_v13 = vmul.f32 0.5, %v3186_v46  ;;  %3620 = vmatmul.bf16.gmra.mxu3 %v3349_v35  ;;  %3669 = vmatmul.bf16.gmra.mxu0 %v3349_v35 }
 0xa5a   : > { %3718 = vmatmul.bf16.gmra.mxu2 %v3349_v35  ;;  %3092 = vadd.xlane.f32.xlu0 %v3065_v54  ;;  %v3317_v1 = vmul.f32 %v9340_v57, %v3298_v10 }
 0xa5b   : > { %v3188_v63 = vsub.f32 1.5, %v3187_v13 }
 0xa5c   : > { %v3336_v2 = vadd.f32 %v9358_v26, %v3317_v1 }
 0xa5d   : > { %v3189_v45 = vmul.f32 %v6979_v47, %v3188_v63 }
 0xa5f   : > { %v3193_v53 = vsel %vm3192_vm3, %v6979_v47, %v3189_v45 }
 0xa60   : > { %v3299_v56 = vmul.f32 %v3193_v53, %v9299_v5 }
 0xa62   : > { %v3318_v20 = vmul.f32 %v9340_v57, %v3299_v56 }
 0xa64   : > { %v3337_v17 = vadd.f32 %v9358_v26, %v3318_v20 }
 0xa66   : > { %v3350_v33 = vpack.c.bf16 %v3337_v17, %v3336_v2 }
 0xa68   : > { %3576 = vmatmul.bf16.gmra.mxu1 %v3350_v33 }
 0xa69   : > { %3625 = vmatmul.bf16.gmra.mxu3 %v3350_v33  ;;  %3674 = vmatmul.bf16.gmra.mxu0 %v3350_v33 }
 0xa6a   : > { %3723 = vmatmul.bf16.gmra.mxu2 %v3350_v33 }
 0xaa3   : > { %v3083_v40 = vpop.xlane.xlu2 %3082 }
 0xaa4   : > { %v3108_v29 = vmul.f32 %v3083_v40, %v10949_v36 }
 0xaa6   : > { %v3124_v48 = vadd.f32 1e-05, %v3108_v29 }
 0xaa8   : > { %6980 = vrsqrt.f32 %v3124_v48  ;;  %vm3200_vm5 = vweird.f32 %v3124_v48 }
 0xaab   : > { %v3015_v60 = vpop.xlane.xlu2 %3014  ;;  %v3085_v5 = vpop.xlane.xlu0 %3084 }
 0xaac   : > { %v3034_v51 = vmul.f32 %v3015_v60, %v10949_v36  ;;  %v3109_v49 = vmul.f32 %v3085_v5, %v10949_v36 }
 0xaae   : > { %v6981_v44 = vpop.eup %6980  ;;  %v9423_v58 = vsub.f32 %v9329_v4, %v3034_v51  ;;  %v3125_v18 = vadd.f32 1e-05, %v3109_v49 }
 0xaaf   : > { %v3195_v0 = vmul.f32 %v6981_v44, %v3124_v48  ;;  %vm3201_vm4 = vweird.f32 %v6981_v44 }
 0xab0   : > { %6982 = vrsqrt.f32 %v3125_v18  ;;  %v3066_v59 = vmul.f32 %v9423_v58, %v9423_v58  ;;  %vm3202_vm6 = vmor %vm3200_vm5, %vm3201_vm4  ;;  %vm3210_vm8 = vweird.f32 %v3125_v18 }
 0xab1   : > { %v3196_v15 = vmul.f32 %v6981_v44, %v3195_v0 }
 0xab2   : > { %3094 = vadd.xlane.f32.xlu2 %v3066_v59 }
 0xab3   : > { %v3197_v32 = vmul.f32 0.5, %v3196_v15  ;;  %v3087_v28 = vpop.xlane.xlu2 %3086  ;;  %v3017_v8 = vpop.xlane.xlu0 %3016 }
 0xab4   : > { %v3110_v31 = vmul.f32 %v3087_v28, %v10949_v36  ;;  %v3035_v34 = vmul.f32 %v3017_v8, %v10949_v36 }
 0xab5   : > { %v3198_v61 = vsub.f32 1.5, %v3197_v32 }
 0xab6   : > { %v6983_v47 = vpop.eup %6982  ;;  %v3126_v19 = vadd.f32 1e-05, %v3110_v31  ;;  %v9430_v11 = vsub.f32 %v9349_v7, %v3035_v34 }
 0xab7   : > { %v3199_v3 = vmul.f32 %v6981_v44, %v3198_v61  ;;  %v3205_v42 = vmul.f32 %v6983_v47, %v3125_v18  ;;  %vm3211_vm7 = vweird.f32 %v6983_v47 }
 0xab8   : > { %6984 = vrsqrt.f32 %v3126_v19  ;;  %v3067_v35 = vmul.f32 %v9430_v11, %v9430_v11  ;;  %vm3212_vm9 = vmor %vm3210_vm8, %vm3211_vm7  ;;  %vm3220_vm11 = vweird.f32 %v3126_v19 }
 0xab9   : > { %v3206_v54 = vmul.f32 %v6983_v47, %v3205_v42  ;;  %v3203_v46 = vsel %vm3202_vm6, %v6981_v44, %v3199_v3 }
 0xaba   : > { %3096 = vadd.xlane.f32.xlu0 %v3067_v35  ;;  %v3300_v10 = vmul.f32 %v3203_v46, %v9316_v39 }
 0xabb   : > { %v3207_v22 = vmul.f32 0.5, %v3206_v54  ;;  %v3019_v13 = vpop.xlane.xlu2 %3018 }
 0xabc   : > { %v3036_v63 = vmul.f32 %v3019_v13, %v10949_v36  ;;  %v3319_v48 = vmul.f32 %v9340_v57, %v3300_v10 }
 0xabd   : > { %v3208_v45 = vsub.f32 1.5, %v3207_v22  ;;  %v3089_v53 = vpop.xlane.xlu0 %3088 }
 0xabe   : > { %v6985_v56 = vpop.eup %6984  ;;  %v9437_v1 = vsub.f32 %v9367_v27, %v3036_v63  ;;  %v3111_v20 = vmul.f32 %v3089_v53, %v10949_v36  ;;  %v3338_v59 = vadd.f32 %v9358_v26, %v3319_v48 }
 0xabf   : > { %v3209_v2 = vmul.f32 %v6983_v47, %v3208_v45  ;;  %v3215_v17 = vmul.f32 %v6985_v56, %v3126_v19  ;;  %vm3221_vm10 = vweird.f32 %v6985_v56 }
 0xac0   : > { %10962 = vst [vmem:[#allocation30_spill] sm:$0xff] %v9437_v1  ;;  %v9440_v33 = vadd.f32 1e-05, %v3111_v20  ;;  %v3068_v40 = vmul.f32 %v9437_v1, %v9437_v1  ;;  %vm9463_vm12 = vmor %vm3220_vm11, %vm3221_vm10 }
 0xac1   : > { %v3213_v29 = vsel %vm3212_vm9, %v6983_v47, %v3209_v2  ;;  %v3216_v39 = vmul.f32 %v6985_v56, %v3215_v17 }
 0xac2   : > { %v3301_v60 = vmul.f32 %v3213_v29, %v9326_v50  ;;  %6986 = vrsqrt.f32 %v9440_v33  ;;  %3098 = vadd.xlane.f32.xlu2 %v3068_v40  ;;  %v3388_v50 = vld [vmem:[%s10963_s3] sm:$0xf]  ;;  %vm3230_vm14 = vweird.f32 %v9440_v33 }
 0xac3   : > { %v3217_v5 = vmul.f32 0.5, %v3216_v39  ;;  %v3091_v51 = vpop.xlane.xlu2 %3090  ;;  %v9469_v35 = vperm.slane %v3388_v50, 0  ;;  %v9471_v54 = vperm.slane %v3388_v50, 1  ;;  %v9475_v46 = vperm.slane %v3388_v50, 2 }
 0xac4   : > { %v3112_v49 = vmul.f32 %v3091_v51, %v10949_v36  ;;  %v3320_v44 = vmul.f32 %v9340_v57, %v3301_v60  ;;  %v9479_v63 = vperm.slane %v3388_v50, 3 }
 0xac5   : > { %v3218_v18 = vsub.f32 1.5, %v3217_v5  ;;  %v3021_v0 = vpop.xlane.xlu0 %3020  ;;  %v3567_v61 = vpop.f32.mrf.mxu1  ;;  %10967 = vst [vmem:[#allocation28_spill] sm:$0xff] %v9469_v35 }
 0xac6   : > { %v9450_v15 = vadd.f32 1e-05, %v3112_v49  ;;  %v3037_v32 = vmul.f32 %v3021_v0, %v10949_v36  ;;  %v3339_v28 = vadd.f32 %v9358_v26, %v3320_v44  ;;  %10968 = vst [vmem:[#allocation61_spill] sm:$0xff] %v9471_v54  ;;  %v3665_v22 = vpop.f32.mrf.mxu0 }
 0xac7   : > { %v3219_v8 = vmul.f32 %v6985_v56, %v3218_v18  ;;  %10969 = vst [vmem:[#allocation62_spill] sm:$0xff] %v9475_v46  ;;  %v3666_v39 = vadd.f32 %v3665_v22, %v9475_v46 }
 0xac8   : > { %v9457_v31 = vpop.eup %6986  ;;  %6988 = vrsqrt.f32 %v9450_v15  ;;  %v9461_v34 = vsub.f32 %v9397_v30, %v3037_v32  ;;  %v3351_v47 = vpack.c.bf16 %v3339_v28, %v3338_v59  ;;  %10970 = vst [vmem:[#allocation60_spill] sm:$0xff] %v9479_v63  ;;  %vm3240_vm1 = vweird.f32 %v9450_v15 }
 0xac9   : > { %v3225_v42 = vmul.f32 %v9457_v31, %v9440_v33  ;;  %v3223_v19 = vsel %vm9463_vm12, %v6985_v56, %v3219_v8  ;;  %v3568_v56 = vadd.f32 %v3567_v61, %v9469_v35  ;;  %vm3231_vm13 = vweird.f32 %v9457_v31 }
 0xaca   : > { %10964 = vst [vmem:[#allocation42_spill] sm:$0xff] %v9461_v34  ;;  %3581 = vmatmul.bf16.gmra.mxu1 %v3351_v47  ;;  %3630 = vmatmul.bf16.gmra.mxu3 %v3351_v47  ;;  %v3069_v13 = vmul.f32 %v9461_v34, %v9461_v34  ;;  %v3302_v53 = vmul.f32 %v3223_v19, %v9344_v37  ;;  %vm9508_vm15 = vmor %vm3230_vm14, %vm3231_vm13 }
 0xacb   : > { %v3226_v10 = vmul.f32 %v9457_v31, %v3225_v42  ;;  %3679 = vmatmul.bf16.gmra.mxu0 %v3351_v47  ;;  %3728 = vmatmul.bf16.gmra.mxu2 %v3351_v47 }
 0xacc   : > { %3100 = vadd.xlane.f32.xlu0 %v3069_v13  ;;  %v3616_v45 = vpop.f32.mrf.mxu3  ;;  %v3321_v32 = vmul.f32 %v9340_v57, %v3302_v53 }
 0xacd   : > { %v3227_v20 = vmul.f32 0.5, %v3226_v10  ;;  %v3617_v2 = vadd.f32 %v3616_v45, %v9471_v54  ;;  %v3714_v17 = vpop.f32.mrf.mxu2  ;;  %v3093_v40 = vpop.xlane.xlu0 %3092 }
 0xace   : > { %v9485_v29 = vpop.eup %6988  ;;  %v3715_v48 = vadd.f32 %v3714_v17, %v9479_v63  ;;  %v3113_v60 = vmul.f32 %v3093_v40, %v10949_v36  ;;  %v3569_v8 = vpop.f32.mrf.mxu1  ;;  %v9520_v53 = vadd.f32 %v9358_v26, %v3321_v32 }
 0xacf   : > { %v3228_v5 = vsub.f32 1.5, %v3227_v20  ;;  %v3235_v51 = vmul.f32 %v9485_v29, %v9450_v15  ;;  %v3754_v37 = vpack.c.bf16 %v3617_v2, %v3568_v56  ;;  %v3667_v19 = vpop.f32.mrf.mxu0  ;;  %v3570_v56 = vadd.f32 %v3569_v8, %v9469_v35 }
 0xad0   : > { %v3755_v49 = vpack.c.bf16 %v3715_v48, %v3666_v39  ;;  %v9493_v44 = vadd.f32 1e-05, %v3113_v60  ;;  %vm3241_vm0 = vweird.f32 %v9485_v29  ;;  %v3668_v48 = vadd.f32 %v3667_v19, %v9475_v46 }
 0xad1   : > { %v3229_v18 = vmul.f32 %v9457_v31, %v3228_v5  ;;  %v9496_v0 = vunpack.c.l.bf16 %v3754_v37  ;;  %v9498_v59 = vunpack.c.h.bf16 %v3754_v37  ;;  %v3236_v61 = vmul.f32 %v9485_v29, %v3235_v51  ;;  %vm9577_vm2 = vmor %vm3240_vm1, %vm3241_vm0 }
 0xad2   : > { %v9501_v50 = vunpack.c.l.bf16 %v3755_v49  ;;  %v9503_v28 = vunpack.c.h.bf16 %v3755_v49  ;;  %6990 = vrsqrt.f32 %v9493_v44  ;;  %vm3250_vm3 = vweird.f32 %v9493_v44 }
 0xad3   : > { %v3946_v3 = vmul.f32 0.044677734, %v9496_v0  ;;  %v3947_v42 = vmul.f32 0.044677734, %v9498_v59  ;;  %v3233_v13 = vsel %vm9508_vm15, %v9457_v31, %v3229_v18  ;;  %v3237_v40 = vmul.f32 0.5, %v3236_v61 }
 0xad4   : > { %v3618_v22 = vpop.f32.mrf.mxu3  ;;  %v3948_v10 = vmul.f32 0.044677734, %v9501_v50  ;;  %v3949_v33 = vmul.f32 0.044677734, %v9503_v28  ;;  %v9527_v31 = vmul.f32 0.5, %v9496_v0  ;;  %v3303_v5 = vmul.f32 %v3233_v13, %v9372_v25 }
 0xad5   : > { %v3716_v45 = vpop.f32.mrf.mxu2  ;;  %v4010_v20 = vpack.c.bf16 %v3947_v42, %v3946_v3  ;;  %v3619_v2 = vadd.f32 %v3618_v22, %v9471_v54  ;;  %v9537_v47 = vmul.f32 0.5, %v9498_v59  ;;  %v9542_v25 = vmul.f32 0.5, %v9501_v50 }
 0xad6   : > { %v3717_v17 = vadd.f32 %v3716_v45, %v9479_v63  ;;  %v4011_v39 = vpack.c.bf16 %v3949_v33, %v3948_v10  ;;  %v3238_v19 = vsub.f32 1.5, %v3237_v40  ;;  %v9549_v45 = vmul.f32 0.5, %v9503_v28 }
 0xad7   : > { %v4042_v51 = vunpack.c.l.bf16 %v4010_v20  ;;  %v4043_v37 = vunpack.c.h.bf16 %v4010_v20  ;;  %v3756_v49 = vpack.c.bf16 %v3619_v2, %v3570_v56  ;;  %v3572_v2 = vpop.f32.mrf.mxu1  ;;  %v3322_v40 = vmul.f32 %v9340_v57, %v3303_v5 }
 0xad8   : > { %v9530_v60 = vpop.eup %6990  ;;  %v4044_v18 = vunpack.c.l.bf16 %v4011_v39  ;;  %v4045_v32 = vunpack.c.h.bf16 %v4011_v39  ;;  %v3757_v61 = vpack.c.bf16 %v3717_v17, %v3668_v48 }
 0xad9   : > { %v3245_v8 = vmul.f32 %v9530_v60, %v9493_v44  ;;  %v4106_v3 = vmul.f32 %v4042_v51, %v9496_v0  ;;  %v4107_v42 = vmul.f32 %v4043_v37, %v9498_v59  ;;  %v9546_v10 = vunpack.c.l.bf16 %v3756_v49 }
 0xada   : > { %v4108_v22 = vmul.f32 %v4044_v18, %v9501_v50  ;;  %v4109_v13 = vmul.f32 %v4045_v32, %v9503_v28  ;;  %v9552_v56 = vunpack.c.h.bf16 %v3756_v49  ;;  %v9555_v48 = vunpack.c.l.bf16 %v3757_v61 }
 0xadb   : > { %v4170_v33 = vpack.c.bf16 %v4107_v42, %v4106_v3  ;;  %v3246_v20 = vmul.f32 %v9530_v60, %v3245_v8  ;;  %v3950_v39 = vmul.f32 0.044677734, %v9546_v10  ;;  %v9559_v32 = vunpack.c.h.bf16 %v3757_v61  ;;  %v3670_v3 = vpop.f32.mrf.mxu0 }
 0xadc   : > { %v4171_v17 = vpack.c.bf16 %v4109_v13, %v4108_v22  ;;  %v3951_v18 = vmul.f32 0.044677734, %v9552_v56  ;;  %v9562_v42 = vmul.f32 %v9485_v29, %v3238_v19  ;;  %v3573_v22 = vadd.f32 %v3572_v2, %v9469_v35  ;;  %v3621_v7 = vpop.f32.mrf.mxu3 }
 0xadd   : > { %v4202_v51 = vunpack.c.l.bf16 %v4170_v33  ;;  %v4203_v37 = vunpack.c.h.bf16 %v4170_v33  ;;  %v3247_v27 = vmul.f32 0.5, %v3246_v20  ;;  %v3952_v4 = vmul.f32 0.044677734, %v9555_v48 }
 0xade   : > { %v4204_v49 = vunpack.c.l.bf16 %v4171_v17  ;;  %v4205_v8 = vunpack.c.h.bf16 %v4171_v17  ;;  %v4012_v5 = vpack.c.bf16 %v3951_v18, %v3950_v39  ;;  %v9571_v19 = vadd.f32 %v3670_v3, %v9475_v46 }
 0xadf   : > { %v4266_v13 = vmul.f32 %v4202_v51, %v9496_v0  ;;  %v4267_v30 = vmul.f32 %v4203_v37, %v9498_v59  ;;  %v3953_v51 = vmul.f32 0.044677734, %v9559_v32  ;;  %v3243_v37 = vsel %vm9577_vm2, %v9485_v29, %v9562_v42 }
 0xae0   : > { %v4268_v33 = vmul.f32 %v4204_v49, %v9501_v50  ;;  %v4269_v61 = vmul.f32 %v4205_v8, %v9503_v28  ;;  %v4046_v17 = vunpack.c.l.bf16 %v4012_v5  ;;  %v4047_v39 = vunpack.c.h.bf16 %v4012_v5 }
 0xae1   : > { %v4330_v20 = vpack.c.bf16 %v4267_v30, %v4266_v13  ;;  %v3341_v3 = vadd.f32 %v9358_v26, %v3322_v40  ;;  %v3622_v49 = vadd.f32 %v3621_v7, %v9471_v54  ;;  %v3248_v43 = vsub.f32 1.5, %v3247_v27 }
 0xae2   : > { %v4331_v18 = vpack.c.bf16 %v4269_v61, %v4268_v33  ;;  %v4110_v52 = vmul.f32 %v4046_v17, %v9546_v10  ;;  %v4111_v5 = vmul.f32 %v4047_v39, %v9552_v56  ;;  %v4013_v38 = vpack.c.bf16 %v3953_v51, %v3952_v4 }
 0xae3   : > { %v4362_v15 = vunpack.c.l.bf16 %v4330_v20  ;;  %v4363_v8 = vunpack.c.h.bf16 %v4330_v20  ;;  %v3352_v29 = vpack.c.bf16 %v3341_v3, %v9520_v53  ;;  %v3758_v42 = vpack.c.bf16 %v3622_v49, %v3573_v22 }
 0xae4   : > { %v4364_v30 = vunpack.c.l.bf16 %v4331_v18  ;;  %v4365_v13 = vunpack.c.h.bf16 %v4331_v18  ;;  %v4172_v27 = vpack.c.bf16 %v4111_v5, %v4110_v52  ;;  %v4048_v33 = vunpack.c.l.bf16 %v4013_v38 }
 0xae5   : > { %v4426_v41 = vadd.f32 %v4362_v15, %v9496_v0  ;;  %v4427_v2 = vadd.f32 %v4363_v8, %v9498_v59  ;;  %v4049_v20 = vunpack.c.h.bf16 %v4013_v38  ;;  %3586 = vmatmul.bf16.gmra.mxu1 %v3352_v29  ;;  %3635 = vmatmul.bf16.gmra.mxu3 %v3352_v29  ;;  %v9596_v4 = vunpack.c.l.bf16 %v3758_v42  ;;  %v3719_v38 = vpop.f32.mrf.mxu2 }
 0xae6   : > { %v4428_v40 = vadd.f32 %v4364_v30, %v9501_v50  ;;  %v4429_v7 = vadd.f32 %v4365_v13, %v9503_v28  ;;  %v9598_v0 = vunpack.c.h.bf16 %v3758_v42  ;;  %v4206_v17 = vunpack.c.l.bf16 %v4172_v27  ;;  %3684 = vmatmul.bf16.gmra.mxu0 %v3352_v29  ;;  %3733 = vmatmul.bf16.gmra.mxu2 %v3352_v29 }
 0xae7   : > { %v4490_v61 = vpack.c.bf16 %v4427_v2, %v4426_v41  ;;  %v4207_v53 = vunpack.c.h.bf16 %v4172_v27  ;;  %v4112_v22 = vmul.f32 %v4048_v33, %v9555_v48  ;;  %v4113_v52 = vmul.f32 %v4049_v20, %v9559_v32 }
 0xae8   : > { %v4491_v59 = vpack.c.bf16 %v4429_v7, %v4428_v40  ;;  %v3954_v41 = vmul.f32 0.044677734, %v9596_v4  ;;  %v4270_v18 = vmul.f32 %v4206_v17, %v9546_v10  ;;  %v3249_v49 = vmul.f32 %v9530_v60, %v3248_v43 }
 0xae9   : > { %v4522_v50 = vunpack.c.l.bf16 %v4490_v61  ;;  %v4523_v28 = vunpack.c.h.bf16 %v4490_v61  ;;  %v4271_v3 = vmul.f32 %v4207_v53, %v9552_v56  ;;  %vm3251_vm4 = vweird.f32 %v9530_v60 }
 0xaea   : > { %v4524_v39 = vunpack.c.l.bf16 %v4491_v59  ;;  %v4525_v51 = vunpack.c.h.bf16 %v4491_v59  ;;  %v4173_v15 = vpack.c.bf16 %v4113_v52, %v4112_v22  ;;  %v3955_v8 = vmul.f32 0.044677734, %v9598_v0  ;;  %vm9617_vm5 = vmor %vm3250_vm3, %vm3251_vm4 }
 0xaeb   : > { %v4586_v30 = vmul.f32 0.796875, %v4522_v50  ;;  %v4587_v13 = vmul.f32 0.796875, %v4523_v28  ;;  %v4332_v5 = vpack.c.bf16 %v4271_v3, %v4270_v18  ;;  %v3720_v2 = vadd.f32 %v3719_v38, %v9479_v63 }
 0xaec   : > { %v4588_v29 = vmul.f32 0.796875, %v4524_v39  ;;  %v4208_v42 = vunpack.c.l.bf16 %v4173_v15  ;;  %v4209_v40 = vunpack.c.h.bf16 %v4173_v15  ;;  %v4014_v7 = vpack.c.bf16 %v3955_v8, %v3954_v41 }
 0xaed   : > { %v4589_v27 = vmul.f32 0.796875, %v4525_v51  ;;  %v4366_v33 = vunpack.c.l.bf16 %v4332_v5  ;;  %v4367_v61 = vunpack.c.h.bf16 %v4332_v5  ;;  %v3759_v20 = vpack.c.bf16 %v3720_v2, %v9571_v19 }
 0xaee   : > { %v9611_v43 = vmul.f32 %v3243_v37, %v9393_v55  ;;  %v9622_v17 = vmul.f32 0.5, %v9546_v10  ;;  %v4272_v53 = vmul.f32 %v4208_v42, %v9555_v48  ;;  %v4273_v22 = vmul.f32 %v4209_v40, %v9559_v32  ;;  %v3623_v42 = vpop.f32.mrf.mxu3  ;;  %v3721_v40 = vpop.f32.mrf.mxu2 }
 0xaef   : > { %v3253_v55 = vsel %vm9617_vm5, %v9530_v60, %v3249_v49  ;;  %v9630_v19 = vmul.f32 0.5, %v9552_v56  ;;  %v4430_v44 = vadd.f32 %v4366_v33, %v9546_v10  ;;  %v4431_v37 = vadd.f32 %v4367_v61, %v9552_v56 }
 0xaf0   : > { %v4650_v50 = vpack.c.bf16 %v4587_v13, %v4586_v30  ;;  %v4333_v28 = vpack.c.bf16 %v4273_v22, %v4272_v53  ;;  %v4050_v52 = vunpack.c.l.bf16 %v4014_v7  ;;  %v4051_v41 = vunpack.c.h.bf16 %v4014_v7  ;;  %v3574_v22 = vpop.f32.mrf.mxu1 }
 0xaf1   : > { %v9634_v38 = vpack.c.bf16 %v4589_v27, %v4588_v29  ;;  %v4492_v39 = vpack.c.bf16 %v4431_v37, %v4430_v44  ;;  %v9636_v51 = vunpack.c.l.bf16 %v3759_v20  ;;  %v9638_v18 = vunpack.c.h.bf16 %v3759_v20  ;;  %v3672_v44 = vpop.f32.mrf.mxu0 }
 0xaf2   : > { %v9641_v60 = vmul.f32 0.5, %v9555_v48  ;;  %v4368_v3 = vunpack.c.l.bf16 %v4333_v28  ;;  %v4369_v49 = vunpack.c.h.bf16 %v4333_v28  ;;  %v4114_v10 = vmul.f32 %v4050_v52, %v9596_v4 }
 0xaf3   : > { %v9645_v56 = vmul.f32 %v3253_v55, %v9407_v21  ;;  %v4526_v15 = vunpack.c.l.bf16 %v4492_v39  ;;  %v4527_v8 = vunpack.c.h.bf16 %v4492_v39  ;;  %v4115_v30 = vmul.f32 %v4051_v41, %v9598_v0 }
 0xaf4   : > { %v4432_v13 = vadd.f32 %v4368_v3, %v9555_v48  ;;  %v4433_v5 = vadd.f32 %v4369_v49, %v9559_v32  ;;  %v3956_v2 = vmul.f32 0.044677734, %v9636_v51  ;;  %v3957_v29 = vmul.f32 0.044677734, %v9638_v18 }
 0xaf5   : > { %v4682_v7 = vunpack.c.l.bf16 %v4650_v50  ;;  %v4683_v27 = vunpack.c.h.bf16 %v4650_v50  ;;  %v4684_v33 = vunpack.c.l.bf16 %v9634_v38  ;;  %v4174_v21 = vpack.c.bf16 %v4115_v30, %v4114_v10 }
 0xaf6   : > { %v4590_v61 = vmul.f32 0.796875, %v4526_v15  ;;  %v4591_v20 = vmul.f32 0.796875, %v4527_v8  ;;  %v4493_v59 = vpack.c.bf16 %v4433_v5, %v4432_v13  ;;  %v4015_v53 = vpack.c.bf16 %v3957_v29, %v3956_v2 }
 0xaf7   : > { %v4210_v55 = vunpack.c.l.bf16 %v4174_v21  ;;  %v4211_v48 = vunpack.c.h.bf16 %v4174_v21  ;;  %v3624_v37 = vadd.f32 %v3623_v42, %v9471_v54  ;;  %v3722_v28 = vadd.f32 %v3721_v40, %v9479_v63 }
 0xaf8   : > { %v4528_v52 = vunpack.c.l.bf16 %v4493_v59  ;;  %v4529_v41 = vunpack.c.h.bf16 %v4493_v59  ;;  %v4052_v39 = vunpack.c.l.bf16 %v4015_v53  ;;  %v4053_v3 = vunpack.c.h.bf16 %v4015_v53 }
 0xaf9   : > { %6992 = vtanh.f32 %v4682_v7  ;;  %v4274_v50 = vmul.f32 %v4210_v55, %v9596_v4  ;;  %v4275_v49 = vmul.f32 %v4211_v48, %v9598_v0  ;;  %v3575_v10 = vadd.f32 %v3574_v22, %v9469_v35 }
 0xafa   : > { %v4652_v15 = vpack.c.bf16 %v4591_v20, %v4590_v61  ;;  %v4116_v8 = vmul.f32 %v4052_v39, %v9636_v51  ;;  %v4117_v30 = vmul.f32 %v4053_v3, %v9638_v18  ;;  %v3673_v13 = vadd.f32 %v3672_v44, %v9475_v46 }
 0xafb   : > { %6994 = vtanh.f32 %v4683_v27  ;;  %v4685_v5 = vunpack.c.h.bf16 %v9634_v38  ;;  %v4334_v2 = vpack.c.bf16 %v4275_v49, %v4274_v50  ;;  %v3760_v29 = vpack.c.bf16 %v3624_v37, %v3575_v10 }
 0xafc   : > { %v4592_v42 = vmul.f32 0.796875, %v4528_v52  ;;  %v4593_v40 = vmul.f32 0.796875, %v4529_v41  ;;  %v4175_v7 = vpack.c.bf16 %v4117_v30, %v4116_v8  ;;  %v3761_v21 = vpack.c.bf16 %v3722_v28, %v3673_v13 }
 0xafd   : > { %v4370_v59 = vunpack.c.l.bf16 %v4334_v2  ;;  %v4371_v53 = vunpack.c.h.bf16 %v4334_v2  ;;  %v9662_v55 = vunpack.c.l.bf16 %v3760_v29  ;;  %v9664_v61 = vunpack.c.h.bf16 %v3760_v29 }
 0xafe   : > { %v4686_v20 = vunpack.c.l.bf16 %v4652_v15  ;;  %v4687_v22 = vunpack.c.h.bf16 %v4652_v15  ;;  %v4212_v48 = vunpack.c.l.bf16 %v4175_v7  ;;  %v4213_v39 = vunpack.c.h.bf16 %v4175_v7 }
 0xaff   : > { %v9666_v44 = vpop.eup %6992  ;;  %v4434_v38 = vadd.f32 %v4370_v59, %v9596_v4  ;;  %v4435_v27 = vadd.f32 %v4371_v53, %v9598_v0  ;;  %v3958_v37 = vmul.f32 0.044677734, %v9662_v55  ;;  %v3959_v28 = vmul.f32 0.044677734, %v9664_v61 }
 0xb00   : > { %6996 = vtanh.f32 %v4684_v33  ;;  %v4276_v52 = vmul.f32 %v4212_v48, %v9636_v51  ;;  %v4277_v41 = vmul.f32 %v4213_v39, %v9638_v18  ;;  %v9674_v3 = vunpack.c.l.bf16 %v3761_v21  ;;  %v3577_v33 = vpop.f32.mrf.mxu1  ;;  %v3724_v39 = vpop.f32.mrf.mxu2 }
 0xb01   : > { %v9676_v50 = vpop.eup %6994  ;;  %6998 = vtanh.f32 %v4685_v5  ;;  %v9678_v49 = vpack.c.bf16 %v4593_v40, %v4592_v42  ;;  %v4016_v10 = vpack.c.bf16 %v3959_v28, %v3958_v37  ;;  %v9680_v15 = vunpack.c.h.bf16 %v3761_v21  ;;  %v3626_v40 = vpop.f32.mrf.mxu3 }
 0xb02   : > { %7000 = vtanh.f32 %v4686_v20  ;;  %v4494_v8 = vpack.c.bf16 %v4435_v27, %v4434_v38  ;;  %v4335_v30 = vpack.c.bf16 %v4277_v41, %v4276_v52  ;;  %v3960_v13 = vmul.f32 0.044677734, %v9674_v3  ;;  %v3675_v52 = vpop.f32.mrf.mxu0 }
 0xb03   : > { %7002 = vtanh.f32 %v4687_v22  ;;  %v4054_v2 = vunpack.c.l.bf16 %v4016_v10  ;;  %v4055_v29 = vunpack.c.h.bf16 %v4016_v10  ;;  %v3323_v7 = vmul.f32 %v9340_v57, %v9611_v43 }
 0xb04   : > { %v4372_v59 = vunpack.c.l.bf16 %v4335_v30  ;;  %v4373_v53 = vunpack.c.h.bf16 %v4335_v30  ;;  %v3961_v5 = vmul.f32 0.044677734, %v9680_v15  ;;  %v3324_v42 = vmul.f32 %v9340_v57, %v9645_v56 }
 0xb05   : > { %v4118_v20 = vmul.f32 %v4054_v2, %v9662_v55  ;;  %v4119_v48 = vmul.f32 %v4055_v29, %v9664_v61  ;;  %v3578_v22 = vadd.f32 %v3577_v33, %v9469_v35  ;;  %v4530_v43 = vunpack.c.l.bf16 %v4494_v8 }
 0xb06   : > { %v9692_v38 = vpop.eup %6996  ;;  %v4436_v27 = vadd.f32 %v4372_v59, %v9636_v51  ;;  %v4437_v37 = vadd.f32 %v4373_v53, %v9638_v18  ;;  %v4017_v28 = vpack.c.bf16 %v3961_v5, %v3960_v13  ;;  %v3342_v41 = vadd.f32 %v9358_v26, %v3323_v7 }
 0xb07   : > { %v9696_v57 = vpop.eup %6998  ;;  %v4176_v56 = vpack.c.bf16 %v4119_v48, %v4118_v20  ;;  %v3343_v10 = vadd.f32 %v9358_v26, %v3324_v42  ;;  %v3627_v30 = vadd.f32 %v3626_v40, %v9471_v54  ;;  %v4531_v2 = vunpack.c.h.bf16 %v4494_v8 }
 0xb08   : > { %v9701_v33 = vpop.eup %7000  ;;  %v4056_v29 = vunpack.c.l.bf16 %v4017_v28  ;;  %v4057_v21 = vunpack.c.h.bf16 %v4017_v28  ;;  %v3725_v59 = vadd.f32 %v3724_v39, %v9479_v63  ;;  %v4495_v20 = vpack.c.bf16 %v4437_v37, %v4436_v27 }
 0xb09   : > { %v9704_v12 = vpop.eup %7002  ;;  %v4214_v13 = vunpack.c.l.bf16 %v4176_v56  ;;  %v4215_v53 = vunpack.c.h.bf16 %v4176_v56  ;;  %v3353_v5 = vpack.c.bf16 %v3343_v10, %v3342_v41  ;;  %v3762_v23 = vpack.c.bf16 %v3627_v30, %v3578_v22 }
 0xb0a   : > { %v4120_v7 = vmul.f32 %v4056_v29, %v9674_v3  ;;  %v4121_v26 = vmul.f32 %v4057_v21, %v9680_v15  ;;  %v3676_v42 = vadd.f32 %v3675_v52, %v9475_v46  ;;  %v4689_v28 = vunpack.c.h.bf16 %v9678_v49 }
 0xb0b   : > { %v4278_v40 = vmul.f32 %v4214_v13, %v9662_v55  ;;  %v4279_v8 = vmul.f32 %v4215_v53, %v9664_v61  ;;  %3591 = vmatmul.bf16.gmra.mxu1 %v3353_v5  ;;  %3640 = vmatmul.bf16.gmra.mxu3 %v3353_v5  ;;  %v9711_v48 = vunpack.c.l.bf16 %v3762_v23  ;;  %v9713_v39 = vunpack.c.h.bf16 %v3762_v23  ;;  %v3579_v23 = vpop.f32.mrf.mxu1 }
 0xb0c   : > { %v4594_v22 = vmul.f32 0.796875, %v4530_v43  ;;  %v4177_v27 = vpack.c.bf16 %v4121_v26, %v4120_v7  ;;  %3689 = vmatmul.bf16.gmra.mxu0 %v3353_v5  ;;  %3738 = vmatmul.bf16.gmra.mxu2 %v3353_v5  ;;  %v3763_v37 = vpack.c.bf16 %v3725_v59, %v3676_v42  ;;  %v4595_v21 = vmul.f32 0.796875, %v4531_v2  ;;  %v3628_v7 = vpop.f32.mrf.mxu3  ;;  %v3726_v5 = vpop.f32.mrf.mxu2 }
 0xb0d   : > { %10977 = vst [vmem:[#allocation64_spill] sm:$0xff] %v9711_v48  ;;  %v4336_v56 = vpack.c.bf16 %v4279_v8, %v4278_v40  ;;  %v3962_v52 = vmul.f32 0.044677734, %v9711_v48  ;;  %v3963_v41 = vmul.f32 0.044677734, %v9713_v39  ;;  %v4532_v10 = vunpack.c.l.bf16 %v4495_v20  ;;  %v3677_v40 = vpop.f32.mrf.mxu0 }
 0xb0e   : > { %10978 = vst [vmem:[#allocation63_spill] sm:$0xff] %v9713_v39  ;;  %v4216_v30 = vunpack.c.l.bf16 %v4177_v27  ;;  %v4217_v29 = vunpack.c.h.bf16 %v4177_v27  ;;  %v9718_v13 = vunpack.c.l.bf16 %v3763_v37  ;;  %v9720_v43 = vunpack.c.h.bf16 %v3763_v37 }
 0xb0f   : > { %v4374_v53 = vunpack.c.l.bf16 %v4336_v56  ;;  %v4375_v6 = vunpack.c.h.bf16 %v4336_v56  ;;  %v4018_v24 = vpack.c.bf16 %v3963_v41, %v3962_v52  ;;  %v4533_v59 = vunpack.c.h.bf16 %v4495_v20 }
 0xb10   : > { %10979 = vst [vmem:[#allocation65_spill] sm:$0xff] %v9718_v13  ;;  %v4280_v2 = vmul.f32 %v4216_v30, %v9674_v3  ;;  %v4281_v26 = vmul.f32 %v4217_v29, %v9680_v15  ;;  %v3964_v42 = vmul.f32 0.044677734, %v9718_v13  ;;  %v3580_v16 = vadd.f32 %v3579_v23, %v9469_v35 }
 0xb11   : > { %10980 = vst [vmem:[#allocation52_spill] sm:$0xff] %v9720_v43  ;;  %v4438_v8 = vadd.f32 %v4374_v53, %v9662_v55  ;;  %v4058_v27 = vunpack.c.l.bf16 %v4018_v24  ;;  %v4059_v62 = vunpack.c.h.bf16 %v4018_v24  ;;  %v4439_v56 = vadd.f32 %v4375_v6, %v9664_v61 }
 0xb12   : > { %v3965_v37 = vmul.f32 0.044677734, %v9720_v43  ;;  %v3629_v52 = vadd.f32 %v3628_v7, %v9471_v54  ;;  %v3727_v20 = vadd.f32 %v3726_v5, %v9479_v63  ;;  %v4337_v41 = vpack.c.bf16 %v4281_v26, %v4280_v2 }
 0xb13   : > { %v4122_v30 = vmul.f32 %v4058_v27, %v9711_v48  ;;  %v4123_v29 = vmul.f32 %v4059_v62, %v9713_v39  ;;  %v3678_v14 = vadd.f32 %v3677_v40, %v9475_v46  ;;  %v9735_v53 = vmul.f32 0.5, %v9559_v32 }
 0xb14   : > { %v10981_v24 = vunpack.c.l.bf16 %v9678_v49  ;;  %v4019_v6 = vpack.c.bf16 %v3965_v37, %v3964_v42  ;;  %v3764_v23 = vpack.c.bf16 %v3629_v52, %v3580_v16  ;;  %v9739_v9 = vpack.c.bf16 %v4595_v21, %v4594_v22 }
 0xb15   : > { %v4178_v7 = vpack.c.bf16 %v4123_v29, %v4122_v30  ;;  %v3765_v5 = vpack.c.bf16 %v3727_v20, %v3678_v14  ;;  %v4596_v2 = vmul.f32 0.796875, %v4532_v10  ;;  %v4496_v26 = vpack.c.bf16 %v4439_v56, %v4438_v8 }
 0xb16   : > { %7004 = vtanh.f32 %v10981_v24  ;;  %v4060_v27 = vunpack.c.l.bf16 %v4019_v6  ;;  %v4061_v34 = vunpack.c.h.bf16 %v4019_v6  ;;  %v4597_v62 = vmul.f32 0.796875, %v4533_v59 }
 0xb17   : > { %7006 = vtanh.f32 %v4689_v28  ;;  %v4376_v63 = vunpack.c.l.bf16 %v4337_v41  ;;  %v4218_v40 = vunpack.c.l.bf16 %v4178_v7  ;;  %v4219_v54 = vunpack.c.h.bf16 %v4178_v7 }
 0xb18   : > { %v4377_v32 = vunpack.c.h.bf16 %v4337_v41  ;;  %v4124_v1 = vmul.f32 %v4060_v27, %v9718_v13  ;;  %v4125_v49 = vmul.f32 %v4061_v34, %v9720_v43  ;;  %v9743_v42 = vunpack.c.l.bf16 %v3764_v23 }
 0xb19   : > { %v4282_v16 = vmul.f32 %v4218_v40, %v9711_v48  ;;  %v4283_v28 = vmul.f32 %v4219_v54, %v9713_v39  ;;  %v9747_v14 = vunpack.c.h.bf16 %v3764_v23  ;;  %v9749_v22 = vunpack.c.l.bf16 %v3765_v5 }
 0xb1a   : > { %v4534_v10 = vunpack.c.l.bf16 %v4496_v26  ;;  %v4535_v59 = vunpack.c.h.bf16 %v4496_v26  ;;  %v4179_v8 = vpack.c.bf16 %v4125_v49, %v4124_v1  ;;  %v3966_v56 = vmul.f32 0.044677734, %v9743_v42 }
 0xb1b   : > { %v4440_v34 = vadd.f32 %v4376_v63, %v9674_v3  ;;  %v4338_v52 = vpack.c.bf16 %v4283_v28, %v4282_v16  ;;  %v3967_v20 = vmul.f32 0.044677734, %v9747_v14  ;;  %v9758_v41 = vunpack.c.h.bf16 %v3765_v5 }
 0xb1c   : > { %v9751_v21 = vpop.eup %7004  ;;  %v4441_v54 = vadd.f32 %v4377_v32, %v9680_v15  ;;  %v4220_v30 = vunpack.c.l.bf16 %v4179_v8  ;;  %v4221_v29 = vunpack.c.h.bf16 %v4179_v8  ;;  %v3968_v24 = vmul.f32 0.044677734, %v9749_v22 }
 0xb1d   : > { %v9754_v37 = vpop.eup %7006  ;;  %v4378_v6 = vunpack.c.l.bf16 %v4338_v52  ;;  %v4379_v23 = vunpack.c.h.bf16 %v4338_v52  ;;  %v4020_v1 = vpack.c.bf16 %v3967_v20, %v3966_v56  ;;  %v3969_v7 = vmul.f32 0.044677734, %v9758_v41 }
 0xb1e   : > { %v9763_v26 = vpack.c.bf16 %v4597_v62, %v4596_v2  ;;  %v4284_v63 = vmul.f32 %v4220_v30, %v9718_v13  ;;  %v4285_v27 = vmul.f32 %v4221_v29, %v9720_v43  ;;  %v9769_v5 = vpack.c.bf16 %v9537_v47, %v9527_v31 }
 0xb1f   : > { %v4442_v40 = vadd.f32 %v4378_v6, %v9711_v48  ;;  %v4443_v32 = vadd.f32 %v4379_v23, %v9713_v39  ;;  %v4062_v49 = vunpack.c.l.bf16 %v4020_v1  ;;  %v4063_v16 = vunpack.c.h.bf16 %v4020_v1  ;;  %v6417_v23 = vld [vmem:[#allocation17 + $0x78] sm:$0xff] }
 0xb20   : > { %v9773_v28 = vmul.f32 0.796875, %v4534_v10  ;;  %v9775_v8 = vmul.f32 0.796875, %v4535_v59  ;;  %v4339_v2 = vpack.c.bf16 %v4285_v27, %v4284_v63  ;;  %v4021_v62 = vpack.c.bf16 %v3969_v7, %v3968_v24  ;;  %v6409_v39 = vld [vmem:[#allocation17 + $0x38] sm:$0xff]  ;;  %5535 = vmatpush.bf16.msra.mxu3 %v6417_v23 }
 0xb21   : > { %v9777_v56 = vpack.c.bf16 %v4441_v54, %v4440_v34  ;;  %v4498_v52 = vpack.c.bf16 %v4443_v32, %v4442_v40  ;;  %v4126_v20 = vmul.f32 %v4062_v49, %v9743_v42  ;;  %v4127_v31 = vmul.f32 %v4063_v16, %v9747_v14  ;;  %5486 = vmatpush.bf16.msra.mxu1 %v6409_v39 }
 0xb22   : > { %v4380_v47 = vunpack.c.l.bf16 %v4339_v2  ;;  %v4381_v30 = vunpack.c.h.bf16 %v4339_v2  ;;  %v4064_v29 = vunpack.c.l.bf16 %v4021_v62  ;;  %v4065_v6 = vunpack.c.h.bf16 %v4021_v62 }
 0xb23   : > { %v4538_v1 = vunpack.c.l.bf16 %v4498_v52  ;;  %v4180_v10 = vpack.c.bf16 %v4127_v31, %v4126_v20  ;;  %v4810_v59 = vpack.c.bf16 %v9676_v50, %v9666_v44  ;;  %v4812_v34 = vpack.c.bf16 %v9704_v12, %v9701_v33 }
 0xb24   : > { %v4444_v54 = vadd.f32 %v4380_v47, %v9718_v13  ;;  %v4445_v24 = vadd.f32 %v4381_v30, %v9720_v43  ;;  %v4128_v7 = vmul.f32 %v4064_v29, %v9749_v22  ;;  %v4129_v63 = vmul.f32 %v4065_v6, %v9758_v41 }
 0xb25   : > { %v3095_v48 = vpop.xlane.xlu2 %3094  ;;  %v4536_v27 = vunpack.c.l.bf16 %v9777_v56  ;;  %v4537_v40 = vunpack.c.h.bf16 %v9777_v56  ;;  %v4222_v32 = vunpack.c.l.bf16 %v4180_v10  ;;  %v4223_v49 = vunpack.c.h.bf16 %v4180_v10 }
 0xb26   : > { %v4539_v44 = vunpack.c.h.bf16 %v4498_v52  ;;  %v4499_v50 = vpack.c.bf16 %v4445_v24, %v4444_v54  ;;  %v4181_v16 = vpack.c.bf16 %v4129_v63, %v4128_v7  ;;  %v3114_v12 = vmul.f32 %v3095_v48, %v10949_v36  ;;  %v6433_v54 = vld [vmem:[#allocation17 + $0xf8] sm:$0xff] }
 0xb27   : > { %v4286_v33 = vmul.f32 %v4222_v32, %v9743_v42  ;;  %v4287_v2 = vmul.f32 %v4223_v49, %v9747_v14  ;;  %v4842_v62 = vunpack.c.l.bf16 %v4810_v59  ;;  %v4843_v20 = vunpack.c.h.bf16 %v4810_v59  ;;  %v6425_v24 = vld [vmem:[#allocation17 + $0xb8] sm:$0xff]  ;;  %5633 = vmatpush.bf16.msra.mxu2 %v6433_v54 }
 0xb28   : > { %v4602_v31 = vmul.f32 0.796875, %v4538_v1  ;;  %v4224_v47 = vunpack.c.l.bf16 %v4181_v16  ;;  %v4225_v30 = vunpack.c.h.bf16 %v4181_v16  ;;  %v4846_v29 = vunpack.c.l.bf16 %v4812_v34  ;;  %5584 = vmatpush.bf16.msra.mxu0 %v6425_v24 }
 0xb29   : > { %v4540_v6 = vunpack.c.l.bf16 %v4499_v50  ;;  %v4541_v56 = vunpack.c.h.bf16 %v4499_v50  ;;  %v4340_v23 = vpack.c.bf16 %v4287_v2, %v4286_v33  ;;  %v9794_v10 = vadd.f32 1e-05, %v3114_v12 }
 0xb2a   : > { %v4603_v39 = vmul.f32 0.796875, %v4539_v44  ;;  %v4288_v52 = vmul.f32 %v4224_v47, %v9749_v22  ;;  %v4289_v48 = vmul.f32 %v4225_v30, %v9758_v41  ;;  %v4847_v7 = vunpack.c.h.bf16 %v4812_v34 }
 0xb2b   : > { %v4382_v63 = vunpack.c.l.bf16 %v4340_v23  ;;  %v4383_v32 = vunpack.c.h.bf16 %v4340_v23  ;;  %7008 = vrsqrt.f32 %v9794_v10  ;;  %v4906_v59 = vadd.f32 1.0, %v4842_v62 }
 0xb2c   : > { %v4341_v49 = vpack.c.bf16 %v4289_v48, %v4288_v52  ;;  %v4907_v16 = vadd.f32 1.0, %v4843_v20  ;;  %v4910_v44 = vadd.f32 1.0, %v4846_v29  ;;  %v4604_v12 = vmul.f32 0.796875, %v4540_v6 }
 0xb2d   : > { %v3097_v1 = vpop.xlane.xlu0 %3096  ;;  %v4605_v33 = vmul.f32 0.796875, %v4541_v56  ;;  %v4446_v2 = vadd.f32 %v4382_v63, %v9743_v42  ;;  %v4447_v47 = vadd.f32 %v4383_v32, %v9747_v14  ;;  %v4911_v43 = vadd.f32 1.0, %v4847_v7 }
 0xb2e   : > { %v3115_v50 = vmul.f32 %v3097_v1, %v10949_v36  ;;  %v4384_v34 = vunpack.c.l.bf16 %v4341_v49  ;;  %v4385_v30 = vunpack.c.h.bf16 %v4341_v49  ;;  %v9804_v13 = vmul.f32 0.796875, %v4536_v27 }
 0xb2f   : > { %v9806_v62 = vmul.f32 0.796875, %v4537_v40  ;;  %v4500_v52 = vpack.c.bf16 %v4447_v47, %v4446_v2  ;;  %v9810_v20 = vpack.c.bf16 %v9630_v19, %v9622_v17  ;;  %v9812_v29 = vpack.c.bf16 %v4603_v39, %v4602_v31  ;;  %v6424_v2 = vld [vmem:[#allocation17 + $0xb0] sm:$0xff] }
 0xb30   : > { %v9802_v23 = vadd.f32 1e-05, %v3115_v50  ;;  %v4448_v6 = vadd.f32 %v4384_v34, %v9749_v22  ;;  %v4449_v56 = vadd.f32 %v4385_v30, %v9758_v41  ;;  %v9819_v54 = vpack.c.bf16 %v4605_v33, %v4604_v12  ;;  %v6416_v50 = vld [vmem:[#allocation17 + $0x70] sm:$0xff]  ;;  %5585 = vmatpush.bf16.msra.mxu0 %v6424_v2 }
 0xb31   : > { %v9817_v48 = vpop.eup %7008  ;;  %v4542_v27 = vunpack.c.l.bf16 %v4500_v52  ;;  %v4543_v40 = vunpack.c.h.bf16 %v4500_v52  ;;  %v4970_v24 = vpack.c.bf16 %v4907_v16, %v4906_v59  ;;  %vm3260_vm6 = vweird.f32 %v9794_v10  ;;  %v6408_v16 = vld [vmem:[#allocation17 + $0x30] sm:$0xff]  ;;  %5536 = vmatpush.bf16.msra.mxu3 %v6416_v50 }
 0xb32   : > { %7010 = vrsqrt.f32 %v9802_v23  ;;  %v4501_v7 = vpack.c.bf16 %v4449_v56, %v4448_v6  ;;  %v3255_v17 = vmul.f32 %v9817_v48, %v9794_v10  ;;  %v9824_v19 = vpack.c.bf16 %v4911_v43, %v4910_v44  ;;  %v6432_v44 = vld [vmem:[#allocation17 + $0xf0] sm:$0xff]  ;;  %5487 = vmatpush.bf16.msra.mxu1 %v6408_v16 }
 0xb33   : > { %v5002_v31 = vunpack.c.l.bf16 %v9769_v5  ;;  %v5006_v63 = vunpack.c.l.bf16 %v9810_v20  ;;  %v5003_v32 = vunpack.c.h.bf16 %v9769_v5  ;;  %v5007_v1 = vunpack.c.h.bf16 %v9810_v20  ;;  %5634 = vmatpush.bf16.msra.mxu2 %v6432_v44 }
 0xb34   : > { %v9832_v59 = vpack.c.bf16 %v9549_v45, %v9542_v25  ;;  %v3256_v49 = vmul.f32 %v9817_v48, %v3255_v17  ;;  %vm3261_vm7 = vweird.f32 %v9817_v48  ;;  %v9839_v12 = vpack.c.bf16 %v9735_v53, %v9641_v60 }
 0xb35   : > { %v3099_v39 = vpop.xlane.xlu2 %3098  ;;  %v9841_v5 = vmul.f32 0.796875, %v4542_v27  ;;  %v9843_v33 = vmul.f32 0.796875, %v4543_v40  ;;  %v4811_v25 = vpack.c.bf16 %v9696_v57, %v9692_v38  ;;  %v3858_v45 = vmul.f32 0.5, %v9596_v4  ;;  %vm3262_vm9 = vmor %vm3260_vm6, %vm3261_vm7 }
 0xb36   : > { %v3116_v43 = vmul.f32 %v3099_v39, %v10949_v36  ;;  %v4544_v34 = vunpack.c.l.bf16 %v4501_v7  ;;  %v4545_v30 = vunpack.c.h.bf16 %v4501_v7  ;;  %v3257_v52 = vmul.f32 0.5, %v3256_v49 }
 0xb37   : > { %vm3270_vm8 = vweird.f32 %v9802_v23  ;;  %v5066_v53 = vunpack.c.l.bf16 %v4970_v24  ;;  %v4844_v56 = vunpack.c.l.bf16 %v4811_v25  ;;  %v5004_v38 = vunpack.c.l.bf16 %v9832_v59 }
 0xb38   : > { %v7011_v47 = vpop.eup %7010  ;;  %v9848_v6 = vadd.f32 1e-05, %v3116_v43  ;;  %v3258_v57 = vsub.f32 1.5, %v3257_v52  ;;  %v5067_v4 = vunpack.c.h.bf16 %v4970_v24  ;;  %v5008_v27 = vunpack.c.l.bf16 %v9839_v12 }
 0xb39   : > { %v3265_v60 = vmul.f32 %v7011_v47, %v9802_v23  ;;  %v4845_v7 = vunpack.c.h.bf16 %v4811_v25  ;;  %v5009_v39 = vunpack.c.h.bf16 %v9839_v12  ;;  %v9857_v49 = vmul.f32 0.796875, %v4544_v34 }
 0xb3a   : > { %7012 = vrsqrt.f32 %v9848_v6  ;;  %v9859_v43 = vmul.f32 0.796875, %v4545_v30  ;;  %v3259_v50 = vmul.f32 %v9817_v48, %v3258_v57  ;;  %v3859_v16 = vmul.f32 0.5, %v9598_v0 }
 0xb3b   : > { %v3266_v40 = vmul.f32 %v7011_v47, %v3265_v60  ;;  %vm3271_vm10 = vweird.f32 %v7011_v47  ;;  %v9867_v44 = vmul.f32 %v5066_v53, %v5002_v31  ;;  %v4908_v2 = vadd.f32 1.0, %v4844_v56 }
 0xb3c   : > { %v3263_v25 = vsel %vm3262_vm9, %v9817_v48, %v3259_v50  ;;  %v9870_v34 = vmul.f32 %v5067_v4, %v5003_v32  ;;  %v4813_v30 = vpack.c.bf16 %v9754_v37, %v9751_v21  ;;  %v4909_v52 = vadd.f32 1.0, %v4845_v7  ;;  %vm3272_vm12 = vmor %vm3270_vm8, %vm3271_vm10 }
 0xb3d   : > { %v3267_v24 = vmul.f32 0.5, %v3266_v40  ;;  %v3306_v0 = vmul.f32 %v3263_v25, %v9423_v58  ;;  %v3862_v10 = vmul.f32 0.5, %v9662_v55  ;;  %v3863_v40 = vmul.f32 0.5, %v9664_v61 }
 0xb3e   : > { %v5070_v48 = vunpack.c.l.bf16 %v9824_v19  ;;  %v4848_v32 = vunpack.c.l.bf16 %v4813_v30  ;;  %v4849_v53 = vunpack.c.h.bf16 %v4813_v30  ;;  %vm3280_vm11 = vweird.f32 %v9848_v6 }
 0xb3f   : > { %v3268_v60 = vsub.f32 1.5, %v3267_v24  ;;  %v3101_v57 = vpop.xlane.xlu0 %3100  ;;  %v9884_v58 = vpack.c.bf16 %v3859_v16, %v3858_v45  ;;  %v9887_v55 = vmul.f32 0.5, %v9636_v51  ;;  %v5071_v61 = vunpack.c.h.bf16 %v9824_v19  ;;  %v9900_v51 = vld [vmem:[#allocation13] ss:$0 sm:$0xff] }
 0xb40   : > { %v9877_v17 = vpop.eup %7012  ;;  %v3117_v31 = vmul.f32 %v3101_v57, %v10949_v36  ;;  %v4912_v37 = vadd.f32 1.0, %v4848_v32  ;;  %v4971_v4 = vpack.c.bf16 %v4909_v52, %v4908_v2  ;;  %v4913_v24 = vadd.f32 1.0, %v4849_v53 }
 0xb41   : > { %v3269_v56 = vmul.f32 %v7011_v47, %v3268_v60  ;;  %v3275_v21 = vmul.f32 %v9877_v17, %v9848_v6  ;;  %v9896_v25 = vpack.c.bf16 %v3863_v40, %v3862_v10  ;;  %v3325_v23 = vmul.f32 %v9900_v51, %v3306_v0  ;;  %v9919_v40 = vld [vmem:[#allocation14] ss:$0 sm:$0xff] }
 0xb42   : > { %v9892_v36 = vadd.f32 1e-05, %v3117_v31  ;;  %v9905_v16 = vmul.f32 %v5070_v48, %v5006_v63  ;;  %v4973_v2 = vpack.c.bf16 %v4913_v24, %v4912_v37  ;;  %v9912_v30 = vmul.f32 0.5, %v9638_v18 }
 0xb43   : > { %v3273_v7 = vsel %vm3272_vm12, %v7011_v47, %v3269_v56  ;;  %v3276_v50 = vmul.f32 %v9877_v17, %v3275_v21  ;;  %v9909_v47 = vmul.f32 %v5071_v61, %v5007_v1  ;;  %v5068_v52 = vunpack.c.l.bf16 %v4971_v4 }
 0xb44   : > { %v3307_v45 = vmul.f32 %v3273_v7, %v9430_v11  ;;  %7014 = vrsqrt.f32 %v9892_v36  ;;  %v4656_v60 = vpack.c.bf16 %v9775_v8, %v9773_v28  ;;  %v4690_v0 = vunpack.c.l.bf16 %v9739_v9  ;;  %v6422_v8 = vld [vmem:[#allocation17 + $0xa0] sm:$0xff] }
 0xb45   : > { %v3277_v19 = vmul.f32 0.5, %v3276_v50  ;;  %vm3281_vm13 = vweird.f32 %v9877_v17  ;;  %v5072_v10 = vunpack.c.l.bf16 %v4973_v2  ;;  %v5069_v20 = vunpack.c.h.bf16 %v4971_v4 }
 0xb46   : > { %v3326_v11 = vmul.f32 %v9900_v51, %v3307_v45  ;;  %v3344_v18 = vadd.f32 %v9919_v40, %v3325_v23  ;;  %v5073_v32 = vunpack.c.h.bf16 %v4973_v2  ;;  %v4691_v56 = vunpack.c.h.bf16 %v9739_v9  ;;  %vm9939_vm14 = vmor %vm3280_vm11, %vm3281_vm13  ;;  %v10986_v2 = vld [vmem:[#allocation61_spill] sm:$0xff] }
 0xb47   : > { %v3278_v57 = vsub.f32 1.5, %v3277_v19  ;;  %v3582_v63 = vpop.f32.mrf.mxu1  ;;  %v9930_v53 = vmul.f32 %v5072_v10, %v5008_v27  ;;  %v9945_v4 = vmul.f32 %v5068_v52, %v5004_v38  ;;  %v4694_v9 = vunpack.c.l.bf16 %v4656_v60 }
 0xb48   : > { %v3680_v1 = vpop.f32.mrf.mxu0  ;;  %v3345_v31 = vadd.f32 %v9919_v40, %v3326_v11  ;;  %v9949_v27 = vmul.f32 %v5073_v32, %v5009_v39  ;;  %vm3290_vm15 = vweird.f32 %v9892_v36  ;;  %v3583_v50 = vadd.f32 %v3582_v63, %v9469_v35  ;;  %v10987_v63 = vld [vmem:[#allocation60_spill] sm:$0xff] }
 0xb49   : > { %v3279_v28 = vmul.f32 %v9877_v17, %v3278_v57  ;;  %v10984_v24 = vunpack.c.h.bf16 %v9832_v59  ;;  %v3681_v12 = vadd.f32 %v3680_v1, %v9475_v46  ;;  %v4695_v39 = vunpack.c.h.bf16 %v4656_v60  ;;  %v6415_v1 = vld [vmem:[#allocation17 + $0x68] sm:$0xff]  ;;  %v6406_v60 = vld [vmem:[#allocation17 + $0x20] sm:$0xff] }
 0xb4a   : > { %v9933_v21 = vpop.eup %7014  ;;  %v3354_v37 = vpack.c.bf16 %v3345_v31, %v3344_v18  ;;  %7016 = vtanh.f32 %v4690_v0  ;;  %5537 = vmatpush.bf16.msra.mxu3 %v6415_v1 }
 0xb4b   : > { %v3283_v7 = vsel %vm9939_vm14, %v9877_v17, %v3279_v28  ;;  %v3285_v6 = vmul.f32 %v9933_v21, %v9892_v36  ;;  %v9960_v38 = vmul.f32 %v5069_v20, %v10984_v24  ;;  %vm3291_vm0 = vweird.f32 %v9933_v21  ;;  %v10985_v17 = vld [vmem:[#allocation30_spill] sm:$0xff] }
 0xb4c   : > { %3596 = vmatmul.bf16.gmra.mxu1 %v3354_v37  ;;  %3645 = vmatmul.bf16.gmra.mxu3 %v3354_v37  ;;  %v3308_v45 = vmul.f32 %v3283_v7, %v10985_v17  ;;  %7018 = vtanh.f32 %v4691_v56  ;;  %v3864_v28 = vmul.f32 0.5, %v9674_v3  ;;  %v3865_v56 = vmul.f32 0.5, %v9680_v15  ;;  %vm3292_vm1 = vmor %vm3290_vm15, %vm3291_vm0  ;;  %v10991_v7 = vld [vmem:[#allocation42_spill] sm:$0xff] }
 0xb4d   : > { %v3286_v23 = vmul.f32 %v9933_v21, %v3285_v6  ;;  %3694 = vmatmul.bf16.gmra.mxu0 %v3354_v37  ;;  %3743 = vmatmul.bf16.gmra.mxu2 %v3354_v37  ;;  %v3631_v19 = vpop.f32.mrf.mxu3  ;;  %7020 = vtanh.f32 %v4694_v9  ;;  %v9980_v6 = vpack.c.bf16 %v9912_v30, %v9887_v55  ;;  %v9989_v3 = vpack.c.bf16 %v9806_v62, %v9804_v13 }
 0xb4e   : > { %v3632_v11 = vadd.f32 %v3631_v19, %v10986_v2  ;;  %v3729_v52 = vpop.f32.mrf.mxu2  ;;  %7022 = vtanh.f32 %v4695_v39  ;;  %v3327_v36 = vmul.f32 %v9900_v51, %v3308_v45 }
 0xb4f   : > { %v3287_v0 = vmul.f32 0.5, %v3286_v23  ;;  %v3730_v10 = vadd.f32 %v3729_v52, %v10987_v63  ;;  %v3584_v20 = vpop.f32.mrf.mxu1  ;;  %v10004_v52 = vpack.c.bf16 %v3865_v56, %v3864_v28  ;;  %v6414_v56 = vld [vmem:[#allocation17 + $0x60] sm:$0xff] }
 0xb50   : > { %v3766_v32 = vpack.c.bf16 %v3632_v11, %v3583_v50  ;;  %v3682_v9 = vpop.f32.mrf.mxu0  ;;  %v7017_v24 = vpop.eup %7016  ;;  %v3585_v50 = vadd.f32 %v3584_v20, %v9469_v35  ;;  %5538 = vmatpush.bf16.msra.mxu3 %v6414_v56 }
 0xb51   : > { %v3288_v61 = vsub.f32 1.5, %v3287_v0  ;;  %v3767_v37 = vpack.c.bf16 %v3730_v10, %v3681_v12  ;;  %v3683_v62 = vadd.f32 %v3682_v9, %v9475_v46 }
 0xb52   : > { %v9982_v17 = vunpack.c.l.bf16 %v3766_v32  ;;  %v9984_v23 = vunpack.c.h.bf16 %v3766_v32  ;;  %v7019_v15 = vpop.eup %7018  ;;  %v6407_v32 = vld [vmem:[#allocation17 + $0x28] sm:$0xff] }
 0xb53   : > { %v3289_v12 = vmul.f32 %v9933_v21, %v3288_v61  ;;  %v9992_v39 = vunpack.c.l.bf16 %v3767_v37  ;;  %v9994_v19 = vunpack.c.h.bf16 %v3767_v37  ;;  %v7021_v30 = vpop.eup %7020  ;;  %v6423_v61 = vld [vmem:[#allocation17 + $0xa8] sm:$0xff]  ;;  %5488 = vmatpush.bf16.msra.mxu1 %v6407_v32  ;;  %v10014_v48 = vpack.c.bf16 %v7019_v15, %v7017_v24 }
 0xb54   : > { %10988 = vst [vmem:[#allocation67_spill] sm:$0xff] %v9984_v23  ;;  %v3970_v11 = vmul.f32 0.044677734, %v9982_v17  ;;  %v3971_v13 = vmul.f32 0.044677734, %v9984_v23  ;;  %v6431_v37 = vld [vmem:[#allocation17 + $0xe8] sm:$0xff]  ;;  %v7023_v31 = vpop.eup %7022  ;;  %5586 = vmatpush.bf16.msra.mxu0 %v6423_v61  ;;  %v3346_v32 = vadd.f32 %v9919_v40, %v3327_v36 }
 0xb55   : > { %10989 = vst [vmem:[#allocation66_spill] sm:$0xff] %v9992_v39  ;;  %v3293_v0 = vsel %vm3292_vm1, %v9933_v21, %v3289_v12  ;;  %v3972_v10 = vmul.f32 0.044677734, %v9992_v39  ;;  %v3973_v20 = vmul.f32 0.044677734, %v9994_v19  ;;  %v3633_v1 = vpop.f32.mrf.mxu3  ;;  %5635 = vmatpush.bf16.msra.mxu2 %v6431_v37  ;;  %v6412_v21 = vld [vmem:[#allocation17 + $0x50] sm:$0xff] }
 0xb56   : > { %10990 = vst [vmem:[#allocation36_spill] sm:$0xff] %v9994_v19  ;;  %v3309_v18 = vmul.f32 %v3293_v0, %v10991_v7  ;;  %v4022_v57 = vpack.c.bf16 %v3971_v13, %v3970_v11  ;;  %v3634_v9 = vadd.f32 %v3633_v1, %v10986_v2  ;;  %v3731_v28 = vpop.f32.mrf.mxu2  ;;  %v6430_v13 = vld [vmem:[#allocation17 + $0xe0] sm:$0xff] }
 0xb57   : > { %v4023_v12 = vpack.c.bf16 %v3973_v20, %v3972_v10  ;;  %v3732_v59 = vadd.f32 %v3731_v28, %v10987_v63  ;;  %5489 = vmatpush.bf16.msra.mxu1 %v6406_v60 }
 0xb58   : > { %v4066_v55 = vunpack.c.l.bf16 %v4022_v57  ;;  %v4067_v7 = vunpack.c.h.bf16 %v4022_v57  ;;  %v3768_v11 = vpack.c.bf16 %v3634_v9, %v3585_v50  ;;  %v3328_v0 = vmul.f32 %v9900_v51, %v3309_v18  ;;  %5587 = vmatpush.bf16.msra.mxu0 %v6422_v8 }
 0xb59   : > { %v4068_v1 = vunpack.c.l.bf16 %v4023_v12  ;;  %v4069_v10 = vunpack.c.h.bf16 %v4023_v12  ;;  %v3769_v20 = vpack.c.bf16 %v3732_v59, %v3683_v62  ;;  %5636 = vmatpush.bf16.msra.mxu2 %v6430_v13  ;;  %v10036_v12 = vpack.c.bf16 %v7023_v31, %v7021_v30 }
 0xb5a   : > { %v4130_v61 = vmul.f32 %v4066_v55, %v9982_v17  ;;  %v4131_v24 = vmul.f32 %v4067_v7, %v9984_v23  ;;  %v10021_v15 = vunpack.c.l.bf16 %v3768_v11  ;;  %v10023_v28 = vunpack.c.h.bf16 %v3768_v11 }
 0xb5b   : > { %v4132_v57 = vmul.f32 %v4068_v1, %v9992_v39  ;;  %v4133_v50 = vmul.f32 %v4069_v10, %v9994_v19  ;;  %v10027_v37 = vunpack.c.l.bf16 %v3769_v20  ;;  %v10029_v51 = vunpack.c.h.bf16 %v3769_v20 }
 0xb5c   : > { %v4182_v59 = vpack.c.bf16 %v4131_v24, %v4130_v61  ;;  %v3974_v18 = vmul.f32 0.044677734, %v10021_v15  ;;  %v3975_v55 = vmul.f32 0.044677734, %v10023_v28  ;;  %v3347_v62 = vadd.f32 %v9919_v40, %v3328_v0 }
 0xb5d   : > { %v4183_v36 = vpack.c.bf16 %v4133_v50, %v4132_v57  ;;  %v3976_v9 = vmul.f32 0.044677734, %v10027_v37  ;;  %v3977_v56 = vmul.f32 0.044677734, %v10029_v51  ;;  %v4850_v61 = vunpack.c.l.bf16 %v10014_v48 }
 0xb5e   : > { %v4226_v7 = vunpack.c.l.bf16 %v4182_v59  ;;  %v4227_v11 = vunpack.c.h.bf16 %v4182_v59  ;;  %v4024_v1 = vpack.c.bf16 %v3975_v55, %v3974_v18  ;;  %v3355_v60 = vpack.c.bf16 %v3347_v62, %v3346_v32 }
 0xb5f   : > { %v4228_v8 = vunpack.c.l.bf16 %v4183_v36  ;;  %v4229_v10 = vunpack.c.h.bf16 %v4183_v36  ;;  %v4025_v20 = vpack.c.bf16 %v3977_v56, %v3976_v9  ;;  %v4851_v55 = vunpack.c.h.bf16 %v10014_v48 }
 0xb60   : > { %v4290_v13 = vmul.f32 %v4226_v7, %v9982_v17  ;;  %v4291_v40 = vmul.f32 %v4227_v11, %v9984_v23  ;;  %v4070_v0 = vunpack.c.l.bf16 %v4024_v1  ;;  %v4071_v24 = vunpack.c.h.bf16 %v4024_v1  ;;  %3601 = vmatmul.bf16.gmra.mxu1 %v3355_v60  ;;  %3650 = vmatmul.bf16.gmra.mxu3 %v3355_v60 }
 0xb61   : > { %v4292_v31 = vmul.f32 %v4228_v8, %v9992_v39  ;;  %v4293_v30 = vmul.f32 %v4229_v10, %v9994_v19  ;;  %v4072_v57 = vunpack.c.l.bf16 %v4025_v20  ;;  %v4073_v50 = vunpack.c.h.bf16 %v4025_v20  ;;  %3699 = vmatmul.bf16.gmra.mxu0 %v3355_v60  ;;  %3748 = vmatmul.bf16.gmra.mxu2 %v3355_v60 }
 0xb62   : > { %v4342_v32 = vpack.c.bf16 %v4291_v40, %v4290_v13  ;;  %v4134_v59 = vmul.f32 %v4070_v0, %v10021_v15  ;;  %v4135_v18 = vmul.f32 %v4071_v24, %v10023_v28  ;;  %v4854_v56 = vunpack.c.l.bf16 %v10036_v12  ;;  %v6405_v13 = vld [vmem:[#allocation17 + $0x18] sm:$0xff] }
 0xb63   : > { %v4343_v62 = vpack.c.bf16 %v4293_v30, %v4292_v31  ;;  %v4136_v36 = vmul.f32 %v4072_v57, %v10027_v37  ;;  %v4137_v9 = vmul.f32 %v4073_v50, %v10029_v51  ;;  %v4855_v8 = vunpack.c.h.bf16 %v10036_v12  ;;  %v6413_v40 = vld [vmem:[#allocation17 + $0x58] sm:$0xff]  ;;  %5490 = vmatpush.bf16.msra.mxu1 %v6405_v13 }
 0xb64   : > { %v4386_v7 = vunpack.c.l.bf16 %v4342_v32  ;;  %v4387_v11 = vunpack.c.h.bf16 %v4342_v32  ;;  %v4184_v1 = vpack.c.bf16 %v4135_v18, %v4134_v59  ;;  %v6421_v0 = vld [vmem:[#allocation17 + $0x98] sm:$0xff]  ;;  %v4914_v24 = vadd.f32 1.0, %v4850_v61  ;;  %v3587_v18 = vpop.f32.mrf.mxu1  ;;  %5539 = vmatpush.bf16.msra.mxu3 %v6413_v40 }
 0xb65   : > { %v4388_v60 = vunpack.c.l.bf16 %v4343_v62  ;;  %v4389_v10 = vunpack.c.h.bf16 %v4343_v62  ;;  %v4185_v20 = vpack.c.bf16 %v4137_v9, %v4136_v36  ;;  %v6429_v50 = vld [vmem:[#allocation17 + $0xd8] sm:$0xff]  ;;  %v3685_v62 = vpop.f32.mrf.mxu0  ;;  %5588 = vmatpush.bf16.msra.mxu0 %v6421_v0 }
 0xb66   : > { %v4450_v48 = vadd.f32 %v4386_v7, %v9982_v17  ;;  %v4451_v31 = vadd.f32 %v4387_v11, %v9984_v23  ;;  %v4230_v30 = vunpack.c.l.bf16 %v4184_v1  ;;  %v4231_v57 = vunpack.c.h.bf16 %v4184_v1  ;;  %5637 = vmatpush.bf16.msra.mxu2 %v6429_v50 }
 0xb67   : > { %v4452_v45 = vadd.f32 %v4388_v60, %v9992_v39  ;;  %v4453_v32 = vadd.f32 %v4389_v10, %v9994_v19  ;;  %v4232_v59 = vunpack.c.l.bf16 %v4185_v20  ;;  %v4233_v12 = vunpack.c.h.bf16 %v4185_v20  ;;  %v6404_v10 = vld [vmem:[#allocation17 + $0x10] sm:$0xff] }
 0xb68   : > { %v4502_v36 = vpack.c.bf16 %v4451_v31, %v4450_v48  ;;  %v4294_v61 = vmul.f32 %v4230_v30, %v10021_v15  ;;  %v4295_v9 = vmul.f32 %v4231_v57, %v10023_v28  ;;  %v4915_v7 = vadd.f32 1.0, %v4851_v55  ;;  %v6420_v20 = vld [vmem:[#allocation17 + $0x90] sm:$0xff]  ;;  %5491 = vmatpush.bf16.msra.mxu1 %v6404_v10  ;;  %5540 = vmatpush.bf16.msra.mxu3 %v6412_v21  ;;  %v6427_v10 = vld [vmem:[#allocation17 + $0xc8] sm:$0xff] }
 0xb69   : > { %v4503_v11 = vpack.c.bf16 %v4453_v32, %v4452_v45  ;;  %v4296_v1 = vmul.f32 %v4232_v59, %v10027_v37  ;;  %v4297_v60 = vmul.f32 %v4233_v12, %v10029_v51  ;;  %v4918_v19 = vadd.f32 1.0, %v4854_v56  ;;  %v6428_v48 = vld [vmem:[#allocation17 + $0xd0] sm:$0xff]  ;;  %v3636_v45 = vpop.f32.mrf.mxu3  ;;  %v3734_v59 = vpop.f32.mrf.mxu2  ;;  %5589 = vmatpush.bf16.msra.mxu0 %v6420_v20 }
 0xb6a   : > { %v4546_v39 = vunpack.c.l.bf16 %v4502_v36  ;;  %v4547_v13 = vunpack.c.h.bf16 %v4502_v36  ;;  %v4344_v40 = vpack.c.bf16 %v4295_v9, %v4294_v61  ;;  %v4919_v31 = vadd.f32 1.0, %v4855_v8  ;;  %5638 = vmatpush.bf16.msra.mxu2 %v6428_v48  ;;  %v6403_v8 = vld [vmem:[#allocation17 + $0x8] sm:$0xff] }
 0xb6b   : > { %v4548_v30 = vunpack.c.l.bf16 %v4503_v11  ;;  %v4549_v23 = vunpack.c.h.bf16 %v4503_v11  ;;  %v4345_v57 = vpack.c.bf16 %v4297_v60, %v4296_v1  ;;  %v3588_v55 = vadd.f32 %v3587_v18, %v9469_v35  ;;  %v6411_v11 = vld [vmem:[#allocation17 + $0x48] sm:$0xff] }
 0xb6c   : > { %v4610_v0 = vmul.f32 0.796875, %v4546_v39  ;;  %v4390_v32 = vunpack.c.l.bf16 %v4344_v40  ;;  %v4391_v50 = vunpack.c.h.bf16 %v4344_v40  ;;  %v10059_v12 = vpack.c.bf16 %v4915_v7, %v4914_v24  ;;  %v6419_v1 = vld [vmem:[#allocation17 + $0x88] sm:$0xff]  ;;  %5492 = vmatpush.bf16.msra.mxu1 %v6403_v8  ;;  %5541 = vmatpush.bf16.msra.mxu3 %v6411_v11 }
 0xb6d   : > { %v4611_v56 = vmul.f32 0.796875, %v4547_v13  ;;  %v4612_v36 = vmul.f32 0.796875, %v4548_v30  ;;  %v4392_v61 = vunpack.c.l.bf16 %v4345_v57  ;;  %v4393_v9 = vunpack.c.h.bf16 %v4345_v57  ;;  %5590 = vmatpush.bf16.msra.mxu0 %v6419_v1 }
 0xb6e   : > { %v4613_v60 = vmul.f32 0.796875, %v4549_v23  ;;  %v4454_v18 = vadd.f32 %v4390_v32, %v10021_v15  ;;  %v4455_v21 = vadd.f32 %v4391_v50, %v10023_v28  ;;  %v3637_v39 = vadd.f32 %v3636_v45, %v10986_v2  ;;  %v3589_v50 = vpop.f32.mrf.mxu1  ;;  %5639 = vmatpush.bf16.msra.mxu2 %v6427_v10 }
 0xb6f   : > { %v4456_v20 = vadd.f32 %v4392_v61, %v10027_v37  ;;  %v4457_v24 = vadd.f32 %v4393_v9, %v10029_v51  ;;  %v3686_v7 = vadd.f32 %v3685_v62, %v9475_v46  ;;  %v3735_v13 = vadd.f32 %v3734_v59, %v10987_v63  ;;  %v3687_v61 = vpop.f32.mrf.mxu0  ;;  %v6402_v62 = vld [vmem:[#allocation17] sm:$0xff] }
 0xb70   : > { %v4504_v40 = vpack.c.bf16 %v4455_v21, %v4454_v18  ;;  %v3770_v48 = vpack.c.bf16 %v3637_v39, %v3588_v55  ;;  %v10068_v23 = vpack.c.bf16 %v4919_v31, %v4918_v19  ;;  %v10071_v57 = vpack.c.bf16 %v4611_v56, %v4610_v0  ;;  %v6410_v9 = vld [vmem:[#allocation17 + $0x40] sm:$0xff]  ;;  %5493 = vmatpush.bf16.msra.mxu1 %v6402_v62 }
 0xb71   : > { %v10073_v45 = vpack.c.bf16 %v4457_v24, %v4456_v20  ;;  %v3771_v32 = vpack.c.bf16 %v3735_v13, %v3686_v7  ;;  %v6418_v59 = vld [vmem:[#allocation17 + $0x80] sm:$0xff]  ;;  %v10992_v8 = vunpack.c.l.bf16 %v9763_v26  ;;  %v10077_v55 = vpack.c.bf16 %v4613_v60, %v4612_v36  ;;  %v3638_v39 = vpop.f32.mrf.mxu3  ;;  %v3736_v24 = vpop.f32.mrf.mxu2  ;;  %5542 = vmatpush.bf16.msra.mxu3 %v6410_v9 }
 0xb72   : > { %v10079_v19 = vunpack.c.l.bf16 %v3770_v48  ;;  %v10081_v31 = vunpack.c.h.bf16 %v3770_v48  ;;  %v6426_v0 = vld [vmem:[#allocation17 + $0xc0] sm:$0xff]  ;;  %v5074_v56 = vunpack.c.l.bf16 %v10059_v12  ;;  %v4550_v11 = vunpack.c.l.bf16 %v4504_v40  ;;  %5591 = vmatpush.bf16.msra.mxu0 %v6418_v59 }
 0xb73   : > { %7024 = vtanh.f32 %v10992_v8  ;;  %v4551_v18 = vunpack.c.h.bf16 %v4504_v40  ;;  %v10084_v21 = vunpack.c.l.bf16 %v3771_v32  ;;  %v10086_v1 = vunpack.c.h.bf16 %v3771_v32  ;;  %5640 = vmatpush.bf16.msra.mxu2 %v6426_v0 }
 0xb74   : > { %v3978_v10 = vmul.f32 0.044677734, %v10079_v19  ;;  %v3979_v36 = vmul.f32 0.044677734, %v10081_v31  ;;  %v3590_v60 = vadd.f32 %v3589_v50, %v9469_v35  ;;  %v3688_v20 = vadd.f32 %v3687_v61, %v9475_v46 }
 0xb75   : > { %10993 = vst [vmem:[#allocation54_spill] sm:$0xff] %v10084_v21  ;;  %v3980_v13 = vmul.f32 0.044677734, %v10084_v21  ;;  %v3981_v40 = vmul.f32 0.044677734, %v10086_v1  ;;  %v5078_v48 = vunpack.c.l.bf16 %v10068_v23  ;;  %v3639_v8 = vadd.f32 %v3638_v39, %v10986_v2 }
 0xb76   : > { %10994 = vst [vmem:[#allocation34_spill] sm:$0xff] %v10086_v1  ;;  %v4026_v62 = vpack.c.bf16 %v3979_v36, %v3978_v10  ;;  %v3737_v50 = vadd.f32 %v3736_v24, %v10987_v63  ;;  %v10995_v61 = vpack.c.bf16 %v9905_v16, %v9867_v44  ;;  %v10104_v7 = vmul.f32 0.796875, %v4550_v11 }
 0xb77   : > { %v10106_v30 = vmul.f32 0.796875, %v4551_v18  ;;  %v4027_v59 = vpack.c.bf16 %v3981_v40, %v3980_v13  ;;  %v10996_v0 = vpack.c.bf16 %v9909_v47, %v9870_v34  ;;  %v10997_v10 = vunpack.c.l.bf16 %v9884_v58 }
 0xb78   : > { %5494 = vmatmul.bf16.vlgmr.msra.gmra.mxu1 %v10995_v61  ;;  %v4074_v36 = vunpack.c.l.bf16 %v4026_v62  ;;  %v4075_v24 = vunpack.c.h.bf16 %v4026_v62  ;;  %v3772_v32 = vpack.c.bf16 %v3639_v8, %v3590_v60  ;;  %v3773_v44 = vpack.c.bf16 %v3737_v50, %v3688_v20 }
 0xb79   : > { %v10102_v9 = vpop.eup %7024  ;;  %5543 = vmatmul.bf16.vlgmr.msra.gmra.mxu3 %v10996_v0  ;;  %v10113_v39 = vmul.f32 %v5074_v56, %v10997_v10  ;;  %v10998_v16 = vpack.c.bf16 %v9930_v53, %v9945_v4  ;;  %v10999_v11 = vpack.c.bf16 %v9949_v27, %v9960_v38  ;;  %v4076_v18 = vunpack.c.l.bf16 %v4027_v59 }
 0xb7a   : > { %v4077_v13 = vunpack.c.h.bf16 %v4027_v59  ;;  %v11000_v34 = vunpack.c.l.bf16 %v9896_v25  ;;  %v5079_v56 = vunpack.c.h.bf16 %v10068_v23  ;;  %v4138_v40 = vmul.f32 %v4074_v36, %v10079_v19 }
 0xb7b   : > { %5592 = vmatmul.bf16.vlgmr.msra.gmra.mxu0 %v10998_v16  ;;  %5641 = vmatmul.bf16.vlgmr.msra.gmra.mxu2 %v10999_v11  ;;  %v4139_v60 = vmul.f32 %v4075_v24, %v10081_v31  ;;  %v10126_v20 = vunpack.c.l.bf16 %v3772_v32  ;;  %v10128_v62 = vunpack.c.h.bf16 %v3772_v32  ;;  %v4140_v53 = vmul.f32 %v4076_v18, %v10084_v21 }
 0xb7c   : > { %v5142_v47 = vmul.f32 %v5078_v48, %v11000_v34  ;;  %v4141_v4 = vmul.f32 %v4077_v13, %v10086_v1  ;;  %v10132_v27 = vunpack.c.l.bf16 %v3773_v44  ;;  %v10134_v38 = vunpack.c.h.bf16 %v3773_v44 }
 0xb7d   : > { %v4186_v8 = vpack.c.bf16 %v4139_v60, %v4138_v40  ;;  %v3982_v48 = vmul.f32 0.044677734, %v10126_v20  ;;  %v3983_v23 = vmul.f32 0.044677734, %v10128_v62  ;;  %v5075_v50 = vunpack.c.h.bf16 %v10059_v12 }
 0xb7e   : > { %11001 = vst [vmem:[#allocation56_spill] sm:$0xff] %v10132_v27  ;;  %v4187_v61 = vpack.c.bf16 %v4141_v4, %v4140_v53  ;;  %v3984_v59 = vmul.f32 0.044677734, %v10132_v27  ;;  %v3985_v32 = vmul.f32 0.044677734, %v10134_v38  ;;  %v11003_v0 = vunpack.c.h.bf16 %v9896_v25 }
 0xb7f   : > { %11002 = vst [vmem:[#allocation68_spill] sm:$0xff] %v10134_v38  ;;  %v4234_v36 = vunpack.c.l.bf16 %v4186_v8  ;;  %v4235_v24 = vunpack.c.h.bf16 %v4186_v8  ;;  %v4028_v16 = vpack.c.bf16 %v3983_v23, %v3982_v48  ;;  %v11004_v44 = vunpack.c.h.bf16 %v9763_v26 }
 0xb80   : > { %v5143_v10 = vmul.f32 %v5079_v56, %v11003_v0  ;;  %v4236_v11 = vunpack.c.l.bf16 %v4187_v61  ;;  %v4237_v18 = vunpack.c.h.bf16 %v4187_v61  ;;  %v4029_v13 = vpack.c.bf16 %v3985_v32, %v3984_v59 }
 0xb81   : > { %7026 = vtanh.f32 %v11004_v44  ;;  %v11005_v34 = vunpack.c.l.bf16 %v9989_v3  ;;  %v4298_v12 = vmul.f32 %v4234_v36, %v10079_v19  ;;  %v4299_v40 = vmul.f32 %v4235_v24, %v10081_v31 }
 0xb82   : > { %v4078_v60 = vunpack.c.l.bf16 %v4028_v16  ;;  %v4079_v53 = vunpack.c.h.bf16 %v4028_v16  ;;  %v4300_v25 = vmul.f32 %v4236_v11, %v10084_v21  ;;  %v4301_v56 = vmul.f32 %v4237_v18, %v10086_v1 }
 0xb83   : > { %7028 = vtanh.f32 %v11005_v34  ;;  %v4080_v4 = vunpack.c.l.bf16 %v4029_v13  ;;  %v4081_v8 = vunpack.c.h.bf16 %v4029_v13  ;;  %v4346_v26 = vpack.c.bf16 %v4299_v40, %v4298_v12 }
 0xb84   : > { %v4142_v48 = vmul.f32 %v4078_v60, %v10126_v20  ;;  %v4143_v23 = vmul.f32 %v4079_v53, %v10128_v62  ;;  %v11006_v61 = vunpack.c.h.bf16 %v9989_v3  ;;  %v4347_v59 = vpack.c.bf16 %v4301_v56, %v4300_v25 }
 0xb85   : > { %v4144_v32 = vmul.f32 %v4080_v4, %v10132_v27  ;;  %v4145_v0 = vmul.f32 %v4081_v8, %v10134_v38  ;;  %v11007_v36 = vunpack.c.h.bf16 %v9884_v58  ;;  %v4394_v44 = vunpack.c.l.bf16 %v4346_v26 }
 0xb86   : > { %7030 = vtanh.f32 %v11006_v61  ;;  %v4395_v11 = vunpack.c.h.bf16 %v4346_v26  ;;  %v4188_v18 = vpack.c.bf16 %v4143_v23, %v4142_v48  ;;  %v5198_v13 = vpack.c.bf16 %v5142_v47, %v10113_v39 }
 0xb87   : > { %v5139_v24 = vmul.f32 %v5075_v50, %v11007_v36  ;;  %v7027_v16 = vpop.eup %7026  ;;  %v4396_v12 = vunpack.c.l.bf16 %v4347_v59  ;;  %v4397_v40 = vunpack.c.h.bf16 %v4347_v59  ;;  %v4189_v60 = vpack.c.bf16 %v4145_v0, %v4144_v32 }
 0xb88   : > { %v4458_v53 = vadd.f32 %v4394_v44, %v10079_v19  ;;  %v4459_v25 = vadd.f32 %v4395_v11, %v10081_v31  ;;  %v4238_v56 = vunpack.c.l.bf16 %v4188_v18  ;;  %v4239_v4 = vunpack.c.h.bf16 %v4188_v18  ;;  %5499 = vmatmul.bf16.gmra.mxu1 %v5198_v13  ;;  %v3592_v13 = vpop.f32.mrf.mxu1 }
 0xb89   : > { %v7029_v34 = vpop.eup %7028  ;;  %v5199_v3 = vpack.c.bf16 %v5143_v10, %v5139_v24  ;;  %v4460_v58 = vadd.f32 %v4396_v12, %v10084_v21  ;;  %v4461_v50 = vadd.f32 %v4397_v40, %v10086_v1  ;;  %v4240_v8 = vunpack.c.l.bf16 %v4189_v60 }
 0xb8a   : > { %v4241_v26 = vunpack.c.h.bf16 %v4189_v60  ;;  %v11008_v47 = vunpack.c.l.bf16 %v10073_v45  ;;  %v4506_v10 = vpack.c.bf16 %v4459_v25, %v4458_v53  ;;  %v4302_v23 = vmul.f32 %v4238_v56, %v10126_v20  ;;  %v3690_v60 = vpop.f32.mrf.mxu0 }
 0xb8b   : > { %5548 = vmatmul.bf16.gmra.mxu3 %v5199_v3  ;;  %v4303_v61 = vmul.f32 %v4239_v4, %v10128_v62  ;;  %v11009_v59 = vunpack.c.h.bf16 %v10073_v45  ;;  %v4507_v0 = vpack.c.bf16 %v4461_v50, %v4460_v58  ;;  %v4304_v36 = vmul.f32 %v4240_v8, %v10132_v27 }
 0xb8c   : > { %v7031_v39 = vpop.eup %7030  ;;  %v10166_v48 = vmul.f32 0.796875, %v11008_v47  ;;  %v4305_v24 = vmul.f32 %v4241_v26, %v10134_v38  ;;  %v4554_v44 = vunpack.c.l.bf16 %v4506_v10  ;;  %v4555_v11 = vunpack.c.h.bf16 %v4506_v10 }
 0xb8d   : > { %v10172_v32 = vmul.f32 0.796875, %v11009_v59  ;;  %v4348_v18 = vpack.c.bf16 %v4303_v61, %v4302_v23  ;;  %v4815_v12 = vpack.c.bf16 %v7027_v16, %v10102_v9  ;;  %v4817_v3 = vpack.c.bf16 %v7031_v39, %v7029_v34 }
 0xb8e   : > { %v4349_v40 = vpack.c.bf16 %v4305_v24, %v4304_v36  ;;  %v4556_v25 = vunpack.c.l.bf16 %v4507_v0  ;;  %v4557_v56 = vunpack.c.h.bf16 %v4507_v0  ;;  %v4618_v50 = vmul.f32 0.796875, %v4554_v44  ;;  %v3641_v44 = vpop.f32.mrf.mxu3 }
 0xb8f   : > { %v4398_v4 = vunpack.c.l.bf16 %v4348_v18  ;;  %v4399_v58 = vunpack.c.h.bf16 %v4348_v18  ;;  %v4619_v8 = vmul.f32 0.796875, %v4555_v11  ;;  %v4852_v9 = vunpack.c.l.bf16 %v4815_v12 }
 0xb90   : > { %v4400_v26 = vunpack.c.l.bf16 %v4349_v40  ;;  %v4401_v47 = vunpack.c.h.bf16 %v4349_v40  ;;  %v4853_v16 = vunpack.c.h.bf16 %v4815_v12  ;;  %v3593_v61 = vadd.f32 %v3592_v13, %v9469_v35  ;;  %v3594_v45 = vpop.f32.mrf.mxu1 }
 0xb91   : > { %v4462_v10 = vadd.f32 %v4398_v4, %v10126_v20  ;;  %v4463_v23 = vadd.f32 %v4399_v58, %v10128_v62  ;;  %v4856_v59 = vunpack.c.l.bf16 %v4817_v3  ;;  %v4620_v0 = vmul.f32 0.796875, %v4556_v25  ;;  %v3739_v58 = vpop.f32.mrf.mxu2 }
 0xb92   : > { %v4464_v34 = vadd.f32 %v4400_v26, %v10132_v27  ;;  %v4465_v39 = vadd.f32 %v4401_v47, %v10134_v38  ;;  %v4621_v36 = vmul.f32 0.796875, %v4557_v56  ;;  %v4857_v11 = vunpack.c.h.bf16 %v4817_v3 }
 0xb93   : > { %v4508_v24 = vpack.c.bf16 %v4463_v23, %v4462_v10  ;;  %v10184_v18 = vpack.c.bf16 %v4619_v8, %v4618_v50  ;;  %v3691_v4 = vadd.f32 %v3690_v60, %v9475_v46  ;;  %v3642_v12 = vadd.f32 %v3641_v44, %v10986_v2 }
 0xb94   : > { %v10186_v40 = vpack.c.bf16 %v4465_v39, %v4464_v34  ;;  %v3740_v47 = vadd.f32 %v3739_v58, %v10987_v63  ;;  %v4916_v13 = vadd.f32 1.0, %v4852_v9  ;;  %v4917_v53 = vadd.f32 1.0, %v4853_v16  ;;  %v3692_v16 = vpop.f32.mrf.mxu0 }
 0xb95   : > { %11010 = vst [vmem:[#allocation43_spill] sm:$0xff] %v10184_v18  ;;  %v4558_v26 = vunpack.c.l.bf16 %v4508_v24  ;;  %v4559_v25 = vunpack.c.h.bf16 %v4508_v24  ;;  %v3774_v56 = vpack.c.bf16 %v3642_v12, %v3593_v61  ;;  %v4920_v10 = vadd.f32 1.0, %v4856_v59 }
 0xb96   : > { %v4921_v23 = vadd.f32 1.0, %v4857_v11  ;;  %v10191_v3 = vpack.c.bf16 %v4621_v36, %v4620_v0  ;;  %v4560_v50 = vunpack.c.l.bf16 %v10186_v40  ;;  %v3775_v8 = vpack.c.bf16 %v3740_v47, %v3691_v4 }
 0xb97   : > { %v5013_v60 = vunpack.c.h.bf16 %v9980_v6  ;;  %v10196_v39 = vunpack.c.l.bf16 %v3774_v56  ;;  %v10198_v44 = vunpack.c.h.bf16 %v3774_v56  ;;  %v3595_v9 = vadd.f32 %v3594_v45, %v9469_v35 }
 0xb98   : > { %11011 = vst [vmem:[#allocation47_spill] sm:$0xff] %v10191_v3  ;;  %v10201_v24 = vmul.f32 0.796875, %v4558_v26  ;;  %v10203_v61 = vunpack.c.l.bf16 %v3775_v8  ;;  %v10205_v59 = vunpack.c.h.bf16 %v3775_v8  ;;  %v4975_v0 = vpack.c.bf16 %v4917_v53, %v4916_v13  ;;  %v3643_v26 = vpop.f32.mrf.mxu3 }
 0xb99   : > { %v10207_v36 = vmul.f32 0.796875, %v4559_v25  ;;  %v3986_v11 = vmul.f32 0.044677734, %v10196_v39  ;;  %v3987_v4 = vmul.f32 0.044677734, %v10198_v44  ;;  %v4977_v12 = vpack.c.bf16 %v4921_v23, %v4920_v10  ;;  %v3741_v35 = vpop.f32.mrf.mxu2 }
 0xb9a   : > { %v3988_v58 = vmul.f32 0.044677734, %v10203_v61  ;;  %v3989_v47 = vmul.f32 0.044677734, %v10205_v59  ;;  %v3693_v45 = vadd.f32 %v3692_v16, %v9475_v46  ;;  %v5076_v56 = vunpack.c.l.bf16 %v4975_v0 }
 0xb9b   : > { %v4030_v34 = vpack.c.bf16 %v3987_v4, %v3986_v11  ;;  %v3644_v8 = vadd.f32 %v3643_v26, %v10986_v2  ;;  %v5080_v53 = vunpack.c.l.bf16 %v4977_v12  ;;  %v5017_v13 = vunpack.c.h.bf16 %v10004_v52 }
 0xb9c   : > { %v4031_v25 = vpack.c.bf16 %v3989_v47, %v3988_v58  ;;  %v3742_v38 = vadd.f32 %v3741_v35, %v10987_v63  ;;  %v11012_v10 = vunpack.c.l.bf16 %v9980_v6  ;;  %v5077_v3 = vunpack.c.h.bf16 %v4975_v0 }
 0xb9d   : > { %v4082_v27 = vunpack.c.l.bf16 %v4030_v34  ;;  %v4083_v1 = vunpack.c.h.bf16 %v4030_v34  ;;  %v3776_v21 = vpack.c.bf16 %v3644_v8, %v3595_v9  ;;  %v11013_v16 = vunpack.c.l.bf16 %v10004_v52 }
 0xb9e   : > { %v5140_v23 = vmul.f32 %v5076_v56, %v11012_v10  ;;  %v4084_v11 = vunpack.c.l.bf16 %v4031_v25  ;;  %v4085_v4 = vunpack.c.h.bf16 %v4031_v25  ;;  %v3777_v26 = vpack.c.bf16 %v3742_v38, %v3693_v45 }
 0xb9f   : > { %v5144_v46 = vmul.f32 %v5080_v53, %v11013_v16  ;;  %v5081_v2 = vunpack.c.h.bf16 %v4977_v12  ;;  %v4146_v18 = vmul.f32 %v4082_v27, %v10196_v39  ;;  %v4147_v58 = vmul.f32 %v4083_v1, %v10198_v44 }
 0xba0   : > { %v10223_v47 = vunpack.c.l.bf16 %v3776_v21  ;;  %v10225_v35 = vunpack.c.h.bf16 %v3776_v21  ;;  %v4148_v6 = vmul.f32 %v4084_v11, %v10203_v61  ;;  %v4149_v34 = vmul.f32 %v4085_v4, %v10205_v59 }
 0xba1   : > { %v10229_v9 = vunpack.c.l.bf16 %v3777_v26  ;;  %v10231_v52 = vunpack.c.h.bf16 %v3777_v26  ;;  %v4190_v0 = vpack.c.bf16 %v4147_v58, %v4146_v18  ;;  %v5200_v27 = vpack.c.bf16 %v5144_v46, %v5140_v23 }
 0xba2   : > { %v3990_v38 = vmul.f32 0.044677734, %v10223_v47  ;;  %v3991_v12 = vmul.f32 0.044677734, %v10225_v35  ;;  %v10235_v45 = vmul.f32 0.796875, %v4560_v50  ;;  %v4191_v1 = vpack.c.bf16 %v4149_v34, %v4148_v6 }
 0xba3   : > { %v3992_v21 = vmul.f32 0.044677734, %v10229_v9  ;;  %v3993_v56 = vmul.f32 0.044677734, %v10231_v52  ;;  %v4242_v8 = vunpack.c.l.bf16 %v4190_v0  ;;  %v4243_v53 = vunpack.c.h.bf16 %v4190_v0  ;;  %5597 = vmatmul.bf16.gmra.mxu0 %v5200_v27 }
 0xba4   : > { %v4032_v25 = vpack.c.bf16 %v3991_v12, %v3990_v38  ;;  %v5145_v10 = vmul.f32 %v5081_v2, %v5017_v13  ;;  %v4244_v16 = vunpack.c.l.bf16 %v4191_v1  ;;  %v4245_v11 = vunpack.c.h.bf16 %v4191_v1 }
 0xba5   : > { %v4033_v18 = vpack.c.bf16 %v3993_v56, %v3992_v21  ;;  %v5141_v4 = vmul.f32 %v5077_v3, %v5013_v60  ;;  %v4306_v26 = vmul.f32 %v4242_v8, %v10196_v39  ;;  %v4307_v46 = vmul.f32 %v4243_v53, %v10198_v44 }
 0xba6   : > { %v4086_v50 = vunpack.c.l.bf16 %v4032_v25  ;;  %v4087_v23 = vunpack.c.h.bf16 %v4032_v25  ;;  %v4308_v58 = vmul.f32 %v4244_v16, %v10203_v61  ;;  %v4309_v6 = vmul.f32 %v4245_v11, %v10205_v59 }
 0xba7   : > { %v4088_v34 = vunpack.c.l.bf16 %v4033_v18  ;;  %v4089_v63 = vunpack.c.h.bf16 %v4033_v18  ;;  %v4350_v0 = vpack.c.bf16 %v4307_v46, %v4306_v26  ;;  %v5201_v13 = vpack.c.bf16 %v5145_v10, %v5141_v4  ;;  %v11015_v10 = vld [vmem:[#allocation64_spill] sm:$0xff] }
 0xba8   : > { %v4150_v38 = vmul.f32 %v4086_v50, %v10223_v47  ;;  %v4151_v2 = vmul.f32 %v4087_v23, %v10225_v35  ;;  %v11014_v3 = vunpack.c.h.bf16 %v10186_v40  ;;  %v4351_v12 = vpack.c.bf16 %v4309_v6, %v4308_v58 }
 0xba9   : > { %v4152_v27 = vmul.f32 %v4088_v34, %v10229_v9  ;;  %v4153_v1 = vmul.f32 %v4089_v63, %v10231_v52  ;;  %v10251_v21 = vpack.c.bf16 %v10207_v36, %v10201_v24  ;;  %v4402_v56 = vunpack.c.l.bf16 %v4350_v0  ;;  %5646 = vmatmul.bf16.gmra.mxu2 %v5201_v13  ;;  %v11016_v34 = vld [vmem:[#allocation63_spill] sm:$0xff] }
 0xbaa   : > { %v4625_v60 = vmul.f32 0.796875, %v11014_v3  ;;  %v4403_v8 = vunpack.c.h.bf16 %v4350_v0  ;;  %v4192_v53 = vpack.c.bf16 %v4151_v2, %v4150_v38  ;;  %v4404_v25 = vunpack.c.l.bf16 %v4351_v12 }
 0xbab   : > { %v4405_v16 = vunpack.c.h.bf16 %v4351_v12  ;;  %v4193_v11 = vpack.c.bf16 %v4153_v1, %v4152_v27  ;;  %v3866_v18 = vmul.f32 0.5, %v11015_v10  ;;  %v4466_v40 = vadd.f32 %v4402_v56, %v10196_v39 }
 0xbac   : > { %v4467_v4 = vadd.f32 %v4403_v8, %v10198_v44  ;;  %v4246_v26 = vunpack.c.l.bf16 %v4192_v53  ;;  %v4247_v46 = vunpack.c.h.bf16 %v4192_v53  ;;  %v4468_v63 = vadd.f32 %v4404_v25, %v10203_v61 }
 0xbad   : > { %v4469_v24 = vadd.f32 %v4405_v16, %v10205_v59  ;;  %v4248_v36 = vunpack.c.l.bf16 %v4193_v11  ;;  %v4249_v50 = vunpack.c.h.bf16 %v4193_v11  ;;  %v3867_v0 = vmul.f32 0.5, %v11016_v34 }
 0xbae   : > { %v4510_v23 = vpack.c.bf16 %v4467_v4, %v4466_v40  ;;  %v4310_v58 = vmul.f32 %v4246_v26, %v10223_v47  ;;  %v4311_v6 = vmul.f32 %v4247_v46, %v10225_v35  ;;  %v3870_v3 = vmul.f32 0.5, %v9743_v42 }
 0xbaf   : > { %v4511_v38 = vpack.c.bf16 %v4469_v24, %v4468_v63  ;;  %v4312_v2 = vmul.f32 %v4248_v36, %v10229_v9  ;;  %v4313_v13 = vmul.f32 %v4249_v50, %v10231_v52  ;;  %v4660_v56 = vpack.c.bf16 %v9843_v33, %v9841_v5 }
 0xbb0   : > { %v4562_v12 = vunpack.c.l.bf16 %v4510_v23  ;;  %v4563_v27 = vunpack.c.h.bf16 %v4510_v23  ;;  %v4352_v1 = vpack.c.bf16 %v4311_v6, %v4310_v58  ;;  %v3871_v25 = vmul.f32 0.5, %v9747_v14 }
 0xbb1   : > { %v4564_v8 = vunpack.c.l.bf16 %v4511_v38  ;;  %v4353_v53 = vpack.c.bf16 %v4313_v13, %v4312_v2  ;;  %v4698_v16 = vunpack.c.l.bf16 %v9812_v29  ;;  %v4565_v11 = vunpack.c.h.bf16 %v4511_v38 }
 0xbb2   : > { %v4406_v10 = vunpack.c.l.bf16 %v4352_v1  ;;  %v4407_v40 = vunpack.c.h.bf16 %v4352_v1  ;;  %v4699_v4 = vunpack.c.h.bf16 %v9812_v29  ;;  %v4626_v26 = vmul.f32 0.796875, %v4562_v12  ;;  %v11017_v12 = vld [vmem:[#allocation65_spill] sm:$0xff] }
 0xbb3   : > { %v4627_v46 = vmul.f32 0.796875, %v4563_v27  ;;  %v4408_v42 = vunpack.c.l.bf16 %v4353_v53  ;;  %v4409_v63 = vunpack.c.h.bf16 %v4353_v53  ;;  %v10270_v24 = vpack.c.bf16 %v4625_v60, %v10235_v45 }
 0xbb4   : > { %v4470_v5 = vadd.f32 %v4406_v10, %v10223_v47  ;;  %v4471_v33 = vadd.f32 %v4407_v40, %v10225_v35  ;;  %v4702_v36 = vunpack.c.l.bf16 %v4660_v56  ;;  %v10276_v23 = vpack.c.bf16 %v3867_v0, %v3866_v18  ;;  %v11018_v18 = vld [vmem:[#allocation52_spill] sm:$0xff] }
 0xbb5   : > { %v4472_v14 = vadd.f32 %v4408_v42, %v10229_v9  ;;  %v4473_v50 = vadd.f32 %v4409_v63, %v10231_v52  ;;  %v4703_v58 = vunpack.c.h.bf16 %v4660_v56  ;;  %v4628_v29 = vmul.f32 0.796875, %v4564_v8 }
 0xbb6   : > { %v4512_v6 = vpack.c.bf16 %v4471_v33, %v4470_v5  ;;  %v10278_v34 = vpack.c.bf16 %v3871_v25, %v3870_v3  ;;  %7032 = vtanh.f32 %v4698_v16  ;;  %v10280_v38 = vpack.c.bf16 %v4627_v46, %v4626_v26 }
 0xbb7   : > { %v4629_v45 = vmul.f32 0.796875, %v4565_v11  ;;  %v4513_v60 = vpack.c.bf16 %v4473_v50, %v4472_v14  ;;  %7034 = vtanh.f32 %v4699_v4  ;;  %v3868_v27 = vmul.f32 0.5, %v11017_v12 }
 0xbb8   : > { %v4566_v2 = vunpack.c.l.bf16 %v4512_v6  ;;  %v4567_v13 = vunpack.c.h.bf16 %v4512_v6  ;;  %7036 = vtanh.f32 %v4702_v36  ;;  %v3869_v0 = vmul.f32 0.5, %v11018_v18  ;;  %v11019_v18 = vld [vmem:[#allocation67_spill] sm:$0xff] }
 0xbb9   : > { %v4568_v1 = vunpack.c.l.bf16 %v4513_v60  ;;  %v4569_v53 = vunpack.c.h.bf16 %v4513_v60  ;;  %7038 = vtanh.f32 %v4703_v58  ;;  %v3872_v3 = vmul.f32 0.5, %v9749_v22 }
 0xbba   : > { %v4630_v56 = vmul.f32 0.796875, %v4566_v2  ;;  %v4631_v8 = vmul.f32 0.796875, %v4567_v13  ;;  %v3873_v25 = vmul.f32 0.5, %v9758_v41  ;;  %v10286_v10 = vpack.c.bf16 %v3869_v0, %v3868_v27 }
 0xbbb   : > { %v4632_v16 = vmul.f32 0.796875, %v4568_v1  ;;  %v4633_v11 = vmul.f32 0.796875, %v4569_v53  ;;  %v4661_v40 = vpack.c.bf16 %v9859_v43, %v9857_v49  ;;  %v10290_v26 = vpack.c.bf16 %v4629_v45, %v4628_v29 }
 0xbbc   : > { %v7033_v4 = vpop.eup %7032  ;;  %v5018_v46 = vunpack.c.l.bf16 %v10276_v23  ;;  %v4700_v42 = vunpack.c.l.bf16 %v9819_v54  ;;  %v4701_v63 = vunpack.c.h.bf16 %v9819_v54  ;;  %v5022_v22 = vunpack.c.l.bf16 %v10278_v34 }
 0xbbd   : > { %v7035_v5 = vpop.eup %7034  ;;  %v10296_v41 = vpack.c.bf16 %v3873_v25, %v3872_v3  ;;  %v4704_v33 = vunpack.c.l.bf16 %v4661_v40  ;;  %v4705_v36 = vunpack.c.h.bf16 %v4661_v40  ;;  %v5019_v49 = vunpack.c.h.bf16 %v10276_v23 }
 0xbbe   : > { %v7037_v14 = vpop.eup %7036  ;;  %v4818_v50 = vpack.c.bf16 %v7035_v5, %v7033_v4  ;;  %v5023_v43 = vunpack.c.h.bf16 %v10278_v34  ;;  %7040 = vtanh.f32 %v4700_v42  ;;  %v10300_v29 = vpack.c.bf16 %v4631_v8, %v4630_v56 }
 0xbbf   : > { %v7039_v58 = vpop.eup %7038  ;;  %v10302_v6 = vpack.c.bf16 %v4633_v11, %v4632_v16  ;;  %7042 = vtanh.f32 %v4701_v63  ;;  %v5020_v54 = vunpack.c.l.bf16 %v10286_v10  ;;  %v5024_v13 = vunpack.c.l.bf16 %v10296_v41 }
 0xbc0   : > { %v4820_v45 = vpack.c.bf16 %v7039_v58, %v7037_v14  ;;  %v4858_v60 = vunpack.c.l.bf16 %v4818_v50  ;;  %v4859_v2 = vunpack.c.h.bf16 %v4818_v50  ;;  %7044 = vtanh.f32 %v4704_v33 }
 0xbc1   : > { %7046 = vtanh.f32 %v4705_v36  ;;  %v5021_v23 = vunpack.c.h.bf16 %v10286_v10  ;;  %v3874_v34 = vmul.f32 0.5, %v9982_v17  ;;  %v3875_v0 = vmul.f32 0.5, %v11019_v18 }
 0xbc2   : > { %v4862_v12 = vunpack.c.l.bf16 %v4820_v45  ;;  %v4863_v27 = vunpack.c.h.bf16 %v4820_v45  ;;  %v4922_v1 = vadd.f32 1.0, %v4858_v60  ;;  %v4923_v53 = vadd.f32 1.0, %v4859_v2  ;;  %v11020_v45 = vld [vmem:[#allocation66_spill] sm:$0xff] }
 0xbc3   : > { %v4664_v56 = vpack.c.bf16 %v10106_v30, %v10104_v7  ;;  %v4706_v8 = vunpack.c.l.bf16 %v10071_v57  ;;  %v4707_v3 = vunpack.c.h.bf16 %v10071_v57  ;;  %v5025_v4 = vunpack.c.h.bf16 %v10296_v41 }
 0xbc4   : > { %v7041_v25 = vpop.eup %7040  ;;  %v4926_v16 = vadd.f32 1.0, %v4862_v12  ;;  %v4927_v11 = vadd.f32 1.0, %v4863_v27  ;;  %v4978_v40 = vpack.c.bf16 %v4923_v53, %v4922_v1  ;;  %v3878_v42 = vmul.f32 0.5, %v10021_v15 }
 0xbc5   : > { %v7043_v17 = vpop.eup %7042  ;;  %v4710_v63 = vunpack.c.l.bf16 %v4664_v56  ;;  %v4711_v5 = vunpack.c.h.bf16 %v4664_v56  ;;  %7048 = vtanh.f32 %v4706_v8  ;;  %v3879_v57 = vmul.f32 0.5, %v10023_v28 }
 0xbc6   : > { %v7045_v33 = vpop.eup %7044  ;;  %v4980_v36 = vpack.c.bf16 %v4927_v11, %v4926_v16  ;;  %v5082_v14 = vunpack.c.l.bf16 %v4978_v40  ;;  %v5083_v30 = vunpack.c.h.bf16 %v4978_v40  ;;  %v4819_v7 = vpack.c.bf16 %v7043_v17, %v7041_v25  ;;  %v11021_v25 = vld [vmem:[#allocation36_spill] sm:$0xff] }
 0xbc7   : > { %v7047_v50 = vpop.eup %7046  ;;  %v10316_v58 = vpack.c.bf16 %v3875_v0, %v3874_v34  ;;  %7050 = vtanh.f32 %v4707_v3  ;;  %v3876_v60 = vmul.f32 0.5, %v11020_v45  ;;  %v3877_v16 = vmul.f32 0.5, %v11021_v25 }
 0xbc8   : > { %v5086_v2 = vunpack.c.l.bf16 %v4980_v36  ;;  %v5146_v12 = vmul.f32 %v5082_v14, %v5018_v46  ;;  %v5087_v27 = vunpack.c.h.bf16 %v4980_v36  ;;  %v5147_v15 = vmul.f32 %v5083_v30, %v5019_v49 }
 0xbc9   : > { %v4821_v1 = vpack.c.bf16 %v7047_v50, %v7045_v33  ;;  %v4860_v53 = vunpack.c.l.bf16 %v4819_v7  ;;  %v4861_v18 = vunpack.c.h.bf16 %v4819_v7  ;;  %7052 = vtanh.f32 %v4710_v63 }
 0xbca   : > { %v5150_v56 = vmul.f32 %v5086_v2, %v5022_v22  ;;  %v5151_v8 = vmul.f32 %v5087_v27, %v5023_v43  ;;  %7054 = vtanh.f32 %v4711_v5  ;;  %v3880_v46 = vmul.f32 0.5, %v10027_v37 }
 0xbcb   : > { %v7049_v11 = vpop.eup %7048  ;;  %v4864_v28 = vunpack.c.l.bf16 %v4821_v1  ;;  %v4865_v34 = vunpack.c.h.bf16 %v4821_v1  ;;  %v4924_v0 = vadd.f32 1.0, %v4860_v53  ;;  %v4925_v3 = vadd.f32 1.0, %v4861_v18 }
 0xbcc   : > { %v5202_v40 = vpack.c.bf16 %v5150_v56, %v5146_v12  ;;  %v5203_v17 = vpack.c.bf16 %v5151_v8, %v5147_v15  ;;  %v3881_v49 = vmul.f32 0.5, %v10029_v51  ;;  %v10322_v22 = vpack.c.bf16 %v3879_v57, %v3878_v42 }
 0xbcd   : > { %v7051_v33 = vpop.eup %7050  ;;  %v4928_v36 = vadd.f32 1.0, %v4864_v28  ;;  %v4929_v14 = vadd.f32 1.0, %v4865_v34  ;;  %v4979_v63 = vpack.c.bf16 %v4925_v3, %v4924_v0  ;;  %v10324_v5 = vpack.c.bf16 %v3877_v16, %v3876_v60 }
 0xbce   : > { %5504 = vmatmul.bf16.gmra.mxu1 %v5202_v40  ;;  %5553 = vmatmul.bf16.gmra.mxu3 %v5203_v17  ;;  %v4822_v43 = vpack.c.bf16 %v7051_v33, %v7049_v11  ;;  %v4665_v30 = vpack.c.bf16 %v10172_v32, %v10166_v48  ;;  %v4708_v7 = vunpack.c.l.bf16 %v10077_v55  ;;  %v4709_v2 = vunpack.c.h.bf16 %v10077_v55 }
 0xbcf   : > { %v7053_v50 = vpop.eup %7052  ;;  %v4981_v37 = vpack.c.bf16 %v4929_v14, %v4928_v36  ;;  %v5084_v45 = vunpack.c.l.bf16 %v4979_v63  ;;  %v5085_v51 = vunpack.c.h.bf16 %v4979_v63  ;;  %v10330_v57 = vpack.c.bf16 %v3881_v49, %v3880_v46 }
 0xbd0   : > { %v7055_v12 = vpop.eup %7054  ;;  %v4866_v27 = vunpack.c.l.bf16 %v4822_v43  ;;  %v4867_v42 = vunpack.c.h.bf16 %v4822_v43  ;;  %v4712_v15 = vunpack.c.l.bf16 %v4665_v30  ;;  %v4713_v48 = vunpack.c.h.bf16 %v4665_v30 }
 0xbd1   : > { %v5088_v1 = vunpack.c.l.bf16 %v4981_v37  ;;  %v5148_v60 = vmul.f32 %v5084_v45, %v5020_v54  ;;  %v5089_v53 = vunpack.c.h.bf16 %v4981_v37  ;;  %v4824_v32 = vpack.c.bf16 %v7055_v12, %v7053_v50 }
 0xbd2   : > { %v4930_v18 = vadd.f32 1.0, %v4866_v27  ;;  %v4931_v56 = vadd.f32 1.0, %v4867_v42  ;;  %7056 = vtanh.f32 %v4708_v7  ;;  %v5149_v55 = vmul.f32 %v5085_v51, %v5021_v23  ;;  %v11022_v7 = vld [vmem:[#allocation43_spill] sm:$0xff] }
 0xbd3   : > { %v5152_v8 = vmul.f32 %v5088_v1, %v5024_v13  ;;  %v5153_v25 = vmul.f32 %v5089_v53, %v5025_v4  ;;  %7058 = vtanh.f32 %v4709_v2  ;;  %v4870_v16 = vunpack.c.l.bf16 %v4824_v32 }
 0xbd4   : > { %v4871_v11 = vunpack.c.h.bf16 %v4824_v32  ;;  %v4982_v28 = vpack.c.bf16 %v4931_v56, %v4930_v18  ;;  %7060 = vtanh.f32 %v4712_v15  ;;  %v5026_v0 = vunpack.c.l.bf16 %v10316_v58 }
 0xbd5   : > { %v5204_v54 = vpack.c.bf16 %v5152_v8, %v5148_v60  ;;  %v5205_v34 = vpack.c.bf16 %v5153_v25, %v5149_v55  ;;  %7062 = vtanh.f32 %v4713_v48  ;;  %v4934_v3 = vadd.f32 1.0, %v4870_v16 }
 0xbd6   : > { %v4935_v40 = vadd.f32 1.0, %v4871_v11  ;;  %v5030_v13 = vunpack.c.l.bf16 %v10322_v22  ;;  %v5090_v17 = vunpack.c.l.bf16 %v4982_v28  ;;  %v5027_v10 = vunpack.c.h.bf16 %v10316_v58 }
 0xbd7   : > { %5602 = vmatmul.bf16.gmra.mxu0 %v5204_v54  ;;  %5651 = vmatmul.bf16.gmra.mxu2 %v5205_v34  ;;  %v5031_v41 = vunpack.c.h.bf16 %v10322_v22  ;;  %v5091_v23 = vunpack.c.h.bf16 %v4982_v28  ;;  %v5028_v4 = vunpack.c.l.bf16 %v10324_v5  ;;  %v5032_v33 = vunpack.c.l.bf16 %v10330_v57 }
 0xbd8   : > { %v7057_v46 = vpop.eup %7056  ;;  %v4984_v49 = vpack.c.bf16 %v4935_v40, %v4934_v3  ;;  %v3882_v36 = vmul.f32 0.5, %v10079_v19  ;;  %v3883_v14 = vmul.f32 0.5, %v10081_v31  ;;  %v3886_v43 = vmul.f32 0.5, %v10126_v20  ;;  %v11023_v3 = vld [vmem:[#allocation54_spill] sm:$0xff] }
 0xbd9   : > { %v7059_v63 = vpop.eup %7058  ;;  %v3887_v30 = vmul.f32 0.5, %v10128_v62  ;;  %v4714_v58 = vunpack.c.l.bf16 %v11022_v7  ;;  %v4715_v22 = vunpack.c.h.bf16 %v11022_v7  ;;  %v5154_v45 = vmul.f32 %v5090_v17, %v5026_v0  ;;  %v11024_v17 = vld [vmem:[#allocation34_spill] sm:$0xff] }
 0xbda   : > { %v7061_v50 = vpop.eup %7060  ;;  %v5094_v37 = vunpack.c.l.bf16 %v4984_v49  ;;  %v5095_v51 = vunpack.c.h.bf16 %v4984_v49  ;;  %v4823_v2 = vpack.c.bf16 %v7059_v63, %v7057_v46  ;;  %v5155_v27 = vmul.f32 %v5091_v23, %v5027_v10  ;;  %v11026_v23 = vld [vmem:[#allocation47_spill] sm:$0xff]  ;;  %v11027_v63 = vld [vmem:[#allocation68_spill] sm:$0xff] }
 0xbdb   : > { %v7063_v12 = vpop.eup %7062  ;;  %v4718_v19 = vunpack.c.l.bf16 %v10251_v21  ;;  %v4719_v31 = vunpack.c.h.bf16 %v10251_v21  ;;  %7064 = vtanh.f32 %v4714_v58  ;;  %v10354_v60 = vpack.c.bf16 %v3883_v14, %v3882_v36 }
 0xbdc   : > { %v5158_v42 = vmul.f32 %v5094_v37, %v5030_v13  ;;  %v5159_v20 = vmul.f32 %v5095_v51, %v5031_v41  ;;  %v4825_v15 = vpack.c.bf16 %v7063_v12, %v7061_v50  ;;  %v4868_v62 = vunpack.c.l.bf16 %v4823_v2 }
 0xbdd   : > { %v4869_v1 = vunpack.c.h.bf16 %v4823_v2  ;;  %v10356_v53 = vpack.c.bf16 %v3887_v30, %v3886_v43  ;;  %7066 = vtanh.f32 %v4715_v22  ;;  %v5029_v25 = vunpack.c.h.bf16 %v10324_v5  ;;  %v11025_v5 = vld [vmem:[#allocation56_spill] sm:$0xff] }
 0xbde   : > { %v5206_v48 = vpack.c.bf16 %v5158_v42, %v5154_v45  ;;  %v5207_v32 = vpack.c.bf16 %v5159_v20, %v5155_v27  ;;  %v4872_v18 = vunpack.c.l.bf16 %v4825_v15  ;;  %v4873_v56 = vunpack.c.h.bf16 %v4825_v15 }
 0xbdf   : > { %v4932_v8 = vadd.f32 1.0, %v4868_v62  ;;  %v4933_v55 = vadd.f32 1.0, %v4869_v1  ;;  %7068 = vtanh.f32 %v4718_v19  ;;  %v5033_v11 = vunpack.c.h.bf16 %v10330_v57 }
 0xbe0   : > { %5509 = vmatmul.bf16.gmra.mxu1 %v5206_v48  ;;  %5558 = vmatmul.bf16.gmra.mxu3 %v5207_v32  ;;  %v4936_v21 = vadd.f32 1.0, %v4872_v18  ;;  %v4937_v16 = vadd.f32 1.0, %v4873_v56  ;;  %7070 = vtanh.f32 %v4719_v31  ;;  %v5034_v34 = vunpack.c.l.bf16 %v10354_v60 }
 0xbe1   : > { %v7065_v28 = vpop.eup %7064  ;;  %v4983_v54 = vpack.c.bf16 %v4933_v55, %v4932_v8  ;;  %v5038_v0 = vunpack.c.l.bf16 %v10356_v53  ;;  %v3884_v40 = vmul.f32 0.5, %v11023_v3  ;;  %v3885_v10 = vmul.f32 0.5, %v11024_v17 }
 0xbe2   : > { %v4985_v13 = vpack.c.bf16 %v4937_v16, %v4936_v21  ;;  %v3888_v41 = vmul.f32 0.5, %v11025_v5  ;;  %v4716_v46 = vunpack.c.l.bf16 %v11026_v23  ;;  %v3889_v43 = vmul.f32 0.5, %v11027_v63 }
 0xbe3   : > { %v7067_v49 = vpop.eup %7066  ;;  %v5092_v36 = vunpack.c.l.bf16 %v4983_v54  ;;  %v5093_v14 = vunpack.c.h.bf16 %v4983_v54  ;;  %v4717_v30 = vunpack.c.h.bf16 %v11026_v23  ;;  %v4720_v50 = vunpack.c.l.bf16 %v10270_v24 }
 0xbe4   : > { %v5096_v7 = vunpack.c.l.bf16 %v4985_v13  ;;  %v5097_v58 = vunpack.c.h.bf16 %v4985_v13  ;;  %v4826_v22 = vpack.c.bf16 %v7067_v49, %v7065_v28  ;;  %v4721_v2 = vunpack.c.h.bf16 %v10270_v24 }
 0xbe5   : > { %v7069_v37 = vpop.eup %7068  ;;  %v5156_v45 = vmul.f32 %v5092_v36, %v5028_v4  ;;  %v5157_v51 = vmul.f32 %v5093_v14, %v5029_v25  ;;  %7072 = vtanh.f32 %v4716_v46  ;;  %v10372_v15 = vpack.c.bf16 %v3885_v10, %v3884_v40 }
 0xbe6   : > { %v7071_v12 = vpop.eup %7070  ;;  %v5160_v27 = vmul.f32 %v5096_v7, %v5032_v33  ;;  %v5161_v19 = vmul.f32 %v5097_v58, %v5033_v11  ;;  %v4874_v31 = vunpack.c.l.bf16 %v4826_v22  ;;  %v4875_v42 = vunpack.c.h.bf16 %v4826_v22 }
 0xbe7   : > { %v4828_v20 = vpack.c.bf16 %v7071_v12, %v7069_v37  ;;  %v10374_v62 = vpack.c.bf16 %v3889_v43, %v3888_v41  ;;  %7074 = vtanh.f32 %v4717_v30  ;;  %v5035_v56 = vunpack.c.h.bf16 %v10354_v60 }
 0xbe8   : > { %v5208_v1 = vpack.c.bf16 %v5160_v27, %v5156_v45  ;;  %v5209_v48 = vpack.c.bf16 %v5161_v19, %v5157_v51  ;;  %v4938_v4 = vadd.f32 1.0, %v4874_v31  ;;  %v4939_v32 = vadd.f32 1.0, %v4875_v42 }
 0xbe9   : > { %v4878_v18 = vunpack.c.l.bf16 %v4828_v20  ;;  %v4879_v24 = vunpack.c.h.bf16 %v4828_v20  ;;  %7076 = vtanh.f32 %v4720_v50  ;;  %v3890_v33 = vmul.f32 0.5, %v10196_v39 }
 0xbea   : > { %5607 = vmatmul.bf16.gmra.mxu0 %v5208_v1  ;;  %5656 = vmatmul.bf16.gmra.mxu2 %v5209_v48  ;;  %v4986_v57 = vpack.c.bf16 %v4939_v32, %v4938_v4  ;;  %7078 = vtanh.f32 %v4721_v2  ;;  %v3891_v8 = vmul.f32 0.5, %v10198_v44  ;;  %v5039_v16 = vunpack.c.h.bf16 %v10356_v53 }
 0xbeb   : > { %v7073_v55 = vpop.eup %7072  ;;  %v4942_v25 = vadd.f32 1.0, %v4878_v18  ;;  %v4943_v21 = vadd.f32 1.0, %v4879_v24  ;;  %v5036_v11 = vunpack.c.l.bf16 %v10372_v15  ;;  %v5040_v3 = vunpack.c.l.bf16 %v10374_v62 }
 0xbec   : > { %v5098_v28 = vunpack.c.l.bf16 %v4986_v57  ;;  %v5099_v54 = vunpack.c.h.bf16 %v4986_v57  ;;  %v4722_v40 = vunpack.c.l.bf16 %v10280_v38  ;;  %v3894_v10 = vmul.f32 0.5, %v10223_v47 }
 0xbed   : > { %v7075_v13 = vpop.eup %7074  ;;  %v4988_v17 = vpack.c.bf16 %v4943_v21, %v4942_v25  ;;  %v4723_v39 = vunpack.c.h.bf16 %v10280_v38  ;;  %v4726_v44 = vunpack.c.l.bf16 %v10300_v29  ;;  %v3895_v41 = vmul.f32 0.5, %v10225_v35 }
 0xbee   : > { %v4827_v5 = vpack.c.bf16 %v7075_v13, %v7073_v55  ;;  %v10387_v23 = vpack.c.bf16 %v3891_v8, %v3890_v33  ;;  %v4727_v46 = vunpack.c.h.bf16 %v10300_v29  ;;  %v5162_v14 = vmul.f32 %v5098_v28, %v5034_v34 }
 0xbef   : > { %v7077_v49 = vpop.eup %7076  ;;  %v5102_v36 = vunpack.c.l.bf16 %v4988_v17  ;;  %v5103_v63 = vunpack.c.h.bf16 %v4988_v17  ;;  %7080 = vtanh.f32 %v4722_v40  ;;  %v5163_v47 = vmul.f32 %v5099_v54, %v5035_v56  ;;  %v3597_v54 = vpop.f32.mrf.mxu1 }
 0xbf0   : > { %v7079_v43 = vpop.eup %7078  ;;  %v4876_v30 = vunpack.c.l.bf16 %v4827_v5  ;;  %v4877_v38 = vunpack.c.h.bf16 %v4827_v5  ;;  %7082 = vtanh.f32 %v4723_v39  ;;  %v10394_v50 = vpack.c.bf16 %v3895_v41, %v3894_v10  ;;  %v3695_v41 = vpop.f32.mrf.mxu0 }
 0xbf1   : > { %v5166_v7 = vmul.f32 %v5102_v36, %v5038_v0  ;;  %v5167_v35 = vmul.f32 %v5103_v63, %v5039_v16  ;;  %v4829_v58 = vpack.c.bf16 %v7079_v43, %v7077_v49  ;;  %7084 = vtanh.f32 %v4726_v44 }
 0xbf2   : > { %v4940_v22 = vadd.f32 1.0, %v4876_v30  ;;  %v4941_v29 = vadd.f32 1.0, %v4877_v38  ;;  %7086 = vtanh.f32 %v4727_v46  ;;  %v5037_v2 = vunpack.c.h.bf16 %v10372_v15  ;;  %v11029_v30 = vld [vmem:[#allocation61_spill] sm:$0xff] }
 0xbf3   : > { %v5210_v60 = vpack.c.bf16 %v5166_v7, %v5162_v14  ;;  %v5211_v34 = vpack.c.bf16 %v5167_v35, %v5163_v47  ;;  %v4880_v37 = vunpack.c.l.bf16 %v4829_v58  ;;  %v4881_v45 = vunpack.c.h.bf16 %v4829_v58 }
 0xbf4   : > { %v4987_v51 = vpack.c.bf16 %v4941_v29, %v4940_v22  ;;  %v3892_v12 = vmul.f32 0.5, %v10203_v61  ;;  %v3893_v53 = vmul.f32 0.5, %v10205_v59  ;;  %v5041_v31 = vunpack.c.h.bf16 %v10374_v62 }
 0xbf5   : > { %v7081_v0 = vpop.eup %7080  ;;  %5514 = vmatmul.bf16.gmra.mxu1 %v5210_v60  ;;  %5563 = vmatmul.bf16.gmra.mxu3 %v5211_v34  ;;  %v4944_v27 = vadd.f32 1.0, %v4880_v37  ;;  %v4945_v19 = vadd.f32 1.0, %v4881_v45  ;;  %v5042_v42 = vunpack.c.l.bf16 %v10387_v23  ;;  %v5046_v4 = vunpack.c.l.bf16 %v10394_v50  ;;  %v3744_v60 = vpop.f32.mrf.mxu2  ;;  %v11030_v37 = vld [vmem:[#allocation60_spill] sm:$0xff] }
 0xbf6   : > { %v7083_v20 = vpop.eup %7082  ;;  %v5100_v1 = vunpack.c.l.bf16 %v4987_v51  ;;  %v5101_v48 = vunpack.c.h.bf16 %v4987_v51  ;;  %v4724_v15 = vunpack.c.l.bf16 %v10290_v26  ;;  %v3896_v59 = vmul.f32 0.5, %v10229_v9  ;;  %v3646_v9 = vpop.f32.mrf.mxu3 }
 0xbf7   : > { %v7085_v32 = vpop.eup %7084  ;;  %v4989_v61 = vpack.c.bf16 %v4945_v19, %v4944_v27  ;;  %v4830_v18 = vpack.c.bf16 %v7083_v20, %v7081_v0  ;;  %v3897_v24 = vmul.f32 0.5, %v10231_v52  ;;  %v10405_v8 = vpack.c.bf16 %v3893_v53, %v3892_v12  ;;  %v11031_v0 = vld [vmem:[#allocation62_spill] sm:$0xff] }
 0xbf8   : > { %v7087_v56 = vpop.eup %7086  ;;  %v5164_v57 = vmul.f32 %v5100_v1, %v5036_v11  ;;  %v5165_v33 = vmul.f32 %v5101_v48, %v5037_v2  ;;  %v4725_v55 = vunpack.c.h.bf16 %v10290_v26  ;;  %v4728_v13 = vunpack.c.l.bf16 %v10302_v6  ;;  %v3599_v48 = vpop.f32.mrf.mxu1 }
 0xbf9   : > { %v5104_v25 = vunpack.c.l.bf16 %v4989_v61  ;;  %v5105_v21 = vunpack.c.h.bf16 %v4989_v61  ;;  %v4832_v16 = vpack.c.bf16 %v7087_v56, %v7085_v32  ;;  %v4882_v28 = vunpack.c.l.bf16 %v4830_v18 }
 0xbfa   : > { %v4883_v40 = vunpack.c.h.bf16 %v4830_v18  ;;  %v4729_v17 = vunpack.c.h.bf16 %v10302_v6  ;;  %7088 = vtanh.f32 %v4724_v15  ;;  %v10412_v5 = vpack.c.bf16 %v3897_v24, %v3896_v59 }
 0xbfb   : > { %v5168_v52 = vmul.f32 %v5104_v25, %v5040_v3  ;;  %v5169_v11 = vmul.f32 %v5105_v21, %v5041_v31  ;;  %v4886_v10 = vunpack.c.l.bf16 %v4832_v16  ;;  %v4887_v39 = vunpack.c.h.bf16 %v4832_v16  ;;  %v11028_v3 = vld [vmem:[#allocation28_spill] sm:$0xff]  ;;  %v3697_v16 = vpop.f32.mrf.mxu0 }
 0xbfc   : > { %v4946_v44 = vadd.f32 1.0, %v4882_v28  ;;  %v4947_v26 = vadd.f32 1.0, %v4883_v40  ;;  %7090 = vtanh.f32 %v4725_v55  ;;  %v5043_v6 = vunpack.c.h.bf16 %v10387_v23 }
 0xbfd   : > { %v5212_v46 = vpack.c.bf16 %v5168_v52, %v5164_v57  ;;  %v5213_v49 = vpack.c.bf16 %v5169_v11, %v5165_v33  ;;  %v4950_v36 = vadd.f32 1.0, %v4886_v10  ;;  %v4951_v14 = vadd.f32 1.0, %v4887_v39 }
 0xbfe   : > { %v4990_v63 = vpack.c.bf16 %v4947_v26, %v4946_v44  ;;  %v5047_v43 = vunpack.c.h.bf16 %v10394_v50  ;;  %7092 = vtanh.f32 %v4728_v13  ;;  %v3598_v47 = vadd.f32 %v3597_v54, %v11028_v3 }
 0xbff   : > { %5612 = vmatmul.bf16.gmra.mxu0 %v5212_v46  ;;  %5661 = vmatmul.bf16.gmra.mxu2 %v5213_v49  ;;  %v4992_v62 = vpack.c.bf16 %v4951_v14, %v4950_v36  ;;  %7094 = vtanh.f32 %v4729_v17  ;;  %v3647_v38 = vadd.f32 %v3646_v9, %v11029_v30  ;;  %v5044_v22 = vunpack.c.l.bf16 %v10405_v8 }
 0xc00   : > { %v7089_v7 = vpop.eup %7088  ;;  %v5106_v35 = vunpack.c.l.bf16 %v4990_v63  ;;  %v5107_v58 = vunpack.c.h.bf16 %v4990_v63  ;;  %v5048_v29 = vunpack.c.l.bf16 %v10412_v5  ;;  %v3745_v45 = vadd.f32 %v3744_v60, %v11030_v37 }
 0xc01   : > { %v5110_v23 = vunpack.c.l.bf16 %v4992_v62  ;;  %v5111_v34 = vunpack.c.h.bf16 %v4992_v62  ;;  %v3778_v50 = vpack.c.bf16 %v3647_v38, %v3598_v47  ;;  %v5045_v53 = vunpack.c.h.bf16 %v10405_v8 }
 0xc02   : > { %v7091_v51 = vpop.eup %7090  ;;  %v5170_v2 = vmul.f32 %v5106_v35, %v5042_v42  ;;  %v5171_v12 = vmul.f32 %v5107_v58, %v5043_v6  ;;  %v3696_v27 = vadd.f32 %v3695_v41, %v11031_v0  ;;  %v5049_v32 = vunpack.c.h.bf16 %v10412_v5  ;;  %v3648_v42 = vpop.f32.mrf.mxu3 }
 0xc03   : > { %v5174_v19 = vmul.f32 %v5110_v23, %v5046_v4  ;;  %v5175_v31 = vmul.f32 %v5111_v34, %v5047_v43  ;;  %v4831_v20 = vpack.c.bf16 %v7091_v51, %v7089_v7  ;;  %v10423_v1 = vunpack.c.l.bf16 %v3778_v50  ;;  %v3746_v35 = vpop.f32.mrf.mxu2 }
 0xc04   : > { %v7093_v15 = vpop.eup %7092  ;;  %v10426_v61 = vunpack.c.h.bf16 %v3778_v50  ;;  %v3779_v18 = vpack.c.bf16 %v3745_v45, %v3696_v27  ;;  %v3600_v59 = vadd.f32 %v3599_v48, %v11028_v3  ;;  %v3649_v13 = vadd.f32 %v3648_v42, %v11029_v30 }
 0xc05   : > { %v7095_v24 = vpop.eup %7094  ;;  %v5214_v56 = vpack.c.bf16 %v5174_v19, %v5170_v2  ;;  %v5215_v57 = vpack.c.bf16 %v5175_v31, %v5171_v12  ;;  %v4884_v33 = vunpack.c.l.bf16 %v4831_v20  ;;  %v4885_v8 = vunpack.c.h.bf16 %v4831_v20 }
 0xc06   : > { %v4833_v4 = vpack.c.bf16 %v7095_v24, %v7093_v15  ;;  %v3994_v55 = vmul.f32 0.044677734, %v10423_v1  ;;  %v3995_v25 = vmul.f32 0.044677734, %v10426_v61  ;;  %v10431_v21 = vunpack.c.l.bf16 %v3779_v18 }
 0xc07   : > { %5519 = vmatmul.bf16.gmra.mxu1 %v5214_v56  ;;  %5568 = vmatmul.bf16.gmra.mxu3 %v5215_v57  ;;  %v4948_v28 = vadd.f32 1.0, %v4884_v33  ;;  %v4949_v54 = vadd.f32 1.0, %v4885_v8  ;;  %v10433_v40 = vunpack.c.h.bf16 %v3779_v18  ;;  %v3698_v44 = vadd.f32 %v3697_v16, %v11031_v0 }
 0xc08   : > { %v4888_v17 = vunpack.c.l.bf16 %v4833_v4  ;;  %v4889_v9 = vunpack.c.h.bf16 %v4833_v4  ;;  %v4034_v52 = vpack.c.bf16 %v3995_v25, %v3994_v55  ;;  %v3996_v11 = vmul.f32 0.044677734, %v10431_v21 }
 0xc09   : > { %v4991_v10 = vpack.c.bf16 %v4949_v54, %v4948_v28  ;;  %v3997_v39 = vmul.f32 0.044677734, %v10433_v40  ;;  %v3780_v26 = vpack.c.bf16 %v3649_v13, %v3600_v59  ;;  %v3747_v31 = vadd.f32 %v3746_v35, %v11030_v37  ;;  %v3602_v54 = vpop.f32.mrf.mxu1 }
 0xc0a   : > { %v4952_v41 = vadd.f32 1.0, %v4888_v17  ;;  %v4953_v46 = vadd.f32 1.0, %v4889_v9  ;;  %v4090_v49 = vunpack.c.l.bf16 %v4034_v52  ;;  %v4091_v36 = vunpack.c.h.bf16 %v4034_v52  ;;  %v3651_v25 = vpop.f32.mrf.mxu3 }
 0xc0b   : > { %v5108_v14 = vunpack.c.l.bf16 %v4991_v10  ;;  %v5109_v63 = vunpack.c.h.bf16 %v4991_v10  ;;  %v4035_v6 = vpack.c.bf16 %v3997_v39, %v3996_v11  ;;  %v10439_v43 = vunpack.c.l.bf16 %v3780_v26 }
 0xc0c   : > { %v4993_v62 = vpack.c.bf16 %v4953_v46, %v4952_v41  ;;  %v4154_v47 = vmul.f32 %v4090_v49, %v10423_v1  ;;  %v4155_v38 = vmul.f32 %v4091_v36, %v10426_v61  ;;  %v10443_v7 = vunpack.c.h.bf16 %v3780_v26 }
 0xc0d   : > { %v5172_v58 = vmul.f32 %v5108_v14, %v5044_v22  ;;  %v5173_v60 = vmul.f32 %v5109_v63, %v5045_v53  ;;  %v4092_v23 = vunpack.c.l.bf16 %v4035_v6  ;;  %v4093_v34 = vunpack.c.h.bf16 %v4035_v6  ;;  %v3700_v63 = vpop.f32.mrf.mxu0 }
 0xc0e   : > { %v5112_v50 = vunpack.c.l.bf16 %v4993_v62  ;;  %v5113_v45 = vunpack.c.h.bf16 %v4993_v62  ;;  %v4194_v51 = vpack.c.bf16 %v4155_v38, %v4154_v47  ;;  %v3998_v2 = vmul.f32 0.044677734, %v10439_v43 }
 0xc0f   : > { %v4156_v12 = vmul.f32 %v4092_v23, %v10431_v21  ;;  %v4157_v27 = vmul.f32 %v4093_v34, %v10433_v40  ;;  %v3999_v19 = vmul.f32 0.044677734, %v10443_v7  ;;  %v3781_v59 = vpack.c.bf16 %v3747_v31, %v3698_v44 }
 0xc10   : > { %v5176_v20 = vmul.f32 %v5112_v50, %v5048_v29  ;;  %v5177_v22 = vmul.f32 %v5113_v45, %v5049_v32  ;;  %v4250_v53 = vunpack.c.l.bf16 %v4194_v51  ;;  %v4251_v48 = vunpack.c.h.bf16 %v4194_v51 }
 0xc11   : > { %v4195_v15 = vpack.c.bf16 %v4157_v27, %v4156_v12  ;;  %v4036_v18 = vpack.c.bf16 %v3999_v19, %v3998_v2  ;;  %v10454_v29 = vunpack.c.l.bf16 %v3781_v59  ;;  %v10456_v32 = vunpack.c.h.bf16 %v3781_v59 }
 0xc12   : > { %v5216_v42 = vpack.c.bf16 %v5176_v20, %v5172_v58  ;;  %v5217_v24 = vpack.c.bf16 %v5177_v22, %v5173_v60  ;;  %v4314_v56 = vmul.f32 %v4250_v53, %v10423_v1  ;;  %v4315_v57 = vmul.f32 %v4251_v48, %v10426_v61  ;;  %v3749_v58 = vpop.f32.mrf.mxu2  ;;  %v3653_v59 = vpop.f32.mrf.mxu3 }
 0xc13   : > { %v4252_v33 = vunpack.c.l.bf16 %v4195_v15  ;;  %v4253_v8 = vunpack.c.h.bf16 %v4195_v15  ;;  %v4094_v4 = vunpack.c.l.bf16 %v4036_v18  ;;  %v4095_v55 = vunpack.c.h.bf16 %v4036_v18 }
 0xc14   : > { %5617 = vmatmul.bf16.gmra.mxu0 %v5216_v42  ;;  %5666 = vmatmul.bf16.gmra.mxu2 %v5217_v24  ;;  %v4354_v5 = vpack.c.bf16 %v4315_v57, %v4314_v56  ;;  %v4000_v13 = vmul.f32 0.044677734, %v10454_v29  ;;  %v4001_v17 = vmul.f32 0.044677734, %v10456_v32  ;;  %v3652_v10 = vadd.f32 %v3651_v25, %v11029_v30 }
 0xc15   : > { %v4158_v16 = vmul.f32 %v4094_v4, %v10439_v43  ;;  %v4159_v28 = vmul.f32 %v4095_v55, %v10443_v7  ;;  %v4316_v9 = vmul.f32 %v4252_v33, %v10431_v21  ;;  %v4317_v52 = vmul.f32 %v4253_v8, %v10433_v40  ;;  %v3604_v55 = vpop.f32.mrf.mxu1 }
 0xc16   : > { %v4410_v39 = vunpack.c.l.bf16 %v4354_v5  ;;  %v4037_v44 = vpack.c.bf16 %v4001_v17, %v4000_v13  ;;  %v3603_v26 = vadd.f32 %v3602_v54, %v11028_v3  ;;  %v4411_v41 = vunpack.c.h.bf16 %v4354_v5  ;;  %v3702_v5 = vpop.f32.mrf.mxu0 }
 0xc17   : > { %v4196_v11 = vpack.c.bf16 %v4159_v28, %v4158_v16  ;;  %v4355_v62 = vpack.c.bf16 %v4317_v52, %v4316_v9  ;;  %v3750_v2 = vadd.f32 %v3749_v58, %v11030_v37  ;;  %v3701_v20 = vadd.f32 %v3700_v63, %v11031_v0 }
 0xc18   : > { %v4096_v36 = vunpack.c.l.bf16 %v4037_v44  ;;  %v4097_v14 = vunpack.c.h.bf16 %v4037_v44  ;;  %v3782_v6 = vpack.c.bf16 %v3652_v10, %v3603_v26  ;;  %v4474_v47 = vadd.f32 %v4410_v39, %v10423_v1 }
 0xc19   : > { %v4254_v46 = vunpack.c.l.bf16 %v4196_v11  ;;  %v4255_v49 = vunpack.c.h.bf16 %v4196_v11  ;;  %v4475_v60 = vadd.f32 %v4411_v41, %v10426_v61  ;;  %v4412_v12 = vunpack.c.l.bf16 %v4355_v62 }
 0xc1a   : > { %v4160_v38 = vmul.f32 %v4096_v36, %v10454_v29  ;;  %v4161_v35 = vmul.f32 %v4097_v14, %v10456_v32  ;;  %v10472_v50 = vunpack.c.l.bf16 %v3782_v6  ;;  %v10474_v51 = vunpack.c.h.bf16 %v3782_v6  ;;  %v3751_v39 = vpop.f32.mrf.mxu2 }
 0xc1b   : > { %v4318_v23 = vmul.f32 %v4254_v46, %v10439_v43  ;;  %v4319_v34 = vmul.f32 %v4255_v49, %v10443_v7  ;;  %v4413_v27 = vunpack.c.h.bf16 %v4355_v62  ;;  %v4514_v53 = vpack.c.bf16 %v4475_v60, %v4474_v47 }
 0xc1c   : > { %v4197_v45 = vpack.c.bf16 %v4161_v35, %v4160_v38  ;;  %v4002_v22 = vmul.f32 0.044677734, %v10472_v50  ;;  %v4003_v15 = vmul.f32 0.044677734, %v10474_v51  ;;  %v3783_v18 = vpack.c.bf16 %v3750_v2, %v3701_v20 }
 0xc1d   : > { %v4356_v48 = vpack.c.bf16 %v4319_v34, %v4318_v23  ;;  %v4476_v42 = vadd.f32 %v4412_v12, %v10431_v21  ;;  %v4477_v24 = vadd.f32 %v4413_v27, %v10433_v40  ;;  %v4570_v25 = vunpack.c.l.bf16 %v4514_v53 }
 0xc1e   : > { %v4256_v19 = vunpack.c.l.bf16 %v4197_v45  ;;  %v4257_v31 = vunpack.c.h.bf16 %v4197_v45  ;;  %v4038_v33 = vpack.c.bf16 %v4003_v15, %v4002_v22  ;;  %v10484_v8 = vunpack.c.l.bf16 %v3783_v18  ;;  %v5495_v22 = vpop.f32.mrf.mxu1 }
 0xc1f   : > { %v10486_v4 = vunpack.c.h.bf16 %v3783_v18  ;;  %v4414_v16 = vunpack.c.l.bf16 %v4356_v48  ;;  %v3654_v28 = vadd.f32 %v3653_v59, %v11029_v30  ;;  %v4415_v54 = vunpack.c.h.bf16 %v4356_v48 }
 0xc20   : > { %v4320_v56 = vmul.f32 %v4256_v19, %v10454_v29  ;;  %v4321_v57 = vmul.f32 %v4257_v31, %v10456_v32  ;;  %v4098_v13 = vunpack.c.l.bf16 %v4038_v33  ;;  %v4099_v17 = vunpack.c.h.bf16 %v4038_v33 }
 0xc21   : > { %v4571_v9 = vunpack.c.h.bf16 %v4514_v53  ;;  %v4004_v52 = vmul.f32 0.044677734, %v10484_v8  ;;  %v4005_v11 = vmul.f32 0.044677734, %v10486_v4  ;;  %v3605_v10 = vadd.f32 %v3604_v55, %v11028_v3  ;;  %v5593_v53 = vpop.f32.mrf.mxu0 }
 0xc22   : > { %v10492_v44 = vpack.c.bf16 %v4477_v24, %v4476_v42  ;;  %v4357_v26 = vpack.c.bf16 %v4321_v57, %v4320_v56  ;;  %v4162_v41 = vmul.f32 %v4098_v13, %v10472_v50  ;;  %v4163_v46 = vmul.f32 %v4099_v17, %v10474_v51  ;;  %v5544_v42 = vpop.f32.mrf.mxu3  ;;  %v10512_v24 = vpop.f32.mrf.mxu2 }
 0xc23   : > { %v4634_v49 = vmul.f32 0.796875, %v4570_v25  ;;  %v4478_v30 = vadd.f32 %v4414_v16, %v10439_v43  ;;  %v4039_v36 = vpack.c.bf16 %v4005_v11, %v4004_v52  ;;  %v3784_v14 = vpack.c.bf16 %v3654_v28, %v3605_v10 }
 0xc24   : > { %v4479_v63 = vadd.f32 %v4415_v54, %v10443_v7  ;;  %v4198_v6 = vpack.c.bf16 %v4163_v46, %v4162_v41  ;;  %v3703_v62 = vadd.f32 %v3702_v5, %v11031_v0  ;;  %v3752_v3 = vadd.f32 %v3751_v39, %v11030_v37  ;;  %v10519_v54 = vld [vmem:[%s11032_s12] ss:$0 sm:$0xff] }
 0xc25   : > { %v4100_v47 = vunpack.c.l.bf16 %v4039_v36  ;;  %v4101_v38 = vunpack.c.h.bf16 %v4039_v36  ;;  %v10500_v35 = vunpack.c.l.bf16 %v3784_v14  ;;  %v10502_v58 = vunpack.c.h.bf16 %v3784_v14 }
 0xc26   : > { %v4416_v60 = vunpack.c.l.bf16 %v4357_v26  ;;  %v4417_v23 = vunpack.c.h.bf16 %v4357_v26  ;;  %v4258_v34 = vunpack.c.l.bf16 %v4198_v6  ;;  %v4259_v45 = vunpack.c.h.bf16 %v4198_v6 }
 0xc27   : > { %v4164_v2 = vmul.f32 %v4100_v47, %v10484_v8  ;;  %v4165_v12 = vmul.f32 %v4101_v38, %v10486_v4  ;;  %v4006_v27 = vmul.f32 0.044677734, %v10500_v35  ;;  %v4007_v0 = vmul.f32 0.044677734, %v10502_v58 }
 0xc28   : > { %v4635_v19 = vmul.f32 0.796875, %v4571_v9  ;;  %v4572_v37 = vunpack.c.l.bf16 %v10492_v44  ;;  %v4322_v31 = vmul.f32 %v4258_v34, %v10472_v50  ;;  %v4323_v20 = vmul.f32 %v4259_v45, %v10474_v51 }
 0xc29   : > { %v4573_v48 = vunpack.c.h.bf16 %v10492_v44  ;;  %v4199_v15 = vpack.c.bf16 %v4165_v12, %v4164_v2  ;;  %v4040_v18 = vpack.c.bf16 %v4007_v0, %v4006_v27  ;;  %v3785_v59 = vpack.c.bf16 %v3752_v3, %v3703_v62 }
 0xc2a   : > { %v4516_v56 = vpack.c.bf16 %v4479_v63, %v4478_v30  ;;  %v4480_v57 = vadd.f32 %v4416_v60, %v10454_v29  ;;  %v4481_v33 = vadd.f32 %v4417_v23, %v10456_v32  ;;  %v4358_v55 = vpack.c.bf16 %v4323_v20, %v4322_v31  ;;  %v5497_v60 = vpop.f32.mrf.mxu1  ;;  %v5595_v23 = vpop.f32.mrf.mxu0 }
 0xc2b   : > { %v4260_v5 = vunpack.c.l.bf16 %v4199_v15  ;;  %v4261_v25 = vunpack.c.h.bf16 %v4199_v15  ;;  %v4102_v16 = vunpack.c.l.bf16 %v4040_v18  ;;  %v4103_v28 = vunpack.c.h.bf16 %v4040_v18  ;;  %v5546_v12 = vpop.f32.mrf.mxu3  ;;  %v5644_v20 = vpop.f32.mrf.mxu2 }
 0xc2c   : > { %v4418_v13 = vunpack.c.l.bf16 %v4358_v55  ;;  %v4419_v17 = vunpack.c.h.bf16 %v4358_v55  ;;  %v10521_v9 = vunpack.c.l.bf16 %v3785_v59  ;;  %v10523_v52 = vunpack.c.h.bf16 %v3785_v59 }
 0xc2d   : > { %v4324_v11 = vmul.f32 %v4260_v5, %v10484_v8  ;;  %v4325_v10 = vmul.f32 %v4261_v25, %v10486_v4  ;;  %v4166_v39 = vmul.f32 %v4102_v16, %v10500_v35  ;;  %v4167_v44 = vmul.f32 %v4103_v28, %v10502_v58 }
 0xc2e   : > { %v10529_v26 = vpack.c.bf16 %v4635_v19, %v4634_v49  ;;  %v4517_v41 = vpack.c.bf16 %v4481_v33, %v4480_v57  ;;  %v4008_v46 = vmul.f32 0.044677734, %v10521_v9  ;;  %v4009_v30 = vmul.f32 0.044677734, %v10523_v52 }
 0xc2f   : > { %v4482_v36 = vadd.f32 %v4418_v13, %v10472_v50  ;;  %v4483_v14 = vadd.f32 %v4419_v17, %v10474_v51  ;;  %v4200_v63 = vpack.c.bf16 %v4167_v44, %v4166_v39  ;;  %v5496_v6 = vadd.f32 %v10519_v54, %v5495_v22 }
 0xc30   : > { %v4636_v62 = vmul.f32 0.796875, %v4572_v37  ;;  %v4574_v3 = vunpack.c.l.bf16 %v4516_v56  ;;  %v4575_v47 = vunpack.c.h.bf16 %v4516_v56  ;;  %v4041_v38 = vpack.c.bf16 %v4009_v30, %v4008_v46 }
 0xc31   : > { %v4359_v49 = vpack.c.bf16 %v4325_v10, %v4324_v11  ;;  %v4262_v34 = vunpack.c.l.bf16 %v4200_v63  ;;  %v4263_v45 = vunpack.c.h.bf16 %v4200_v63  ;;  %v5545_v2 = vadd.f32 %v5544_v42, %v5496_v6 }
 0xc32   : > { %v4576_v27 = vunpack.c.l.bf16 %v4517_v41  ;;  %v4577_v0 = vunpack.c.h.bf16 %v4517_v41  ;;  %v4104_v19 = vunpack.c.l.bf16 %v4041_v38  ;;  %v4105_v31 = vunpack.c.h.bf16 %v4041_v38 }
 0xc33   : > { %v4637_v15 = vmul.f32 0.796875, %v4573_v48  ;;  %v4518_v18 = vpack.c.bf16 %v4483_v14, %v4482_v36  ;;  %v4326_v22 = vmul.f32 %v4262_v34, %v10500_v35  ;;  %v4327_v37 = vmul.f32 %v4263_v45, %v10502_v58  ;;  %v5500_v36 = vpop.f32.mrf.mxu1 }
 0xc34   : > { %v4638_v59 = vmul.f32 0.796875, %v4574_v3  ;;  %v4639_v56 = vmul.f32 0.796875, %v4575_v47  ;;  %v4168_v57 = vmul.f32 %v4104_v19, %v10521_v9  ;;  %v4169_v33 = vmul.f32 %v4105_v31, %v10523_v52  ;;  %v5549_v3 = vpop.f32.mrf.mxu3 }
 0xc35   : > { %v4420_v55 = vunpack.c.l.bf16 %v4359_v49  ;;  %v4421_v42 = vunpack.c.h.bf16 %v4359_v49  ;;  %v4360_v5 = vpack.c.bf16 %v4327_v37, %v4326_v22  ;;  %v5594_v25 = vadd.f32 %v5593_v53, %v5545_v2  ;;  %v5647_v22 = vpop.f32.mrf.mxu2 }
 0xc36   : > { %v4640_v16 = vmul.f32 0.796875, %v4576_v27  ;;  %v4641_v28 = vmul.f32 0.796875, %v4577_v0  ;;  %v4201_v13 = vpack.c.bf16 %v4169_v33, %v4168_v57  ;;  %v5498_v48 = vadd.f32 %v10519_v54, %v5497_v60  ;;  %v11033_v60 = vld [vmem:[#allocation48_spill] sm:$0xff]  ;;  %v11034_v57 = vld [vmem:[#allocation35_spill] sm:$0xff] }
 0xc37   : > { %v4578_v17 = vunpack.c.l.bf16 %v4518_v18  ;;  %v4579_v11 = vunpack.c.h.bf16 %v4518_v18  ;;  %v4422_v10 = vunpack.c.l.bf16 %v4360_v5  ;;  %v4423_v39 = vunpack.c.h.bf16 %v4360_v5 }
 0xc38   : > { %v4264_v44 = vunpack.c.l.bf16 %v4201_v13  ;;  %v4265_v41 = vunpack.c.h.bf16 %v4201_v13  ;;  %v5643_v46 = vadd.f32 %v10512_v24, %v5594_v25  ;;  %v5547_v30 = vadd.f32 %v5546_v12, %v5498_v48  ;;  %v5598_v24 = vpop.f32.mrf.mxu0 }
 0xc39   : > { %v4484_v14 = vadd.f32 %v4420_v55, %v10484_v8  ;;  %v4485_v63 = vadd.f32 %v4421_v42, %v10486_v4  ;;  %v4486_v53 = vadd.f32 %v4422_v10, %v10500_v35  ;;  %v4487_v6 = vadd.f32 %v4423_v39, %v10502_v58 }
 0xc3a   : > { %v4328_v47 = vmul.f32 %v4264_v44, %v10521_v9  ;;  %v4329_v38 = vmul.f32 %v4265_v41, %v10523_v52  ;;  %v5682_v49 = vadd.f32 %v5643_v46, %v11033_v60  ;;  %v5596_v34 = vadd.f32 %v5595_v23, %v5547_v30  ;;  %v11035_v46 = vld [vmem:[#allocation55_spill] sm:$0xff] }
 0xc3b   : > { %v10549_v45 = vpack.c.bf16 %v4637_v15, %v4636_v62  ;;  %v4676_v2 = vpack.c.bf16 %v4639_v56, %v4638_v59  ;;  %v4520_v12 = vpack.c.bf16 %v4487_v6, %v4486_v53  ;;  %v5501_v27 = vadd.f32 %v10519_v54, %v5500_v36 }
 0xc3c   : > { %v10552_v0 = vpack.c.bf16 %v4641_v28, %v4640_v16  ;;  %v4642_v19 = vmul.f32 0.796875, %v4578_v17  ;;  %v4361_v31 = vpack.c.bf16 %v4329_v38, %v4328_v47  ;;  %5698 = vst [vmem:[%s10556_s19] sm:$0xff] %v5682_v49  ;;  %v5645_v18 = vadd.f32 %v5644_v20, %v5596_v34  ;;  %v5502_v20 = vpop.f32.mrf.mxu1  ;;  %v5551_v10 = vpop.f32.mrf.mxu3 }
 0xc3d   : > { %v4643_v23 = vmul.f32 0.796875, %v4579_v11  ;;  %v4519_v37 = vpack.c.bf16 %v4485_v63, %v4484_v14  ;;  %v5550_v62 = vadd.f32 %v5549_v3, %v5501_v27  ;;  %v3898_v15 = vmul.f32 0.5, %v10423_v1  ;;  %v5649_v60 = vpop.f32.mrf.mxu2 }
 0xc3e   : > { %v4424_v59 = vunpack.c.l.bf16 %v4361_v31  ;;  %v4425_v56 = vunpack.c.h.bf16 %v4361_v31  ;;  %v5683_v33 = vadd.f32 %v5645_v18, %v11034_v57  ;;  %v3899_v55 = vmul.f32 0.5, %v10426_v61 }
 0xc3f   : > { %v4582_v42 = vunpack.c.l.bf16 %v4520_v12  ;;  %v4583_v5 = vunpack.c.h.bf16 %v4520_v12  ;;  %v5599_v25 = vadd.f32 %v5598_v24, %v5550_v62  ;;  %v3902_v16 = vmul.f32 0.5, %v10439_v43  ;;  %v11036_v62 = vld [vmem:[#allocation38_spill] sm:$0xff] }
 0xc40   : > { %v4488_v28 = vadd.f32 %v4424_v59, %v10521_v9  ;;  %5699 = vst [vmem:[%s10556_s19 + $0x8] sm:$0xff] %v5683_v33  ;;  %v3903_v13 = vmul.f32 0.5, %v10443_v7  ;;  %v4730_v48 = vunpack.c.l.bf16 %v10529_v26  ;;  %v4731_v1 = vunpack.c.h.bf16 %v10529_v26  ;;  %v5600_v63 = vpop.f32.mrf.mxu0 }
 0xc41   : > { %v4489_v17 = vadd.f32 %v4425_v56, %v10523_v52  ;;  %v5648_v11 = vadd.f32 %v5647_v22, %v5599_v25  ;;  %v5503_v61 = vadd.f32 %v10519_v54, %v5502_v20  ;;  %v4734_v39 = vunpack.c.l.bf16 %v4676_v2 }
 0xc42   : > { %v4580_v44 = vunpack.c.l.bf16 %v4519_v37  ;;  %v4581_v43 = vunpack.c.h.bf16 %v4519_v37  ;;  %v4735_v41 = vunpack.c.h.bf16 %v4676_v2  ;;  %7096 = vtanh.f32 %v4730_v48 }
 0xc43   : > { %v5684_v30 = vadd.f32 %v5648_v11, %v11035_v46  ;;  %v5552_v36 = vadd.f32 %v5551_v10, %v5503_v61  ;;  %v10571_v7 = vpack.c.bf16 %v3899_v55, %v3898_v15  ;;  %7098 = vtanh.f32 %v4731_v1 }
 0xc44   : > { %v4646_v14 = vmul.f32 0.796875, %v4582_v42  ;;  %v4647_v26 = vmul.f32 0.796875, %v4583_v5  ;;  %v10573_v53 = vpack.c.bf16 %v3903_v13, %v3902_v16  ;;  %7100 = vtanh.f32 %v4734_v39 }
 0xc45   : > { %v4521_v6 = vpack.c.bf16 %v4489_v17, %v4488_v28  ;;  %5700 = vst [vmem:[%s10556_s19 + $0x10] sm:$0xff] %v5684_v30  ;;  %v5601_v3 = vadd.f32 %v5600_v63, %v5552_v36  ;;  %7102 = vtanh.f32 %v4735_v41  ;;  %v10576_v47 = vpack.c.bf16 %v4643_v23, %v4642_v19 }
 0xc46   : > { %v10578_v38 = vmul.f32 0.796875, %v4580_v44  ;;  %v10580_v49 = vmul.f32 0.796875, %v4581_v43  ;;  %v4732_v24 = vunpack.c.l.bf16 %v10549_v45  ;;  %v4733_v2 = vunpack.c.h.bf16 %v10549_v45 }
 0xc47   : > { %v5650_v34 = vadd.f32 %v5649_v60, %v5601_v3  ;;  %v10584_v27 = vpack.c.bf16 %v4647_v26, %v4646_v14  ;;  %v5050_v18 = vunpack.c.l.bf16 %v10571_v7  ;;  %v5054_v19 = vunpack.c.l.bf16 %v10573_v53 }
 0xc48   : > { %v7097_v12 = vpop.eup %7096  ;;  %v4736_v22 = vunpack.c.l.bf16 %v10552_v0  ;;  %v4584_v37 = vunpack.c.l.bf16 %v4521_v6  ;;  %v4737_v59 = vunpack.c.h.bf16 %v10552_v0  ;;  %7104 = vtanh.f32 %v4732_v24 }
 0xc49   : > { %v7099_v23 = vpop.eup %7098  ;;  %v5685_v15 = vadd.f32 %v5650_v34, %v11036_v62  ;;  %v4585_v45 = vunpack.c.h.bf16 %v4521_v6  ;;  %v3900_v33 = vmul.f32 0.5, %v10431_v21  ;;  %7106 = vtanh.f32 %v4733_v2 }
 0xc4a   : > { %v7101_v56 = vpop.eup %7100  ;;  %v4834_v57 = vpack.c.bf16 %v7099_v23, %v7097_v12  ;;  %v3901_v25 = vmul.f32 0.5, %v10433_v40  ;;  %v3904_v16 = vmul.f32 0.5, %v10454_v29  ;;  %v3905_v28 = vmul.f32 0.5, %v10456_v32 }
 0xc4b   : > { %v5505_v31 = vpop.f32.mrf.mxu1  ;;  %v7103_v55 = vpop.eup %7102  ;;  %5701 = vst [vmem:[%s10556_s19 + $0x18] sm:$0xff] %v5685_v15  ;;  %7108 = vtanh.f32 %v4736_v22  ;;  %v5051_v1 = vunpack.c.h.bf16 %v10571_v7  ;;  %v5055_v21 = vunpack.c.h.bf16 %v10573_v53  ;;  %v4648_v44 = vmul.f32 0.796875, %v4584_v37 }
 0xc4c   : > { %v5506_v42 = vadd.f32 %v10519_v54, %v5505_v31  ;;  %v4836_v20 = vpack.c.bf16 %v7103_v55, %v7101_v56  ;;  %v4890_v0 = vunpack.c.l.bf16 %v4834_v57  ;;  %v4891_v13 = vunpack.c.h.bf16 %v4834_v57 }
 0xc4d   : > { %7110 = vtanh.f32 %v4737_v59  ;;  %v4649_v29 = vmul.f32 0.796875, %v4585_v45  ;;  %v10599_v43 = vpack.c.bf16 %v3901_v25, %v3900_v33  ;;  %v4738_v32 = vunpack.c.l.bf16 %v10576_v47 }
 0xc4e   : > { %v4894_v11 = vunpack.c.l.bf16 %v4836_v20  ;;  %v4895_v61 = vunpack.c.h.bf16 %v4836_v20  ;;  %v4954_v10 = vadd.f32 1.0, %v4890_v0  ;;  %v4955_v39 = vadd.f32 1.0, %v4891_v13  ;;  %v7105_v40 = vpop.eup %7104 }
 0xc4f   : > { %v7107_v41 = vpop.eup %7106  ;;  %v10602_v14 = vpack.c.bf16 %v3905_v28, %v3904_v16  ;;  %v4739_v3 = vunpack.c.h.bf16 %v10576_v47  ;;  %v4742_v12 = vunpack.c.l.bf16 %v10584_v27  ;;  %v4743_v62 = vunpack.c.h.bf16 %v10584_v27  ;;  %v11037_v28 = vld [vmem:[#allocation59_spill] sm:$0xff] }
 0xc50   : > { %v4958_v30 = vadd.f32 1.0, %v4894_v11  ;;  %v4959_v36 = vadd.f32 1.0, %v4895_v61  ;;  %v4994_v7 = vpack.c.bf16 %v4955_v39, %v4954_v10  ;;  %v4835_v6 = vpack.c.bf16 %v7107_v41, %v7105_v40 }
 0xc51   : > { %v5554_v5 = vpop.f32.mrf.mxu3  ;;  %v7109_v60 = vpop.eup %7108  ;;  %7112 = vtanh.f32 %v4738_v32  ;;  %v10613_v61 = vpack.c.bf16 %v4649_v29, %v4648_v44  ;;  %v5052_v39 = vunpack.c.l.bf16 %v10599_v43  ;;  %v5057_v44 = vunpack.c.h.bf16 %v10602_v14 }
 0xc52   : > { %v5555_v48 = vadd.f32 %v5554_v5, %v5506_v42  ;;  %v4996_v34 = vpack.c.bf16 %v4959_v36, %v4958_v30  ;;  %v5114_v24 = vunpack.c.l.bf16 %v4994_v7  ;;  %v5115_v2 = vunpack.c.h.bf16 %v4994_v7 }
 0xc53   : > { %v5507_v46 = vpop.f32.mrf.mxu1  ;;  %v7111_v31 = vpop.eup %7110  ;;  %v4892_v22 = vunpack.c.l.bf16 %v4835_v6  ;;  %v4893_v23 = vunpack.c.h.bf16 %v4835_v6  ;;  %7114 = vtanh.f32 %v4739_v3  ;;  %v3906_v30 = vmul.f32 0.5, %v10472_v50 }
 0xc54   : > { %v5603_v17 = vpop.f32.mrf.mxu0  ;;  %v5508_v63 = vadd.f32 %v10519_v54, %v5507_v46  ;;  %v5118_v59 = vunpack.c.l.bf16 %v4996_v34  ;;  %v5178_v56 = vmul.f32 %v5114_v24, %v5050_v18  ;;  %v5119_v45 = vunpack.c.h.bf16 %v4996_v34 }
 0xc55   : > { %v5604_v26 = vadd.f32 %v5603_v17, %v5555_v48  ;;  %v5179_v57 = vmul.f32 %v5115_v2, %v5051_v1  ;;  %v4837_v47 = vpack.c.bf16 %v7111_v31, %v7109_v60  ;;  %v4956_v55 = vadd.f32 1.0, %v4892_v22  ;;  %v11038_v22 = vld [vmem:[#allocation40_spill] sm:$0xff] }
 0xc56   : > { %v4957_v42 = vadd.f32 1.0, %v4893_v23  ;;  %v5182_v5 = vmul.f32 %v5118_v59, %v5054_v19  ;;  %v5183_v25 = vmul.f32 %v5119_v45, %v5055_v21  ;;  %v4679_v18 = vpack.c.bf16 %v10580_v49, %v10578_v38 }
 0xc57   : > { %v4896_v0 = vunpack.c.l.bf16 %v4837_v47  ;;  %v4897_v13 = vunpack.c.h.bf16 %v4837_v47  ;;  %7116 = vtanh.f32 %v4742_v12  ;;  %v7113_v11 = vpop.eup %7112  ;;  %v5056_v38 = vunpack.c.l.bf16 %v10602_v14 }
 0xc58   : > { %v4995_v48 = vpack.c.bf16 %v4957_v42, %v4956_v55  ;;  %v5218_v1 = vpack.c.bf16 %v5182_v5, %v5178_v56  ;;  %v5219_v17 = vpack.c.bf16 %v5183_v25, %v5179_v57  ;;  %7118 = vtanh.f32 %v4743_v62 }
 0xc59   : > { %v5556_v37 = vpop.f32.mrf.mxu3  ;;  %v4960_v53 = vadd.f32 1.0, %v4896_v0  ;;  %v4961_v19 = vadd.f32 1.0, %v4897_v13  ;;  %v5053_v49 = vunpack.c.h.bf16 %v10599_v43  ;;  %v7115_v29 = vpop.eup %7114  ;;  %v3907_v36 = vmul.f32 0.5, %v10474_v51 }
 0xc5a   : > { %v5652_v15 = vpop.f32.mrf.mxu2  ;;  %v5557_v16 = vadd.f32 %v5556_v37, %v5508_v63  ;;  %5524 = vmatmul.bf16.gmra.mxu1 %v5218_v1  ;;  %5573 = vmatmul.bf16.gmra.mxu3 %v5219_v17  ;;  %v5116_v40 = vunpack.c.l.bf16 %v4995_v48  ;;  %v5117_v32 = vunpack.c.h.bf16 %v4995_v48  ;;  %v3910_v7 = vmul.f32 0.5, %v10500_v35 }
 0xc5b   : > { %v5653_v33 = vadd.f32 %v5652_v15, %v5604_v26  ;;  %v4997_v41 = vpack.c.bf16 %v4961_v19, %v4960_v53  ;;  %v3911_v26 = vmul.f32 0.5, %v10502_v58  ;;  %v4838_v34 = vpack.c.bf16 %v7115_v29, %v7113_v11 }
 0xc5c   : > { %v5605_v27 = vpop.f32.mrf.mxu0  ;;  %v5180_v43 = vmul.f32 %v5116_v40, %v5052_v39  ;;  %v5181_v2 = vmul.f32 %v5117_v32, %v5053_v49  ;;  %v4740_v12 = vunpack.c.l.bf16 %v4679_v18  ;;  %v4741_v62 = vunpack.c.h.bf16 %v4679_v18 }
 0xc5d   : > { %v5686_v20 = vadd.f32 %v5653_v33, %v11037_v28  ;;  %v5606_v21 = vadd.f32 %v5605_v27, %v5557_v16  ;;  %v5510_v10 = vpop.f32.mrf.mxu1  ;;  %v5120_v63 = vunpack.c.l.bf16 %v4997_v41  ;;  %v5121_v6 = vunpack.c.h.bf16 %v4997_v41  ;;  %v7117_v24 = vpop.eup %7116 }
 0xc5e   : > { %v5511_v14 = vadd.f32 %v10519_v54, %v5510_v10  ;;  %v4898_v23 = vunpack.c.l.bf16 %v4838_v34  ;;  %v7119_v35 = vpop.eup %7118  ;;  %v4899_v58 = vunpack.c.h.bf16 %v4838_v34  ;;  %v4744_v15 = vunpack.c.l.bf16 %v10613_v61 }
 0xc5f   : > { %5702 = vst [vmem:[%s10556_s19 + $0x20] sm:$0xff] %v5686_v20  ;;  %v5184_v31 = vmul.f32 %v5120_v63, %v5056_v38  ;;  %v5185_v50 = vmul.f32 %v5121_v6, %v5057_v44  ;;  %v4840_v57 = vpack.c.bf16 %v7119_v35, %v7117_v24  ;;  %v4745_v33 = vunpack.c.h.bf16 %v10613_v61 }
 0xc60   : > { %v3942_v47 = vpack.c.bf16 %v3907_v36, %v3906_v30  ;;  %v4962_v55 = vadd.f32 1.0, %v4898_v23  ;;  %v4963_v42 = vadd.f32 1.0, %v4899_v58  ;;  %7120 = vtanh.f32 %v4740_v12  ;;  %v11039_v30 = vld [vmem:[#allocation45_spill] sm:$0xff] }
 0xc61   : > { %v5220_v59 = vpack.c.bf16 %v5184_v31, %v5180_v43  ;;  %v5221_v56 = vpack.c.bf16 %v5185_v50, %v5181_v2  ;;  %v3944_v25 = vpack.c.bf16 %v3911_v26, %v3910_v7  ;;  %v4902_v16 = vunpack.c.l.bf16 %v4840_v57 }
 0xc62   : > { %v5654_v46 = vpop.f32.mrf.mxu2  ;;  %v4903_v28 = vunpack.c.h.bf16 %v4840_v57  ;;  %7122 = vtanh.f32 %v4741_v62  ;;  %v4998_v27 = vpack.c.bf16 %v4963_v42, %v4962_v55  ;;  %v5058_v1 = vunpack.c.l.bf16 %v3942_v47 }
 0xc63   : > { %v5655_v3 = vadd.f32 %v5654_v46, %v5606_v21  ;;  %v5559_v60 = vpop.f32.mrf.mxu3  ;;  %5622 = vmatmul.bf16.gmra.mxu0 %v5220_v59  ;;  %5671 = vmatmul.bf16.gmra.mxu2 %v5221_v56  ;;  %7124 = vtanh.f32 %v4744_v15  ;;  %v4966_v0 = vadd.f32 1.0, %v4902_v16  ;;  %v5062_v61 = vunpack.c.l.bf16 %v3944_v25 }
 0xc64   : > { %v5560_v37 = vadd.f32 %v5559_v60, %v5511_v14  ;;  %v4967_v13 = vadd.f32 1.0, %v4903_v28  ;;  %7126 = vtanh.f32 %v4745_v33  ;;  %v5122_v53 = vunpack.c.l.bf16 %v4998_v27  ;;  %v11040_v33 = vld [vmem:[#allocation31_spill] sm:$0xff] }
 0xc65   : > { %v5687_v51 = vadd.f32 %v5655_v3, %v11038_v22  ;;  %v5512_v5 = vpop.f32.mrf.mxu1  ;;  %v5123_v19 = vunpack.c.h.bf16 %v4998_v27  ;;  %v5059_v39 = vunpack.c.h.bf16 %v3942_v47  ;;  %v5063_v40 = vunpack.c.h.bf16 %v3944_v25 }
 0xc66   : > { %v5513_v18 = vadd.f32 %v10519_v54, %v5512_v5  ;;  %v5000_v11 = vpack.c.bf16 %v4967_v13, %v4966_v0  ;;  %v7121_v21 = vpop.eup %7120  ;;  %v3908_v44 = vmul.f32 0.5, %v10484_v8  ;;  %v3909_v29 = vmul.f32 0.5, %v10486_v4 }
 0xc67   : > { %5703 = vst [vmem:[%s10556_s19 + $0x28] sm:$0xff] %v5687_v51  ;;  %v5608_v45 = vpop.f32.mrf.mxu0  ;;  %v3912_v7 = vmul.f32 0.5, %v10521_v9  ;;  %v3913_v26 = vmul.f32 0.5, %v10523_v52  ;;  %v5186_v3 = vmul.f32 %v5122_v53, %v5058_v1  ;;  %v5187_v34 = vmul.f32 %v5123_v19, %v5059_v39 }
 0xc68   : > { %v5609_v20 = vadd.f32 %v5608_v45, %v5560_v37  ;;  %v7123_v41 = vpop.eup %7122  ;;  %v5126_v38 = vunpack.c.l.bf16 %v5000_v11  ;;  %v5127_v49 = vunpack.c.h.bf16 %v5000_v11  ;;  %v3943_v52 = vpack.c.bf16 %v3909_v29, %v3908_v44 }
 0xc69   : > { %v7125_v46 = vpop.eup %7124  ;;  %v4839_v63 = vpack.c.bf16 %v7123_v41, %v7121_v21  ;;  %v3945_v35 = vpack.c.bf16 %v3913_v26, %v3912_v7  ;;  %v11041_v41 = vld [vmem:[#allocation44_spill] sm:$0xff]  ;;  %v11042_v7 = vld [vmem:[#allocation50_spill] sm:$0xff] }
 0xc6a   : > { %v7127_v6 = vpop.eup %7126  ;;  %v5190_v60 = vmul.f32 %v5126_v38, %v5062_v61  ;;  %v5191_v24 = vmul.f32 %v5127_v49, %v5063_v40  ;;  %v5060_v42 = vunpack.c.l.bf16 %v3943_v52  ;;  %v5061_v28 = vunpack.c.h.bf16 %v3943_v52 }
 0xc6b   : > { %v5561_v48 = vpop.f32.mrf.mxu3  ;;  %v4841_v2 = vpack.c.bf16 %v7127_v6, %v7125_v46  ;;  %v4900_v14 = vunpack.c.l.bf16 %v4839_v63  ;;  %v4901_v8 = vunpack.c.h.bf16 %v4839_v63  ;;  %v5064_v5 = vunpack.c.l.bf16 %v3945_v35 }
 0xc6c   : > { %v5562_v32 = vadd.f32 %v5561_v48, %v5513_v18  ;;  %v5222_v4 = vpack.c.bf16 %v5190_v60, %v5186_v3  ;;  %v5223_v31 = vpack.c.bf16 %v5191_v24, %v5187_v34 }
 0xc6d   : > { %v5657_v17 = vpop.f32.mrf.mxu2  ;;  %v4904_v50 = vunpack.c.l.bf16 %v4841_v2  ;;  %v4905_v22 = vunpack.c.h.bf16 %v4841_v2  ;;  %v4964_v51 = vadd.f32 1.0, %v4900_v14  ;;  %v4965_v9 = vadd.f32 1.0, %v4901_v8 }
 0xc6e   : > { %v5658_v10 = vadd.f32 %v5657_v17, %v5609_v20  ;;  %5529 = vmatmul.bf16.gmra.mxu1 %v5222_v4  ;;  %5578 = vmatmul.bf16.gmra.mxu3 %v5223_v31  ;;  %v5065_v20 = vunpack.c.h.bf16 %v3945_v35 }
 0xc6f   : > { %v5610_v43 = vpop.f32.mrf.mxu0  ;;  %v4968_v58 = vadd.f32 1.0, %v4904_v50  ;;  %v4969_v62 = vadd.f32 1.0, %v4905_v22  ;;  %v4999_v15 = vpack.c.bf16 %v4965_v9, %v4964_v51  ;;  %v11044_v9 = vld [vmem:[#allocation51_spill] sm:$0xff] }
 0xc70   : > { %v5688_v36 = vadd.f32 %v5658_v10, %v11039_v30  ;;  %v5611_v12 = vadd.f32 %v5610_v43, %v5562_v32 }
 0xc71   : > { %v5001_v56 = vpack.c.bf16 %v4969_v62, %v4968_v58  ;;  %v5124_v45 = vunpack.c.l.bf16 %v4999_v15  ;;  %v5125_v57 = vunpack.c.h.bf16 %v4999_v15 }
 0xc72   : > { %5704 = vst [vmem:[%s10556_s19 + $0x30] sm:$0xff] %v5688_v36  ;;  %v5515_v23 = vpop.f32.mrf.mxu1 }
 0xc73   : > { %v5516_v25 = vadd.f32 %v10519_v54, %v5515_v23  ;;  %v5128_v16 = vunpack.c.l.bf16 %v5001_v56  ;;  %v5129_v27 = vunpack.c.h.bf16 %v5001_v56  ;;  %v5188_v13 = vmul.f32 %v5124_v45, %v5060_v42 }
 0xc74   : > { %v5189_v18 = vmul.f32 %v5125_v57, %v5061_v28 }
 0xc75   : > { %v5659_v37 = vpop.f32.mrf.mxu2  ;;  %v5192_v48 = vmul.f32 %v5128_v16, %v5064_v5  ;;  %v5193_v1 = vmul.f32 %v5129_v27, %v5065_v20  ;;  %v11046_v27 = vld [vmem:[#allocation58_spill] sm:$0xff] }
 0xc76   : > { %v5660_v59 = vadd.f32 %v5659_v37, %v5611_v12  ;;  %v11043_v12 = vld [vmem:[#allocation29_spill] sm:$0xff] }
 0xc77   : > { %v5224_v11 = vpack.c.bf16 %v5192_v48, %v5188_v13  ;;  %v5225_v61 = vpack.c.bf16 %v5193_v1, %v5189_v18 }
 0xc78   : > { %v5689_v47 = vadd.f32 %v5660_v59, %v11040_v33  ;;  %v5564_v55 = vpop.f32.mrf.mxu3 }
 0xc79   : > { %v5565_v0 = vadd.f32 %v5564_v55, %v5516_v25  ;;  %5627 = vmatmul.bf16.gmra.mxu0 %v5224_v11  ;;  %5676 = vmatmul.bf16.gmra.mxu2 %v5225_v61  ;;  %v11045_v55 = vld [vmem:[#allocation32_spill] sm:$0xff] }
 0xc7a   : > { %5705 = vst [vmem:[%s10556_s19 + $0x38] sm:$0xff] %v5689_v47  ;;  %v5517_v53 = vpop.f32.mrf.mxu1 }
 0xc7b   : > { %v5518_v10 = vadd.f32 %v10519_v54, %v5517_v53 }
 0xc7c   : > { %v5613_v17 = vpop.f32.mrf.mxu0 }
 0xc7d   : > { %v5614_v19 = vadd.f32 %v5613_v17, %v5565_v0 }
 0xc80   : > { %v5566_v21 = vpop.f32.mrf.mxu3 }
 0xc81   : > { %v5567_v32 = vadd.f32 %v5566_v21, %v5518_v10 }
 0xc82   : > { %v5662_v39 = vpop.f32.mrf.mxu2 }
 0xc83   : > { %v5663_v40 = vadd.f32 %v5662_v39, %v5614_v19  ;;  %v11047_v39 = vld [vmem:[#allocation39_spill] sm:$0xff] }
 0xc84   : > { %v5615_v49 = vpop.f32.mrf.mxu0  ;;  %v5520_v29 = vpop.f32.mrf.mxu1 }
 0xc85   : > { %v5690_v38 = vadd.f32 %v5663_v40, %v11041_v41  ;;  %v5616_v44 = vadd.f32 %v5615_v49, %v5567_v32  ;;  %v5521_v63 = vadd.f32 %v10519_v54, %v5520_v29  ;;  %v11049_v49 = vld [vmem:[#allocation41_spill] sm:$0xff] }
 0xc87   : > { %5706 = vst [vmem:[%s10556_s19 + $0x40] sm:$0xff] %v5690_v38 }
 0xc8a   : > { %v5664_v46 = vpop.f32.mrf.mxu2  ;;  %v5569_v36 = vpop.f32.mrf.mxu3 }
 0xc8b   : > { %v5665_v30 = vadd.f32 %v5664_v46, %v5616_v44  ;;  %v5570_v6 = vadd.f32 %v5569_v36, %v5521_v63 }
 0xc8c   : > { %v5522_v60 = vpop.f32.mrf.mxu1 }
 0xc8d   : > { %v5691_v26 = vadd.f32 %v5665_v30, %v11042_v7  ;;  %v5523_v43 = vadd.f32 %v10519_v54, %v5522_v60 }
 0xc8f   : > { %5707 = vst [vmem:[%s10556_s19 + $0x48] sm:$0xff] %v5691_v26 }
 0xc91   : > { %v5618_v3 = vpop.f32.mrf.mxu0 }
 0xc92   : > { %v5619_v34 = vadd.f32 %v5618_v3, %v5570_v6  ;;  %v5571_v24 = vpop.f32.mrf.mxu3 }
 0xc93   : > { %v5572_v8 = vadd.f32 %v5571_v24, %v5523_v43 }
 0xc97   : > { %v5667_v2 = vpop.f32.mrf.mxu2 }
 0xc98   : > { %v5668_v14 = vadd.f32 %v5667_v2, %v5619_v34 }
 0xc99   : > { %v5620_v31 = vpop.f32.mrf.mxu0 }
 0xc9a   : > { %v5692_v4 = vadd.f32 %v5668_v14, %v11043_v12  ;;  %v5621_v50 = vadd.f32 %v5620_v31, %v5572_v8 }
 0xc9c   : > { %5708 = vst [vmem:[%s10556_s19 + $0x50] sm:$0xff] %v5692_v4 }
 0xc9f   : > { %v5669_v22 = vpop.f32.mrf.mxu2 }
 0xca0   : > { %v5670_v51 = vadd.f32 %v5669_v22, %v5621_v50 }
 0xca2   : > { %v5693_v23 = vadd.f32 %v5670_v51, %v11044_v9 }
 0xca4   : > { %5709 = vst [vmem:[%s10556_s19 + $0x58] sm:$0xff] %v5693_v23 }
 0xcd7   : > { %v5525_v52 = vpop.f32.mrf.mxu1 }
 0xcd8   : > { %v5526_v35 = vadd.f32 %v10519_v54, %v5525_v52 }
 0xcdd   : > { %v5574_v37 = vpop.f32.mrf.mxu3 }
 0xcde   : > { %v5575_v58 = vadd.f32 %v5574_v37, %v5526_v35 }
 0xcdf   : > { %v5527_v15 = vpop.f32.mrf.mxu1 }
 0xce0   : > { %v5623_v62 = vpop.f32.mrf.mxu0  ;;  %v5528_v56 = vadd.f32 %v10519_v54, %v5527_v15 }
 0xce1   : > { %v5624_v59 = vadd.f32 %v5623_v62, %v5575_v58 }
 0xce5   : > { %v5576_v45 = vpop.f32.mrf.mxu3 }
 0xce6   : > { %v5672_v57 = vpop.f32.mrf.mxu2  ;;  %v5577_v47 = vadd.f32 %v5576_v45, %v5528_v56 }
 0xce7   : > { %v5673_v33 = vadd.f32 %v5672_v57, %v5624_v59 }
 0xce8   : > { %v5625_v5 = vpop.f32.mrf.mxu0 }
 0xce9   : > { %v5694_v42 = vadd.f32 %v5673_v33, %v11045_v55  ;;  %v5626_v25 = vadd.f32 %v5625_v5, %v5577_v47 }
 0xceb   : > { %5710 = vst [vmem:[%s10556_s19 + $0x60] sm:$0xff] %v5694_v42  ;;  %v5530_v20 = vpop.f32.mrf.mxu1 }
 0xcec   : > { %v5531_v48 = vadd.f32 %v10519_v54, %v5530_v20 }
 0xcee   : > { %v5674_v16 = vpop.f32.mrf.mxu2 }
 0xcef   : > { %v5675_v28 = vadd.f32 %v5674_v16, %v5626_v25 }
 0xcf1   : > { %v5695_v0 = vadd.f32 %v5675_v28, %v11046_v27  ;;  %v5579_v13 = vpop.f32.mrf.mxu3 }
 0xcf2   : > { %v5580_v18 = vadd.f32 %v5579_v13, %v5531_v48 }
 0xcf3   : > { %5711 = vst [vmem:[%s10556_s19 + $0x68] sm:$0xff] %v5695_v0  ;;  %v5532_v17 = vpop.f32.mrf.mxu1 }
 0xcf4   : > { %v5533_v53 = vadd.f32 %v10519_v54, %v5532_v17 }
 0xcf6   : > { %v5628_v1 = vpop.f32.mrf.mxu0 }
 0xcf7   : > { %v5629_v11 = vadd.f32 %v5628_v1, %v5580_v18 }
 0xcf9   : > { %v5581_v61 = vpop.f32.mrf.mxu3 }
 0xcfa   : > { %v5582_v10 = vadd.f32 %v5581_v61, %v5533_v53 }
 0xcfc   : > { %v5677_v19 = vpop.f32.mrf.mxu2 }
 0xcfd   : > { %v5678_v21 = vadd.f32 %v5677_v19, %v5629_v11 }
 0xcfe   : > { %v5630_v32 = vpop.f32.mrf.mxu0 }
 0xcff   : > { %v5696_v40 = vadd.f32 %v5678_v21, %v11047_v39  ;;  %v5631_v41 = vadd.f32 %v5630_v32, %v5582_v10 }
 0xd01   : > { %5712 = vst [vmem:[%s10556_s19 + $0x70] sm:$0xff] %v5696_v40 }
 0xd04   : > { %v5679_v38 = vpop.f32.mrf.mxu2 }
 0xd05   : > { %v5680_v54 = vadd.f32 %v5679_v38, %v5631_v41 }
 0xd07   : > { %v5697_v44 = vadd.f32 %v5680_v54, %v11049_v49 }
 0xd09   : > { %5713 = vst [vmem:[%s10556_s19 + $0x78] sm:$0xff] %v5697_v44 }
 0xd0a   : > { %7474 = shalt.err (!%p7471_p9)
}
 0xd0b   : > { %s7553_s29 = smov 128   ;;  %s7554_s19 = smov 8  }
 0xd0c   : > { %6501 = dma.vmem_to_hbm [thread:$0]  (%p7736_p0), %s5728_s16, 2048, %s5730_s22, %s5715_s15, %s7553_s29, %s7553_s29, %s7554_s19  }
 0xd0d PF: > { %s5744_s14 = sand.u32 1, %s7521_s25   ;;  %p11050_p10 = scmp.ge.s32.totalorder %s7533_s28, 2 }
 0xd0e   : > { %s5745_s5 = scalar_lea.sflag [#allocation4], %s5744_s14 }
 0xd0f   : > { %p6536_p11 = pnand %p11050_p10, %p7742_p6 }
 0xd11   : > { %p6537_p12 = pneg %p6536_p11 }
 0xd13   : > { %7516 = dma.done.wait (%p6537_p12), %s5745_s5, 2048  }
 0xd14   : > { %7518 = vsyncadd (%p6537_p12), %s5745_s5, 4294965248  ;;  %p31_p2 = scmp.ge.s32.totalorder %s7712_s1, 4   ;;  %s11051_s25 = smov %s7525_s26 }
 0xd15   : > { %s11052_s26 = smov %s7529_s27  ;;  %s11053_s27 = smov %s7724_s30 }
 0xd16   : > { %s11054_s28 = smov %s7712_s1  ;;  %33 = sbr.rel (!%p31_p2) target bundleno = 19 (0x13), region = 153 }
 0xd1b   :  { %5751 = vsyncpa [#allocation3], 1 }
 0xd1c   :  { %5753 = vsyncpa [#allocation3 + $0x1], 1 }
 0xd1d   :  { %5754 = vsyncpa [#allocation6], 1 }
 0xd1e   :  { %5755 = vsyncpa [#allocation9], 1 }
 0xd1f   :  { %5756 = vsyncpa [#allocation12], 1 }
 0xd20   :  { %5757 = vsyncpa [#allocation15], 1 }
 0xd21   :  { %5758 = vsyncpa [#allocation18], 1 }
 0xd22   :  { %5759 = vsyncpa [#allocation4], 1 }
 0xd23   :  { %5761 = vsyncpa [#allocation4 + $0x1], 1 }

</bundles_post_ra>
